<compile_context>
chip_gen: v7x
topology: tpu7x:2x2x1
jax: 0.10.0
libtpu: 0.0.40
codegen_flags: <defaults>
</compile_context>

<pallas_src>
import math

import numpy as np
import jax
import jax.numpy as jnp
from jax import lax
from jax.experimental import pallas as pl
from jax.experimental.pallas import tpu as pltpu

# ----------------------------------------------------------------------------
# Synthetic (small) Encodec-like config -- deterministic, no checkpoint load.
# ----------------------------------------------------------------------------
AUDIO_CHANNELS = 1
NUM_FILTERS = 8
UPSAMPLING_RATIOS = (2, 2)          # encoder downsamples by reversed(ratios)
NUM_RESIDUAL_LAYERS = 1
DILATION_GROWTH_RATE = 2
KERNEL_SIZE = 7
LAST_KERNEL_SIZE = 7
RESIDUAL_KERNEL_SIZE = 3
COMPRESS = 2
HIDDEN_SIZE = 32                    # codebook / embedding dim
CODEBOOK_SIZE = 64                  # power of 2 -> bits_per_codebook = 6
SAMPLING_RATE = 256
FRAME_RATE = SAMPLING_RATE // (UPSAMPLING_RATIOS[0] * UPSAMPLING_RATIOS[1])
TARGET_BANDWIDTHS = (1.5,)
NUM_QUANTIZERS = 2
INTERMEDIATE_SIZE = 48
NORMALIZE = False                   # encodec_24khz default; padding_mask unused

BITS_PER_CODEBOOK = int(math.log2(CODEBOOK_SIZE))
assert 2 ** BITS_PER_CODEBOOK == CODEBOOK_SIZE, "codebook_size must be a power of 2"

CIN_PAD = 8                         # pad mono input channel 1 -> 8 (sublane-friendly)
NPAD = max(128, CODEBOOK_SIZE)      # lane-pad codebook rows to a full vreg width


# ----------------------------------------------------------------------------
# Trace-time constants: fold causal reflect-pad + tap selection into 0/1 mats.
# ----------------------------------------------------------------------------
def _conv_selectors(L, K, stride=1, dilation=1):
    """G[k] (Lout, Lin) s.t. (G[k] @ x)[l] = xpad[l*stride + k*dilation] with
    Encodec causal reflect padding.  Built in numpy at trace time."""
    eff_k = (K - 1) * dilation + 1
    padding_total = eff_k - stride
    n_frames = (L - eff_k + padding_total) / stride + 1
    ideal_length = (math.ceil(n_frames) - 1) * stride + (eff_k - padding_total)
    extra = int(ideal_length - L)
    pad_left, pad_right = padding_total, extra
    # TODO(synk): HF _pad1d zero-pads first when length <= max_pad; our static
    # lengths always exceed the pad so the plain reflect mapping is exact.
    src = np.pad(np.arange(L), (pad_left, pad_right), mode="reflect")
    Lp = L + pad_left + pad_right
    Lout = (Lp - eff_k) // stride + 1
    G = np.zeros((K, Lout, L), dtype=np.float32)
    for k in range(K):
        for l in range(Lout):
            G[k, l, src[l * stride + k * dilation]] = 1.0
    return G, int(Lout)


def _pad_up(n, m):
    return -(-n // m) * m


# ----------------------------------------------------------------------------
# Full CodecEncoder forward: one fused Pallas kernel.
# ----------------------------------------------------------------------------
def codec_encoder_forward(params, input_values, padding_mask=None, bandwidth=None):
    if bandwidth is None:
        bandwidth = TARGET_BANDWIDTHS[0]
    if bandwidth not in TARGET_BANDWIDTHS:
        raise ValueError(f"unsupported bandwidth {bandwidth}")
    # NORMALIZE is False (encodec_24khz default) -> padding_mask / scale path skipped.

    B, cin, L0 = input_values.shape
    assert cin == AUDIO_CHANNELS
    enc = params["encoder"]

    nq = int(max(1, math.floor(bandwidth * 1000 / (FRAME_RATE * BITS_PER_CODEBOOK))))
    nq = min(nq, NUM_QUANTIZERS)

    # ------------------ per-conv descriptors (batch-interleaved) ------------------
    conv_descs = []

    def add_conv(w, b, L_in, stride=1, dilation=1):
        c_out, c_in, K = w.shape
        G_np, L_out = _conv_selectors(L_in, K, stride, dilation)
        ident = (K == 1 and stride == 1 and dilation == 1
                 and np.array_equal(G_np[0], np.eye(L_in, dtype=np.float32)))
        eyeB = np.eye(B, dtype=np.float32)
        # interleaved batch rows (row = l*B + b): kron(G, I_B); taps stacked on rows
        G_il = np.concatenate([np.kron(G_np[k], eyeB) for k in range(K)], axis=0)
        # (Cout, Cin, K) -> (Cin, K*Cout) so one matmul produces all K tap outputs
        W_wide = jnp.reshape(jnp.transpose(w.astype(jnp.float32), (1, 2, 0)),
                             (c_in, K * c_out))
        conv_descs.append(dict(
            G=G_il, W=W_wide, b=jnp.reshape(b, (c_out,)).astype(jnp.float32),
            K=K, BLin=B * L_in, BLout=B * L_out, Cin=c_in, Cout=c_out, ident=ident))
        return L_out

    L = L0
    # first conv: pad Cin 1 -> 8 with zero weights (matches zero-padded input)
    w0 = jnp.pad(enc["conv0_w"].astype(jnp.float32),
                 ((0, 0), (0, CIN_PAD - AUDIO_CHANNELS), (0, 0)))
    L = add_conv(w0, enc["conv0_b"], L)
    for st in enc["stages"]:
        L_blk = L
        L = add_conv(st["res_w1"], st["res_b1"], L_blk, dilation=1)
        L = add_conv(st["res_w2"], st["res_b2"], L)
        Ls = add_conv(st["short_w"], st["short_b"], L_blk)   # conv shortcut
        assert Ls == L
        L = add_conv(st["down_w"], st["down_b"], L, stride=st["ratio"])
    T_lstm = L
    C = enc["lstm"]["wih0T"].shape[0]
    L = add_conv(enc["convf_w"], enc["convf_b"], L)
    T = L
    D = HIDDEN_SIZE
    I = params["proj_w"].shape[1]
    n_convs = len(conv_descs)
    n_stages = len(enc["stages"])
    BT = B * T

    # ------------------ packed constant buffers (few DMAs) ------------------
    # g_pack: all non-identity tap-selection matrices stacked on rows (bf16, 0/1 exact)
    GL = B * L0
    g_offs, g_blocks, grow = [], [], 0
    for d in conv_descs:
        if d["ident"]:
            g_offs.append(-1)
            continue
        g = np.zeros((d["G"].shape[0], GL), np.float32)
        g[:, :d["BLin"]] = d["G"]
        g_offs.append(grow)
        g_blocks.append(g)
        grow += g.shape[0]
    g_pack = jnp.asarray(np.concatenate(g_blocks, axis=0)).astype(jnp.bfloat16)

    # w_pack: (Cin, K*Cout) weight blocks stacked on rows (bf16), 16-row aligned
    WL = max(d["W"].shape[1] for d in conv_descs)
    w_offs, w_blocks, wrow = [], [], 0
    for d in conv_descs:
        rows_p = _pad_up(d["Cin"], 16)
        blk = jnp.zeros((rows_p, WL), jnp.float32)
        blk = blk.at[:d["Cin"], :d["W"].shape[1]].set(d["W"])
        w_offs.append(wrow)
        w_blocks.append(blk)
        wrow += rows_p
    w_pack = jnp.concatenate(w_blocks, axis=0).astype(jnp.bfloat16)

    # lw_pack: LSTM weights (rows 0..4C) + projector weight (rows 4C..4C+D), bf16
    lp = enc["lstm"]
    LW_LANES = max(4 * C, I)
    lw = jnp.zeros((4 * C + D, LW_LANES), jnp.float32)
    lw = lw.at[0 * C:1 * C, :4 * C].set(lp["wih0T"].astype(jnp.float32))
    lw = lw.at[1 * C:2 * C, :4 * C].set(lp["whh0T"].astype(jnp.float32))
    lw = lw.at[2 * C:3 * C, :4 * C].set(lp["wih1T"].astype(jnp.float32))
    lw = lw.at[3 * C:4 * C, :4 * C].set(lp["whh1T"].astype(jnp.float32))
    lw = lw.at[4 * C:4 * C + D, :I].set(params["proj_w"].astype(jnp.float32))
    lw_pack = lw.astype(jnp.bfloat16)

    # fb_pack (f32): conv/LSTM/proj biases + suffix-mask matrix S + pooling matrix P
    LSTM_B0_ROW = n_convs
    LSTM_B1_ROW = n_convs + 1
    PROJ_B_ROW = n_convs + 2
    S_ROW = _pad_up(PROJ_B_ROW + 1, 8)
    P_ROW = S_ROW + BT
    FB_ROWS = _pad_up(P_ROW + B, 8)
    fb = jnp.zeros((FB_ROWS, 128), jnp.float32)
    for ci, d in enumerate(conv_descs):
        fb = fb.at[ci, :d["Cout"]].set(d["b"])
    fb = fb.at[LSTM_B0_ROW, :4 * C].set(jnp.reshape(lp["b0"], (4 * C,)))
    fb = fb.at[LSTM_B1_ROW, :4 * C].set(jnp.reshape(lp["b1"], (4 * C,)))
    fb = fb.at[PROJ_B_ROW, :I].set(params["proj_b"].astype(jnp.float32))
    # S[t*B+b, t'*B+b'] = 1 iff b==b' and t' >= t  (suffix-any, replaces flip/cummax)
    S_il = np.kron(np.triu(np.ones((T, T), np.float32)), np.eye(B, dtype=np.float32))
    # P[b, t*B+b'] = 1 iff b'==b  (per-batch row sum for the masked mean pool)
    P_np = np.kron(np.ones((1, T), np.float32), np.eye(B, dtype=np.float32))
    fb = fb.at[S_ROW:S_ROW + BT, :BT].set(jnp.asarray(S_il))
    fb = fb.at[P_ROW:P_ROW + B, :BT].set(jnp.asarray(P_np))
    fb_pack = fb

    # cb_pack (f32): per quantizer -> codebook (NPAD, D), its transpose, row norms
    cb = params["codebooks"][:nq].astype(jnp.float32)
    cb_pad = jnp.concatenate(
        [cb, jnp.full((nq, NPAD - CODEBOOK_SIZE, D), 1.0e4, jnp.float32)], axis=1)
    QBLK = _pad_up(NPAD + D + 1, 8)
    cbp = jnp.zeros((nq * QBLK, NPAD), jnp.float32)
    for q in range(nq):
        e_q = cb_pad[q]                                      # (NPAD, D)
        cbp = cbp.at[q * QBLK:q * QBLK + NPAD, :D].set(e_q)
        cbp = cbp.at[q * QBLK + NPAD:q * QBLK + NPAD + D, :].set(e_q.T)
        cbp = cbp.at[q * QBLK + NPAD + D, :].set(jnp.sum(e_q * e_q, axis=-1))
    cb_pack = cbp

    # audio (B,1,L) -> batch-interleaved rows (L*B, CIN_PAD), row = l*B + b
    xt = jnp.transpose(input_values.astype(jnp.float32), (2, 0, 1))
    x_in = jnp.pad(jnp.reshape(xt, (L0 * B, AUDIO_CHANNELS)),
                   ((0, 0), (0, CIN_PAD - AUDIO_CHANNELS)))

    conv_meta = [(g_offs[i], w_offs[i], d["K"], d["BLin"], d["BLout"],
                  d["Cin"], d["Cout"], d["ident"]) for i, d in enumerate(conv_descs)]

    # ------------------------------------------------------------------------
    # The fused kernel.
    # ------------------------------------------------------------------------
    def kernel(x_ref, g_ref, w_ref, lw_ref, fb_ref, cb_ref, out_ref):
        def elu(v):
            # TODO(synk): jnp.expm1 would be marginally more accurate near 0.
            return jnp.where(v > 0.0, v, jnp.exp(v) - 1.0)

        def conv(h, ci):
            goff, woff, K, BLin, BLout, Cin, Cout, ident = conv_meta[ci]
            w_wide = w_ref[pl.ds(woff, Cin), :K * Cout]          # bf16 (Cin, K*Cout)
            y = jnp.dot(h.astype(jnp.bfloat16), w_wide,
                        preferred_element_type=jnp.float32)      # (BLin, K*Cout)
            bias = fb_ref[pl.ds(ci, 1), :Cout]                   # f32 (1, Cout)
            if ident:                                            # 1x1 identity selector
                return y + bias
            yb = y.astype(jnp.bfloat16)
            acc = None
            for k in range(K):                                   # sum_k G_k @ (x @ W_k)
                gk = g_ref[pl.ds(goff + k * BLout, BLout), :BLin]
                contrib = jnp.dot(gk, yb[:, k * Cout:(k + 1) * Cout],
                                  preferred_element_type=jnp.float32)
                acc = contrib if acc is None else acc + contrib
            return acc + bias

        # ---------------- Encodec conv encoder (batch-stacked rows) ----------
        h = conv(x_ref[...], 0)
        ci = 1
        for _ in range(n_stages):
            res_in = h
            y = conv(elu(h), ci); ci += 1                        # residual conv 1
            y = conv(elu(y), ci); ci += 1                        # residual conv 2 (1x1)
            sc = conv(res_in, ci); ci += 1                       # conv shortcut
            h = sc + y
            h = conv(elu(h), ci); ci += 1                        # ELU + strided down

        # ---------------- 2-layer LSTM, both batch rows jointly --------------
        wih0 = lw_ref[pl.ds(0 * C, C), :4 * C]
        whh0 = lw_ref[pl.ds(1 * C, C), :4 * C]
        wih1 = lw_ref[pl.ds(2 * C, C), :4 * C]
        whh1 = lw_ref[pl.ds(3 * C, C), :4 * C]
        b0 = fb_ref[pl.ds(LSTM_B0_ROW, 1), :4 * C]
        b1 = fb_ref[pl.ds(LSTM_B1_ROW, 1), :4 * C]

        # input projection hoisted out of the recurrence: (B*T, C) @ (C, 4C)
        gx = jnp.dot(h.astype(jnp.bfloat16), wih0,
                     preferred_element_type=jnp.float32) + b0

        def cell(gates, c_prev):
            sg = jax.nn.sigmoid(gates)                           # 1 full-width EUP pass
            th = jnp.tanh(gates)                                 # 1 full-width EUP pass
            c_new = sg[:, C:2 * C] * c_prev + sg[:, 0:C] * th[:, 2 * C:3 * C]
            return sg[:, 3 * C:4 * C] * jnp.tanh(c_new), c_new

        zero = jnp.zeros((B, C), jnp.float32)
        h0, c0, h1, c1 = zero, zero, zero, zero
        ys = []
        for t in range(T_lstm):
            g0 = gx[t * B:(t + 1) * B, :] + jnp.dot(
                h0.astype(jnp.bfloat16), whh0, preferred_element_type=jnp.float32)
            h0, c0 = cell(g0, c0)
            g1 = (jnp.dot(h0.astype(jnp.bfloat16), wih1,
                          preferred_element_type=jnp.float32)
                  + jnp.dot(h1.astype(jnp.bfloat16), whh1,
                            preferred_element_type=jnp.float32) + b1)
            h1, c1 = cell(g1, c1)
            ys.append(h1)                                        # (B, C) per step
        h = jnp.concatenate(ys, axis=0) + h                      # LSTM residual skip

        emb = conv(elu(h), n_convs - 1)                          # final conv -> (BT, D)

        # ---------------- residual VQ encode + decode (f32) ------------------
        residual = emb
        qsum = jnp.zeros_like(emb)
        not62 = None
        for q in range(nq):
            embq = cb_ref[pl.ds(q * QBLK, NPAD), :D]             # (NPAD, D)
            embqT = cb_ref[pl.ds(q * QBLK + NPAD, D), :]         # (D, NPAD)
            e2 = cb_ref[pl.ds(q * QBLK + NPAD + D, 1), :]        # (1, NPAD)
            dots = jnp.dot(residual, embqT, preferred_element_type=jnp.float32)
            dist = e2 - 2.0 * dots                               # r2 dropped (argmin-equiv)
            mind = jnp.min(dist, axis=-1, keepdims=True)
            col = lax.broadcasted_iota(jnp.int32, dist.shape, 1)
            idx = jnp.min(jnp.where(dist <= mind, col, NPAD),
                          axis=-1, keepdims=True)                # first argmin
            onehot = (col == idx).astype(jnp.float32)
            quant = jnp.dot(onehot, embq, preferred_element_type=jnp.float32)
            residual = residual - quant
            qsum = qsum + quant
            if q == 0:
                not62 = (idx != 62).astype(jnp.float32)          # (BT, 1)

        # trailing-62 codes mask: suffix-any per batch via S matmul
        Smat = fb_ref[pl.ds(S_ROW, BT), :BT]
        mask = (jnp.dot(Smat, not62, preferred_element_type=jnp.float32) > 0.0
                ).astype(jnp.float32)                            # (BT, 1)

        # ---------------- projector + masked mean pool -----------------------
        pw = lw_ref[pl.ds(4 * C, D), :I]                         # bf16 (D, I)
        pb = fb_ref[pl.ds(PROJ_B_ROW, 1), :I]
        hp = jnp.dot(qsum.astype(jnp.bfloat16), pw,
                     preferred_element_type=jnp.float32) + pb    # (BT, I)
        hm = hp * mask
        Pmat = fb_ref[pl.ds(P_ROW, B), :BT]                      # (B, BT)
        num = jnp.dot(Pmat, hm, preferred_element_type=jnp.float32)    # (B, I)
        den = jnp.dot(Pmat, mask, preferred_element_type=jnp.float32)  # (B, 1)
        # guard only changes the degenerate 0/0 case (NaN in the reference)
        out_ref[...] = num / jnp.maximum(den, 1.0)

    pooled = pl.pallas_call(
        kernel,
        out_shape=jax.ShapeDtypeStruct((B, I), jnp.float32),
        compiler_params=pltpu.CompilerParams(
            # <1 MiB total footprint; 32 MiB cap stays valid on v7x's 64 MiB VMEM.
            vmem_limit_bytes=32 * 1024 * 1024),
    )(x_in, g_pack, w_pack, lw_pack, fb_pack, cb_pack)
    return pooled


# ----------------------------------------------------------------------------
# Deterministic synthetic parameters (weight_norm folded into dense weights)
# ----------------------------------------------------------------------------
def init_params(key):
    kit = iter(jax.random.split(key, 64))

    def rn(shape, scale=0.1):
        return (scale * jax.random.normal(next(kit), shape)).astype(jnp.float32)

    enc = {
        "conv0_w": rn((NUM_FILTERS, AUDIO_CHANNELS, KERNEL_SIZE)),
        "conv0_b": rn((NUM_FILTERS,)),
    }
    stages = []
    scaling = 1
    for ratio in reversed(UPSAMPLING_RATIOS):
        dim = scaling * NUM_FILTERS
        hid = dim // COMPRESS
        stages.append({
            "res_w1": rn((hid, dim, RESIDUAL_KERNEL_SIZE)),
            "res_b1": rn((hid,)),
            "res_w2": rn((dim, hid, 1)),
            "res_b2": rn((dim,)),
            "short_w": rn((dim, dim, 1)),
            "short_b": rn((dim,)),
            "down_w": rn((2 * dim, dim, 2 * ratio)),
            "down_b": rn((2 * dim,)),
            "ratio": ratio,
        })
        scaling *= 2
    enc["stages"] = stages

    C = scaling * NUM_FILTERS
    lstm = {}
    for layer in range(2):
        wih = rn((4 * C, C))
        whh = rn((4 * C, C))
        bih = rn((4 * C,))
        bhh = rn((4 * C,))
        lstm[f"wih{layer}T"] = jnp.transpose(wih)        # (C, 4C)
        lstm[f"whh{layer}T"] = jnp.transpose(whh)        # (C, 4C)
        lstm[f"b{layer}"] = (bih + bhh).reshape(1, 4 * C)
    enc["lstm"] = lstm
    enc["convf_w"] = rn((HIDDEN_SIZE, C, LAST_KERNEL_SIZE))
    enc["convf_b"] = rn((HIDDEN_SIZE,))

    codebooks = jax.random.normal(next(kit),
                                  (NUM_QUANTIZERS, CODEBOOK_SIZE, HIDDEN_SIZE),
                                  dtype=jnp.float32)
    # Deterministic init choice: push codebook entry 62 far from the origin so the
    # trailing-62 mask never degenerates to all-zero (avoids 0/0 in the pooling).
    codebooks = codebooks.at[:, 62, :].add(10.0)

    return {
        "encoder": enc,
        "codebooks": codebooks,
        "proj_w": rn((HIDDEN_SIZE, INTERMEDIATE_SIZE)),  # stored (in, out); torch Linear is (out, in)
        "proj_b": rn((INTERMEDIATE_SIZE,)),
    }


# ----------------------------------------------------------------------------
if __name__ == "__main__":
    key = jax.random.PRNGKey(0)
    pkey, xkey = jax.random.split(key)
    params = init_params(pkey)

    B, L = 2, 64
    input_values = jax.random.normal(xkey, (B, AUDIO_CHANNELS, L), dtype=jnp.float32)

    pooled = codec_encoder_forward(params, input_values)
    pooled = jax.block_until_ready(pooled)

    assert pooled.shape == (B, INTERMEDIATE_SIZE), pooled.shape
    assert bool(jnp.all(jnp.isfinite(pooled)))
    print("KERNEL_OK")
</pallas_src>

<mosaic_0001>
module attributes {stable_mosaic.version = 11 : i64} {
  func.func @kernel(%arg0: memref<128x8xf32, #tpu.memory_space<vmem>>, %arg1: memref<2080x128xbf16, #tpu.memory_space<vmem>>, %arg2: memref<176x224xbf16, #tpu.memory_space<vmem>>, %arg3: memref<160x128xbf16, #tpu.memory_space<vmem>>, %arg4: memref<56x128xf32, #tpu.memory_space<vmem>>, %arg5: memref<336x128xf32, #tpu.memory_space<vmem>>, %arg6: memref<2x48xf32, #tpu.memory_space<vmem>>) attributes {dimension_semantics = [], scalar_prefetch = 0 : i64, scratch_operands = 0 : i64, tpu.core_type = #tpu.core_type<tc>} {
    %c0 = arith.constant 0 : index
    %c0_0 = arith.constant 0 : index
    %0 = vector.load %arg0[%c0, %c0_0] : memref<128x8xf32, #tpu.memory_space<vmem>>, vector<128x8xf32>
    %c0_1 = arith.constant 0 : index
    %c0_2 = arith.constant 0 : index
    %1 = vector.load %arg2[%c0_1, %c0_2] : memref<176x224xbf16, #tpu.memory_space<vmem>>, vector<8x56xbf16>
    %2 = arith.truncf %0 : vector<128x8xf32> to vector<128x8xbf16>
    %cst = arith.constant dense<0.000000e+00> : vector<128x56xf32>
    %3 = tpu.matmul %2, %1, %cst {dimension_numbers = #tpu.dot_dimension_numbers<[1], [0], [0], [1], [0, 0, 1, 1], [], []>} : vector<128x8xbf16>, vector<8x56xbf16>, vector<128x56xf32> -> vector<128x56xf32>
    %c0_3 = arith.constant 0 : index
    %c0_4 = arith.constant 0 : index
    %4 = vector.load %arg4[%c0_3, %c0_4] : memref<56x128xf32, #tpu.memory_space<vmem>>, vector<1x8xf32>
    %5 = arith.truncf %3 : vector<128x56xf32> to vector<128x56xbf16>
    %c0_5 = arith.constant 0 : index
    %c0_6 = arith.constant 0 : index
    %6 = vector.load %arg1[%c0_5, %c0_6] : memref<2080x128xbf16, #tpu.memory_space<vmem>>, vector<128x128xbf16>
    %7 = vector.extract_strided_slice %5 {offsets = [0, 0], sizes = [128, 8], strides = [1, 1]} : vector<128x56xbf16> to vector<128x8xbf16>
    %cst_7 = arith.constant dense<0.000000e+00> : vector<128x8xf32>
    %8 = tpu.matmul %6, %7, %cst_7 {dimension_numbers = #tpu.dot_dimension_numbers<[1], [0], [0], [1], [0, 0, 1, 1], [], []>} : vector<128x128xbf16>, vector<128x8xbf16>, vector<128x8xf32> -> vector<128x8xf32>
    %c128 = arith.constant 128 : index
    %c0_8 = arith.constant 0 : index
    %9 = vector.load %arg1[%c128, %c0_8] : memref<2080x128xbf16, #tpu.memory_space<vmem>>, vector<128x128xbf16>
    %10 = vector.extract_strided_slice %5 {offsets = [0, 8], sizes = [128, 8], strides = [1, 1]} : vector<128x56xbf16> to vector<128x8xbf16>
    %cst_9 = arith.constant dense<0.000000e+00> : vector<128x8xf32>
    %11 = tpu.matmul %9, %10, %cst_9 {dimension_numbers = #tpu.dot_dimension_numbers<[1], [0], [0], [1], [0, 0, 1, 1], [], []>} : vector<128x128xbf16>, vector<128x8xbf16>, vector<128x8xf32> -> vector<128x8xf32>
    %12 = arith.addf %8, %11 : vector<128x8xf32>
    %c256 = arith.constant 256 : index
    %c0_10 = arith.constant 0 : index
    %13 = vector.load %arg1[%c256, %c0_10] : memref<2080x128xbf16, #tpu.memory_space<vmem>>, vector<128x128xbf16>
    %14 = vector.extract_strided_slice %5 {offsets = [0, 16], sizes = [128, 8], strides = [1, 1]} : vector<128x56xbf16> to vector<128x8xbf16>
    %cst_11 = arith.constant dense<0.000000e+00> : vector<128x8xf32>
    %15 = tpu.matmul %13, %14, %cst_11 {dimension_numbers = #tpu.dot_dimension_numbers<[1], [0], [0], [1], [0, 0, 1, 1], [], []>} : vector<128x128xbf16>, vector<128x8xbf16>, vector<128x8xf32> -> vector<128x8xf32>
    %16 = arith.addf %12, %15 : vector<128x8xf32>
    %c384 = arith.constant 384 : index
    %c0_12 = arith.constant 0 : index
    %17 = vector.load %arg1[%c384, %c0_12] : memref<2080x128xbf16, #tpu.memory_space<vmem>>, vector<128x128xbf16>
    %18 = vector.extract_strided_slice %5 {offsets = [0, 24], sizes = [128, 8], strides = [1, 1]} : vector<128x56xbf16> to vector<128x8xbf16>
    %cst_13 = arith.constant dense<0.000000e+00> : vector<128x8xf32>
    %19 = tpu.matmul %17, %18, %cst_13 {dimension_numbers = #tpu.dot_dimension_numbers<[1], [0], [0], [1], [0, 0, 1, 1], [], []>} : vector<128x128xbf16>, vector<128x8xbf16>, vector<128x8xf32> -> vector<128x8xf32>
    %20 = arith.addf %16, %19 : vector<128x8xf32>
    %c512 = arith.constant 512 : index
    %c0_14 = arith.constant 0 : index
    %21 = vector.load %arg1[%c512, %c0_14] : memref<2080x128xbf16, #tpu.memory_space<vmem>>, vector<128x128xbf16>
    %22 = vector.extract_strided_slice %5 {offsets = [0, 32], sizes = [128, 8], strides = [1, 1]} : vector<128x56xbf16> to vector<128x8xbf16>
    %cst_15 = arith.constant dense<0.000000e+00> : vector<128x8xf32>
    %23 = tpu.matmul %21, %22, %cst_15 {dimension_numbers = #tpu.dot_dimension_numbers<[1], [0], [0], [1], [0, 0, 1, 1], [], []>} : vector<128x128xbf16>, vector<128x8xbf16>, vector<128x8xf32> -> vector<128x8xf32>
    %24 = arith.addf %20, %23 : vector<128x8xf32>
    %c640 = arith.constant 640 : index
    %c0_16 = arith.constant 0 : index
    %25 = vector.load %arg1[%c640, %c0_16] : memref<2080x128xbf16, #tpu.memory_space<vmem>>, vector<128x128xbf16>
    %26 = vector.extract_strided_slice %5 {offsets = [0, 40], sizes = [128, 8], strides = [1, 1]} : vector<128x56xbf16> to vector<128x8xbf16>
    %cst_17 = arith.constant dense<0.000000e+00> : vector<128x8xf32>
    %27 = tpu.matmul %25, %26, %cst_17 {dimension_numbers = #tpu.dot_dimension_numbers<[1], [0], [0], [1], [0, 0, 1, 1], [], []>} : vector<128x128xbf16>, vector<128x8xbf16>, vector<128x8xf32> -> vector<128x8xf32>
    %28 = arith.addf %24, %27 : vector<128x8xf32>
    %c768 = arith.constant 768 : index
    %c0_18 = arith.constant 0 : index
    %29 = vector.load %arg1[%c768, %c0_18] : memref<2080x128xbf16, #tpu.memory_space<vmem>>, vector<128x128xbf16>
    %30 = vector.extract_strided_slice %5 {offsets = [0, 48], sizes = [128, 8], strides = [1, 1]} : vector<128x56xbf16> to vector<128x8xbf16>
    %cst_19 = arith.constant dense<0.000000e+00> : vector<128x8xf32>
    %31 = tpu.matmul %29, %30, %cst_19 {dimension_numbers = #tpu.dot_dimension_numbers<[1], [0], [0], [1], [0, 0, 1, 1], [], []>} : vector<128x128xbf16>, vector<128x8xbf16>, vector<128x8xf32> -> vector<128x8xf32>
    %32 = arith.addf %28, %31 : vector<128x8xf32>
    %33 = vector.broadcast %4 : vector<1x8xf32> to vector<128x8xf32>
    %34 = arith.addf %32, %33 : vector<128x8xf32>
    %cst_20 = arith.constant 0.000000e+00 : f32
    %35 = vector.broadcast %cst_20 : f32 to vector<128x8xf32>
    %36 = arith.cmpf ogt, %34, %35 : vector<128x8xf32>
    %37 = math.exp %34 : vector<128x8xf32>
    %cst_21 = arith.constant 1.000000e+00 : f32
    %38 = vector.broadcast %cst_21 : f32 to vector<128x8xf32>
    %39 = arith.subf %37, %38 : vector<128x8xf32>
    %40 = arith.select %36, %34, %39 : vector<128x8xi1>, vector<128x8xf32>
    %c16 = arith.constant 16 : index
    %c0_22 = arith.constant 0 : index
    %41 = vector.load %arg2[%c16, %c0_22] : memref<176x224xbf16, #tpu.memory_space<vmem>>, vector<8x12xbf16>
    %42 = arith.truncf %40 : vector<128x8xf32> to vector<128x8xbf16>
    %cst_23 = arith.constant dense<0.000000e+00> : vector<128x12xf32>
    %43 = tpu.matmul %42, %41, %cst_23 {dimension_numbers = #tpu.dot_dimension_numbers<[1], [0], [0], [1], [0, 0, 1, 1], [], []>} : vector<128x8xbf16>, vector<8x12xbf16>, vector<128x12xf32> -> vector<128x12xf32>
    %c1 = arith.constant 1 : index
    %c0_24 = arith.constant 0 : index
    %44 = vector.load %arg4[%c1, %c0_24] : memref<56x128xf32, #tpu.memory_space<vmem>>, vector<1x4xf32>
    %45 = arith.truncf %43 : vector<128x12xf32> to vector<128x12xbf16>
    %c896 = arith.constant 896 : index
    %c0_25 = arith.constant 0 : index
    %46 = vector.load %arg1[%c896, %c0_25] : memref<2080x128xbf16, #tpu.memory_space<vmem>>, vector<128x128xbf16>
    %47 = vector.extract_strided_slice %45 {offsets = [0, 0], sizes = [128, 4], strides = [1, 1]} : vector<128x12xbf16> to vector<128x4xbf16>
    %cst_26 = arith.constant dense<0.000000e+00> : vector<128x4xf32>
    %48 = tpu.matmul %46, %47, %cst_26 {dimension_numbers = #tpu.dot_dimension_numbers<[1], [0], [0], [1], [0, 0, 1, 1], [], []>} : vector<128x128xbf16>, vector<128x4xbf16>, vector<128x4xf32> -> vector<128x4xf32>
    %c1024 = arith.constant 1024 : index
    %c0_27 = arith.constant 0 : index
    %49 = vector.load %arg1[%c1024, %c0_27] : memref<2080x128xbf16, #tpu.memory_space<vmem>>, vector<128x128xbf16>
    %50 = vector.extract_strided_slice %45 {offsets = [0, 4], sizes = [128, 4], strides = [1, 1]} : vector<128x12xbf16> to vector<128x4xbf16>
    %cst_28 = arith.constant dense<0.000000e+00> : vector<128x4xf32>
    %51 = tpu.matmul %49, %50, %cst_28 {dimension_numbers = #tpu.dot_dimension_numbers<[1], [0], [0], [1], [0, 0, 1, 1], [], []>} : vector<128x128xbf16>, vector<128x4xbf16>, vector<128x4xf32> -> vector<128x4xf32>
    %52 = arith.addf %48, %51 : vector<128x4xf32>
    %c1152 = arith.constant 1152 : index
    %c0_29 = arith.constant 0 : index
    %53 = vector.load %arg1[%c1152, %c0_29] : memref<2080x128xbf16, #tpu.memory_space<vmem>>, vector<128x128xbf16>
    %54 = vector.extract_strided_slice %45 {offsets = [0, 8], sizes = [128, 4], strides = [1, 1]} : vector<128x12xbf16> to vector<128x4xbf16>
    %cst_30 = arith.constant dense<0.000000e+00> : vector<128x4xf32>
    %55 = tpu.matmul %53, %54, %cst_30 {dimension_numbers = #tpu.dot_dimension_numbers<[1], [0], [0], [1], [0, 0, 1, 1], [], []>} : vector<128x128xbf16>, vector<128x4xbf16>, vector<128x4xf32> -> vector<128x4xf32>
    %56 = arith.addf %52, %55 : vector<128x4xf32>
    %57 = vector.broadcast %44 : vector<1x4xf32> to vector<128x4xf32>
    %58 = arith.addf %56, %57 : vector<128x4xf32>
    %cst_31 = arith.constant 0.000000e+00 : f32
    %59 = vector.broadcast %cst_31 : f32 to vector<128x4xf32>
    %60 = arith.cmpf ogt, %58, %59 : vector<128x4xf32>
    %61 = math.exp %58 : vector<128x4xf32>
    %cst_32 = arith.constant 1.000000e+00 : f32
    %62 = vector.broadcast %cst_32 : f32 to vector<128x4xf32>
    %63 = arith.subf %61, %62 : vector<128x4xf32>
    %64 = arith.select %60, %58, %63 : vector<128x4xi1>, vector<128x4xf32>
    %c32 = arith.constant 32 : index
    %c0_33 = arith.constant 0 : index
    %65 = vector.load %arg2[%c32, %c0_33] : memref<176x224xbf16, #tpu.memory_space<vmem>>, vector<4x8xbf16>
    %66 = arith.truncf %64 : vector<128x4xf32> to vector<128x4xbf16>
    %cst_34 = arith.constant dense<0.000000e+00> : vector<128x8xf32>
    %67 = tpu.matmul %66, %65, %cst_34 {dimension_numbers = #tpu.dot_dimension_numbers<[1], [0], [0], [1], [0, 0, 1, 1], [], []>} : vector<128x4xbf16>, vector<4x8xbf16>, vector<128x8xf32> -> vector<128x8xf32>
    %c2 = arith.constant 2 : index
    %c0_35 = arith.constant 0 : index
    %68 = vector.load %arg4[%c2, %c0_35] : memref<56x128xf32, #tpu.memory_space<vmem>>, vector<1x8xf32>
    %69 = vector.broadcast %68 : vector<1x8xf32> to vector<128x8xf32>
    %70 = arith.addf %67, %69 : vector<128x8xf32>
    %c48 = arith.constant 48 : index
    %c0_36 = arith.constant 0 : index
    %71 = vector.load %arg2[%c48, %c0_36] : memref<176x224xbf16, #tpu.memory_space<vmem>>, vector<8x8xbf16>
    %72 = arith.truncf %34 : vector<128x8xf32> to vector<128x8xbf16>
    %cst_37 = arith.constant dense<0.000000e+00> : vector<128x8xf32>
    %73 = tpu.matmul %72, %71, %cst_37 {dimension_numbers = #tpu.dot_dimension_numbers<[1], [0], [0], [1], [0, 0, 1, 1], [], []>} : vector<128x8xbf16>, vector<8x8xbf16>, vector<128x8xf32> -> vector<128x8xf32>
    %c3 = arith.constant 3 : index
    %c0_38 = arith.constant 0 : index
    %74 = vector.load %arg4[%c3, %c0_38] : memref<56x128xf32, #tpu.memory_space<vmem>>, vector<1x8xf32>
    %75 = vector.broadcast %74 : vector<1x8xf32> to vector<128x8xf32>
    %76 = arith.addf %73, %75 : vector<128x8xf32>
    %77 = arith.addf %76, %70 : vector<128x8xf32>
    %cst_39 = arith.constant 0.000000e+00 : f32
    %78 = vector.broadcast %cst_39 : f32 to vector<128x8xf32>
    %79 = arith.cmpf ogt, %77, %78 : vector<128x8xf32>
    %80 = math.exp %77 : vector<128x8xf32>
    %cst_40 = arith.constant 1.000000e+00 : f32
    %81 = vector.broadcast %cst_40 : f32 to vector<128x8xf32>
    %82 = arith.subf %80, %81 : vector<128x8xf32>
    %83 = arith.select %79, %77, %82 : vector<128x8xi1>, vector<128x8xf32>
    %c64 = arith.constant 64 : index
    %c0_41 = arith.constant 0 : index
    %84 = vector.load %arg2[%c64, %c0_41] : memref<176x224xbf16, #tpu.memory_space<vmem>>, vector<8x64xbf16>
    %85 = arith.truncf %83 : vector<128x8xf32> to vector<128x8xbf16>
    %cst_42 = arith.constant dense<0.000000e+00> : vector<128x64xf32>
    %86 = tpu.matmul %85, %84, %cst_42 {dimension_numbers = #tpu.dot_dimension_numbers<[1], [0], [0], [1], [0, 0, 1, 1], [], []>} : vector<128x8xbf16>, vector<8x64xbf16>, vector<128x64xf32> -> vector<128x64xf32>
    %c4 = arith.constant 4 : index
    %c0_43 = arith.constant 0 : index
    %87 = vector.load %arg4[%c4, %c0_43] : memref<56x128xf32, #tpu.memory_space<vmem>>, vector<1x16xf32>
    %88 = arith.truncf %86 : vector<128x64xf32> to vector<128x64xbf16>
    %c1280 = arith.constant 1280 : index
    %c0_44 = arith.constant 0 : index
    %89 = vector.load %arg1[%c1280, %c0_44] : memref<2080x128xbf16, #tpu.memory_space<vmem>>, vector<64x128xbf16>
    %90 = vector.extract_strided_slice %88 {offsets = [0, 0], sizes = [128, 16], strides = [1, 1]} : vector<128x64xbf16> to vector<128x16xbf16>
    %cst_45 = arith.constant dense<0.000000e+00> : vector<64x16xf32>
    %91 = tpu.matmul %89, %90, %cst_45 {dimension_numbers = #tpu.dot_dimension_numbers<[1], [0], [0], [1], [0, 0, 1, 1], [], []>} : vector<64x128xbf16>, vector<128x16xbf16>, vector<64x16xf32> -> vector<64x16xf32>
    %c1344 = arith.constant 1344 : index
    %c0_46 = arith.constant 0 : index
    %92 = vector.load %arg1[%c1344, %c0_46] : memref<2080x128xbf16, #tpu.memory_space<vmem>>, vector<64x128xbf16>
    %93 = vector.extract_strided_slice %88 {offsets = [0, 16], sizes = [128, 16], strides = [1, 1]} : vector<128x64xbf16> to vector<128x16xbf16>
    %cst_47 = arith.constant dense<0.000000e+00> : vector<64x16xf32>
    %94 = tpu.matmul %92, %93, %cst_47 {dimension_numbers = #tpu.dot_dimension_numbers<[1], [0], [0], [1], [0, 0, 1, 1], [], []>} : vector<64x128xbf16>, vector<128x16xbf16>, vector<64x16xf32> -> vector<64x16xf32>
    %95 = arith.addf %91, %94 : vector<64x16xf32>
    %c1408 = arith.constant 1408 : index
    %c0_48 = arith.constant 0 : index
    %96 = vector.load %arg1[%c1408, %c0_48] : memref<2080x128xbf16, #tpu.memory_space<vmem>>, vector<64x128xbf16>
    %97 = vector.extract_strided_slice %88 {offsets = [0, 32], sizes = [128, 16], strides = [1, 1]} : vector<128x64xbf16> to vector<128x16xbf16>
    %cst_49 = arith.constant dense<0.000000e+00> : vector<64x16xf32>
    %98 = tpu.matmul %96, %97, %cst_49 {dimension_numbers = #tpu.dot_dimension_numbers<[1], [0], [0], [1], [0, 0, 1, 1], [], []>} : vector<64x128xbf16>, vector<128x16xbf16>, vector<64x16xf32> -> vector<64x16xf32>
    %99 = arith.addf %95, %98 : vector<64x16xf32>
    %c1472 = arith.constant 1472 : index
    %c0_50 = arith.constant 0 : index
    %100 = vector.load %arg1[%c1472, %c0_50] : memref<2080x128xbf16, #tpu.memory_space<vmem>>, vector<64x128xbf16>
    %101 = vector.extract_strided_slice %88 {offsets = [0, 48], sizes = [128, 16], strides = [1, 1]} : vector<128x64xbf16> to vector<128x16xbf16>
    %cst_51 = arith.constant dense<0.000000e+00> : vector<64x16xf32>
    %102 = tpu.matmul %100, %101, %cst_51 {dimension_numbers = #tpu.dot_dimension_numbers<[1], [0], [0], [1], [0, 0, 1, 1], [], []>} : vector<64x128xbf16>, vector<128x16xbf16>, vector<64x16xf32> -> vector<64x16xf32>
    %103 = arith.addf %99, %102 : vector<64x16xf32>
    %104 = vector.broadcast %87 : vector<1x16xf32> to vector<64x16xf32>
    %105 = arith.addf %103, %104 : vector<64x16xf32>
    %cst_52 = arith.constant 0.000000e+00 : f32
    %106 = vector.broadcast %cst_52 : f32 to vector<64x16xf32>
    %107 = arith.cmpf ogt, %105, %106 : vector<64x16xf32>
    %108 = math.exp %105 : vector<64x16xf32>
    %cst_53 = arith.constant 1.000000e+00 : f32
    %109 = vector.broadcast %cst_53 : f32 to vector<64x16xf32>
    %110 = arith.subf %108, %109 : vector<64x16xf32>
    %111 = arith.select %107, %105, %110 : vector<64x16xi1>, vector<64x16xf32>
    %c80 = arith.constant 80 : index
    %c0_54 = arith.constant 0 : index
    %112 = vector.load %arg2[%c80, %c0_54] : memref<176x224xbf16, #tpu.memory_space<vmem>>, vector<16x24xbf16>
    %113 = arith.truncf %111 : vector<64x16xf32> to vector<64x16xbf16>
    %cst_55 = arith.constant dense<0.000000e+00> : vector<64x24xf32>
    %114 = tpu.matmul %113, %112, %cst_55 {dimension_numbers = #tpu.dot_dimension_numbers<[1], [0], [0], [1], [0, 0, 1, 1], [], []>} : vector<64x16xbf16>, vector<16x24xbf16>, vector<64x24xf32> -> vector<64x24xf32>
    %c5 = arith.constant 5 : index
    %c0_56 = arith.constant 0 : index
    %115 = vector.load %arg4[%c5, %c0_56] : memref<56x128xf32, #tpu.memory_space<vmem>>, vector<1x8xf32>
    %116 = arith.truncf %114 : vector<64x24xf32> to vector<64x24xbf16>
    %c1536 = arith.constant 1536 : index
    %c0_57 = arith.constant 0 : index
    %117 = vector.load %arg1[%c1536, %c0_57] : memref<2080x128xbf16, #tpu.memory_space<vmem>>, vector<64x64xbf16>
    %118 = vector.extract_strided_slice %116 {offsets = [0, 0], sizes = [64, 8], strides = [1, 1]} : vector<64x24xbf16> to vector<64x8xbf16>
    %cst_58 = arith.constant dense<0.000000e+00> : vector<64x8xf32>
    %119 = tpu.matmul %117, %118, %cst_58 {dimension_numbers = #tpu.dot_dimension_numbers<[1], [0], [0], [1], [0, 0, 1, 1], [], []>} : vector<64x64xbf16>, vector<64x8xbf16>, vector<64x8xf32> -> vector<64x8xf32>
    %c1600 = arith.constant 1600 : index
    %c0_59 = arith.constant 0 : index
    %120 = vector.load %arg1[%c1600, %c0_59] : memref<2080x128xbf16, #tpu.memory_space<vmem>>, vector<64x64xbf16>
    %121 = vector.extract_strided_slice %116 {offsets = [0, 8], sizes = [64, 8], strides = [1, 1]} : vector<64x24xbf16> to vector<64x8xbf16>
    %cst_60 = arith.constant dense<0.000000e+00> : vector<64x8xf32>
    %122 = tpu.matmul %120, %121, %cst_60 {dimension_numbers = #tpu.dot_dimension_numbers<[1], [0], [0], [1], [0, 0, 1, 1], [], []>} : vector<64x64xbf16>, vector<64x8xbf16>, vector<64x8xf32> -> vector<64x8xf32>
    %123 = arith.addf %119, %122 : vector<64x8xf32>
    %c1664 = arith.constant 1664 : index
    %c0_61 = arith.constant 0 : index
    %124 = vector.load %arg1[%c1664, %c0_61] : memref<2080x128xbf16, #tpu.memory_space<vmem>>, vector<64x64xbf16>
    %125 = vector.extract_strided_slice %116 {offsets = [0, 16], sizes = [64, 8], strides = [1, 1]} : vector<64x24xbf16> to vector<64x8xbf16>
    %cst_62 = arith.constant dense<0.000000e+00> : vector<64x8xf32>
    %126 = tpu.matmul %124, %125, %cst_62 {dimension_numbers = #tpu.dot_dimension_numbers<[1], [0], [0], [1], [0, 0, 1, 1], [], []>} : vector<64x64xbf16>, vector<64x8xbf16>, vector<64x8xf32> -> vector<64x8xf32>
    %127 = arith.addf %123, %126 : vector<64x8xf32>
    %128 = vector.broadcast %115 : vector<1x8xf32> to vector<64x8xf32>
    %129 = arith.addf %127, %128 : vector<64x8xf32>
    %cst_63 = arith.constant 0.000000e+00 : f32
    %130 = vector.broadcast %cst_63 : f32 to vector<64x8xf32>
    %131 = arith.cmpf ogt, %129, %130 : vector<64x8xf32>
    %132 = math.exp %129 : vector<64x8xf32>
    %cst_64 = arith.constant 1.000000e+00 : f32
    %133 = vector.broadcast %cst_64 : f32 to vector<64x8xf32>
    %134 = arith.subf %132, %133 : vector<64x8xf32>
    %135 = arith.select %131, %129, %134 : vector<64x8xi1>, vector<64x8xf32>
    %c96 = arith.constant 96 : index
    %c0_65 = arith.constant 0 : index
    %136 = vector.load %arg2[%c96, %c0_65] : memref<176x224xbf16, #tpu.memory_space<vmem>>, vector<8x16xbf16>
    %137 = arith.truncf %135 : vector<64x8xf32> to vector<64x8xbf16>
    %cst_66 = arith.constant dense<0.000000e+00> : vector<64x16xf32>
    %138 = tpu.matmul %137, %136, %cst_66 {dimension_numbers = #tpu.dot_dimension_numbers<[1], [0], [0], [1], [0, 0, 1, 1], [], []>} : vector<64x8xbf16>, vector<8x16xbf16>, vector<64x16xf32> -> vector<64x16xf32>
    %c6 = arith.constant 6 : index
    %c0_67 = arith.constant 0 : index
    %139 = vector.load %arg4[%c6, %c0_67] : memref<56x128xf32, #tpu.memory_space<vmem>>, vector<1x16xf32>
    %140 = vector.broadcast %139 : vector<1x16xf32> to vector<64x16xf32>
    %141 = arith.addf %138, %140 : vector<64x16xf32>
    %c112 = arith.constant 112 : index
    %c0_68 = arith.constant 0 : index
    %142 = vector.load %arg2[%c112, %c0_68] : memref<176x224xbf16, #tpu.memory_space<vmem>>, vector<16x16xbf16>
    %143 = arith.truncf %105 : vector<64x16xf32> to vector<64x16xbf16>
    %cst_69 = arith.constant dense<0.000000e+00> : vector<64x16xf32>
    %144 = tpu.matmul %143, %142, %cst_69 {dimension_numbers = #tpu.dot_dimension_numbers<[1], [0], [0], [1], [0, 0, 1, 1], [], []>} : vector<64x16xbf16>, vector<16x16xbf16>, vector<64x16xf32> -> vector<64x16xf32>
    %c7 = arith.constant 7 : index
    %c0_70 = arith.constant 0 : index
    %145 = vector.load %arg4[%c7, %c0_70] : memref<56x128xf32, #tpu.memory_space<vmem>>, vector<1x16xf32>
    %146 = vector.broadcast %145 : vector<1x16xf32> to vector<64x16xf32>
    %147 = arith.addf %144, %146 : vector<64x16xf32>
    %148 = arith.addf %147, %141 : vector<64x16xf32>
    %cst_71 = arith.constant 0.000000e+00 : f32
    %149 = vector.broadcast %cst_71 : f32 to vector<64x16xf32>
    %150 = arith.cmpf ogt, %148, %149 : vector<64x16xf32>
    %151 = math.exp %148 : vector<64x16xf32>
    %cst_72 = arith.constant 1.000000e+00 : f32
    %152 = vector.broadcast %cst_72 : f32 to vector<64x16xf32>
    %153 = arith.subf %151, %152 : vector<64x16xf32>
    %154 = arith.select %150, %148, %153 : vector<64x16xi1>, vector<64x16xf32>
    %c128_73 = arith.constant 128 : index
    %c0_74 = arith.constant 0 : index
    %155 = vector.load %arg2[%c128_73, %c0_74] : memref<176x224xbf16, #tpu.memory_space<vmem>>, vector<16x128xbf16>
    %156 = arith.truncf %154 : vector<64x16xf32> to vector<64x16xbf16>
    %cst_75 = arith.constant dense<0.000000e+00> : vector<64x128xf32>
    %157 = tpu.matmul %156, %155, %cst_75 {dimension_numbers = #tpu.dot_dimension_numbers<[1], [0], [0], [1], [0, 0, 1, 1], [], []>} : vector<64x16xbf16>, vector<16x128xbf16>, vector<64x128xf32> -> vector<64x128xf32>
    %c8 = arith.constant 8 : index
    %c0_76 = arith.constant 0 : index
    %158 = vector.load %arg4[%c8, %c0_76] : memref<56x128xf32, #tpu.memory_space<vmem>>, vector<1x32xf32>
    %159 = arith.truncf %157 : vector<64x128xf32> to vector<64x128xbf16>
    %c1728 = arith.constant 1728 : index
    %c0_77 = arith.constant 0 : index
    %160 = vector.load %arg1[%c1728, %c0_77] : memref<2080x128xbf16, #tpu.memory_space<vmem>>, vector<32x64xbf16>
    %161 = vector.extract_strided_slice %159 {offsets = [0, 0], sizes = [64, 32], strides = [1, 1]} : vector<64x128xbf16> to vector<64x32xbf16>
    %cst_78 = arith.constant dense<0.000000e+00> : vector<32x32xf32>
    %162 = tpu.matmul %160, %161, %cst_78 {dimension_numbers = #tpu.dot_dimension_numbers<[1], [0], [0], [1], [0, 0, 1, 1], [], []>} : vector<32x64xbf16>, vector<64x32xbf16>, vector<32x32xf32> -> vector<32x32xf32>
    %c1760 = arith.constant 1760 : index
    %c0_79 = arith.constant 0 : index
    %163 = vector.load %arg1[%c1760, %c0_79] : memref<2080x128xbf16, #tpu.memory_space<vmem>>, vector<32x64xbf16>
    %164 = vector.extract_strided_slice %159 {offsets = [0, 32], sizes = [64, 32], strides = [1, 1]} : vector<64x128xbf16> to vector<64x32xbf16>
    %cst_80 = arith.constant dense<0.000000e+00> : vector<32x32xf32>
    %165 = tpu.matmul %163, %164, %cst_80 {dimension_numbers = #tpu.dot_dimension_numbers<[1], [0], [0], [1], [0, 0, 1, 1], [], []>} : vector<32x64xbf16>, vector<64x32xbf16>, vector<32x32xf32> -> vector<32x32xf32>
    %166 = arith.addf %162, %165 : vector<32x32xf32>
    %c1792 = arith.constant 1792 : index
    %c0_81 = arith.constant 0 : index
    %167 = vector.load %arg1[%c1792, %c0_81] : memref<2080x128xbf16, #tpu.memory_space<vmem>>, vector<32x64xbf16>
    %168 = vector.extract_strided_slice %159 {offsets = [0, 64], sizes = [64, 32], strides = [1, 1]} : vector<64x128xbf16> to vector<64x32xbf16>
    %cst_82 = arith.constant dense<0.000000e+00> : vector<32x32xf32>
    %169 = tpu.matmul %167, %168, %cst_82 {dimension_numbers = #tpu.dot_dimension_numbers<[1], [0], [0], [1], [0, 0, 1, 1], [], []>} : vector<32x64xbf16>, vector<64x32xbf16>, vector<32x32xf32> -> vector<32x32xf32>
    %170 = arith.addf %166, %169 : vector<32x32xf32>
    %c1824 = arith.constant 1824 : index
    %c0_83 = arith.constant 0 : index
    %171 = vector.load %arg1[%c1824, %c0_83] : memref<2080x128xbf16, #tpu.memory_space<vmem>>, vector<32x64xbf16>
    %172 = vector.extract_strided_slice %159 {offsets = [0, 96], sizes = [64, 32], strides = [1, 1]} : vector<64x128xbf16> to vector<64x32xbf16>
    %cst_84 = arith.constant dense<0.000000e+00> : vector<32x32xf32>
    %173 = tpu.matmul %171, %172, %cst_84 {dimension_numbers = #tpu.dot_dimension_numbers<[1], [0], [0], [1], [0, 0, 1, 1], [], []>} : vector<32x64xbf16>, vector<64x32xbf16>, vector<32x32xf32> -> vector<32x32xf32>
    %174 = arith.addf %170, %173 : vector<32x32xf32>
    %175 = vector.broadcast %158 : vector<1x32xf32> to vector<32x32xf32>
    %176 = arith.addf %174, %175 : vector<32x32xf32>
    %c0_85 = arith.constant 0 : index
    %c0_86 = arith.constant 0 : index
    %177 = vector.load %arg3[%c0_85, %c0_86] : memref<160x128xbf16, #tpu.memory_space<vmem>>, vector<32x128xbf16>
    %c32_87 = arith.constant 32 : index
    %c0_88 = arith.constant 0 : index
    %178 = vector.load %arg3[%c32_87, %c0_88] : memref<160x128xbf16, #tpu.memory_space<vmem>>, vector<32x128xbf16>
    %c64_89 = arith.constant 64 : index
    %c0_90 = arith.constant 0 : index
    %179 = vector.load %arg3[%c64_89, %c0_90] : memref<160x128xbf16, #tpu.memory_space<vmem>>, vector<32x128xbf16>
    %c96_91 = arith.constant 96 : index
    %c0_92 = arith.constant 0 : index
    %180 = vector.load %arg3[%c96_91, %c0_92] : memref<160x128xbf16, #tpu.memory_space<vmem>>, vector<32x128xbf16>
    %c10 = arith.constant 10 : index
    %c0_93 = arith.constant 0 : index
    %181 = vector.load %arg4[%c10, %c0_93] : memref<56x128xf32, #tpu.memory_space<vmem>>, vector<1x128xf32>
    %c11 = arith.constant 11 : index
    %c0_94 = arith.constant 0 : index
    %182 = vector.load %arg4[%c11, %c0_94] : memref<56x128xf32, #tpu.memory_space<vmem>>, vector<1x128xf32>
    %183 = arith.truncf %176 : vector<32x32xf32> to vector<32x32xbf16>
    %cst_95 = arith.constant dense<0.000000e+00> : vector<32x128xf32>
    %184 = tpu.matmul %183, %177, %cst_95 {dimension_numbers = #tpu.dot_dimension_numbers<[1], [0], [0], [1], [0, 0, 1, 1], [], []>} : vector<32x32xbf16>, vector<32x128xbf16>, vector<32x128xf32> -> vector<32x128xf32>
    %185 = vector.broadcast %181 : vector<1x128xf32> to vector<32x128xf32>
    %186 = arith.addf %184, %185 : vector<32x128xf32>
    %cst_96 = arith.constant 0.000000e+00 : f32
    %187 = vector.broadcast %cst_96 : f32 to vector<2x32xf32>
    %188 = vector.extract_strided_slice %186 {offsets = [0, 0], sizes = [2, 128], strides = [1, 1]} : vector<32x128xf32> to vector<2x128xf32>
    %189 = arith.truncf %187 : vector<2x32xf32> to vector<2x32xbf16>
    %cst_97 = arith.constant dense<0.000000e+00> : vector<2x128xf32>
    %190 = tpu.matmul %189, %178, %cst_97 {dimension_numbers = #tpu.dot_dimension_numbers<[1], [0], [0], [1], [0, 0, 1, 1], [], []>} : vector<2x32xbf16>, vector<32x128xbf16>, vector<2x128xf32> -> vector<2x128xf32>
    %191 = arith.addf %188, %190 : vector<2x128xf32>
    %192 = arith.negf %191 : vector<2x128xf32>
    %193 = math.exp %192 : vector<2x128xf32>
    %cst_98 = arith.constant 1.000000e+00 : f32
    %194 = vector.broadcast %cst_98 : f32 to vector<2x128xf32>
    %195 = arith.addf %194, %193 : vector<2x128xf32>
    %196 = arith.divf %194, %195 : vector<2x128xf32>
    %197 = math.tanh %191 : vector<2x128xf32>
    %198 = vector.extract_strided_slice %196 {offsets = [0, 32], sizes = [2, 32], strides = [1, 1]} : vector<2x128xf32> to vector<2x32xf32>
    %199 = arith.mulf %198, %187 : vector<2x32xf32>
    %200 = vector.extract_strided_slice %196 {offsets = [0, 0], sizes = [2, 32], strides = [1, 1]} : vector<2x128xf32> to vector<2x32xf32>
    %201 = vector.extract_strided_slice %197 {offsets = [0, 64], sizes = [2, 32], strides = [1, 1]} : vector<2x128xf32> to vector<2x32xf32>
    %202 = arith.mulf %200, %201 : vector<2x32xf32>
    %203 = arith.addf %199, %202 : vector<2x32xf32>
    %204 = vector.extract_strided_slice %196 {offsets = [0, 96], sizes = [2, 32], strides = [1, 1]} : vector<2x128xf32> to vector<2x32xf32>
    %205 = math.tanh %203 : vector<2x32xf32>
    %206 = arith.mulf %204, %205 : vector<2x32xf32>
    %207 = arith.truncf %206 : vector<2x32xf32> to vector<2x32xbf16>
    %cst_99 = arith.constant dense<0.000000e+00> : vector<2x128xf32>
    %208 = tpu.matmul %207, %179, %cst_99 {dimension_numbers = #tpu.dot_dimension_numbers<[1], [0], [0], [1], [0, 0, 1, 1], [], []>} : vector<2x32xbf16>, vector<32x128xbf16>, vector<2x128xf32> -> vector<2x128xf32>
    %209 = arith.truncf %187 : vector<2x32xf32> to vector<2x32xbf16>
    %cst_100 = arith.constant dense<0.000000e+00> : vector<2x128xf32>
    %210 = tpu.matmul %209, %180, %cst_100 {dimension_numbers = #tpu.dot_dimension_numbers<[1], [0], [0], [1], [0, 0, 1, 1], [], []>} : vector<2x32xbf16>, vector<32x128xbf16>, vector<2x128xf32> -> vector<2x128xf32>
    %211 = arith.addf %208, %210 : vector<2x128xf32>
    %212 = vector.broadcast %182 : vector<1x128xf32> to vector<2x128xf32>
    %213 = arith.addf %211, %212 : vector<2x128xf32>
    %214 = arith.negf %213 : vector<2x128xf32>
    %215 = math.exp %214 : vector<2x128xf32>
    %cst_101 = arith.constant 1.000000e+00 : f32
    %216 = vector.broadcast %cst_101 : f32 to vector<2x128xf32>
    %217 = arith.addf %216, %215 : vector<2x128xf32>
    %218 = arith.divf %216, %217 : vector<2x128xf32>
    %219 = math.tanh %213 : vector<2x128xf32>
    %220 = vector.extract_strided_slice %218 {offsets = [0, 32], sizes = [2, 32], strides = [1, 1]} : vector<2x128xf32> to vector<2x32xf32>
    %221 = arith.mulf %220, %187 : vector<2x32xf32>
    %222 = vector.extract_strided_slice %218 {offsets = [0, 0], sizes = [2, 32], strides = [1, 1]} : vector<2x128xf32> to vector<2x32xf32>
    %223 = vector.extract_strided_slice %219 {offsets = [0, 64], sizes = [2, 32], strides = [1, 1]} : vector<2x128xf32> to vector<2x32xf32>
    %224 = arith.mulf %222, %223 : vector<2x32xf32>
    %225 = arith.addf %221, %224 : vector<2x32xf32>
    %226 = vector.extract_strided_slice %218 {offsets = [0, 96], sizes = [2, 32], strides = [1, 1]} : vector<2x128xf32> to vector<2x32xf32>
    %227 = math.tanh %225 : vector<2x32xf32>
    %228 = arith.mulf %226, %227 : vector<2x32xf32>
    %229 = vector.extract_strided_slice %186 {offsets = [2, 0], sizes = [2, 128], strides = [1, 1]} : vector<32x128xf32> to vector<2x128xf32>
    %230 = arith.truncf %206 : vector<2x32xf32> to vector<2x32xbf16>
    %cst_102 = arith.constant dense<0.000000e+00> : vector<2x128xf32>
    %231 = tpu.matmul %230, %178, %cst_102 {dimension_numbers = #tpu.dot_dimension_numbers<[1], [0], [0], [1], [0, 0, 1, 1], [], []>} : vector<2x32xbf16>, vector<32x128xbf16>, vector<2x128xf32> -> vector<2x128xf32>
    %232 = arith.addf %229, %231 : vector<2x128xf32>
    %233 = arith.negf %232 : vector<2x128xf32>
    %234 = math.exp %233 : vector<2x128xf32>
    %cst_103 = arith.constant 1.000000e+00 : f32
    %235 = vector.broadcast %cst_103 : f32 to vector<2x128xf32>
    %236 = arith.addf %235, %234 : vector<2x128xf32>
    %237 = arith.divf %235, %236 : vector<2x128xf32>
    %238 = math.tanh %232 : vector<2x128xf32>
    %239 = vector.extract_strided_slice %237 {offsets = [0, 32], sizes = [2, 32], strides = [1, 1]} : vector<2x128xf32> to vector<2x32xf32>
    %240 = arith.mulf %239, %203 : vector<2x32xf32>
    %241 = vector.extract_strided_slice %237 {offsets = [0, 0], sizes = [2, 32], strides = [1, 1]} : vector<2x128xf32> to vector<2x32xf32>
    %242 = vector.extract_strided_slice %238 {offsets = [0, 64], sizes = [2, 32], strides = [1, 1]} : vector<2x128xf32> to vector<2x32xf32>
    %243 = arith.mulf %241, %242 : vector<2x32xf32>
    %244 = arith.addf %240, %243 : vector<2x32xf32>
    %245 = vector.extract_strided_slice %237 {offsets = [0, 96], sizes = [2, 32], strides = [1, 1]} : vector<2x128xf32> to vector<2x32xf32>
    %246 = math.tanh %244 : vector<2x32xf32>
    %247 = arith.mulf %245, %246 : vector<2x32xf32>
    %248 = arith.truncf %247 : vector<2x32xf32> to vector<2x32xbf16>
    %cst_104 = arith.constant dense<0.000000e+00> : vector<2x128xf32>
    %249 = tpu.matmul %248, %179, %cst_104 {dimension_numbers = #tpu.dot_dimension_numbers<[1], [0], [0], [1], [0, 0, 1, 1], [], []>} : vector<2x32xbf16>, vector<32x128xbf16>, vector<2x128xf32> -> vector<2x128xf32>
    %250 = arith.truncf %228 : vector<2x32xf32> to vector<2x32xbf16>
    %cst_105 = arith.constant dense<0.000000e+00> : vector<2x128xf32>
    %251 = tpu.matmul %250, %180, %cst_105 {dimension_numbers = #tpu.dot_dimension_numbers<[1], [0], [0], [1], [0, 0, 1, 1], [], []>} : vector<2x32xbf16>, vector<32x128xbf16>, vector<2x128xf32> -> vector<2x128xf32>
    %252 = arith.addf %249, %251 : vector<2x128xf32>
    %253 = vector.broadcast %182 : vector<1x128xf32> to vector<2x128xf32>
    %254 = arith.addf %252, %253 : vector<2x128xf32>
    %255 = arith.negf %254 : vector<2x128xf32>
    %256 = math.exp %255 : vector<2x128xf32>
    %cst_106 = arith.constant 1.000000e+00 : f32
    %257 = vector.broadcast %cst_106 : f32 to vector<2x128xf32>
    %258 = arith.addf %257, %256 : vector<2x128xf32>
    %259 = arith.divf %257, %258 : vector<2x128xf32>
    %260 = math.tanh %254 : vector<2x128xf32>
    %261 = vector.extract_strided_slice %259 {offsets = [0, 32], sizes = [2, 32], strides = [1, 1]} : vector<2x128xf32> to vector<2x32xf32>
    %262 = arith.mulf %261, %225 : vector<2x32xf32>
    %263 = vector.extract_strided_slice %259 {offsets = [0, 0], sizes = [2, 32], strides = [1, 1]} : vector<2x128xf32> to vector<2x32xf32>
    %264 = vector.extract_strided_slice %260 {offsets = [0, 64], sizes = [2, 32], strides = [1, 1]} : vector<2x128xf32> to vector<2x32xf32>
    %265 = arith.mulf %263, %264 : vector<2x32xf32>
    %266 = arith.addf %262, %265 : vector<2x32xf32>
    %267 = vector.extract_strided_slice %259 {offsets = [0, 96], sizes = [2, 32], strides = [1, 1]} : vector<2x128xf32> to vector<2x32xf32>
    %268 = math.tanh %266 : vector<2x32xf32>
    %269 = arith.mulf %267, %268 : vector<2x32xf32>
    %270 = vector.extract_strided_slice %186 {offsets = [4, 0], sizes = [2, 128], strides = [1, 1]} : vector<32x128xf32> to vector<2x128xf32>
    %271 = arith.truncf %247 : vector<2x32xf32> to vector<2x32xbf16>
    %cst_107 = arith.constant dense<0.000000e+00> : vector<2x128xf32>
    %272 = tpu.matmul %271, %178, %cst_107 {dimension_numbers = #tpu.dot_dimension_numbers<[1], [0], [0], [1], [0, 0, 1, 1], [], []>} : vector<2x32xbf16>, vector<32x128xbf16>, vector<2x128xf32> -> vector<2x128xf32>
    %273 = arith.addf %270, %272 : vector<2x128xf32>
    %274 = arith.negf %273 : vector<2x128xf32>
    %275 = math.exp %274 : vector<2x128xf32>
    %cst_108 = arith.constant 1.000000e+00 : f32
    %276 = vector.broadcast %cst_108 : f32 to vector<2x128xf32>
    %277 = arith.addf %276, %275 : vector<2x128xf32>
    %278 = arith.divf %276, %277 : vector<2x128xf32>
    %279 = math.tanh %273 : vector<2x128xf32>
    %280 = vector.extract_strided_slice %278 {offsets = [0, 32], sizes = [2, 32], strides = [1, 1]} : vector<2x128xf32> to vector<2x32xf32>
    %281 = arith.mulf %280, %244 : vector<2x32xf32>
    %282 = vector.extract_strided_slice %278 {offsets = [0, 0], sizes = [2, 32], strides = [1, 1]} : vector<2x128xf32> to vector<2x32xf32>
    %283 = vector.extract_strided_slice %279 {offsets = [0, 64], sizes = [2, 32], strides = [1, 1]} : vector<2x128xf32> to vector<2x32xf32>
    %284 = arith.mulf %282, %283 : vector<2x32xf32>
    %285 = arith.addf %281, %284 : vector<2x32xf32>
    %286 = vector.extract_strided_slice %278 {offsets = [0, 96], sizes = [2, 32], strides = [1, 1]} : vector<2x128xf32> to vector<2x32xf32>
    %287 = math.tanh %285 : vector<2x32xf32>
    %288 = arith.mulf %286, %287 : vector<2x32xf32>
    %289 = arith.truncf %288 : vector<2x32xf32> to vector<2x32xbf16>
    %cst_109 = arith.constant dense<0.000000e+00> : vector<2x128xf32>
    %290 = tpu.matmul %289, %179, %cst_109 {dimension_numbers = #tpu.dot_dimension_numbers<[1], [0], [0], [1], [0, 0, 1, 1], [], []>} : vector<2x32xbf16>, vector<32x128xbf16>, vector<2x128xf32> -> vector<2x128xf32>
    %291 = arith.truncf %269 : vector<2x32xf32> to vector<2x32xbf16>
    %cst_110 = arith.constant dense<0.000000e+00> : vector<2x128xf32>
    %292 = tpu.matmul %291, %180, %cst_110 {dimension_numbers = #tpu.dot_dimension_numbers<[1], [0], [0], [1], [0, 0, 1, 1], [], []>} : vector<2x32xbf16>, vector<32x128xbf16>, vector<2x128xf32> -> vector<2x128xf32>
    %293 = arith.addf %290, %292 : vector<2x128xf32>
    %294 = vector.broadcast %182 : vector<1x128xf32> to vector<2x128xf32>
    %295 = arith.addf %293, %294 : vector<2x128xf32>
    %296 = arith.negf %295 : vector<2x128xf32>
    %297 = math.exp %296 : vector<2x128xf32>
    %cst_111 = arith.constant 1.000000e+00 : f32
    %298 = vector.broadcast %cst_111 : f32 to vector<2x128xf32>
    %299 = arith.addf %298, %297 : vector<2x128xf32>
    %300 = arith.divf %298, %299 : vector<2x128xf32>
    %301 = math.tanh %295 : vector<2x128xf32>
    %302 = vector.extract_strided_slice %300 {offsets = [0, 32], sizes = [2, 32], strides = [1, 1]} : vector<2x128xf32> to vector<2x32xf32>
    %303 = arith.mulf %302, %266 : vector<2x32xf32>
    %304 = vector.extract_strided_slice %300 {offsets = [0, 0], sizes = [2, 32], strides = [1, 1]} : vector<2x128xf32> to vector<2x32xf32>
    %305 = vector.extract_strided_slice %301 {offsets = [0, 64], sizes = [2, 32], strides = [1, 1]} : vector<2x128xf32> to vector<2x32xf32>
    %306 = arith.mulf %304, %305 : vector<2x32xf32>
    %307 = arith.addf %303, %306 : vector<2x32xf32>
    %308 = vector.extract_strided_slice %300 {offsets = [0, 96], sizes = [2, 32], strides = [1, 1]} : vector<2x128xf32> to vector<2x32xf32>
    %309 = math.tanh %307 : vector<2x32xf32>
    %310 = arith.mulf %308, %309 : vector<2x32xf32>
    %311 = vector.extract_strided_slice %186 {offsets = [6, 0], sizes = [2, 128], strides = [1, 1]} : vector<32x128xf32> to vector<2x128xf32>
    %312 = arith.truncf %288 : vector<2x32xf32> to vector<2x32xbf16>
    %cst_112 = arith.constant dense<0.000000e+00> : vector<2x128xf32>
    %313 = tpu.matmul %312, %178, %cst_112 {dimension_numbers = #tpu.dot_dimension_numbers<[1], [0], [0], [1], [0, 0, 1, 1], [], []>} : vector<2x32xbf16>, vector<32x128xbf16>, vector<2x128xf32> -> vector<2x128xf32>
    %314 = arith.addf %311, %313 : vector<2x128xf32>
    %315 = arith.negf %314 : vector<2x128xf32>
    %316 = math.exp %315 : vector<2x128xf32>
    %cst_113 = arith.constant 1.000000e+00 : f32
    %317 = vector.broadcast %cst_113 : f32 to vector<2x128xf32>
    %318 = arith.addf %317, %316 : vector<2x128xf32>
    %319 = arith.divf %317, %318 : vector<2x128xf32>
    %320 = math.tanh %314 : vector<2x128xf32>
    %321 = vector.extract_strided_slice %319 {offsets = [0, 32], sizes = [2, 32], strides = [1, 1]} : vector<2x128xf32> to vector<2x32xf32>
    %322 = arith.mulf %321, %285 : vector<2x32xf32>
    %323 = vector.extract_strided_slice %319 {offsets = [0, 0], sizes = [2, 32], strides = [1, 1]} : vector<2x128xf32> to vector<2x32xf32>
    %324 = vector.extract_strided_slice %320 {offsets = [0, 64], sizes = [2, 32], strides = [1, 1]} : vector<2x128xf32> to vector<2x32xf32>
    %325 = arith.mulf %323, %324 : vector<2x32xf32>
    %326 = arith.addf %322, %325 : vector<2x32xf32>
    %327 = vector.extract_strided_slice %319 {offsets = [0, 96], sizes = [2, 32], strides = [1, 1]} : vector<2x128xf32> to vector<2x32xf32>
    %328 = math.tanh %326 : vector<2x32xf32>
    %329 = arith.mulf %327, %328 : vector<2x32xf32>
    %330 = arith.truncf %329 : vector<2x32xf32> to vector<2x32xbf16>
    %cst_114 = arith.constant dense<0.000000e+00> : vector<2x128xf32>
    %331 = tpu.matmul %330, %179, %cst_114 {dimension_numbers = #tpu.dot_dimension_numbers<[1], [0], [0], [1], [0, 0, 1, 1], [], []>} : vector<2x32xbf16>, vector<32x128xbf16>, vector<2x128xf32> -> vector<2x128xf32>
    %332 = arith.truncf %310 : vector<2x32xf32> to vector<2x32xbf16>
    %cst_115 = arith.constant dense<0.000000e+00> : vector<2x128xf32>
    %333 = tpu.matmul %332, %180, %cst_115 {dimension_numbers = #tpu.dot_dimension_numbers<[1], [0], [0], [1], [0, 0, 1, 1], [], []>} : vector<2x32xbf16>, vector<32x128xbf16>, vector<2x128xf32> -> vector<2x128xf32>
    %334 = arith.addf %331, %333 : vector<2x128xf32>
    %335 = vector.broadcast %182 : vector<1x128xf32> to vector<2x128xf32>
    %336 = arith.addf %334, %335 : vector<2x128xf32>
    %337 = arith.negf %336 : vector<2x128xf32>
    %338 = math.exp %337 : vector<2x128xf32>
    %cst_116 = arith.constant 1.000000e+00 : f32
    %339 = vector.broadcast %cst_116 : f32 to vector<2x128xf32>
    %340 = arith.addf %339, %338 : vector<2x128xf32>
    %341 = arith.divf %339, %340 : vector<2x128xf32>
    %342 = math.tanh %336 : vector<2x128xf32>
    %343 = vector.extract_strided_slice %341 {offsets = [0, 32], sizes = [2, 32], strides = [1, 1]} : vector<2x128xf32> to vector<2x32xf32>
    %344 = arith.mulf %343, %307 : vector<2x32xf32>
    %345 = vector.extract_strided_slice %341 {offsets = [0, 0], sizes = [2, 32], strides = [1, 1]} : vector<2x128xf32> to vector<2x32xf32>
    %346 = vector.extract_strided_slice %342 {offsets = [0, 64], sizes = [2, 32], strides = [1, 1]} : vector<2x128xf32> to vector<2x32xf32>
    %347 = arith.mulf %345, %346 : vector<2x32xf32>
    %348 = arith.addf %344, %347 : vector<2x32xf32>
    %349 = vector.extract_strided_slice %341 {offsets = [0, 96], sizes = [2, 32], strides = [1, 1]} : vector<2x128xf32> to vector<2x32xf32>
    %350 = math.tanh %348 : vector<2x32xf32>
    %351 = arith.mulf %349, %350 : vector<2x32xf32>
    %352 = vector.extract_strided_slice %186 {offsets = [8, 0], sizes = [2, 128], strides = [1, 1]} : vector<32x128xf32> to vector<2x128xf32>
    %353 = arith.truncf %329 : vector<2x32xf32> to vector<2x32xbf16>
    %cst_117 = arith.constant dense<0.000000e+00> : vector<2x128xf32>
    %354 = tpu.matmul %353, %178, %cst_117 {dimension_numbers = #tpu.dot_dimension_numbers<[1], [0], [0], [1], [0, 0, 1, 1], [], []>} : vector<2x32xbf16>, vector<32x128xbf16>, vector<2x128xf32> -> vector<2x128xf32>
    %355 = arith.addf %352, %354 : vector<2x128xf32>
    %356 = arith.negf %355 : vector<2x128xf32>
    %357 = math.exp %356 : vector<2x128xf32>
    %cst_118 = arith.constant 1.000000e+00 : f32
    %358 = vector.broadcast %cst_118 : f32 to vector<2x128xf32>
    %359 = arith.addf %358, %357 : vector<2x128xf32>
    %360 = arith.divf %358, %359 : vector<2x128xf32>
    %361 = math.tanh %355 : vector<2x128xf32>
    %362 = vector.extract_strided_slice %360 {offsets = [0, 32], sizes = [2, 32], strides = [1, 1]} : vector<2x128xf32> to vector<2x32xf32>
    %363 = arith.mulf %362, %326 : vector<2x32xf32>
    %364 = vector.extract_strided_slice %360 {offsets = [0, 0], sizes = [2, 32], strides = [1, 1]} : vector<2x128xf32> to vector<2x32xf32>
    %365 = vector.extract_strided_slice %361 {offsets = [0, 64], sizes = [2, 32], strides = [1, 1]} : vector<2x128xf32> to vector<2x32xf32>
    %366 = arith.mulf %364, %365 : vector<2x32xf32>
    %367 = arith.addf %363, %366 : vector<2x32xf32>
    %368 = vector.extract_strided_slice %360 {offsets = [0, 96], sizes = [2, 32], strides = [1, 1]} : vector<2x128xf32> to vector<2x32xf32>
    %369 = math.tanh %367 : vector<2x32xf32>
    %370 = arith.mulf %368, %369 : vector<2x32xf32>
    %371 = arith.truncf %370 : vector<2x32xf32> to vector<2x32xbf16>
    %cst_119 = arith.constant dense<0.000000e+00> : vector<2x128xf32>
    %372 = tpu.matmul %371, %179, %cst_119 {dimension_numbers = #tpu.dot_dimension_numbers<[1], [0], [0], [1], [0, 0, 1, 1], [], []>} : vector<2x32xbf16>, vector<32x128xbf16>, vector<2x128xf32> -> vector<2x128xf32>
    %373 = arith.truncf %351 : vector<2x32xf32> to vector<2x32xbf16>
    %cst_120 = arith.constant dense<0.000000e+00> : vector<2x128xf32>
    %374 = tpu.matmul %373, %180, %cst_120 {dimension_numbers = #tpu.dot_dimension_numbers<[1], [0], [0], [1], [0, 0, 1, 1], [], []>} : vector<2x32xbf16>, vector<32x128xbf16>, vector<2x128xf32> -> vector<2x128xf32>
    %375 = arith.addf %372, %374 : vector<2x128xf32>
    %376 = vector.broadcast %182 : vector<1x128xf32> to vector<2x128xf32>
    %377 = arith.addf %375, %376 : vector<2x128xf32>
    %378 = arith.negf %377 : vector<2x128xf32>
    %379 = math.exp %378 : vector<2x128xf32>
    %cst_121 = arith.constant 1.000000e+00 : f32
    %380 = vector.broadcast %cst_121 : f32 to vector<2x128xf32>
    %381 = arith.addf %380, %379 : vector<2x128xf32>
    %382 = arith.divf %380, %381 : vector<2x128xf32>
    %383 = math.tanh %377 : vector<2x128xf32>
    %384 = vector.extract_strided_slice %382 {offsets = [0, 32], sizes = [2, 32], strides = [1, 1]} : vector<2x128xf32> to vector<2x32xf32>
    %385 = arith.mulf %384, %348 : vector<2x32xf32>
    %386 = vector.extract_strided_slice %382 {offsets = [0, 0], sizes = [2, 32], strides = [1, 1]} : vector<2x128xf32> to vector<2x32xf32>
    %387 = vector.extract_strided_slice %383 {offsets = [0, 64], sizes = [2, 32], strides = [1, 1]} : vector<2x128xf32> to vector<2x32xf32>
    %388 = arith.mulf %386, %387 : vector<2x32xf32>
    %389 = arith.addf %385, %388 : vector<2x32xf32>
    %390 = vector.extract_strided_slice %382 {offsets = [0, 96], sizes = [2, 32], strides = [1, 1]} : vector<2x128xf32> to vector<2x32xf32>
    %391 = math.tanh %389 : vector<2x32xf32>
    %392 = arith.mulf %390, %391 : vector<2x32xf32>
    %393 = vector.extract_strided_slice %186 {offsets = [10, 0], sizes = [2, 128], strides = [1, 1]} : vector<32x128xf32> to vector<2x128xf32>
    %394 = arith.truncf %370 : vector<2x32xf32> to vector<2x32xbf16>
    %cst_122 = arith.constant dense<0.000000e+00> : vector<2x128xf32>
    %395 = tpu.matmul %394, %178, %cst_122 {dimension_numbers = #tpu.dot_dimension_numbers<[1], [0], [0], [1], [0, 0, 1, 1], [], []>} : vector<2x32xbf16>, vector<32x128xbf16>, vector<2x128xf32> -> vector<2x128xf32>
    %396 = arith.addf %393, %395 : vector<2x128xf32>
    %397 = arith.negf %396 : vector<2x128xf32>
    %398 = math.exp %397 : vector<2x128xf32>
    %cst_123 = arith.constant 1.000000e+00 : f32
    %399 = vector.broadcast %cst_123 : f32 to vector<2x128xf32>
    %400 = arith.addf %399, %398 : vector<2x128xf32>
    %401 = arith.divf %399, %400 : vector<2x128xf32>
    %402 = math.tanh %396 : vector<2x128xf32>
    %403 = vector.extract_strided_slice %401 {offsets = [0, 32], sizes = [2, 32], strides = [1, 1]} : vector<2x128xf32> to vector<2x32xf32>
    %404 = arith.mulf %403, %367 : vector<2x32xf32>
    %405 = vector.extract_strided_slice %401 {offsets = [0, 0], sizes = [2, 32], strides = [1, 1]} : vector<2x128xf32> to vector<2x32xf32>
    %406 = vector.extract_strided_slice %402 {offsets = [0, 64], sizes = [2, 32], strides = [1, 1]} : vector<2x128xf32> to vector<2x32xf32>
    %407 = arith.mulf %405, %406 : vector<2x32xf32>
    %408 = arith.addf %404, %407 : vector<2x32xf32>
    %409 = vector.extract_strided_slice %401 {offsets = [0, 96], sizes = [2, 32], strides = [1, 1]} : vector<2x128xf32> to vector<2x32xf32>
    %410 = math.tanh %408 : vector<2x32xf32>
    %411 = arith.mulf %409, %410 : vector<2x32xf32>
    %412 = arith.truncf %411 : vector<2x32xf32> to vector<2x32xbf16>
    %cst_124 = arith.constant dense<0.000000e+00> : vector<2x128xf32>
    %413 = tpu.matmul %412, %179, %cst_124 {dimension_numbers = #tpu.dot_dimension_numbers<[1], [0], [0], [1], [0, 0, 1, 1], [], []>} : vector<2x32xbf16>, vector<32x128xbf16>, vector<2x128xf32> -> vector<2x128xf32>
    %414 = arith.truncf %392 : vector<2x32xf32> to vector<2x32xbf16>
    %cst_125 = arith.constant dense<0.000000e+00> : vector<2x128xf32>
    %415 = tpu.matmul %414, %180, %cst_125 {dimension_numbers = #tpu.dot_dimension_numbers<[1], [0], [0], [1], [0, 0, 1, 1], [], []>} : vector<2x32xbf16>, vector<32x128xbf16>, vector<2x128xf32> -> vector<2x128xf32>
    %416 = arith.addf %413, %415 : vector<2x128xf32>
    %417 = vector.broadcast %182 : vector<1x128xf32> to vector<2x128xf32>
    %418 = arith.addf %416, %417 : vector<2x128xf32>
    %419 = arith.negf %418 : vector<2x128xf32>
    %420 = math.exp %419 : vector<2x128xf32>
    %cst_126 = arith.constant 1.000000e+00 : f32
    %421 = vector.broadcast %cst_126 : f32 to vector<2x128xf32>
    %422 = arith.addf %421, %420 : vector<2x128xf32>
    %423 = arith.divf %421, %422 : vector<2x128xf32>
    %424 = math.tanh %418 : vector<2x128xf32>
    %425 = vector.extract_strided_slice %423 {offsets = [0, 32], sizes = [2, 32], strides = [1, 1]} : vector<2x128xf32> to vector<2x32xf32>
    %426 = arith.mulf %425, %389 : vector<2x32xf32>
    %427 = vector.extract_strided_slice %423 {offsets = [0, 0], sizes = [2, 32], strides = [1, 1]} : vector<2x128xf32> to vector<2x32xf32>
    %428 = vector.extract_strided_slice %424 {offsets = [0, 64], sizes = [2, 32], strides = [1, 1]} : vector<2x128xf32> to vector<2x32xf32>
    %429 = arith.mulf %427, %428 : vector<2x32xf32>
    %430 = arith.addf %426, %429 : vector<2x32xf32>
    %431 = vector.extract_strided_slice %423 {offsets = [0, 96], sizes = [2, 32], strides = [1, 1]} : vector<2x128xf32> to vector<2x32xf32>
    %432 = math.tanh %430 : vector<2x32xf32>
    %433 = arith.mulf %431, %432 : vector<2x32xf32>
    %434 = vector.extract_strided_slice %186 {offsets = [12, 0], sizes = [2, 128], strides = [1, 1]} : vector<32x128xf32> to vector<2x128xf32>
    %435 = arith.truncf %411 : vector<2x32xf32> to vector<2x32xbf16>
    %cst_127 = arith.constant dense<0.000000e+00> : vector<2x128xf32>
    %436 = tpu.matmul %435, %178, %cst_127 {dimension_numbers = #tpu.dot_dimension_numbers<[1], [0], [0], [1], [0, 0, 1, 1], [], []>} : vector<2x32xbf16>, vector<32x128xbf16>, vector<2x128xf32> -> vector<2x128xf32>
    %437 = arith.addf %434, %436 : vector<2x128xf32>
    %438 = arith.negf %437 : vector<2x128xf32>
    %439 = math.exp %438 : vector<2x128xf32>
    %cst_128 = arith.constant 1.000000e+00 : f32
    %440 = vector.broadcast %cst_128 : f32 to vector<2x128xf32>
    %441 = arith.addf %440, %439 : vector<2x128xf32>
    %442 = arith.divf %440, %441 : vector<2x128xf32>
    %443 = math.tanh %437 : vector<2x128xf32>
    %444 = vector.extract_strided_slice %442 {offsets = [0, 32], sizes = [2, 32], strides = [1, 1]} : vector<2x128xf32> to vector<2x32xf32>
    %445 = arith.mulf %444, %408 : vector<2x32xf32>
    %446 = vector.extract_strided_slice %442 {offsets = [0, 0], sizes = [2, 32], strides = [1, 1]} : vector<2x128xf32> to vector<2x32xf32>
    %447 = vector.extract_strided_slice %443 {offsets = [0, 64], sizes = [2, 32], strides = [1, 1]} : vector<2x128xf32> to vector<2x32xf32>
    %448 = arith.mulf %446, %447 : vector<2x32xf32>
    %449 = arith.addf %445, %448 : vector<2x32xf32>
    %450 = vector.extract_strided_slice %442 {offsets = [0, 96], sizes = [2, 32], strides = [1, 1]} : vector<2x128xf32> to vector<2x32xf32>
    %451 = math.tanh %449 : vector<2x32xf32>
    %452 = arith.mulf %450, %451 : vector<2x32xf32>
    %453 = arith.truncf %452 : vector<2x32xf32> to vector<2x32xbf16>
    %cst_129 = arith.constant dense<0.000000e+00> : vector<2x128xf32>
    %454 = tpu.matmul %453, %179, %cst_129 {dimension_numbers = #tpu.dot_dimension_numbers<[1], [0], [0], [1], [0, 0, 1, 1], [], []>} : vector<2x32xbf16>, vector<32x128xbf16>, vector<2x128xf32> -> vector<2x128xf32>
    %455 = arith.truncf %433 : vector<2x32xf32> to vector<2x32xbf16>
    %cst_130 = arith.constant dense<0.000000e+00> : vector<2x128xf32>
    %456 = tpu.matmul %455, %180, %cst_130 {dimension_numbers = #tpu.dot_dimension_numbers<[1], [0], [0], [1], [0, 0, 1, 1], [], []>} : vector<2x32xbf16>, vector<32x128xbf16>, vector<2x128xf32> -> vector<2x128xf32>
    %457 = arith.addf %454, %456 : vector<2x128xf32>
    %458 = vector.broadcast %182 : vector<1x128xf32> to vector<2x128xf32>
    %459 = arith.addf %457, %458 : vector<2x128xf32>
    %460 = arith.negf %459 : vector<2x128xf32>
    %461 = math.exp %460 : vector<2x128xf32>
    %cst_131 = arith.constant 1.000000e+00 : f32
    %462 = vector.broadcast %cst_131 : f32 to vector<2x128xf32>
    %463 = arith.addf %462, %461 : vector<2x128xf32>
    %464 = arith.divf %462, %463 : vector<2x128xf32>
    %465 = math.tanh %459 : vector<2x128xf32>
    %466 = vector.extract_strided_slice %464 {offsets = [0, 32], sizes = [2, 32], strides = [1, 1]} : vector<2x128xf32> to vector<2x32xf32>
    %467 = arith.mulf %466, %430 : vector<2x32xf32>
    %468 = vector.extract_strided_slice %464 {offsets = [0, 0], sizes = [2, 32], strides = [1, 1]} : vector<2x128xf32> to vector<2x32xf32>
    %469 = vector.extract_strided_slice %465 {offsets = [0, 64], sizes = [2, 32], strides = [1, 1]} : vector<2x128xf32> to vector<2x32xf32>
    %470 = arith.mulf %468, %469 : vector<2x32xf32>
    %471 = arith.addf %467, %470 : vector<2x32xf32>
    %472 = vector.extract_strided_slice %464 {offsets = [0, 96], sizes = [2, 32], strides = [1, 1]} : vector<2x128xf32> to vector<2x32xf32>
    %473 = math.tanh %471 : vector<2x32xf32>
    %474 = arith.mulf %472, %473 : vector<2x32xf32>
    %475 = vector.extract_strided_slice %186 {offsets = [14, 0], sizes = [2, 128], strides = [1, 1]} : vector<32x128xf32> to vector<2x128xf32>
    %476 = arith.truncf %452 : vector<2x32xf32> to vector<2x32xbf16>
    %cst_132 = arith.constant dense<0.000000e+00> : vector<2x128xf32>
    %477 = tpu.matmul %476, %178, %cst_132 {dimension_numbers = #tpu.dot_dimension_numbers<[1], [0], [0], [1], [0, 0, 1, 1], [], []>} : vector<2x32xbf16>, vector<32x128xbf16>, vector<2x128xf32> -> vector<2x128xf32>
    %478 = arith.addf %475, %477 : vector<2x128xf32>
    %479 = arith.negf %478 : vector<2x128xf32>
    %480 = math.exp %479 : vector<2x128xf32>
    %cst_133 = arith.constant 1.000000e+00 : f32
    %481 = vector.broadcast %cst_133 : f32 to vector<2x128xf32>
    %482 = arith.addf %481, %480 : vector<2x128xf32>
    %483 = arith.divf %481, %482 : vector<2x128xf32>
    %484 = math.tanh %478 : vector<2x128xf32>
    %485 = vector.extract_strided_slice %483 {offsets = [0, 32], sizes = [2, 32], strides = [1, 1]} : vector<2x128xf32> to vector<2x32xf32>
    %486 = arith.mulf %485, %449 : vector<2x32xf32>
    %487 = vector.extract_strided_slice %483 {offsets = [0, 0], sizes = [2, 32], strides = [1, 1]} : vector<2x128xf32> to vector<2x32xf32>
    %488 = vector.extract_strided_slice %484 {offsets = [0, 64], sizes = [2, 32], strides = [1, 1]} : vector<2x128xf32> to vector<2x32xf32>
    %489 = arith.mulf %487, %488 : vector<2x32xf32>
    %490 = arith.addf %486, %489 : vector<2x32xf32>
    %491 = vector.extract_strided_slice %483 {offsets = [0, 96], sizes = [2, 32], strides = [1, 1]} : vector<2x128xf32> to vector<2x32xf32>
    %492 = math.tanh %490 : vector<2x32xf32>
    %493 = arith.mulf %491, %492 : vector<2x32xf32>
    %494 = arith.truncf %493 : vector<2x32xf32> to vector<2x32xbf16>
    %cst_134 = arith.constant dense<0.000000e+00> : vector<2x128xf32>
    %495 = tpu.matmul %494, %179, %cst_134 {dimension_numbers = #tpu.dot_dimension_numbers<[1], [0], [0], [1], [0, 0, 1, 1], [], []>} : vector<2x32xbf16>, vector<32x128xbf16>, vector<2x128xf32> -> vector<2x128xf32>
    %496 = arith.truncf %474 : vector<2x32xf32> to vector<2x32xbf16>
    %cst_135 = arith.constant dense<0.000000e+00> : vector<2x128xf32>
    %497 = tpu.matmul %496, %180, %cst_135 {dimension_numbers = #tpu.dot_dimension_numbers<[1], [0], [0], [1], [0, 0, 1, 1], [], []>} : vector<2x32xbf16>, vector<32x128xbf16>, vector<2x128xf32> -> vector<2x128xf32>
    %498 = arith.addf %495, %497 : vector<2x128xf32>
    %499 = vector.broadcast %182 : vector<1x128xf32> to vector<2x128xf32>
    %500 = arith.addf %498, %499 : vector<2x128xf32>
    %501 = arith.negf %500 : vector<2x128xf32>
    %502 = math.exp %501 : vector<2x128xf32>
    %cst_136 = arith.constant 1.000000e+00 : f32
    %503 = vector.broadcast %cst_136 : f32 to vector<2x128xf32>
    %504 = arith.addf %503, %502 : vector<2x128xf32>
    %505 = arith.divf %503, %504 : vector<2x128xf32>
    %506 = math.tanh %500 : vector<2x128xf32>
    %507 = vector.extract_strided_slice %505 {offsets = [0, 32], sizes = [2, 32], strides = [1, 1]} : vector<2x128xf32> to vector<2x32xf32>
    %508 = arith.mulf %507, %471 : vector<2x32xf32>
    %509 = vector.extract_strided_slice %505 {offsets = [0, 0], sizes = [2, 32], strides = [1, 1]} : vector<2x128xf32> to vector<2x32xf32>
    %510 = vector.extract_strided_slice %506 {offsets = [0, 64], sizes = [2, 32], strides = [1, 1]} : vector<2x128xf32> to vector<2x32xf32>
    %511 = arith.mulf %509, %510 : vector<2x32xf32>
    %512 = arith.addf %508, %511 : vector<2x32xf32>
    %513 = vector.extract_strided_slice %505 {offsets = [0, 96], sizes = [2, 32], strides = [1, 1]} : vector<2x128xf32> to vector<2x32xf32>
    %514 = math.tanh %512 : vector<2x32xf32>
    %515 = arith.mulf %513, %514 : vector<2x32xf32>
    %516 = vector.extract_strided_slice %186 {offsets = [16, 0], sizes = [2, 128], strides = [1, 1]} : vector<32x128xf32> to vector<2x128xf32>
    %517 = arith.truncf %493 : vector<2x32xf32> to vector<2x32xbf16>
    %cst_137 = arith.constant dense<0.000000e+00> : vector<2x128xf32>
    %518 = tpu.matmul %517, %178, %cst_137 {dimension_numbers = #tpu.dot_dimension_numbers<[1], [0], [0], [1], [0, 0, 1, 1], [], []>} : vector<2x32xbf16>, vector<32x128xbf16>, vector<2x128xf32> -> vector<2x128xf32>
    %519 = arith.addf %516, %518 : vector<2x128xf32>
    %520 = arith.negf %519 : vector<2x128xf32>
    %521 = math.exp %520 : vector<2x128xf32>
    %cst_138 = arith.constant 1.000000e+00 : f32
    %522 = vector.broadcast %cst_138 : f32 to vector<2x128xf32>
    %523 = arith.addf %522, %521 : vector<2x128xf32>
    %524 = arith.divf %522, %523 : vector<2x128xf32>
    %525 = math.tanh %519 : vector<2x128xf32>
    %526 = vector.extract_strided_slice %524 {offsets = [0, 32], sizes = [2, 32], strides = [1, 1]} : vector<2x128xf32> to vector<2x32xf32>
    %527 = arith.mulf %526, %490 : vector<2x32xf32>
    %528 = vector.extract_strided_slice %524 {offsets = [0, 0], sizes = [2, 32], strides = [1, 1]} : vector<2x128xf32> to vector<2x32xf32>
    %529 = vector.extract_strided_slice %525 {offsets = [0, 64], sizes = [2, 32], strides = [1, 1]} : vector<2x128xf32> to vector<2x32xf32>
    %530 = arith.mulf %528, %529 : vector<2x32xf32>
    %531 = arith.addf %527, %530 : vector<2x32xf32>
    %532 = vector.extract_strided_slice %524 {offsets = [0, 96], sizes = [2, 32], strides = [1, 1]} : vector<2x128xf32> to vector<2x32xf32>
    %533 = math.tanh %531 : vector<2x32xf32>
    %534 = arith.mulf %532, %533 : vector<2x32xf32>
    %535 = arith.truncf %534 : vector<2x32xf32> to vector<2x32xbf16>
    %cst_139 = arith.constant dense<0.000000e+00> : vector<2x128xf32>
    %536 = tpu.matmul %535, %179, %cst_139 {dimension_numbers = #tpu.dot_dimension_numbers<[1], [0], [0], [1], [0, 0, 1, 1], [], []>} : vector<2x32xbf16>, vector<32x128xbf16>, vector<2x128xf32> -> vector<2x128xf32>
    %537 = arith.truncf %515 : vector<2x32xf32> to vector<2x32xbf16>
    %cst_140 = arith.constant dense<0.000000e+00> : vector<2x128xf32>
    %538 = tpu.matmul %537, %180, %cst_140 {dimension_numbers = #tpu.dot_dimension_numbers<[1], [0], [0], [1], [0, 0, 1, 1], [], []>} : vector<2x32xbf16>, vector<32x128xbf16>, vector<2x128xf32> -> vector<2x128xf32>
    %539 = arith.addf %536, %538 : vector<2x128xf32>
    %540 = vector.broadcast %182 : vector<1x128xf32> to vector<2x128xf32>
    %541 = arith.addf %539, %540 : vector<2x128xf32>
    %542 = arith.negf %541 : vector<2x128xf32>
    %543 = math.exp %542 : vector<2x128xf32>
    %cst_141 = arith.constant 1.000000e+00 : f32
    %544 = vector.broadcast %cst_141 : f32 to vector<2x128xf32>
    %545 = arith.addf %544, %543 : vector<2x128xf32>
    %546 = arith.divf %544, %545 : vector<2x128xf32>
    %547 = math.tanh %541 : vector<2x128xf32>
    %548 = vector.extract_strided_slice %546 {offsets = [0, 32], sizes = [2, 32], strides = [1, 1]} : vector<2x128xf32> to vector<2x32xf32>
    %549 = arith.mulf %548, %512 : vector<2x32xf32>
    %550 = vector.extract_strided_slice %546 {offsets = [0, 0], sizes = [2, 32], strides = [1, 1]} : vector<2x128xf32> to vector<2x32xf32>
    %551 = vector.extract_strided_slice %547 {offsets = [0, 64], sizes = [2, 32], strides = [1, 1]} : vector<2x128xf32> to vector<2x32xf32>
    %552 = arith.mulf %550, %551 : vector<2x32xf32>
    %553 = arith.addf %549, %552 : vector<2x32xf32>
    %554 = vector.extract_strided_slice %546 {offsets = [0, 96], sizes = [2, 32], strides = [1, 1]} : vector<2x128xf32> to vector<2x32xf32>
    %555 = math.tanh %553 : vector<2x32xf32>
    %556 = arith.mulf %554, %555 : vector<2x32xf32>
    %557 = vector.extract_strided_slice %186 {offsets = [18, 0], sizes = [2, 128], strides = [1, 1]} : vector<32x128xf32> to vector<2x128xf32>
    %558 = arith.truncf %534 : vector<2x32xf32> to vector<2x32xbf16>
    %cst_142 = arith.constant dense<0.000000e+00> : vector<2x128xf32>
    %559 = tpu.matmul %558, %178, %cst_142 {dimension_numbers = #tpu.dot_dimension_numbers<[1], [0], [0], [1], [0, 0, 1, 1], [], []>} : vector<2x32xbf16>, vector<32x128xbf16>, vector<2x128xf32> -> vector<2x128xf32>
    %560 = arith.addf %557, %559 : vector<2x128xf32>
    %561 = arith.negf %560 : vector<2x128xf32>
    %562 = math.exp %561 : vector<2x128xf32>
    %cst_143 = arith.constant 1.000000e+00 : f32
    %563 = vector.broadcast %cst_143 : f32 to vector<2x128xf32>
    %564 = arith.addf %563, %562 : vector<2x128xf32>
    %565 = arith.divf %563, %564 : vector<2x128xf32>
    %566 = math.tanh %560 : vector<2x128xf32>
    %567 = vector.extract_strided_slice %565 {offsets = [0, 32], sizes = [2, 32], strides = [1, 1]} : vector<2x128xf32> to vector<2x32xf32>
    %568 = arith.mulf %567, %531 : vector<2x32xf32>
    %569 = vector.extract_strided_slice %565 {offsets = [0, 0], sizes = [2, 32], strides = [1, 1]} : vector<2x128xf32> to vector<2x32xf32>
    %570 = vector.extract_strided_slice %566 {offsets = [0, 64], sizes = [2, 32], strides = [1, 1]} : vector<2x128xf32> to vector<2x32xf32>
    %571 = arith.mulf %569, %570 : vector<2x32xf32>
    %572 = arith.addf %568, %571 : vector<2x32xf32>
    %573 = vector.extract_strided_slice %565 {offsets = [0, 96], sizes = [2, 32], strides = [1, 1]} : vector<2x128xf32> to vector<2x32xf32>
    %574 = math.tanh %572 : vector<2x32xf32>
    %575 = arith.mulf %573, %574 : vector<2x32xf32>
    %576 = arith.truncf %575 : vector<2x32xf32> to vector<2x32xbf16>
    %cst_144 = arith.constant dense<0.000000e+00> : vector<2x128xf32>
    %577 = tpu.matmul %576, %179, %cst_144 {dimension_numbers = #tpu.dot_dimension_numbers<[1], [0], [0], [1], [0, 0, 1, 1], [], []>} : vector<2x32xbf16>, vector<32x128xbf16>, vector<2x128xf32> -> vector<2x128xf32>
    %578 = arith.truncf %556 : vector<2x32xf32> to vector<2x32xbf16>
    %cst_145 = arith.constant dense<0.000000e+00> : vector<2x128xf32>
    %579 = tpu.matmul %578, %180, %cst_145 {dimension_numbers = #tpu.dot_dimension_numbers<[1], [0], [0], [1], [0, 0, 1, 1], [], []>} : vector<2x32xbf16>, vector<32x128xbf16>, vector<2x128xf32> -> vector<2x128xf32>
    %580 = arith.addf %577, %579 : vector<2x128xf32>
    %581 = vector.broadcast %182 : vector<1x128xf32> to vector<2x128xf32>
    %582 = arith.addf %580, %581 : vector<2x128xf32>
    %583 = arith.negf %582 : vector<2x128xf32>
    %584 = math.exp %583 : vector<2x128xf32>
    %cst_146 = arith.constant 1.000000e+00 : f32
    %585 = vector.broadcast %cst_146 : f32 to vector<2x128xf32>
    %586 = arith.addf %585, %584 : vector<2x128xf32>
    %587 = arith.divf %585, %586 : vector<2x128xf32>
    %588 = math.tanh %582 : vector<2x128xf32>
    %589 = vector.extract_strided_slice %587 {offsets = [0, 32], sizes = [2, 32], strides = [1, 1]} : vector<2x128xf32> to vector<2x32xf32>
    %590 = arith.mulf %589, %553 : vector<2x32xf32>
    %591 = vector.extract_strided_slice %587 {offsets = [0, 0], sizes = [2, 32], strides = [1, 1]} : vector<2x128xf32> to vector<2x32xf32>
    %592 = vector.extract_strided_slice %588 {offsets = [0, 64], sizes = [2, 32], strides = [1, 1]} : vector<2x128xf32> to vector<2x32xf32>
    %593 = arith.mulf %591, %592 : vector<2x32xf32>
    %594 = arith.addf %590, %593 : vector<2x32xf32>
    %595 = vector.extract_strided_slice %587 {offsets = [0, 96], sizes = [2, 32], strides = [1, 1]} : vector<2x128xf32> to vector<2x32xf32>
    %596 = math.tanh %594 : vector<2x32xf32>
    %597 = arith.mulf %595, %596 : vector<2x32xf32>
    %598 = vector.extract_strided_slice %186 {offsets = [20, 0], sizes = [2, 128], strides = [1, 1]} : vector<32x128xf32> to vector<2x128xf32>
    %599 = arith.truncf %575 : vector<2x32xf32> to vector<2x32xbf16>
    %cst_147 = arith.constant dense<0.000000e+00> : vector<2x128xf32>
    %600 = tpu.matmul %599, %178, %cst_147 {dimension_numbers = #tpu.dot_dimension_numbers<[1], [0], [0], [1], [0, 0, 1, 1], [], []>} : vector<2x32xbf16>, vector<32x128xbf16>, vector<2x128xf32> -> vector<2x128xf32>
    %601 = arith.addf %598, %600 : vector<2x128xf32>
    %602 = arith.negf %601 : vector<2x128xf32>
    %603 = math.exp %602 : vector<2x128xf32>
    %cst_148 = arith.constant 1.000000e+00 : f32
    %604 = vector.broadcast %cst_148 : f32 to vector<2x128xf32>
    %605 = arith.addf %604, %603 : vector<2x128xf32>
    %606 = arith.divf %604, %605 : vector<2x128xf32>
    %607 = math.tanh %601 : vector<2x128xf32>
    %608 = vector.extract_strided_slice %606 {offsets = [0, 32], sizes = [2, 32], strides = [1, 1]} : vector<2x128xf32> to vector<2x32xf32>
    %609 = arith.mulf %608, %572 : vector<2x32xf32>
    %610 = vector.extract_strided_slice %606 {offsets = [0, 0], sizes = [2, 32], strides = [1, 1]} : vector<2x128xf32> to vector<2x32xf32>
    %611 = vector.extract_strided_slice %607 {offsets = [0, 64], sizes = [2, 32], strides = [1, 1]} : vector<2x128xf32> to vector<2x32xf32>
    %612 = arith.mulf %610, %611 : vector<2x32xf32>
    %613 = arith.addf %609, %612 : vector<2x32xf32>
    %614 = vector.extract_strided_slice %606 {offsets = [0, 96], sizes = [2, 32], strides = [1, 1]} : vector<2x128xf32> to vector<2x32xf32>
    %615 = math.tanh %613 : vector<2x32xf32>
    %616 = arith.mulf %614, %615 : vector<2x32xf32>
    %617 = arith.truncf %616 : vector<2x32xf32> to vector<2x32xbf16>
    %cst_149 = arith.constant dense<0.000000e+00> : vector<2x128xf32>
    %618 = tpu.matmul %617, %179, %cst_149 {dimension_numbers = #tpu.dot_dimension_numbers<[1], [0], [0], [1], [0, 0, 1, 1], [], []>} : vector<2x32xbf16>, vector<32x128xbf16>, vector<2x128xf32> -> vector<2x128xf32>
    %619 = arith.truncf %597 : vector<2x32xf32> to vector<2x32xbf16>
    %cst_150 = arith.constant dense<0.000000e+00> : vector<2x128xf32>
    %620 = tpu.matmul %619, %180, %cst_150 {dimension_numbers = #tpu.dot_dimension_numbers<[1], [0], [0], [1], [0, 0, 1, 1], [], []>} : vector<2x32xbf16>, vector<32x128xbf16>, vector<2x128xf32> -> vector<2x128xf32>
    %621 = arith.addf %618, %620 : vector<2x128xf32>
    %622 = vector.broadcast %182 : vector<1x128xf32> to vector<2x128xf32>
    %623 = arith.addf %621, %622 : vector<2x128xf32>
    %624 = arith.negf %623 : vector<2x128xf32>
    %625 = math.exp %624 : vector<2x128xf32>
    %cst_151 = arith.constant 1.000000e+00 : f32
    %626 = vector.broadcast %cst_151 : f32 to vector<2x128xf32>
    %627 = arith.addf %626, %625 : vector<2x128xf32>
    %628 = arith.divf %626, %627 : vector<2x128xf32>
    %629 = math.tanh %623 : vector<2x128xf32>
    %630 = vector.extract_strided_slice %628 {offsets = [0, 32], sizes = [2, 32], strides = [1, 1]} : vector<2x128xf32> to vector<2x32xf32>
    %631 = arith.mulf %630, %594 : vector<2x32xf32>
    %632 = vector.extract_strided_slice %628 {offsets = [0, 0], sizes = [2, 32], strides = [1, 1]} : vector<2x128xf32> to vector<2x32xf32>
    %633 = vector.extract_strided_slice %629 {offsets = [0, 64], sizes = [2, 32], strides = [1, 1]} : vector<2x128xf32> to vector<2x32xf32>
    %634 = arith.mulf %632, %633 : vector<2x32xf32>
    %635 = arith.addf %631, %634 : vector<2x32xf32>
    %636 = vector.extract_strided_slice %628 {offsets = [0, 96], sizes = [2, 32], strides = [1, 1]} : vector<2x128xf32> to vector<2x32xf32>
    %637 = math.tanh %635 : vector<2x32xf32>
    %638 = arith.mulf %636, %637 : vector<2x32xf32>
    %639 = vector.extract_strided_slice %186 {offsets = [22, 0], sizes = [2, 128], strides = [1, 1]} : vector<32x128xf32> to vector<2x128xf32>
    %640 = arith.truncf %616 : vector<2x32xf32> to vector<2x32xbf16>
    %cst_152 = arith.constant dense<0.000000e+00> : vector<2x128xf32>
    %641 = tpu.matmul %640, %178, %cst_152 {dimension_numbers = #tpu.dot_dimension_numbers<[1], [0], [0], [1], [0, 0, 1, 1], [], []>} : vector<2x32xbf16>, vector<32x128xbf16>, vector<2x128xf32> -> vector<2x128xf32>
    %642 = arith.addf %639, %641 : vector<2x128xf32>
    %643 = arith.negf %642 : vector<2x128xf32>
    %644 = math.exp %643 : vector<2x128xf32>
    %cst_153 = arith.constant 1.000000e+00 : f32
    %645 = vector.broadcast %cst_153 : f32 to vector<2x128xf32>
    %646 = arith.addf %645, %644 : vector<2x128xf32>
    %647 = arith.divf %645, %646 : vector<2x128xf32>
    %648 = math.tanh %642 : vector<2x128xf32>
    %649 = vector.extract_strided_slice %647 {offsets = [0, 32], sizes = [2, 32], strides = [1, 1]} : vector<2x128xf32> to vector<2x32xf32>
    %650 = arith.mulf %649, %613 : vector<2x32xf32>
    %651 = vector.extract_strided_slice %647 {offsets = [0, 0], sizes = [2, 32], strides = [1, 1]} : vector<2x128xf32> to vector<2x32xf32>
    %652 = vector.extract_strided_slice %648 {offsets = [0, 64], sizes = [2, 32], strides = [1, 1]} : vector<2x128xf32> to vector<2x32xf32>
    %653 = arith.mulf %651, %652 : vector<2x32xf32>
    %654 = arith.addf %650, %653 : vector<2x32xf32>
    %655 = vector.extract_strided_slice %647 {offsets = [0, 96], sizes = [2, 32], strides = [1, 1]} : vector<2x128xf32> to vector<2x32xf32>
    %656 = math.tanh %654 : vector<2x32xf32>
    %657 = arith.mulf %655, %656 : vector<2x32xf32>
    %658 = arith.truncf %657 : vector<2x32xf32> to vector<2x32xbf16>
    %cst_154 = arith.constant dense<0.000000e+00> : vector<2x128xf32>
    %659 = tpu.matmul %658, %179, %cst_154 {dimension_numbers = #tpu.dot_dimension_numbers<[1], [0], [0], [1], [0, 0, 1, 1], [], []>} : vector<2x32xbf16>, vector<32x128xbf16>, vector<2x128xf32> -> vector<2x128xf32>
    %660 = arith.truncf %638 : vector<2x32xf32> to vector<2x32xbf16>
    %cst_155 = arith.constant dense<0.000000e+00> : vector<2x128xf32>
    %661 = tpu.matmul %660, %180, %cst_155 {dimension_numbers = #tpu.dot_dimension_numbers<[1], [0], [0], [1], [0, 0, 1, 1], [], []>} : vector<2x32xbf16>, vector<32x128xbf16>, vector<2x128xf32> -> vector<2x128xf32>
    %662 = arith.addf %659, %661 : vector<2x128xf32>
    %663 = vector.broadcast %182 : vector<1x128xf32> to vector<2x128xf32>
    %664 = arith.addf %662, %663 : vector<2x128xf32>
    %665 = arith.negf %664 : vector<2x128xf32>
    %666 = math.exp %665 : vector<2x128xf32>
    %cst_156 = arith.constant 1.000000e+00 : f32
    %667 = vector.broadcast %cst_156 : f32 to vector<2x128xf32>
    %668 = arith.addf %667, %666 : vector<2x128xf32>
    %669 = arith.divf %667, %668 : vector<2x128xf32>
    %670 = math.tanh %664 : vector<2x128xf32>
    %671 = vector.extract_strided_slice %669 {offsets = [0, 32], sizes = [2, 32], strides = [1, 1]} : vector<2x128xf32> to vector<2x32xf32>
    %672 = arith.mulf %671, %635 : vector<2x32xf32>
    %673 = vector.extract_strided_slice %669 {offsets = [0, 0], sizes = [2, 32], strides = [1, 1]} : vector<2x128xf32> to vector<2x32xf32>
    %674 = vector.extract_strided_slice %670 {offsets = [0, 64], sizes = [2, 32], strides = [1, 1]} : vector<2x128xf32> to vector<2x32xf32>
    %675 = arith.mulf %673, %674 : vector<2x32xf32>
    %676 = arith.addf %672, %675 : vector<2x32xf32>
    %677 = vector.extract_strided_slice %669 {offsets = [0, 96], sizes = [2, 32], strides = [1, 1]} : vector<2x128xf32> to vector<2x32xf32>
    %678 = math.tanh %676 : vector<2x32xf32>
    %679 = arith.mulf %677, %678 : vector<2x32xf32>
    %680 = vector.extract_strided_slice %186 {offsets = [24, 0], sizes = [2, 128], strides = [1, 1]} : vector<32x128xf32> to vector<2x128xf32>
    %681 = arith.truncf %657 : vector<2x32xf32> to vector<2x32xbf16>
    %cst_157 = arith.constant dense<0.000000e+00> : vector<2x128xf32>
    %682 = tpu.matmul %681, %178, %cst_157 {dimension_numbers = #tpu.dot_dimension_numbers<[1], [0], [0], [1], [0, 0, 1, 1], [], []>} : vector<2x32xbf16>, vector<32x128xbf16>, vector<2x128xf32> -> vector<2x128xf32>
    %683 = arith.addf %680, %682 : vector<2x128xf32>
    %684 = arith.negf %683 : vector<2x128xf32>
    %685 = math.exp %684 : vector<2x128xf32>
    %cst_158 = arith.constant 1.000000e+00 : f32
    %686 = vector.broadcast %cst_158 : f32 to vector<2x128xf32>
    %687 = arith.addf %686, %685 : vector<2x128xf32>
    %688 = arith.divf %686, %687 : vector<2x128xf32>
    %689 = math.tanh %683 : vector<2x128xf32>
    %690 = vector.extract_strided_slice %688 {offsets = [0, 32], sizes = [2, 32], strides = [1, 1]} : vector<2x128xf32> to vector<2x32xf32>
    %691 = arith.mulf %690, %654 : vector<2x32xf32>
    %692 = vector.extract_strided_slice %688 {offsets = [0, 0], sizes = [2, 32], strides = [1, 1]} : vector<2x128xf32> to vector<2x32xf32>
    %693 = vector.extract_strided_slice %689 {offsets = [0, 64], sizes = [2, 32], strides = [1, 1]} : vector<2x128xf32> to vector<2x32xf32>
    %694 = arith.mulf %692, %693 : vector<2x32xf32>
    %695 = arith.addf %691, %694 : vector<2x32xf32>
    %696 = vector.extract_strided_slice %688 {offsets = [0, 96], sizes = [2, 32], strides = [1, 1]} : vector<2x128xf32> to vector<2x32xf32>
    %697 = math.tanh %695 : vector<2x32xf32>
    %698 = arith.mulf %696, %697 : vector<2x32xf32>
    %699 = arith.truncf %698 : vector<2x32xf32> to vector<2x32xbf16>
    %cst_159 = arith.constant dense<0.000000e+00> : vector<2x128xf32>
    %700 = tpu.matmul %699, %179, %cst_159 {dimension_numbers = #tpu.dot_dimension_numbers<[1], [0], [0], [1], [0, 0, 1, 1], [], []>} : vector<2x32xbf16>, vector<32x128xbf16>, vector<2x128xf32> -> vector<2x128xf32>
    %701 = arith.truncf %679 : vector<2x32xf32> to vector<2x32xbf16>
    %cst_160 = arith.constant dense<0.000000e+00> : vector<2x128xf32>
    %702 = tpu.matmul %701, %180, %cst_160 {dimension_numbers = #tpu.dot_dimension_numbers<[1], [0], [0], [1], [0, 0, 1, 1], [], []>} : vector<2x32xbf16>, vector<32x128xbf16>, vector<2x128xf32> -> vector<2x128xf32>
    %703 = arith.addf %700, %702 : vector<2x128xf32>
    %704 = vector.broadcast %182 : vector<1x128xf32> to vector<2x128xf32>
    %705 = arith.addf %703, %704 : vector<2x128xf32>
    %706 = arith.negf %705 : vector<2x128xf32>
    %707 = math.exp %706 : vector<2x128xf32>
    %cst_161 = arith.constant 1.000000e+00 : f32
    %708 = vector.broadcast %cst_161 : f32 to vector<2x128xf32>
    %709 = arith.addf %708, %707 : vector<2x128xf32>
    %710 = arith.divf %708, %709 : vector<2x128xf32>
    %711 = math.tanh %705 : vector<2x128xf32>
    %712 = vector.extract_strided_slice %710 {offsets = [0, 32], sizes = [2, 32], strides = [1, 1]} : vector<2x128xf32> to vector<2x32xf32>
    %713 = arith.mulf %712, %676 : vector<2x32xf32>
    %714 = vector.extract_strided_slice %710 {offsets = [0, 0], sizes = [2, 32], strides = [1, 1]} : vector<2x128xf32> to vector<2x32xf32>
    %715 = vector.extract_strided_slice %711 {offsets = [0, 64], sizes = [2, 32], strides = [1, 1]} : vector<2x128xf32> to vector<2x32xf32>
    %716 = arith.mulf %714, %715 : vector<2x32xf32>
    %717 = arith.addf %713, %716 : vector<2x32xf32>
    %718 = vector.extract_strided_slice %710 {offsets = [0, 96], sizes = [2, 32], strides = [1, 1]} : vector<2x128xf32> to vector<2x32xf32>
    %719 = math.tanh %717 : vector<2x32xf32>
    %720 = arith.mulf %718, %719 : vector<2x32xf32>
    %721 = vector.extract_strided_slice %186 {offsets = [26, 0], sizes = [2, 128], strides = [1, 1]} : vector<32x128xf32> to vector<2x128xf32>
    %722 = arith.truncf %698 : vector<2x32xf32> to vector<2x32xbf16>
    %cst_162 = arith.constant dense<0.000000e+00> : vector<2x128xf32>
    %723 = tpu.matmul %722, %178, %cst_162 {dimension_numbers = #tpu.dot_dimension_numbers<[1], [0], [0], [1], [0, 0, 1, 1], [], []>} : vector<2x32xbf16>, vector<32x128xbf16>, vector<2x128xf32> -> vector<2x128xf32>
    %724 = arith.addf %721, %723 : vector<2x128xf32>
    %725 = arith.negf %724 : vector<2x128xf32>
    %726 = math.exp %725 : vector<2x128xf32>
    %cst_163 = arith.constant 1.000000e+00 : f32
    %727 = vector.broadcast %cst_163 : f32 to vector<2x128xf32>
    %728 = arith.addf %727, %726 : vector<2x128xf32>
    %729 = arith.divf %727, %728 : vector<2x128xf32>
    %730 = math.tanh %724 : vector<2x128xf32>
    %731 = vector.extract_strided_slice %729 {offsets = [0, 32], sizes = [2, 32], strides = [1, 1]} : vector<2x128xf32> to vector<2x32xf32>
    %732 = arith.mulf %731, %695 : vector<2x32xf32>
    %733 = vector.extract_strided_slice %729 {offsets = [0, 0], sizes = [2, 32], strides = [1, 1]} : vector<2x128xf32> to vector<2x32xf32>
    %734 = vector.extract_strided_slice %730 {offsets = [0, 64], sizes = [2, 32], strides = [1, 1]} : vector<2x128xf32> to vector<2x32xf32>
    %735 = arith.mulf %733, %734 : vector<2x32xf32>
    %736 = arith.addf %732, %735 : vector<2x32xf32>
    %737 = vector.extract_strided_slice %729 {offsets = [0, 96], sizes = [2, 32], strides = [1, 1]} : vector<2x128xf32> to vector<2x32xf32>
    %738 = math.tanh %736 : vector<2x32xf32>
    %739 = arith.mulf %737, %738 : vector<2x32xf32>
    %740 = arith.truncf %739 : vector<2x32xf32> to vector<2x32xbf16>
    %cst_164 = arith.constant dense<0.000000e+00> : vector<2x128xf32>
    %741 = tpu.matmul %740, %179, %cst_164 {dimension_numbers = #tpu.dot_dimension_numbers<[1], [0], [0], [1], [0, 0, 1, 1], [], []>} : vector<2x32xbf16>, vector<32x128xbf16>, vector<2x128xf32> -> vector<2x128xf32>
    %742 = arith.truncf %720 : vector<2x32xf32> to vector<2x32xbf16>
    %cst_165 = arith.constant dense<0.000000e+00> : vector<2x128xf32>
    %743 = tpu.matmul %742, %180, %cst_165 {dimension_numbers = #tpu.dot_dimension_numbers<[1], [0], [0], [1], [0, 0, 1, 1], [], []>} : vector<2x32xbf16>, vector<32x128xbf16>, vector<2x128xf32> -> vector<2x128xf32>
    %744 = arith.addf %741, %743 : vector<2x128xf32>
    %745 = vector.broadcast %182 : vector<1x128xf32> to vector<2x128xf32>
    %746 = arith.addf %744, %745 : vector<2x128xf32>
    %747 = arith.negf %746 : vector<2x128xf32>
    %748 = math.exp %747 : vector<2x128xf32>
    %cst_166 = arith.constant 1.000000e+00 : f32
    %749 = vector.broadcast %cst_166 : f32 to vector<2x128xf32>
    %750 = arith.addf %749, %748 : vector<2x128xf32>
    %751 = arith.divf %749, %750 : vector<2x128xf32>
    %752 = math.tanh %746 : vector<2x128xf32>
    %753 = vector.extract_strided_slice %751 {offsets = [0, 32], sizes = [2, 32], strides = [1, 1]} : vector<2x128xf32> to vector<2x32xf32>
    %754 = arith.mulf %753, %717 : vector<2x32xf32>
    %755 = vector.extract_strided_slice %751 {offsets = [0, 0], sizes = [2, 32], strides = [1, 1]} : vector<2x128xf32> to vector<2x32xf32>
    %756 = vector.extract_strided_slice %752 {offsets = [0, 64], sizes = [2, 32], strides = [1, 1]} : vector<2x128xf32> to vector<2x32xf32>
    %757 = arith.mulf %755, %756 : vector<2x32xf32>
    %758 = arith.addf %754, %757 : vector<2x32xf32>
    %759 = vector.extract_strided_slice %751 {offsets = [0, 96], sizes = [2, 32], strides = [1, 1]} : vector<2x128xf32> to vector<2x32xf32>
    %760 = math.tanh %758 : vector<2x32xf32>
    %761 = arith.mulf %759, %760 : vector<2x32xf32>
    %762 = vector.extract_strided_slice %186 {offsets = [28, 0], sizes = [2, 128], strides = [1, 1]} : vector<32x128xf32> to vector<2x128xf32>
    %763 = arith.truncf %739 : vector<2x32xf32> to vector<2x32xbf16>
    %cst_167 = arith.constant dense<0.000000e+00> : vector<2x128xf32>
    %764 = tpu.matmul %763, %178, %cst_167 {dimension_numbers = #tpu.dot_dimension_numbers<[1], [0], [0], [1], [0, 0, 1, 1], [], []>} : vector<2x32xbf16>, vector<32x128xbf16>, vector<2x128xf32> -> vector<2x128xf32>
    %765 = arith.addf %762, %764 : vector<2x128xf32>
    %766 = arith.negf %765 : vector<2x128xf32>
    %767 = math.exp %766 : vector<2x128xf32>
    %cst_168 = arith.constant 1.000000e+00 : f32
    %768 = vector.broadcast %cst_168 : f32 to vector<2x128xf32>
    %769 = arith.addf %768, %767 : vector<2x128xf32>
    %770 = arith.divf %768, %769 : vector<2x128xf32>
    %771 = math.tanh %765 : vector<2x128xf32>
    %772 = vector.extract_strided_slice %770 {offsets = [0, 32], sizes = [2, 32], strides = [1, 1]} : vector<2x128xf32> to vector<2x32xf32>
    %773 = arith.mulf %772, %736 : vector<2x32xf32>
    %774 = vector.extract_strided_slice %770 {offsets = [0, 0], sizes = [2, 32], strides = [1, 1]} : vector<2x128xf32> to vector<2x32xf32>
    %775 = vector.extract_strided_slice %771 {offsets = [0, 64], sizes = [2, 32], strides = [1, 1]} : vector<2x128xf32> to vector<2x32xf32>
    %776 = arith.mulf %774, %775 : vector<2x32xf32>
    %777 = arith.addf %773, %776 : vector<2x32xf32>
    %778 = vector.extract_strided_slice %770 {offsets = [0, 96], sizes = [2, 32], strides = [1, 1]} : vector<2x128xf32> to vector<2x32xf32>
    %779 = math.tanh %777 : vector<2x32xf32>
    %780 = arith.mulf %778, %779 : vector<2x32xf32>
    %781 = arith.truncf %780 : vector<2x32xf32> to vector<2x32xbf16>
    %cst_169 = arith.constant dense<0.000000e+00> : vector<2x128xf32>
    %782 = tpu.matmul %781, %179, %cst_169 {dimension_numbers = #tpu.dot_dimension_numbers<[1], [0], [0], [1], [0, 0, 1, 1], [], []>} : vector<2x32xbf16>, vector<32x128xbf16>, vector<2x128xf32> -> vector<2x128xf32>
    %783 = arith.truncf %761 : vector<2x32xf32> to vector<2x32xbf16>
    %cst_170 = arith.constant dense<0.000000e+00> : vector<2x128xf32>
    %784 = tpu.matmul %783, %180, %cst_170 {dimension_numbers = #tpu.dot_dimension_numbers<[1], [0], [0], [1], [0, 0, 1, 1], [], []>} : vector<2x32xbf16>, vector<32x128xbf16>, vector<2x128xf32> -> vector<2x128xf32>
    %785 = arith.addf %782, %784 : vector<2x128xf32>
    %786 = vector.broadcast %182 : vector<1x128xf32> to vector<2x128xf32>
    %787 = arith.addf %785, %786 : vector<2x128xf32>
    %788 = arith.negf %787 : vector<2x128xf32>
    %789 = math.exp %788 : vector<2x128xf32>
    %cst_171 = arith.constant 1.000000e+00 : f32
    %790 = vector.broadcast %cst_171 : f32 to vector<2x128xf32>
    %791 = arith.addf %790, %789 : vector<2x128xf32>
    %792 = arith.divf %790, %791 : vector<2x128xf32>
    %793 = math.tanh %787 : vector<2x128xf32>
    %794 = vector.extract_strided_slice %792 {offsets = [0, 32], sizes = [2, 32], strides = [1, 1]} : vector<2x128xf32> to vector<2x32xf32>
    %795 = arith.mulf %794, %758 : vector<2x32xf32>
    %796 = vector.extract_strided_slice %792 {offsets = [0, 0], sizes = [2, 32], strides = [1, 1]} : vector<2x128xf32> to vector<2x32xf32>
    %797 = vector.extract_strided_slice %793 {offsets = [0, 64], sizes = [2, 32], strides = [1, 1]} : vector<2x128xf32> to vector<2x32xf32>
    %798 = arith.mulf %796, %797 : vector<2x32xf32>
    %799 = arith.addf %795, %798 : vector<2x32xf32>
    %800 = vector.extract_strided_slice %792 {offsets = [0, 96], sizes = [2, 32], strides = [1, 1]} : vector<2x128xf32> to vector<2x32xf32>
    %801 = math.tanh %799 : vector<2x32xf32>
    %802 = arith.mulf %800, %801 : vector<2x32xf32>
    %803 = vector.extract_strided_slice %186 {offsets = [30, 0], sizes = [2, 128], strides = [1, 1]} : vector<32x128xf32> to vector<2x128xf32>
    %804 = arith.truncf %780 : vector<2x32xf32> to vector<2x32xbf16>
    %cst_172 = arith.constant dense<0.000000e+00> : vector<2x128xf32>
    %805 = tpu.matmul %804, %178, %cst_172 {dimension_numbers = #tpu.dot_dimension_numbers<[1], [0], [0], [1], [0, 0, 1, 1], [], []>} : vector<2x32xbf16>, vector<32x128xbf16>, vector<2x128xf32> -> vector<2x128xf32>
    %806 = arith.addf %803, %805 : vector<2x128xf32>
    %807 = arith.negf %806 : vector<2x128xf32>
    %808 = math.exp %807 : vector<2x128xf32>
    %cst_173 = arith.constant 1.000000e+00 : f32
    %809 = vector.broadcast %cst_173 : f32 to vector<2x128xf32>
    %810 = arith.addf %809, %808 : vector<2x128xf32>
    %811 = arith.divf %809, %810 : vector<2x128xf32>
    %812 = math.tanh %806 : vector<2x128xf32>
    %813 = vector.extract_strided_slice %811 {offsets = [0, 32], sizes = [2, 32], strides = [1, 1]} : vector<2x128xf32> to vector<2x32xf32>
    %814 = arith.mulf %813, %777 : vector<2x32xf32>
    %815 = vector.extract_strided_slice %811 {offsets = [0, 0], sizes = [2, 32], strides = [1, 1]} : vector<2x128xf32> to vector<2x32xf32>
    %816 = vector.extract_strided_slice %812 {offsets = [0, 64], sizes = [2, 32], strides = [1, 1]} : vector<2x128xf32> to vector<2x32xf32>
    %817 = arith.mulf %815, %816 : vector<2x32xf32>
    %818 = arith.addf %814, %817 : vector<2x32xf32>
    %819 = vector.extract_strided_slice %811 {offsets = [0, 96], sizes = [2, 32], strides = [1, 1]} : vector<2x128xf32> to vector<2x32xf32>
    %820 = math.tanh %818 : vector<2x32xf32>
    %821 = arith.mulf %819, %820 : vector<2x32xf32>
    %822 = arith.truncf %821 : vector<2x32xf32> to vector<2x32xbf16>
    %cst_174 = arith.constant dense<0.000000e+00> : vector<2x128xf32>
    %823 = tpu.matmul %822, %179, %cst_174 {dimension_numbers = #tpu.dot_dimension_numbers<[1], [0], [0], [1], [0, 0, 1, 1], [], []>} : vector<2x32xbf16>, vector<32x128xbf16>, vector<2x128xf32> -> vector<2x128xf32>
    %824 = arith.truncf %802 : vector<2x32xf32> to vector<2x32xbf16>
    %cst_175 = arith.constant dense<0.000000e+00> : vector<2x128xf32>
    %825 = tpu.matmul %824, %180, %cst_175 {dimension_numbers = #tpu.dot_dimension_numbers<[1], [0], [0], [1], [0, 0, 1, 1], [], []>} : vector<2x32xbf16>, vector<32x128xbf16>, vector<2x128xf32> -> vector<2x128xf32>
    %826 = arith.addf %823, %825 : vector<2x128xf32>
    %827 = vector.broadcast %182 : vector<1x128xf32> to vector<2x128xf32>
    %828 = arith.addf %826, %827 : vector<2x128xf32>
    %829 = arith.negf %828 : vector<2x128xf32>
    %830 = math.exp %829 : vector<2x128xf32>
    %cst_176 = arith.constant 1.000000e+00 : f32
    %831 = vector.broadcast %cst_176 : f32 to vector<2x128xf32>
    %832 = arith.addf %831, %830 : vector<2x128xf32>
    %833 = arith.divf %831, %832 : vector<2x128xf32>
    %834 = math.tanh %828 : vector<2x128xf32>
    %835 = vector.extract_strided_slice %833 {offsets = [0, 32], sizes = [2, 32], strides = [1, 1]} : vector<2x128xf32> to vector<2x32xf32>
    %836 = arith.mulf %835, %799 : vector<2x32xf32>
    %837 = vector.extract_strided_slice %833 {offsets = [0, 0], sizes = [2, 32], strides = [1, 1]} : vector<2x128xf32> to vector<2x32xf32>
    %838 = vector.extract_strided_slice %834 {offsets = [0, 64], sizes = [2, 32], strides = [1, 1]} : vector<2x128xf32> to vector<2x32xf32>
    %839 = arith.mulf %837, %838 : vector<2x32xf32>
    %840 = arith.addf %836, %839 : vector<2x32xf32>
    %841 = vector.extract_strided_slice %833 {offsets = [0, 96], sizes = [2, 32], strides = [1, 1]} : vector<2x128xf32> to vector<2x32xf32>
    %842 = math.tanh %840 : vector<2x32xf32>
    %843 = arith.mulf %841, %842 : vector<2x32xf32>
    %844 = tpu.concatenate %228, %269, %310, %351, %392, %433, %474, %515, %556, %597, %638, %679, %720, %761, %802, %843 in 0 : vector<2x32xf32>, vector<2x32xf32>, vector<2x32xf32>, vector<2x32xf32>, vector<2x32xf32>, vector<2x32xf32>, vector<2x32xf32>, vector<2x32xf32>, vector<2x32xf32>, vector<2x32xf32>, vector<2x32xf32>, vector<2x32xf32>, vector<2x32xf32>, vector<2x32xf32>, vector<2x32xf32>, vector<2x32xf32> -> vector<32x32xf32>
    %845 = arith.addf %844, %176 : vector<32x32xf32>
    %cst_177 = arith.constant 0.000000e+00 : f32
    %846 = vector.broadcast %cst_177 : f32 to vector<32x32xf32>
    %847 = arith.cmpf ogt, %845, %846 : vector<32x32xf32>
    %848 = math.exp %845 : vector<32x32xf32>
    %cst_178 = arith.constant 1.000000e+00 : f32
    %849 = vector.broadcast %cst_178 : f32 to vector<32x32xf32>
    %850 = arith.subf %848, %849 : vector<32x32xf32>
    %851 = arith.select %847, %845, %850 : vector<32x32xi1>, vector<32x32xf32>
    %c144 = arith.constant 144 : index
    %c0_179 = arith.constant 0 : index
    %852 = vector.load %arg2[%c144, %c0_179] : memref<176x224xbf16, #tpu.memory_space<vmem>>, vector<32x224xbf16>
    %853 = arith.truncf %851 : vector<32x32xf32> to vector<32x32xbf16>
    %cst_180 = arith.constant dense<0.000000e+00> : vector<32x224xf32>
    %854 = tpu.matmul %853, %852, %cst_180 {dimension_numbers = #tpu.dot_dimension_numbers<[1], [0], [0], [1], [0, 0, 1, 1], [], []>} : vector<32x32xbf16>, vector<32x224xbf16>, vector<32x224xf32> -> vector<32x224xf32>
    %c9 = arith.constant 9 : index
    %c0_181 = arith.constant 0 : index
    %855 = vector.load %arg4[%c9, %c0_181] : memref<56x128xf32, #tpu.memory_space<vmem>>, vector<1x32xf32>
    %856 = arith.truncf %854 : vector<32x224xf32> to vector<32x224xbf16>
    %c1856 = arith.constant 1856 : index
    %c0_182 = arith.constant 0 : index
    %857 = vector.load %arg1[%c1856, %c0_182] : memref<2080x128xbf16, #tpu.memory_space<vmem>>, vector<32x32xbf16>
    %858 = vector.extract_strided_slice %856 {offsets = [0, 0], sizes = [32, 32], strides = [1, 1]} : vector<32x224xbf16> to vector<32x32xbf16>
    %cst_183 = arith.constant dense<0.000000e+00> : vector<32x32xf32>
    %859 = tpu.matmul %857, %858, %cst_183 {dimension_numbers = #tpu.dot_dimension_numbers<[1], [0], [0], [1], [0, 0, 1, 1], [], []>} : vector<32x32xbf16>, vector<32x32xbf16>, vector<32x32xf32> -> vector<32x32xf32>
    %c1888 = arith.constant 1888 : index
    %c0_184 = arith.constant 0 : index
    %860 = vector.load %arg1[%c1888, %c0_184] : memref<2080x128xbf16, #tpu.memory_space<vmem>>, vector<32x32xbf16>
    %861 = vector.extract_strided_slice %856 {offsets = [0, 32], sizes = [32, 32], strides = [1, 1]} : vector<32x224xbf16> to vector<32x32xbf16>
    %cst_185 = arith.constant dense<0.000000e+00> : vector<32x32xf32>
    %862 = tpu.matmul %860, %861, %cst_185 {dimension_numbers = #tpu.dot_dimension_numbers<[1], [0], [0], [1], [0, 0, 1, 1], [], []>} : vector<32x32xbf16>, vector<32x32xbf16>, vector<32x32xf32> -> vector<32x32xf32>
    %863 = arith.addf %859, %862 : vector<32x32xf32>
    %c1920 = arith.constant 1920 : index
    %c0_186 = arith.constant 0 : index
    %864 = vector.load %arg1[%c1920, %c0_186] : memref<2080x128xbf16, #tpu.memory_space<vmem>>, vector<32x32xbf16>
    %865 = vector.extract_strided_slice %856 {offsets = [0, 64], sizes = [32, 32], strides = [1, 1]} : vector<32x224xbf16> to vector<32x32xbf16>
    %cst_187 = arith.constant dense<0.000000e+00> : vector<32x32xf32>
    %866 = tpu.matmul %864, %865, %cst_187 {dimension_numbers = #tpu.dot_dimension_numbers<[1], [0], [0], [1], [0, 0, 1, 1], [], []>} : vector<32x32xbf16>, vector<32x32xbf16>, vector<32x32xf32> -> vector<32x32xf32>
    %867 = arith.addf %863, %866 : vector<32x32xf32>
    %c1952 = arith.constant 1952 : index
    %c0_188 = arith.constant 0 : index
    %868 = vector.load %arg1[%c1952, %c0_188] : memref<2080x128xbf16, #tpu.memory_space<vmem>>, vector<32x32xbf16>
    %869 = vector.extract_strided_slice %856 {offsets = [0, 96], sizes = [32, 32], strides = [1, 1]} : vector<32x224xbf16> to vector<32x32xbf16>
    %cst_189 = arith.constant dense<0.000000e+00> : vector<32x32xf32>
    %870 = tpu.matmul %868, %869, %cst_189 {dimension_numbers = #tpu.dot_dimension_numbers<[1], [0], [0], [1], [0, 0, 1, 1], [], []>} : vector<32x32xbf16>, vector<32x32xbf16>, vector<32x32xf32> -> vector<32x32xf32>
    %871 = arith.addf %867, %870 : vector<32x32xf32>
    %c1984 = arith.constant 1984 : index
    %c0_190 = arith.constant 0 : index
    %872 = vector.load %arg1[%c1984, %c0_190] : memref<2080x128xbf16, #tpu.memory_space<vmem>>, vector<32x32xbf16>
    %873 = vector.extract_strided_slice %856 {offsets = [0, 128], sizes = [32, 32], strides = [1, 1]} : vector<32x224xbf16> to vector<32x32xbf16>
    %cst_191 = arith.constant dense<0.000000e+00> : vector<32x32xf32>
    %874 = tpu.matmul %872, %873, %cst_191 {dimension_numbers = #tpu.dot_dimension_numbers<[1], [0], [0], [1], [0, 0, 1, 1], [], []>} : vector<32x32xbf16>, vector<32x32xbf16>, vector<32x32xf32> -> vector<32x32xf32>
    %875 = arith.addf %871, %874 : vector<32x32xf32>
    %c2016 = arith.constant 2016 : index
    %c0_192 = arith.constant 0 : index
    %876 = vector.load %arg1[%c2016, %c0_192] : memref<2080x128xbf16, #tpu.memory_space<vmem>>, vector<32x32xbf16>
    %877 = vector.extract_strided_slice %856 {offsets = [0, 160], sizes = [32, 32], strides = [1, 1]} : vector<32x224xbf16> to vector<32x32xbf16>
    %cst_193 = arith.constant dense<0.000000e+00> : vector<32x32xf32>
    %878 = tpu.matmul %876, %877, %cst_193 {dimension_numbers = #tpu.dot_dimension_numbers<[1], [0], [0], [1], [0, 0, 1, 1], [], []>} : vector<32x32xbf16>, vector<32x32xbf16>, vector<32x32xf32> -> vector<32x32xf32>
    %879 = arith.addf %875, %878 : vector<32x32xf32>
    %c2048 = arith.constant 2048 : index
    %c0_194 = arith.constant 0 : index
    %880 = vector.load %arg1[%c2048, %c0_194] : memref<2080x128xbf16, #tpu.memory_space<vmem>>, vector<32x32xbf16>
    %881 = vector.extract_strided_slice %856 {offsets = [0, 192], sizes = [32, 32], strides = [1, 1]} : vector<32x224xbf16> to vector<32x32xbf16>
    %cst_195 = arith.constant dense<0.000000e+00> : vector<32x32xf32>
    %882 = tpu.matmul %880, %881, %cst_195 {dimension_numbers = #tpu.dot_dimension_numbers<[1], [0], [0], [1], [0, 0, 1, 1], [], []>} : vector<32x32xbf16>, vector<32x32xbf16>, vector<32x32xf32> -> vector<32x32xf32>
    %883 = arith.addf %879, %882 : vector<32x32xf32>
    %884 = vector.broadcast %855 : vector<1x32xf32> to vector<32x32xf32>
    %885 = arith.addf %883, %884 : vector<32x32xf32>
    %cst_196 = arith.constant 0.000000e+00 : f32
    %886 = vector.broadcast %cst_196 : f32 to vector<32x32xf32>
    %c0_197 = arith.constant 0 : index
    %c0_198 = arith.constant 0 : index
    %887 = vector.load %arg5[%c0_197, %c0_198] : memref<336x128xf32, #tpu.memory_space<vmem>>, vector<128x32xf32>
    %c128_199 = arith.constant 128 : index
    %c0_200 = arith.constant 0 : index
    %888 = vector.load %arg5[%c128_199, %c0_200] : memref<336x128xf32, #tpu.memory_space<vmem>>, vector<32x128xf32>
    %c160 = arith.constant 160 : index
    %c0_201 = arith.constant 0 : index
    %889 = vector.load %arg5[%c160, %c0_201] : memref<336x128xf32, #tpu.memory_space<vmem>>, vector<1x128xf32>
    %cst_202 = arith.constant dense<0.000000e+00> : vector<32x128xf32>
    %890 = tpu.matmul %885, %888, %cst_202 {dimension_numbers = #tpu.dot_dimension_numbers<[1], [0], [0], [1], [0, 0, 1, 1], [], []>} : vector<32x32xf32>, vector<32x128xf32>, vector<32x128xf32> -> vector<32x128xf32>
    %cst_203 = arith.constant 2.000000e+00 : f32
    %891 = vector.broadcast %cst_203 : f32 to vector<32x128xf32>
    %892 = arith.mulf %891, %890 : vector<32x128xf32>
    %893 = vector.broadcast %889 : vector<1x128xf32> to vector<32x128xf32>
    %894 = arith.subf %893, %892 : vector<32x128xf32>
    %cst_204 = arith.constant dense<0x7F800000> : vector<32xf32>
    %895 = vector.multi_reduction <minimumf>, %894, %cst_204 [1] : vector<32x128xf32> to vector<32xf32>
    %896 = vector.shape_cast %895 : vector<32xf32> to vector<32x1xf32>
    %897 = tpu.iota {dimensions = array<i32: 1>} : vector<32x128xi32>
    %898 = vector.broadcast %896 : vector<32x1xf32> to vector<32x128xf32>
    %899 = arith.cmpf ole, %894, %898 : vector<32x128xf32>
    %c128_i32 = arith.constant 128 : i32
    %900 = vector.broadcast %c128_i32 : i32 to vector<32x128xi32>
    %901 = arith.select %899, %897, %900 : vector<32x128xi1>, vector<32x128xi32>
    %cst_205 = arith.constant dense<2147483647> : vector<32xi32>
    %902 = vector.multi_reduction <minsi>, %901, %cst_205 [1] : vector<32x128xi32> to vector<32xi32>
    %903 = vector.shape_cast %902 : vector<32xi32> to vector<32x1xi32>
    %904 = vector.broadcast %903 : vector<32x1xi32> to vector<32x128xi32>
    %905 = arith.cmpi eq, %897, %904 : vector<32x128xi32>
    %906 = arith.extui %905 : vector<32x128xi1> to vector<32x128xi32>
    %907 = arith.sitofp %906 : vector<32x128xi32> to vector<32x128xf32>
    %cst_206 = arith.constant dense<0.000000e+00> : vector<32x32xf32>
    %908 = tpu.matmul %907, %887, %cst_206 {dimension_numbers = #tpu.dot_dimension_numbers<[1], [0], [0], [1], [0, 0, 1, 1], [], []>} : vector<32x128xf32>, vector<128x32xf32>, vector<32x32xf32> -> vector<32x32xf32>
    %909 = arith.subf %885, %908 : vector<32x32xf32>
    %910 = arith.addf %886, %908 : vector<32x32xf32>
    %c62_i32 = arith.constant 62 : i32
    %911 = vector.broadcast %c62_i32 : i32 to vector<32x1xi32>
    %912 = arith.cmpi ne, %903, %911 : vector<32x1xi32>
    %913 = arith.extui %912 : vector<32x1xi1> to vector<32x1xi32>
    %914 = arith.sitofp %913 : vector<32x1xi32> to vector<32x1xf32>
    %c168 = arith.constant 168 : index
    %c0_207 = arith.constant 0 : index
    %915 = vector.load %arg5[%c168, %c0_207] : memref<336x128xf32, #tpu.memory_space<vmem>>, vector<128x32xf32>
    %c296 = arith.constant 296 : index
    %c0_208 = arith.constant 0 : index
    %916 = vector.load %arg5[%c296, %c0_208] : memref<336x128xf32, #tpu.memory_space<vmem>>, vector<32x128xf32>
    %c328 = arith.constant 328 : index
    %c0_209 = arith.constant 0 : index
    %917 = vector.load %arg5[%c328, %c0_209] : memref<336x128xf32, #tpu.memory_space<vmem>>, vector<1x128xf32>
    %cst_210 = arith.constant dense<0.000000e+00> : vector<32x128xf32>
    %918 = tpu.matmul %909, %916, %cst_210 {dimension_numbers = #tpu.dot_dimension_numbers<[1], [0], [0], [1], [0, 0, 1, 1], [], []>} : vector<32x32xf32>, vector<32x128xf32>, vector<32x128xf32> -> vector<32x128xf32>
    %cst_211 = arith.constant 2.000000e+00 : f32
    %919 = vector.broadcast %cst_211 : f32 to vector<32x128xf32>
    %920 = arith.mulf %919, %918 : vector<32x128xf32>
    %921 = vector.broadcast %917 : vector<1x128xf32> to vector<32x128xf32>
    %922 = arith.subf %921, %920 : vector<32x128xf32>
    %cst_212 = arith.constant dense<0x7F800000> : vector<32xf32>
    %923 = vector.multi_reduction <minimumf>, %922, %cst_212 [1] : vector<32x128xf32> to vector<32xf32>
    %924 = vector.shape_cast %923 : vector<32xf32> to vector<32x1xf32>
    %925 = tpu.iota {dimensions = array<i32: 1>} : vector<32x128xi32>
    %926 = vector.broadcast %924 : vector<32x1xf32> to vector<32x128xf32>
    %927 = arith.cmpf ole, %922, %926 : vector<32x128xf32>
    %c128_i32_213 = arith.constant 128 : i32
    %928 = vector.broadcast %c128_i32_213 : i32 to vector<32x128xi32>
    %929 = arith.select %927, %925, %928 : vector<32x128xi1>, vector<32x128xi32>
    %cst_214 = arith.constant dense<2147483647> : vector<32xi32>
    %930 = vector.multi_reduction <minsi>, %929, %cst_214 [1] : vector<32x128xi32> to vector<32xi32>
    %931 = vector.shape_cast %930 : vector<32xi32> to vector<32x1xi32>
    %932 = vector.broadcast %931 : vector<32x1xi32> to vector<32x128xi32>
    %933 = arith.cmpi eq, %925, %932 : vector<32x128xi32>
    %934 = arith.extui %933 : vector<32x128xi1> to vector<32x128xi32>
    %935 = arith.sitofp %934 : vector<32x128xi32> to vector<32x128xf32>
    %cst_215 = arith.constant dense<0.000000e+00> : vector<32x32xf32>
    %936 = tpu.matmul %935, %915, %cst_215 {dimension_numbers = #tpu.dot_dimension_numbers<[1], [0], [0], [1], [0, 0, 1, 1], [], []>} : vector<32x128xf32>, vector<128x32xf32>, vector<32x32xf32> -> vector<32x32xf32>
    %937 = arith.addf %910, %936 : vector<32x32xf32>
    %c16_216 = arith.constant 16 : index
    %c0_217 = arith.constant 0 : index
    %938 = vector.load %arg4[%c16_216, %c0_217] : memref<56x128xf32, #tpu.memory_space<vmem>>, vector<32x32xf32>
    %cst_218 = arith.constant dense<0.000000e+00> : vector<32x1xf32>
    %939 = tpu.matmul %938, %914, %cst_218 {dimension_numbers = #tpu.dot_dimension_numbers<[1], [0], [0], [1], [0, 0, 1, 1], [], []>} : vector<32x32xf32>, vector<32x1xf32>, vector<32x1xf32> -> vector<32x1xf32>
    %cst_219 = arith.constant 0.000000e+00 : f32
    %940 = vector.broadcast %cst_219 : f32 to vector<32x1xf32>
    %941 = arith.cmpf ogt, %939, %940 : vector<32x1xf32>
    %942 = arith.extui %941 : vector<32x1xi1> to vector<32x1xi32>
    %943 = arith.sitofp %942 : vector<32x1xi32> to vector<32x1xf32>
    %c128_220 = arith.constant 128 : index
    %c0_221 = arith.constant 0 : index
    %944 = vector.load %arg3[%c128_220, %c0_221] : memref<160x128xbf16, #tpu.memory_space<vmem>>, vector<32x48xbf16>
    %c12 = arith.constant 12 : index
    %c0_222 = arith.constant 0 : index
    %945 = vector.load %arg4[%c12, %c0_222] : memref<56x128xf32, #tpu.memory_space<vmem>>, vector<1x48xf32>
    %946 = arith.truncf %937 : vector<32x32xf32> to vector<32x32xbf16>
    %cst_223 = arith.constant dense<0.000000e+00> : vector<32x48xf32>
    %947 = tpu.matmul %946, %944, %cst_223 {dimension_numbers = #tpu.dot_dimension_numbers<[1], [0], [0], [1], [0, 0, 1, 1], [], []>} : vector<32x32xbf16>, vector<32x48xbf16>, vector<32x48xf32> -> vector<32x48xf32>
    %948 = vector.broadcast %945 : vector<1x48xf32> to vector<32x48xf32>
    %949 = arith.addf %947, %948 : vector<32x48xf32>
    %950 = vector.broadcast %943 : vector<32x1xf32> to vector<32x48xf32>
    %951 = arith.mulf %949, %950 : vector<32x48xf32>
    %c48_224 = arith.constant 48 : index
    %c0_225 = arith.constant 0 : index
    %952 = vector.load %arg4[%c48_224, %c0_225] : memref<56x128xf32, #tpu.memory_space<vmem>>, vector<2x32xf32>
    %cst_226 = arith.constant dense<0.000000e+00> : vector<2x48xf32>
    %953 = tpu.matmul %952, %951, %cst_226 {dimension_numbers = #tpu.dot_dimension_numbers<[1], [0], [0], [1], [0, 0, 1, 1], [], []>} : vector<2x32xf32>, vector<32x48xf32>, vector<2x48xf32> -> vector<2x48xf32>
    %cst_227 = arith.constant dense<0.000000e+00> : vector<2x1xf32>
    %954 = tpu.matmul %952, %943, %cst_227 {dimension_numbers = #tpu.dot_dimension_numbers<[1], [0], [0], [1], [0, 0, 1, 1], [], []>} : vector<2x32xf32>, vector<32x1xf32>, vector<2x1xf32> -> vector<2x1xf32>
    %cst_228 = arith.constant 1.000000e+00 : f32
    %955 = vector.broadcast %cst_228 : f32 to vector<2x1xf32>
    %956 = arith.maximumf %954, %955 : vector<2x1xf32>
    %957 = vector.broadcast %956 : vector<2x1xf32> to vector<2x48xf32>
    %958 = arith.divf %953, %957 : vector<2x48xf32>
    %c0_229 = arith.constant 0 : index
    %c0_230 = arith.constant 0 : index
    %959 = vector.load %arg6[%c0_229, %c0_230] : memref<2x48xf32, #tpu.memory_space<vmem>>, vector<2x48xf32>
    tpu.vector_store %arg6[%c0_229, %c0_230], %958 {strides = array<i32>} : memref<2x48xf32, #tpu.memory_space<vmem>>, vector<2x48xf32>,
    return
  }
}

</mosaic_0001>

<bundles_post_ra>
// kernel: tpu_custom_call.1
= control target key start
LH: loop header
LB: loop body
LE: loop exit
PB: predicated region body
PF: predicated region fallthrough
CT: control target
= control target key end

     0   :  { %11 = vsyncpa [#allocation3], 0  ;;  %s14830_s0 = inlined_call_operand.vmem [shape: f32[128,8], index: 0, kind: input, shape index: {}]   ;;  %s14831_s1 = inlined_call_operand.hbm [shape: bf16[2080,128], index: 1, kind: input, shape index: {}]   ;;  %s14832_s2 = inlined_call_operand.hbm [shape: bf16[176,224], index: 2, kind: input, shape index: {}]   ;;  %s14833_s3 = inlined_call_operand.vmem [shape: bf16[160,128], index: 3, kind: input, shape index: {}]   ;;  %s14834_s4 = inlined_call_operand.vmem [shape: f32[56,128], index: 4, kind: input, shape index: {}]   ;;  %s14835_s5 = inlined_call_operand.hbm [shape: f32[336,128], index: 5, kind: input, shape index: {}]   ;;  %s14836_s6 = inlined_call_operand.hbm [shape: f32[2,48], index: 6, kind: output, shape index: {}]  }
   0x1   :  { %12 = vsyncpa [#allocation6], 0 }
   0x2   :  { %13 = vsyncpa [#allocation4], 0  ;;  %s12949_s21 = smov [#allocation5]   ;;  %s12855_s25 = scalar_lea.hbm %s14832_s2, 2816 }
   0x3   :  { %s33_s22 = sshll.u32 %s12949_s21, 4  ;;  %p12856_p0 = scmp.ne.s32.totalorder %s14832_s2, %s12855_s25  ;;  %s34_s22 = int_to_ptr.vmem [resolvable:$true] %s33_s22 }
   0x4   :  { %p12859_p1 = scmp.lt.u32.totalorder %s12855_s25, %s14832_s2 }
   0x6   :  { %p12861_p2 = pnand %p12859_p1, %p12856_p0 }
   0x8   :  { %12864 = shalt.err (!%p12861_p2)
}
   0x9   :  { %s12865_s30 = scalar_lea.vmem %s34_s22, 2816  ;;  %p12870_p4 = scmp.lt.s32.totalorder %s34_s22, %s34_s22 }
   0xa   :  { %p12866_p3 = scmp.ne.s32.totalorder %s34_s22, %s12865_s30  ;;  %p12871_p5 = scmp.lt.s32.totalorder %s12865_s30, %s12865_s30 }
   0xc   :  { %p12872_p6 = por %p12871_p5, %p12870_p4 }
   0xe   :  { %p12873_p7 = pnand %p12872_p6, %p12866_p3 }
  0x10   :  { %12876 = shalt.err (!%p12873_p7)
}
  0x11   :  { %s12950_s7 = smov 128   ;;  %s12951_s8 = smov 8  }
  0x12   :  { %39 = dma.hbm_to_vmem [thread:$0]  %s14832_s2, 2816, %s34_s22, [#allocation6], %s12950_s7, %s12950_s7, %s12951_s8  }
  0x13   :  { %s12952_s11 = smov [#allocation2]   ;;  %s12877_s15 = scalar_lea.hbm %s14831_s1, 16640 }
  0x14   :  { %s21_s12 = sshll.u32 %s12952_s11, 4  ;;  %p12878_p8 = scmp.ne.s32.totalorder %s14831_s1, %s12877_s15  ;;  %s22_s12 = int_to_ptr.vmem [resolvable:$true] %s21_s12 }
  0x15   :  { %p12881_p9 = scmp.lt.u32.totalorder %s12877_s15, %s14831_s1 }
  0x17   :  { %p12883_p10 = pnand %p12881_p9, %p12878_p8 }
  0x19   :  { %12886 = shalt.err (!%p12883_p10)
}
  0x1a   :  { %s12887_s20 = scalar_lea.vmem %s22_s12, 16640  ;;  %p12892_p12 = scmp.lt.s32.totalorder %s22_s12, %s22_s12 }
  0x1b   :  { %p12888_p11 = scmp.ne.s32.totalorder %s22_s12, %s12887_s20  ;;  %p12893_p13 = scmp.lt.s32.totalorder %s12887_s20, %s12887_s20 }
  0x1d   :  { %p12894_p0 = por %p12893_p13, %p12892_p12 }
  0x1f   :  { %p12895_p1 = pnand %p12894_p0, %p12888_p11 }
  0x21   :  { %12898 = shalt.err (!%p12895_p1)
}
  0x22   :  { %s12953_s2 = smov 64   ;;  %s12954_s21 = smov 4  }
  0x23   :  { %27 = dma.hbm_to_vmem [thread:$0]  %s14831_s1, 16640, %s22_s12, [#allocation3], %s12953_s2, %s12953_s2, %s12954_s21  }
  0x24   :  { %s12955_s24 = smov [#allocation7]   ;;  %s12899_s28 = scalar_lea.hbm %s14835_s5, 5376 }
  0x25   :  { %s49_s25 = sshll.u32 %s12955_s24, 4  ;;  %p12900_p2 = scmp.ne.s32.totalorder %s14835_s5, %s12899_s28  ;;  %s50_s25 = int_to_ptr.vmem [resolvable:$true] %s49_s25 }
  0x26   :  { %p12903_p3 = scmp.lt.u32.totalorder %s12899_s28, %s14835_s5 }
  0x28   :  { %p12905_p4 = pnand %p12903_p3, %p12900_p2 }
  0x2a   :  { %12908 = shalt.err (!%p12905_p4)
}
  0x2b   :  { %s12909_s11 = scalar_lea.vmem %s50_s25, 5376  ;;  %p12914_p6 = scmp.lt.s32.totalorder %s50_s25, %s50_s25 }
  0x2c   :  { %p12910_p5 = scmp.ne.s32.totalorder %s50_s25, %s12909_s11  ;;  %p12915_p7 = scmp.lt.s32.totalorder %s12909_s11, %s12909_s11 }
  0x2e   :  { %p12916_p8 = por %p12915_p7, %p12914_p6 }
  0x30   :  { %p12917_p9 = pnand %p12916_p8, %p12910_p5 }
  0x32   :  { %12920 = shalt.err (!%p12917_p9)
}
  0x33   :  { %55 = dma.hbm_to_vmem [thread:$0]  %s14835_s5, 5376, %s50_s25, [#allocation6], %s12950_s7, %s12950_s7, %s12951_s8  }
  0x34   :  { %12943 = dma.done.wait [#allocation3], 16640  }
  0x35   :  { %12944 = vsyncadd [#allocation3], 4294950656 }
  0x36   :  { %12945 = dma.done.wait [#allocation6], 8192  }
  0x37   :  { %12946 = vsyncadd [#allocation6], 4294959104  ;;  %vm116_vm0 = vcmask 1043456   ;;  %v82_v0 = vld [vmem:[#allocation5] sm:$0xf]  ;;  %v67_v2 = vld [vmem:[%s14830_s0 + $0x8] sm:$0xff] }
  0x38   :  { %v66_v1 = vld [vmem:[%s14830_s0] sm:$0xff]  ;;  %vm91_vm1 = vcmask 64512   ;;  %12242 = vmatprep.subr.msk.bf16.mxu0 %vm116_vm0, %v82_v0  ;;  %v118_v3 = vsel %vm116_vm0, %v82_v0, 0  ;;  %v68_v5 = vld [vmem:[%s14830_s0 + $0x10] sm:$0xff]  ;;  %v69_v6 = vld [vmem:[%s14830_s0 + $0x18] sm:$0xff]  ;;  %s12956_s8 = smov 120  }
  0x39   :  { %v83_v4 = vpack.c.bf16 %v67_v2, %v66_v1  ;;  %v70_v7 = vld [vmem:[%s14830_s0 + $0x20] sm:$0xff]  ;;  %10629 = vmatpush3.bf16.msra.mxu0 %v118_v3  ;;  %v84_v8 = vpack.c.bf16 %v69_v6, %v68_v5  ;;  %v71_v9 = vld [vmem:[%s14830_s0 + $0x28] sm:$0xff]  ;;  %v72_v11 = vld [vmem:[%s14830_s0 + $0x30] sm:$0xff]  ;;  %s12958_s17 = smov 104   ;;  %s12959_s18 = smov 96  }
  0x3a   :  { %v85_v10 = vpack.c.bf16 %v71_v9, %v70_v7  ;;  %v73_v12 = vld [vmem:[%s14830_s0 + $0x38] sm:$0xff]  ;;  %v74_v13 = vld [vmem:[%s14830_s0 + $0x40] sm:$0xff]  ;;  %v75_v14 = vld [vmem:[%s14830_s0 + $0x48] sm:$0xff]  ;;  %s12960_s19 = smov 88   ;;  %s12961_s20 = smov 80  }
  0x3b   :  { %10630 = vmatprep.mubr.msk.bf16.mxu0 %vm91_vm1, %v83_v4  ;;  %v86_v15 = vpack.c.bf16 %v73_v12, %v72_v11  ;;  %v87_v16 = vpack.c.bf16 %v75_v14, %v74_v13  ;;  %v76_v17 = vld [vmem:[%s14830_s0 + $0x50] sm:$0xff]  ;;  %v77_v18 = vld [vmem:[%s14830_s0 + $0x58] sm:$0xff]  ;;  %v78_v19 = vld [vmem:[%s14830_s0 + $0x60] sm:$0xff]  ;;  %s12962_s23 = smov 124   ;;  %s12963_s15 = smov 32  }
  0x3c   :  { %10631 = vmatmul.mubr.msk.bf16.vlgmr.msra.gmra.mrb[0].mxu0 %vm91_vm1, %v84_v8  ;;  %v79_v20 = vld [vmem:[%s14830_s0 + $0x68] sm:$0xff]  ;;  %v88_v21 = vpack.c.bf16 %v77_v18, %v76_v17  ;;  %v80_v23 = vld [vmem:[%s14830_s0 + $0x70] sm:$0xff]  ;;  %v81_v24 = vld [vmem:[%s14830_s0 + $0x78] sm:$0xff]  ;;  %s12957_s0 = smov 112  }
  0x3d   :  { %10634 = vmatprep.mubr.msk.bf16.mxu0 %vm91_vm1, %v85_v10  ;;  %v89_v22 = vpack.c.bf16 %v79_v20, %v78_v19  ;;  %v90_v25 = vpack.c.bf16 %v81_v24, %v80_v23  ;;  %v12282_v44 = vld [vmem:[#allocation2 + $0x40] sm:$0xff]   ;;  %v12283_v59 = vld [vmem:[#allocation2 + $0x48] sm:$0xff]   ;;  %v12284_v60 = vld [vmem:[#allocation2 + $0x50] sm:$0xff]  }
  0x3e   :  { %10662 = vmatprep.mubr.bf16.mxu1 %v12282_v44  ;;  %v12285_v61 = vld [vmem:[#allocation2 + $0x58] sm:$0xff]   ;;  %v12286_v62 = vld [vmem:[#allocation2 + $0x60] sm:$0xff]   ;;  %v12287_v63 = vld [vmem:[#allocation2 + $0x68] sm:$0xff]  }
  0x3f   :  { %v12288_v0 = vld [vmem:[#allocation2 + $0x70] sm:$0xff]   ;;  %v12289_v1 = vld [vmem:[#allocation2 + $0x78] sm:$0xff]   ;;  %v12290_v2 = vld [vmem:[#allocation2] sm:$0xff]  }
  0x40   :  { %v12291_v3 = vld [vmem:[#allocation2 + $0x8] sm:$0xff]   ;;  %v12292_v5 = vld [vmem:[#allocation2 + $0x10] sm:$0xff]   ;;  %v12293_v7 = vld [vmem:[#allocation2 + $0x18] sm:$0xff]  }
  0x41   :  { %v12294_v9 = vld [vmem:[#allocation2 + $0x20] sm:$0xff]   ;;  %v12295_v11 = vld [vmem:[#allocation2 + $0x28] sm:$0xff]   ;;  %v12296_v13 = vld [vmem:[#allocation2 + $0x30] sm:$0xff]  }
  0x42   :  { %v12298_v17 = vld [vmem:[#allocation2 + $0x80] sm:$0xff]   ;;  %v12299_v19 = vld [vmem:[#allocation2 + $0x88] sm:$0xff]   ;;  %v12301_v23 = vld [vmem:[#allocation2 + $0x98] sm:$0xff]  }
  0x44   :  { %10635 = vmatmul.mubr.msk.bf16.gmra.mrb[4].mxu0 %vm91_vm1, %v86_v15  ;;  %v12297_v15 = vld [vmem:[#allocation2 + $0x38] sm:$0xff]  }
  0x45   :  { %10638 = vmatprep.mubr.msk.bf16.mxu0 %vm91_vm1, %v87_v16 }
  0x4c   :  { %10639 = vmatmul.mubr.msk.bf16.gmra.mrb[8].mxu0 %vm91_vm1, %v88_v21  ;;  %v12300_v21 = vld [vmem:[#allocation2 + $0x90] sm:$0xff]  }
  0x4d   :  { %10642 = vmatprep.mubr.msk.bf16.mxu0 %vm91_vm1, %v89_v22 }
  0x54   :  { %10643 = vmatmul.mubr.msk.bf16.gmra.mrb[12].mxu0 %vm91_vm1, %v90_v25  ;;  %v12302_v25 = vld [vmem:[#allocation2 + $0xa0] sm:$0xff]  }
 0x10f   :  { %v10632_v26 = vpop.f32.mrb[0].mxu0 }
 0x110   :  { %v154_v27 = vpop.f32.mrb[1].mxu0 }
 0x111   :  { %v10633_v28 = vpop.f32.mrb[2].mxu0 }
 0x112   :  { %v13108_v29 = vpack.c.bf16 %v10633_v28, %v10632_v26  ;;  %v157_v30 = vpop.f32.mrb[3].mxu0 }
 0x113   :  { %v13110_v31 = vpack.c.bf16 %v157_v30, %v154_v27  ;;  %v12303_v27 = vld [vmem:[#allocation2 + $0xa8] sm:$0xff]  }
 0x115   :  { %314 = vrot.lane.b32.xlu0 %v13110_v31, %s12956_s8 }
 0x117   :  { %v10636_v32 = vpop.f32.mrb[4].mxu0 }
 0x118   :  { %v170_v33 = vpop.f32.mrb[5].mxu0 }
 0x119   :  { %316 = vrot.lane.b32.xlu0 %v13108_v29, %s12956_s8  ;;  %v10637_v34 = vpop.f32.mrb[6].mxu0 }
 0x11a   :  { %v13116_v35 = vpack.c.bf16 %v10637_v34, %v10636_v32  ;;  %v173_v36 = vpop.f32.mrb[7].mxu0  ;;  %v1685_v34 = vld [vmem:[#allocation5 + $0x10] sm:$0xf] }
 0x11b   :  { %v13118_v37 = vpack.c.bf16 %v173_v36, %v170_v33  ;;  %v12306_v33 = vld [vmem:[#allocation2 + $0xc0] sm:$0xff]   ;;  %v1719_v36 = vsel %vm116_vm0, %v1685_v34, 0  ;;  %12243 = vmatprep.subr.msk.bf16.mxu0 %vm116_vm0, %v1685_v34 }
 0x11c   :  { %10871 = vmatpush3.bf16.msra.mxu0 %v1719_v36 }
 0x11d   :  { %318 = vrot.lane.b32.xlu1 %v13118_v37, %s12956_s8 }
 0x11f   :  { %v10640_v38 = vpop.f32.mrb[8].mxu0 }
 0x120   :  { %v186_v39 = vpop.f32.mrb[9].mxu0 }
 0x121   :  { %320 = vrot.lane.b32.xlu1 %v13116_v35, %s12956_s8  ;;  %v10641_v40 = vpop.f32.mrb[10].mxu0 }
 0x122   :  { %v13124_v41 = vpack.c.bf16 %v10641_v40, %v10640_v38  ;;  %v189_v42 = vpop.f32.mrb[11].mxu0 }
 0x123   :  { %v13126_v43 = vpack.c.bf16 %v189_v42, %v186_v39  ;;  %v12308_v39 = vld [vmem:[#allocation2 + $0xd0] sm:$0xff]  }
 0x125   :  { %324 = vrot.lane.b32.xlu1 %v13124_v41, %s12956_s8  ;;  %322 = vrot.lane.b32.xlu0 %v13126_v43, %s12956_s8 }
 0x127   :  { %v10644_v45 = vpop.f32.mrb[12].mxu0 }
 0x128   :  { %v202_v46 = vpop.f32.mrb[13].mxu0 }
 0x129   :  { %v10645_v47 = vpop.f32.mrb[14].mxu0 }
 0x12a   :  { %v13132_v48 = vpack.c.bf16 %v10645_v47, %v10644_v45  ;;  %v205_v49 = vpop.f32.mrb[15].mxu0  ;;  %v12311_v45 = vld [vmem:[#allocation2 + $0xe8] sm:$0xff]   ;;  %v12312_v47 = vld [vmem:[#allocation2 + $0xf0] sm:$0xff]  }
 0x12b   :  { %v13134_v50 = vpack.c.bf16 %v205_v49, %v202_v46  ;;  %v12313_v49 = vld [vmem:[#allocation2 + $0xf8] sm:$0xff]  }
 0x12c   :  { %328 = vrot.lane.b32.xlu1 %v13132_v48, %s12956_s8 }
 0x12d   :  { %326 = vrot.lane.b32.xlu0 %v13134_v50, %s12956_s8 }
 0x130   :  { %646 = vrot.lane.b32.xlu1 %v13108_v29, %s12957_s0 }
 0x131   :  { %644 = vrot.lane.b32.xlu0 %v13110_v31, %s12957_s0 }
 0x134   :  { %650 = vrot.lane.b32.xlu1 %v13116_v35, %s12957_s0 }
 0x135   :  { %648 = vrot.lane.b32.xlu0 %v13118_v37, %s12957_s0 }
 0x138   :  { %654 = vrot.lane.b32.xlu1 %v13124_v41, %s12957_s0 }
 0x139   :  { %652 = vrot.lane.b32.xlu0 %v13126_v43, %s12957_s0 }
 0x13c   :  { %658 = vrot.lane.b32.xlu1 %v13132_v48, %s12957_s0 }
 0x13d   :  { %656 = vrot.lane.b32.xlu0 %v13134_v50, %s12957_s0 }
 0x140   :  { %847 = vrot.lane.b32.xlu1 %v13108_v29, %s12958_s17 }
 0x141   :  { %845 = vrot.lane.b32.xlu0 %v13110_v31, %s12958_s17 }
 0x144   :  { %851 = vrot.lane.b32.xlu1 %v13116_v35, %s12958_s17 }
 0x145   :  { %849 = vrot.lane.b32.xlu0 %v13118_v37, %s12958_s17 }
 0x148   :  { %855 = vrot.lane.b32.xlu1 %v13124_v41, %s12958_s17 }
 0x149   :  { %853 = vrot.lane.b32.xlu0 %v13126_v43, %s12958_s17 }
 0x14c   :  { %859 = vrot.lane.b32.xlu1 %v13132_v48, %s12958_s17 }
 0x14d   :  { %857 = vrot.lane.b32.xlu0 %v13134_v50, %s12958_s17 }
 0x150   :  { %1048 = vrot.lane.b32.xlu1 %v13108_v29, %s12959_s18 }
 0x151   :  { %1046 = vrot.lane.b32.xlu0 %v13110_v31, %s12959_s18 }
 0x154   :  { %1052 = vrot.lane.b32.xlu1 %v13116_v35, %s12959_s18 }
 0x155   :  { %1050 = vrot.lane.b32.xlu0 %v13118_v37, %s12959_s18 }
 0x158   :  { %1056 = vrot.lane.b32.xlu1 %v13124_v41, %s12959_s18 }
 0x159   :  { %1054 = vrot.lane.b32.xlu0 %v13126_v43, %s12959_s18 }
 0x15c   :  { %1060 = vrot.lane.b32.xlu1 %v13132_v48, %s12959_s18 }
 0x15d   :  { %1058 = vrot.lane.b32.xlu0 %v13134_v50, %s12959_s18 }
 0x160   :  { %1249 = vrot.lane.b32.xlu1 %v13108_v29, %s12960_s19 }
 0x161   :  { %1247 = vrot.lane.b32.xlu0 %v13110_v31, %s12960_s19 }
 0x164   :  { %1253 = vrot.lane.b32.xlu1 %v13116_v35, %s12960_s19 }
 0x165   :  { %1251 = vrot.lane.b32.xlu0 %v13118_v37, %s12960_s19 }
 0x168   :  { %1257 = vrot.lane.b32.xlu1 %v13124_v41, %s12960_s19 }
 0x169   :  { %1255 = vrot.lane.b32.xlu0 %v13126_v43, %s12960_s19 }
 0x16c   :  { %1261 = vrot.lane.b32.xlu1 %v13132_v48, %s12960_s19 }
 0x16d   :  { %1259 = vrot.lane.b32.xlu0 %v13134_v50, %s12960_s19 }
 0x170   :  { %1450 = vrot.lane.b32.xlu1 %v13108_v29, %s12961_s20 }
 0x171   :  { %1448 = vrot.lane.b32.xlu0 %v13110_v31, %s12961_s20 }
 0x174   :  { %1454 = vrot.lane.b32.xlu1 %v13116_v35, %s12961_s20 }
 0x175   :  { %1452 = vrot.lane.b32.xlu0 %v13118_v37, %s12961_s20 }
 0x178   :  { %1458 = vrot.lane.b32.xlu1 %v13124_v41, %s12961_s20 }
 0x179   :  { %1456 = vrot.lane.b32.xlu0 %v13126_v43, %s12961_s20 }
 0x17c   :  { %1462 = vrot.lane.b32.xlu1 %v13132_v48, %s12961_s20 }
 0x17d   :  { %1460 = vrot.lane.b32.xlu0 %v13134_v50, %s12961_s20 }
 0x187   :  { %v315_v51 = vpop.permute.xlu0 %314 }
 0x188   :  { %10646 = vmatprep.subr.bf16.mxu1 %v315_v51 }
 0x189   :  { %10647 = vmatpush3.bf16.msra.mxu1 %v315_v51  ;;  %v12314_v51 = vld [vmem:[#allocation2 + $0x100] sm:$0xff]  }
 0x18b   :  { %v317_v52 = vpop.permute.xlu0 %316 }
 0x18c   :  { %10648 = vmatprep.subr.bf16.mxu1 %v317_v52 }
 0x18d   :  { %10649 = vmatpush3.bf16.msra.mxu1 %v317_v52 }
 0x18f   :  { %v319_v53 = vpop.permute.xlu1 %318 }
 0x190   :  { %10650 = vmatprep.subr.bf16.mxu1 %v319_v53 }
 0x191   :  { %10651 = vmatpush3.bf16.msra.mxu1 %v319_v53  ;;  %v12315_v53 = vld [vmem:[#allocation2 + $0x108] sm:$0xff]  }
 0x193   :  { %v321_v54 = vpop.permute.xlu1 %320 }
 0x194   :  { %10652 = vmatprep.subr.bf16.mxu1 %v321_v54 }
 0x195   :  { %10653 = vmatpush3.bf16.msra.mxu1 %v321_v54 }
 0x197   :  { %v323_v55 = vpop.permute.xlu0 %322  ;;  %v325_v56 = vpop.permute.xlu1 %324 }
 0x198   :  { %10654 = vmatprep.subr.bf16.mxu1 %v323_v55 }
 0x199   :  { %10655 = vmatpush3.bf16.msra.mxu1 %v323_v55  ;;  %v12316_v55 = vld [vmem:[#allocation2 + $0x110] sm:$0xff]  }
 0x19a   :  { %10656 = vmatprep.subr.bf16.mxu1 %v325_v56 }
 0x19d   :  { %10657 = vmatpush3.bf16.msra.mxu1 %v325_v56 }
 0x19e   :  { %v329_v58 = vpop.permute.xlu1 %328 }
 0x19f   :  { %v327_v57 = vpop.permute.xlu0 %326 }
 0x1a0   :  { %10658 = vmatprep.subr.bf16.mxu1 %v327_v57 }
 0x1a1   :  { %10659 = vmatpush3.bf16.msra.mxu1 %v327_v57  ;;  %v12317_v57 = vld [vmem:[#allocation2 + $0x118] sm:$0xff]  }
 0x1a2   :  { %10660 = vmatprep.subr.bf16.mxu1 %v329_v58  ;;  %v647_v6 = vpop.permute.xlu1 %646 }
 0x1a3   :  { %v645_v4 = vpop.permute.xlu0 %644 }
 0x1a5   :  { %10661 = vmatpush3.bf16.msra.mxu1 %v329_v58 }
 0x1a6   :  { %10678 = vmatprep.subr.bf16.mxu1 %v13110_v31  ;;  %v651_v10 = vpop.permute.xlu1 %650 }
 0x1a7   :  { %v649_v8 = vpop.permute.xlu0 %648 }
 0x1a8   :  { %10663 = vmatmul.mubr.bf16.vlgmr.msra.gmra.mrb[0].mxu1 %v12283_v59  ;;  %v12318_v59 = vld [vmem:[#allocation2 + $0x120] sm:$0xff]  }
 0x1a9   :  { %10679 = vmatpush3.bf16.msra.mxu1 %v13110_v31  ;;  %10666 = vmatprep.mubr.bf16.mxu1 %v12284_v60  ;;  %v12305_v31 = vld [vmem:[#allocation2 + $0xb8] sm:$0xff]  }
 0x1aa   :  { %10680 = vmatprep.subr.bf16.mxu1 %v13108_v29  ;;  %v655_v14 = vpop.permute.xlu1 %654 }
 0x1ab   :  { %v653_v12 = vpop.permute.xlu0 %652 }
 0x1ad   :  { %10681 = vmatpush3.bf16.msra.mxu1 %v13108_v29  ;;  %v12304_v29 = vld [vmem:[#allocation2 + $0xb0] sm:$0xff]  }
 0x1ae   :  { %10682 = vmatprep.subr.bf16.mxu1 %v13118_v37  ;;  %v659_v18 = vpop.permute.xlu1 %658 }
 0x1af   :  { %v657_v16 = vpop.permute.xlu0 %656 }
 0x1b0   :  { %10667 = vmatmul.mubr.bf16.gmra.mrb[4].mxu1 %v12285_v61  ;;  %v12319_v61 = vld [vmem:[#allocation2 + $0x128] sm:$0xff]  }
 0x1b1   :  { %10683 = vmatpush3.bf16.msra.mxu1 %v13118_v37  ;;  %10670 = vmatprep.mubr.bf16.mxu1 %v12286_v62  ;;  %v12307_v37 = vld [vmem:[#allocation2 + $0xc8] sm:$0xff]  }
 0x1b2   :  { %10684 = vmatprep.subr.bf16.mxu1 %v13116_v35  ;;  %v848_v22 = vpop.permute.xlu1 %847 }
 0x1b3   :  { %v846_v20 = vpop.permute.xlu0 %845 }
 0x1b5   :  { %10685 = vmatpush3.bf16.msra.mxu1 %v13116_v35 }
 0x1b6   :  { %10686 = vmatprep.subr.bf16.mxu1 %v13126_v43  ;;  %v852_v26 = vpop.permute.xlu1 %851 }
 0x1b7   :  { %v850_v24 = vpop.permute.xlu0 %849 }
 0x1b8   :  { %10671 = vmatmul.mubr.bf16.gmra.mrb[8].mxu1 %v12287_v63  ;;  %v12320_v63 = vld [vmem:[#allocation2 + $0x130] sm:$0xff]  }
 0x1b9   :  { %10687 = vmatpush3.bf16.msra.mxu1 %v13126_v43  ;;  %10674 = vmatprep.mubr.bf16.mxu1 %v12288_v0  ;;  %v12310_v43 = vld [vmem:[#allocation2 + $0xe0] sm:$0xff]  }
 0x1ba   :  { %10688 = vmatprep.subr.bf16.mxu1 %v13124_v41  ;;  %v856_v30 = vpop.permute.xlu1 %855 }
 0x1bb   :  { %v854_v28 = vpop.permute.xlu0 %853 }
 0x1bd   :  { %10689 = vmatpush3.bf16.msra.mxu1 %v13124_v41  ;;  %v12309_v41 = vld [vmem:[#allocation2 + $0xd8] sm:$0xff]  }
 0x1be   :  { %10690 = vmatprep.subr.bf16.mxu1 %v13134_v50  ;;  %v860_v35 = vpop.permute.xlu1 %859 }
 0x1bf   :  { %v858_v32 = vpop.permute.xlu0 %857 }
 0x1c0   :  { %10675 = vmatmul.mubr.bf16.gmra.mrb[12].mxu1 %v12289_v1  ;;  %v12321_v1 = vld [vmem:[#allocation2 + $0x138] sm:$0xff]  }
 0x1c1   :  { %10691 = vmatpush3.bf16.msra.mxu1 %v13134_v50  ;;  %10694 = vmatprep.mubr.bf16.mxu1 %v12290_v2 }
 0x1c2   :  { %10692 = vmatprep.subr.bf16.mxu1 %v13132_v48  ;;  %v1049_v40 = vpop.permute.xlu1 %1048 }
 0x1c3   :  { %v1047_v38 = vpop.permute.xlu0 %1046 }
 0x1c5   :  { %10693 = vmatpush3.bf16.msra.mxu1 %v13132_v48 }
 0x1c6   :  { %10710 = vmatprep.subr.bf16.mxu1 %v645_v4  ;;  %v1053_v44 = vpop.permute.xlu1 %1052 }
 0x1c7   :  { %v1051_v42 = vpop.permute.xlu0 %1050 }
 0x1c8   :  { %10695 = vmatmul.mubr.bf16.vlgmr.msra.gmra.mrb[0].mxu1 %v12291_v3  ;;  %v12322_v3 = vld [vmem:[#allocation2 + $0x140] sm:$0xff]  }
 0x1c9   :  { %10711 = vmatpush3.bf16.msra.mxu1 %v645_v4  ;;  %10698 = vmatprep.mubr.bf16.mxu1 %v12292_v5  ;;  %v12323_v5 = vld [vmem:[#allocation2 + $0x148] sm:$0xff]  }
 0x1ca   :  { %10712 = vmatprep.subr.bf16.mxu1 %v647_v6  ;;  %v1057_v48 = vpop.permute.xlu1 %1056 }
 0x1cb   :  { %v1055_v46 = vpop.permute.xlu0 %1054 }
 0x1cd   :  { %10713 = vmatpush3.bf16.msra.mxu1 %v647_v6 }
 0x1ce   :  { %10714 = vmatprep.subr.bf16.mxu1 %v649_v8  ;;  %v1061_v52 = vpop.permute.xlu1 %1060 }
 0x1cf   :  { %v1059_v50 = vpop.permute.xlu0 %1058 }
 0x1d0   :  { %10699 = vmatmul.mubr.bf16.gmra.mrb[4].mxu1 %v12293_v7  ;;  %v12324_v7 = vld [vmem:[#allocation2 + $0x150] sm:$0xff]  }
 0x1d1   :  { %10715 = vmatpush3.bf16.msra.mxu1 %v649_v8  ;;  %10702 = vmatprep.mubr.bf16.mxu1 %v12294_v9  ;;  %v12325_v9 = vld [vmem:[#allocation2 + $0x158] sm:$0xff]  }
 0x1d2   :  { %10716 = vmatprep.subr.bf16.mxu1 %v651_v10  ;;  %v1250_v56 = vpop.permute.xlu1 %1249 }
 0x1d3   :  { %v1248_v54 = vpop.permute.xlu0 %1247 }
 0x1d5   :  { %10717 = vmatpush3.bf16.msra.mxu1 %v651_v10 }
 0x1d6   :  { %10718 = vmatprep.subr.bf16.mxu1 %v653_v12  ;;  %v1254_v60 = vpop.permute.xlu1 %1253 }
 0x1d7   :  { %v1252_v58 = vpop.permute.xlu0 %1251 }
 0x1d8   :  { %10703 = vmatmul.mubr.bf16.gmra.mrb[8].mxu1 %v12295_v11  ;;  %v12326_v11 = vld [vmem:[#allocation2 + $0x160] sm:$0xff]  }
 0x1d9   :  { %10719 = vmatpush3.bf16.msra.mxu1 %v653_v12  ;;  %10706 = vmatprep.mubr.bf16.mxu1 %v12296_v13  ;;  %v12327_v13 = vld [vmem:[#allocation2 + $0x168] sm:$0xff]  }
 0x1da   :  { %10720 = vmatprep.subr.bf16.mxu1 %v655_v14  ;;  %v1258_v0 = vpop.permute.xlu1 %1257 }
 0x1db   :  { %v1256_v62 = vpop.permute.xlu0 %1255 }
 0x1dd   :  { %10721 = vmatpush3.bf16.msra.mxu1 %v655_v14 }
 0x1de   :  { %10722 = vmatprep.subr.bf16.mxu1 %v657_v16  ;;  %v1262_v4 = vpop.permute.xlu1 %1261 }
 0x1df   :  { %v1260_v2 = vpop.permute.xlu0 %1259 }
 0x1e0   :  { %10707 = vmatmul.mubr.bf16.gmra.mrb[12].mxu1 %v12297_v15  ;;  %v12328_v15 = vld [vmem:[#allocation2 + $0x170] sm:$0xff]  }
 0x1e1   :  { %10723 = vmatpush3.bf16.msra.mxu1 %v657_v16  ;;  %10726 = vmatprep.mubr.bf16.mxu1 %v12298_v17  ;;  %v12329_v17 = vld [vmem:[#allocation2 + $0x178] sm:$0xff]  }
 0x1e2   :  { %10724 = vmatprep.subr.bf16.mxu1 %v659_v18  ;;  %v1451_v8 = vpop.permute.xlu1 %1450 }
 0x1e3   :  { %v1449_v6 = vpop.permute.xlu0 %1448 }
 0x1e5   :  { %10725 = vmatpush3.bf16.msra.mxu1 %v659_v18 }
 0x1e6   :  { %10742 = vmatprep.subr.bf16.mxu1 %v846_v20  ;;  %v1455_v12 = vpop.permute.xlu1 %1454 }
 0x1e7   :  { %v1453_v10 = vpop.permute.xlu0 %1452 }
 0x1e8   :  { %10727 = vmatmul.mubr.bf16.vlgmr.msra.gmra.mrb[0].mxu1 %v12299_v19  ;;  %v12330_v19 = vld [vmem:[#allocation2 + $0x180] sm:$0xff]  }
 0x1e9   :  { %10743 = vmatpush3.bf16.msra.mxu1 %v846_v20  ;;  %10730 = vmatprep.mubr.bf16.mxu1 %v12300_v21  ;;  %v12331_v21 = vld [vmem:[#allocation2 + $0x188] sm:$0xff]  }
 0x1ea   :  { %10744 = vmatprep.subr.bf16.mxu1 %v848_v22  ;;  %v1459_v16 = vpop.permute.xlu1 %1458 }
 0x1eb   :  { %v1457_v14 = vpop.permute.xlu0 %1456 }
 0x1ed   :  { %10745 = vmatpush3.bf16.msra.mxu1 %v848_v22  ;;  %v12332_v22 = vld [vmem:[#allocation2 + $0x190] sm:$0xff]  }
 0x1ee   :  { %10746 = vmatprep.subr.bf16.mxu1 %v850_v24  ;;  %v1463_v20 = vpop.permute.xlu1 %1462 }
 0x1ef   :  { %v1461_v18 = vpop.permute.xlu0 %1460 }
 0x1f0   :  { %10731 = vmatmul.mubr.bf16.gmra.mrb[4].mxu1 %v12301_v23  ;;  %v12333_v23 = vld [vmem:[#allocation2 + $0x198] sm:$0xff]  }
 0x1f1   :  { %10747 = vmatpush3.bf16.msra.mxu1 %v850_v24  ;;  %10734 = vmatprep.mubr.bf16.mxu1 %v12302_v25  ;;  %v12334_v24 = vld [vmem:[#allocation2 + $0x1a0] sm:$0xff]   ;;  %v12335_v25 = vld [vmem:[#allocation2 + $0x1a8] sm:$0xff]  }
 0x1f2   :  { %10748 = vmatprep.subr.bf16.mxu1 %v852_v26 }
 0x1f5   :  { %10749 = vmatpush3.bf16.msra.mxu1 %v852_v26  ;;  %v12336_v26 = vld [vmem:[#allocation2 + $0x1b0] sm:$0xff]  }
 0x1f6   :  { %10750 = vmatprep.subr.bf16.mxu1 %v854_v28 }
 0x1f8   :  { %10735 = vmatmul.mubr.bf16.gmra.mrb[8].mxu1 %v12303_v27  ;;  %v12337_v27 = vld [vmem:[#allocation2 + $0x1b8] sm:$0xff]  }
 0x1f9   :  { %10751 = vmatpush3.bf16.msra.mxu1 %v854_v28  ;;  %10738 = vmatprep.mubr.bf16.mxu1 %v12304_v29  ;;  %v13225_v28 = vld [vmem:[%s14834_s4] ss:$0 sm:$0xff] }
 0x1fa   :  { %10752 = vmatprep.subr.bf16.mxu1 %v856_v30 }
 0x1fd   :  { %10753 = vmatpush3.bf16.msra.mxu1 %v856_v30 }
 0x1fe   :  { %10754 = vmatprep.subr.bf16.mxu1 %v858_v32 }
 0x200   :  { %10739 = vmatmul.mubr.bf16.gmra.mrb[12].mxu1 %v12305_v31 }
 0x201   :  { %10755 = vmatpush3.bf16.msra.mxu1 %v858_v32  ;;  %10758 = vmatprep.mubr.bf16.mxu1 %v12306_v33 }
 0x202   :  { %10756 = vmatprep.subr.bf16.mxu1 %v860_v35 }
 0x205   :  { %10757 = vmatpush3.bf16.msra.mxu1 %v860_v35 }
 0x206   :  { %10774 = vmatprep.subr.bf16.mxu1 %v1047_v38 }
 0x208   :  { %10759 = vmatmul.mubr.bf16.vlgmr.msra.gmra.mrb[0].mxu1 %v12307_v37 }
 0x209   :  { %10775 = vmatpush3.bf16.msra.mxu1 %v1047_v38  ;;  %10762 = vmatprep.mubr.bf16.mxu1 %v12308_v39 }
 0x20a   :  { %10776 = vmatprep.subr.bf16.mxu1 %v1049_v40 }
 0x20d   :  { %10777 = vmatpush3.bf16.msra.mxu1 %v1049_v40 }
 0x20e   :  { %10778 = vmatprep.subr.bf16.mxu1 %v1051_v42 }
 0x210   :  { %10763 = vmatmul.mubr.bf16.gmra.mrb[4].mxu1 %v12309_v41 }
 0x211   :  { %10779 = vmatpush3.bf16.msra.mxu1 %v1051_v42  ;;  %10766 = vmatprep.mubr.bf16.mxu1 %v12310_v43 }
 0x212   :  { %10780 = vmatprep.subr.bf16.mxu1 %v1053_v44 }
 0x215   :  { %10781 = vmatpush3.bf16.msra.mxu1 %v1053_v44 }
 0x216   :  { %10782 = vmatprep.subr.bf16.mxu1 %v1055_v46 }
 0x218   :  { %10767 = vmatmul.mubr.bf16.gmra.mrb[8].mxu1 %v12311_v45 }
 0x219   :  { %10783 = vmatpush3.bf16.msra.mxu1 %v1055_v46  ;;  %10770 = vmatprep.mubr.bf16.mxu1 %v12312_v47 }
 0x21a   :  { %10784 = vmatprep.subr.bf16.mxu1 %v1057_v48 }
 0x21d   :  { %10785 = vmatpush3.bf16.msra.mxu1 %v1057_v48 }
 0x21e   :  { %10786 = vmatprep.subr.bf16.mxu1 %v1059_v50 }
 0x220   :  { %10771 = vmatmul.mubr.bf16.gmra.mrb[12].mxu1 %v12313_v49 }
 0x221   :  { %10787 = vmatpush3.bf16.msra.mxu1 %v1059_v50  ;;  %10790 = vmatprep.mubr.bf16.mxu1 %v12314_v51 }
 0x222   :  { %10788 = vmatprep.subr.bf16.mxu1 %v1061_v52 }
 0x225   :  { %10789 = vmatpush3.bf16.msra.mxu1 %v1061_v52 }
 0x226   :  { %10806 = vmatprep.subr.bf16.mxu1 %v1248_v54 }
 0x228   :  { %10791 = vmatmul.mubr.bf16.vlgmr.msra.gmra.mrb[0].mxu1 %v12315_v53 }
 0x229   :  { %10807 = vmatpush3.bf16.msra.mxu1 %v1248_v54  ;;  %10794 = vmatprep.mubr.bf16.mxu1 %v12316_v55 }
 0x22a   :  { %10808 = vmatprep.subr.bf16.mxu1 %v1250_v56 }
 0x22d   :  { %10809 = vmatpush3.bf16.msra.mxu1 %v1250_v56 }
 0x22e   :  { %10810 = vmatprep.subr.bf16.mxu1 %v1252_v58 }
 0x230   :  { %10795 = vmatmul.mubr.bf16.gmra.mrb[4].mxu1 %v12317_v57 }
 0x231   :  { %10811 = vmatpush3.bf16.msra.mxu1 %v1252_v58  ;;  %10798 = vmatprep.mubr.bf16.mxu1 %v12318_v59 }
 0x232   :  { %10812 = vmatprep.subr.bf16.mxu1 %v1254_v60 }
 0x235   :  { %10813 = vmatpush3.bf16.msra.mxu1 %v1254_v60 }
 0x236   :  { %10814 = vmatprep.subr.bf16.mxu1 %v1256_v62 }
 0x238   :  { %10799 = vmatmul.mubr.bf16.gmra.mrb[8].mxu1 %v12319_v61 }
 0x239   :  { %10815 = vmatpush3.bf16.msra.mxu1 %v1256_v62  ;;  %10802 = vmatprep.mubr.bf16.mxu1 %v12320_v63 }
 0x23a   :  { %10816 = vmatprep.subr.bf16.mxu1 %v1258_v0 }
 0x23d   :  { %10817 = vmatpush3.bf16.msra.mxu1 %v1258_v0 }
 0x23e   :  { %10818 = vmatprep.subr.bf16.mxu1 %v1260_v2 }
 0x240   :  { %10803 = vmatmul.mubr.bf16.gmra.mrb[12].mxu1 %v12321_v1 }
 0x241   :  { %10819 = vmatpush3.bf16.msra.mxu1 %v1260_v2  ;;  %10822 = vmatprep.mubr.bf16.mxu1 %v12322_v3 }
 0x242   :  { %10820 = vmatprep.subr.bf16.mxu1 %v1262_v4 }
 0x245   :  { %10821 = vmatpush3.bf16.msra.mxu1 %v1262_v4 }
 0x246   :  { %10838 = vmatprep.subr.bf16.mxu1 %v1449_v6 }
 0x248   :  { %10823 = vmatmul.mubr.bf16.vlgmr.msra.gmra.mrb[0].mxu1 %v12323_v5 }
 0x249   :  { %10839 = vmatpush3.bf16.msra.mxu1 %v1449_v6  ;;  %10826 = vmatprep.mubr.bf16.mxu1 %v12324_v7 }
 0x24a   :  { %10840 = vmatprep.subr.bf16.mxu1 %v1451_v8 }
 0x24d   :  { %10841 = vmatpush3.bf16.msra.mxu1 %v1451_v8 }
 0x24e   :  { %10842 = vmatprep.subr.bf16.mxu1 %v1453_v10 }
 0x250   :  { %10827 = vmatmul.mubr.bf16.gmra.mrb[4].mxu1 %v12325_v9 }
 0x251   :  { %10843 = vmatpush3.bf16.msra.mxu1 %v1453_v10  ;;  %10830 = vmatprep.mubr.bf16.mxu1 %v12326_v11 }
 0x252   :  { %10844 = vmatprep.subr.bf16.mxu1 %v1455_v12 }
 0x255   :  { %10845 = vmatpush3.bf16.msra.mxu1 %v1455_v12 }
 0x256   :  { %10846 = vmatprep.subr.bf16.mxu1 %v1457_v14 }
 0x258   :  { %10831 = vmatmul.mubr.bf16.gmra.mrb[8].mxu1 %v12327_v13 }
 0x259   :  { %10847 = vmatpush3.bf16.msra.mxu1 %v1457_v14  ;;  %10834 = vmatprep.mubr.bf16.mxu1 %v12328_v15 }
 0x25a   :  { %10848 = vmatprep.subr.bf16.mxu1 %v1459_v16 }
 0x25d   :  { %10849 = vmatpush3.bf16.msra.mxu1 %v1459_v16 }
 0x25e   :  { %10850 = vmatprep.subr.bf16.mxu1 %v1461_v18 }
 0x260   :  { %10835 = vmatmul.mubr.bf16.gmra.mrb[12].mxu1 %v12329_v17 }
 0x261   :  { %10851 = vmatpush3.bf16.msra.mxu1 %v1461_v18  ;;  %10854 = vmatprep.mubr.bf16.mxu1 %v12330_v19 }
 0x262   :  { %10852 = vmatprep.subr.bf16.mxu1 %v1463_v20 }
 0x265   :  { %10853 = vmatpush3.bf16.msra.mxu1 %v1463_v20 }
 0x268   :  { %10855 = vmatmul.mubr.bf16.vlgmr.msra.gmra.mrb[0].mxu1 %v12331_v21 }
 0x269   :  { %10858 = vmatprep.mubr.bf16.mxu1 %v12332_v22 }
 0x270   :  { %10859 = vmatmul.mubr.bf16.gmra.mrb[4].mxu1 %v12333_v23 }
 0x271   :  { %10862 = vmatprep.mubr.bf16.mxu1 %v12334_v24 }
 0x278   :  { %10863 = vmatmul.mubr.bf16.gmra.mrb[8].mxu1 %v12335_v25 }
 0x279   :  { %10866 = vmatprep.mubr.bf16.mxu1 %v12336_v26 }
 0x280   :  { %10867 = vmatmul.mubr.bf16.gmra.mrb[12].mxu1 %v12337_v27 }
 0x33b   :  { %v10856_v29 = vpop.f32.mrb[0].mxu1 }
 0x33c   :  { %v13228_v30 = vadd.f32 %v10856_v29, %v13225_v28  ;;  %v1506_v31 = vpop.f32.mrb[1].mxu1 }
 0x33d   :  { %v13231_v32 = vadd.f32 %v13225_v28, %v1506_v31  ;;  %v10857_v33 = vpop.f32.mrb[2].mxu1 }
 0x33e   :  { %v1625_v34 = vmul.f32 1.442695, %v13228_v30  ;;  %v13235_v35 = vadd.f32 %v10857_v33, %v13225_v28  ;;  %v1509_v36 = vpop.f32.mrb[3].mxu1  ;;  %vm1607_vm2 = vcmp.gt.f32.partialorder %v13228_v30, 0.0 }
 0x33f   :  { %v1621_v37 = vmul.f32 1.442695, %v13231_v32  ;;  %v13239_v38 = vadd.f32 %v13225_v28, %v1509_v36  ;;  %vm1605_vm4 = vcmp.gt.f32.partialorder %v13231_v32, 0.0 }
 0x340   :  { %12431 = vpow2.f32 %v1625_v34  ;;  %v1627_v39 = vmul.f32 1.442695, %v13235_v35  ;;  %v2624_v40 = vpack.c.bf16 %v13235_v35, %v13228_v30  ;;  %vm1608_vm3 = vcmp.gt.f32.partialorder %v13235_v35, 0.0 }
 0x341   :  { %12433 = vpow2.f32 %v1621_v37  ;;  %v1623_v41 = vmul.f32 1.442695, %v13239_v38  ;;  %v2623_v42 = vpack.c.bf16 %v13239_v38, %v13231_v32  ;;  %vm1606_vm5 = vcmp.gt.f32.partialorder %v13239_v38, 0.0 }
 0x342   :  { %12435 = vpow2.f32 %v1627_v39 }
 0x343   :  { %12437 = vpow2.f32 %v1623_v41  ;;  %v10860_v43 = vpop.f32.mrb[4].mxu1 }
 0x344   :  { %v13248_v44 = vadd.f32 %v10860_v43, %v13225_v28  ;;  %v1522_v45 = vpop.f32.mrb[5].mxu1 }
 0x345   :  { %v13251_v46 = vadd.f32 %v13225_v28, %v1522_v45  ;;  %v10861_v47 = vpop.f32.mrb[6].mxu1 }
 0x346   :  { %v1633_v48 = vmul.f32 1.442695, %v13248_v44  ;;  %v13255_v49 = vadd.f32 %v10861_v47, %v13225_v28  ;;  %v1525_v50 = vpop.f32.mrb[7].mxu1  ;;  %vm1611_vm6 = vcmp.gt.f32.partialorder %v13248_v44, 0.0 }
 0x347   :  { %v1629_v51 = vmul.f32 1.442695, %v13251_v46  ;;  %v13259_v52 = vadd.f32 %v13225_v28, %v1525_v50  ;;  %vm1609_vm7 = vcmp.gt.f32.partialorder %v13251_v46, 0.0 }
 0x348   :  { %12439 = vpow2.f32 %v1633_v48  ;;  %v1635_v53 = vmul.f32 1.442695, %v13255_v49  ;;  %v2626_v54 = vpack.c.bf16 %v13255_v49, %v13248_v44  ;;  %vm1612_vm8 = vcmp.gt.f32.partialorder %v13255_v49, 0.0 }
 0x349   :  { %12441 = vpow2.f32 %v1629_v51  ;;  %v1631_v55 = vmul.f32 1.442695, %v13259_v52  ;;  %v2625_v56 = vpack.c.bf16 %v13259_v52, %v13251_v46  ;;  %vm1610_vm9 = vcmp.gt.f32.partialorder %v13259_v52, 0.0 }
 0x34a   :  { %v12432_v57 = vpop.eup %12431  ;;  %12443 = vpow2.f32 %v1635_v53 }
 0x34b   :  { %v12434_v58 = vpop.eup %12433  ;;  %v9662_v59 = vadd.f32 -1.0, %v12432_v57  ;;  %12445 = vpow2.f32 %v1631_v55  ;;  %v10864_v60 = vpop.f32.mrb[8].mxu1 }
 0x34c   :  { %v12436_v61 = vpop.eup %12435  ;;  %v13268_v62 = vadd.f32 %v10864_v60, %v13225_v28  ;;  %v1538_v63 = vpop.f32.mrb[9].mxu1  ;;  %v9660_v1 = vadd.f32 -1.0, %v12434_v58 }
 0x34d   :  { %v12438_v0 = vpop.eup %12437  ;;  %v9663_v2 = vadd.f32 -1.0, %v12436_v61  ;;  %v13272_v3 = vadd.f32 %v13225_v28, %v1538_v63  ;;  %v10865_v4 = vpop.f32.mrb[10].mxu1  ;;  %v1671_v9 = vsel %vm1607_vm2, %v13228_v30, %v9662_v59  ;;  %v9725_v30 = vld [vmem:[%s14834_s4 + $0x2] ss:$0 sm:$0xff] }
 0x34e   :  { %v9661_v5 = vadd.f32 -1.0, %v12438_v0  ;;  %v1641_v6 = vmul.f32 1.442695, %v13268_v62  ;;  %v13277_v7 = vadd.f32 %v10865_v4, %v13225_v28  ;;  %v1541_v8 = vpop.f32.mrb[11].mxu1  ;;  %v1669_v16 = vsel %vm1605_vm4, %v13231_v32, %v9660_v1  ;;  %v9734_v32 = vld [vmem:[%s14834_s4 + $0x3] ss:$0 sm:$0xff] }
 0x34f   :  { %v1672_v10 = vsel %vm1608_vm3, %v13235_v35, %v9663_v2  ;;  %v1637_v11 = vmul.f32 1.442695, %v13272_v3  ;;  %v13283_v12 = vadd.f32 %v13225_v28, %v1541_v8  ;;  %vm1615_vm10 = vcmp.gt.f32.partialorder %v13268_v62, 0.0 }
 0x350   :  { %v1687_v13 = vpack.c.bf16 %v1672_v10, %v1671_v9  ;;  %12447 = vpow2.f32 %v1641_v6  ;;  %v1643_v14 = vmul.f32 1.442695, %v13277_v7  ;;  %v1670_v18 = vsel %vm1606_vm5, %v13239_v38, %v9661_v5 }
 0x351   :  { %12449 = vpow2.f32 %v1637_v11  ;;  %v1639_v15 = vmul.f32 1.442695, %v13283_v12  ;;  %v2627_v19 = vpack.c.bf16 %v13283_v12, %v13272_v3  ;;  %v2628_v20 = vpack.c.bf16 %v13277_v7, %v13268_v62 }
 0x352   :  { %v12440_v17 = vpop.eup %12439  ;;  %12451 = vpow2.f32 %v1643_v14  ;;  %v1686_v23 = vpack.c.bf16 %v1670_v18, %v1669_v16  ;;  %vm1616_vm11 = vcmp.gt.f32.partialorder %v13277_v7, 0.0  ;;  %vm1613_vm12 = vcmp.gt.f32.partialorder %v13272_v3, 0.0 }
 0x353   :  { %v12442_v21 = vpop.eup %12441  ;;  %12453 = vpow2.f32 %v1639_v15  ;;  %v10868_v22 = vpop.f32.mrb[12].mxu1  ;;  %v9666_v31 = vadd.f32 -1.0, %v12440_v17  ;;  %vm1614_vm13 = vcmp.gt.f32.partialorder %v13283_v12, 0.0  ;;  %vm2521_vm4 = vcmask 1041408  }
 0x354   :  { %v12444_v24 = vpop.eup %12443  ;;  %v9664_v25 = vadd.f32 -1.0, %v12442_v21  ;;  %v13296_v26 = vadd.f32 %v10868_v22, %v13225_v28  ;;  %v1554_v27 = vpop.f32.mrb[13].mxu1  ;;  %10872 = vmatprep.mubr.msk.bf16.mxu0 %vm91_vm1, %v1686_v23  ;;  %v13527_v35 = vadd.f32 %v9734_v32, %v9725_v30 }
 0x355   :  { %v12446_v29 = vpop.eup %12445  ;;  %v13302_v33 = vadd.f32 %v13225_v28, %v1554_v27  ;;  %v10869_v34 = vpop.f32.mrb[14].mxu1  ;;  %v9667_v36 = vadd.f32 -1.0, %v12444_v24  ;;  %10873 = vmatmul.mubr.msk.bf16.vlgmr.msra.gmra.mrb[16].mxu0 %vm91_vm1, %v1687_v13  ;;  %v1675_v57 = vsel %vm1611_vm6, %v13248_v44, %v9666_v31  ;;  %vm2496_vm6 = vcmask 31744  }
 0x356   :  { %v9665_v37 = vadd.f32 -1.0, %v12446_v29  ;;  %v1649_v39 = vmul.f32 1.442695, %v13296_v26  ;;  %v13307_v41 = vadd.f32 %v10869_v34, %v13225_v28  ;;  %v1557_v43 = vpop.f32.mrb[15].mxu1  ;;  %v1673_v50 = vsel %vm1609_vm7, %v13251_v46, %v9664_v25 }
 0x357   :  { %v1645_v45 = vmul.f32 1.442695, %v13302_v33  ;;  %v13313_v47 = vadd.f32 %v13225_v28, %v1557_v43  ;;  %v1676_v28 = vsel %vm1612_vm8, %v13255_v49, %v9667_v36  ;;  %vm1619_vm14 = vcmp.gt.f32.partialorder %v13296_v26, 0.0 }
 0x358   :  { %12455 = vpow2.f32 %v1649_v39  ;;  %v1651_v48 = vmul.f32 1.442695, %v13307_v41  ;;  %v1674_v51 = vsel %vm1610_vm9, %v13259_v52, %v9665_v37  ;;  %v2630_v60 = vpack.c.bf16 %v13307_v41, %v13296_v26 }
 0x359   :  { %12457 = vpow2.f32 %v1645_v45  ;;  %v1647_v53 = vmul.f32 1.442695, %v13313_v47  ;;  %v1688_v55 = vpack.c.bf16 %v1674_v51, %v1673_v50  ;;  %v2629_v59 = vpack.c.bf16 %v13313_v47, %v13302_v33 }
 0x35a   :  { %v12448_v58 = vpop.eup %12447  ;;  %12459 = vpow2.f32 %v1651_v48  ;;  %v1689_v0 = vpack.c.bf16 %v1676_v28, %v1675_v57  ;;  %vm1620_vm15 = vcmp.gt.f32.partialorder %v13307_v41, 0.0  ;;  %vm1617_vm2 = vcmp.gt.f32.partialorder %v13302_v33, 0.0 }
 0x35b   :  { %v12450_v61 = vpop.eup %12449  ;;  %v9670_v63 = vadd.f32 -1.0, %v12448_v58  ;;  %12461 = vpow2.f32 %v1647_v53  ;;  %10876 = vmatprep.mubr.msk.bf16.mxu0 %vm91_vm1, %v1688_v55  ;;  %vm1618_vm3 = vcmp.gt.f32.partialorder %v13313_v47, 0.0 }
 0x35c   :  { %v12452_v1 = vpop.eup %12451  ;;  %v9668_v2 = vadd.f32 -1.0, %v12450_v61 }
 0x35d   :  { %v12454_v4 = vpop.eup %12453  ;;  %v9671_v5 = vadd.f32 -1.0, %v12452_v1  ;;  %10877 = vmatmul.mubr.msk.bf16.gmra.mrb[20].mxu0 %vm91_vm1, %v1689_v0  ;;  %v1679_v8 = vsel %vm1615_vm10, %v13268_v62, %v9670_v63 }
 0x35e   :  { %v9669_v6 = vadd.f32 -1.0, %v12454_v4  ;;  %v1677_v10 = vsel %vm1613_vm12, %v13272_v3, %v9668_v2 }
 0x35f   :  { %v1680_v9 = vsel %vm1616_vm11, %v13277_v7, %v9671_v5  ;;  %v12338_v5 = vld [vmem:[#allocation2 + $0x200] sm:$0xff]  }
 0x360   :  { %v1678_v11 = vsel %vm1614_vm13, %v13283_v12, %v9669_v6  ;;  %v1691_v13 = vpack.c.bf16 %v1680_v9, %v1679_v8 }
 0x361   :  { %v1690_v14 = vpack.c.bf16 %v1678_v11, %v1677_v10 }
 0x362   :  { %v12456_v15 = vpop.eup %12455 }
 0x363   :  { %v12458_v16 = vpop.eup %12457  ;;  %v9674_v17 = vadd.f32 -1.0, %v12456_v15  ;;  %10880 = vmatprep.mubr.msk.bf16.mxu0 %vm91_vm1, %v1690_v14 }
 0x364   :  { %v12460_v18 = vpop.eup %12459  ;;  %v9672_v21 = vadd.f32 -1.0, %v12458_v16 }
 0x365   :  { %v12462_v22 = vpop.eup %12461  ;;  %v9675_v23 = vadd.f32 -1.0, %v12460_v18  ;;  %10881 = vmatmul.mubr.msk.bf16.gmra.mrb[24].mxu0 %vm91_vm1, %v1691_v13  ;;  %v1683_v25 = vsel %vm1619_vm14, %v13296_v26, %v9674_v17 }
 0x366   :  { %v9673_v24 = vadd.f32 -1.0, %v12462_v22  ;;  %v1681_v29 = vsel %vm1617_vm2, %v13302_v33, %v9672_v21 }
 0x367   :  { %v1684_v27 = vsel %vm1620_vm15, %v13307_v41, %v9675_v23 }
 0x368   :  { %v1682_v31 = vsel %vm1618_vm3, %v13313_v47, %v9673_v24  ;;  %v1693_v34 = vpack.c.bf16 %v1684_v27, %v1683_v25  ;;  %v12339_v24 = vld [vmem:[#allocation2 + $0x208] sm:$0xff]   ;;  %v12340_v25 = vld [vmem:[#allocation2 + $0x210] sm:$0xff]   ;;  %v12341_v27 = vld [vmem:[#allocation2 + $0x218] sm:$0xff]  }
 0x369   :  { %v1692_v36 = vpack.c.bf16 %v1682_v31, %v1681_v29  ;;  %v12342_v29 = vld [vmem:[#allocation2 + $0x220] sm:$0xff]   ;;  %v12343_v31 = vld [vmem:[#allocation2 + $0x228] sm:$0xff]  }
 0x36b   :  { %10884 = vmatprep.mubr.msk.bf16.mxu0 %vm91_vm1, %v1692_v36  ;;  %v12345_v36 = vld [vmem:[#allocation2 + $0x238] sm:$0xff]  }
 0x36d   :  { %10885 = vmatmul.mubr.msk.bf16.gmra.mrb[28].mxu0 %vm91_vm1, %v1693_v34  ;;  %v12344_v34 = vld [vmem:[#allocation2 + $0x230] sm:$0xff]  }
 0x36e   :  { %10904 = vmatprep.mubr.bf16.mxu0 %v12338_v5  ;;  %v12355_v5 = vld [vmem:[#allocation2 + $0x248] sm:$0xff]  }
 0x428   :  { %v10874_v37 = vpop.f32.mrb[16].mxu0 }
 0x429   :  { %v1755_v39 = vpop.f32.mrb[17].mxu0 }
 0x42a   :  { %v10875_v43 = vpop.f32.mrb[18].mxu0 }
 0x42b   :  { %v13351_v45 = vpack.c.bf16 %v10875_v43, %v10874_v37  ;;  %v1758_v48 = vpop.f32.mrb[19].mxu0  ;;  %v12346_v37 = vld [vmem:[#allocation2 + $0x1c0] sm:$0xff]  }
 0x42c   :  { %v13353_v50 = vpack.c.bf16 %v1758_v48, %v1755_v39  ;;  %v12347_v39 = vld [vmem:[#allocation2 + $0x1c8] sm:$0xff]  }
 0x42d   :  { %1917 = vrot.lane.b32.xlu1 %v13351_v45, %s12962_s23 }
 0x42e   :  { %1915 = vrot.lane.b32.xlu0 %v13353_v50, %s12962_s23 }
 0x430   :  { %v10878_v51 = vpop.f32.mrb[20].mxu0 }
 0x431   :  { %v1771_v53 = vpop.f32.mrb[21].mxu0 }
 0x432   :  { %v10879_v55 = vpop.f32.mrb[22].mxu0 }
 0x433   :  { %v13357_v57 = vpack.c.bf16 %v10879_v55, %v10878_v51  ;;  %v1774_v58 = vpop.f32.mrb[23].mxu0 }
 0x434   :  { %v13359_v28 = vpack.c.bf16 %v1774_v58, %v1771_v53  ;;  %v12350_v53 = vld [vmem:[#allocation2 + $0x1e0] sm:$0xff]  }
 0x435   :  { %1921 = vrot.lane.b32.xlu1 %v13357_v57, %s12962_s23 }
 0x436   :  { %1919 = vrot.lane.b32.xlu0 %v13359_v28, %s12962_s23 }
 0x438   :  { %v10882_v61 = vpop.f32.mrb[24].mxu0 }
 0x439   :  { %v1787_v63 = vpop.f32.mrb[25].mxu0 }
 0x43a   :  { %v10883_v0 = vpop.f32.mrb[26].mxu0 }
 0x43b   :  { %v13363_v1 = vpack.c.bf16 %v10883_v0, %v10882_v61  ;;  %v1790_v2 = vpop.f32.mrb[27].mxu0 }
 0x43c   :  { %v13365_v4 = vpack.c.bf16 %v1790_v2, %v1787_v63  ;;  %v12353_v63 = vld [vmem:[#allocation2 + $0x1f8] sm:$0xff]  }
 0x43d   :  { %1925 = vrot.lane.b32.xlu1 %v13363_v1, %s12962_s23 }
 0x43e   :  { %1923 = vrot.lane.b32.xlu0 %v13365_v4, %s12962_s23 }
 0x440   :  { %v10886_v6 = vpop.f32.mrb[28].mxu0 }
 0x441   :  { %v1803_v8 = vpop.f32.mrb[29].mxu0 }
 0x442   :  { %v10887_v9 = vpop.f32.mrb[30].mxu0 }
 0x443   :  { %v13369_v10 = vpack.c.bf16 %v10887_v9, %v10886_v6  ;;  %v1806_v11 = vpop.f32.mrb[31].mxu0  ;;  %v12356_v6 = vld [vmem:[#allocation2 + $0x250] sm:$0xff]   ;;  %v12357_v9 = vld [vmem:[#allocation2 + $0x258] sm:$0xff]  }
 0x444   :  { %v1825_v13 = vpack.c.bf16 %v1806_v11, %v1803_v8  ;;  %v12359_v11 = vld [vmem:[#allocation2 + $0x268] sm:$0xff]  }
 0x445   :  { %1929 = vrot.lane.b32.xlu1 %v13369_v10, %s12962_s23 }
 0x446   :  { %1927 = vrot.lane.b32.xlu0 %v1825_v13, %s12962_s23 }
 0x449   :  { %2247 = vrot.lane.b32.xlu1 %v13351_v45, %s12956_s8 }
 0x44a   :  { %2245 = vrot.lane.b32.xlu0 %v13353_v50, %s12956_s8 }
 0x44d   :  { %2251 = vrot.lane.b32.xlu1 %v13357_v57, %s12956_s8 }
 0x44e   :  { %2249 = vrot.lane.b32.xlu0 %v13359_v28, %s12956_s8 }
 0x451   :  { %2255 = vrot.lane.b32.xlu1 %v13363_v1, %s12956_s8 }
 0x452   :  { %2253 = vrot.lane.b32.xlu0 %v13365_v4, %s12956_s8 }
 0x455   :  { %2259 = vrot.lane.b32.xlu1 %v13369_v10, %s12956_s8 }
 0x456   :  { %2257 = vrot.lane.b32.xlu0 %v1825_v13, %s12956_s8 }
 0x49f   :  { %v1918_v15 = vpop.permute.xlu1 %1917 }
 0x4a0   :  { %v1916_v14 = vpop.permute.xlu0 %1915 }
 0x4a1   :  { %10888 = vmatprep.subr.bf16.mxu0 %v1916_v14 }
 0x4a2   :  { %10889 = vmatpush3.bf16.msra.mxu0 %v1916_v14  ;;  %v12361_v14 = vld [vmem:[#allocation2 + $0x278] sm:$0xff]  }
 0x4a3   :  { %10890 = vmatprep.subr.bf16.mxu0 %v1918_v15 }
 0x4a6   :  { %10891 = vmatpush3.bf16.msra.mxu0 %v1918_v15  ;;  %v13403_v15 = vld [vmem:[#allocation5 + $0x30] sm:$0xf] }
 0x4a7   :  { %v1922_v17 = vpop.permute.xlu1 %1921 }
 0x4a8   :  { %v1920_v16 = vpop.permute.xlu0 %1919 }
 0x4a9   :  { %10892 = vmatprep.subr.bf16.mxu0 %v1920_v16 }
 0x4aa   :  { %10893 = vmatpush3.bf16.msra.mxu0 %v1920_v16  ;;  %v13410_v16 = vld [vmem:[%s14834_s4 + $0x1] ss:$0 sm:$0xff] }
 0x4ab   :  { %10894 = vmatprep.subr.bf16.mxu0 %v1922_v17 }
 0x4ae   :  { %10895 = vmatpush3.bf16.msra.mxu0 %v1922_v17 }
 0x4af   :  { %v1926_v21 = vpop.permute.xlu1 %1925 }
 0x4b0   :  { %v1924_v18 = vpop.permute.xlu0 %1923 }
 0x4b1   :  { %10896 = vmatprep.subr.bf16.mxu0 %v1924_v18 }
 0x4b2   :  { %10897 = vmatpush3.bf16.msra.mxu0 %v1924_v18 }
 0x4b3   :  { %10898 = vmatprep.subr.bf16.mxu0 %v1926_v21 }
 0x4b6   :  { %10899 = vmatpush3.bf16.msra.mxu0 %v1926_v21 }
 0x4b7   :  { %v1930_v23 = vpop.permute.xlu1 %1929 }
 0x4b8   :  { %v1928_v22 = vpop.permute.xlu0 %1927 }
 0x4b9   :  { %10900 = vmatprep.subr.bf16.mxu0 %v1928_v22 }
 0x4ba   :  { %10901 = vmatpush3.bf16.msra.mxu0 %v1928_v22 }
 0x4bb   :  { %10902 = vmatprep.subr.bf16.mxu0 %v1930_v23  ;;  %v2248_v48 = vpop.permute.xlu1 %2247 }
 0x4bc   :  { %v2246_v43 = vpop.permute.xlu0 %2245 }
 0x4be   :  { %10903 = vmatpush3.bf16.msra.mxu0 %v1930_v23 }
 0x4bf   :  { %10920 = vmatprep.subr.bf16.mxu0 %v13353_v50  ;;  %v2252_v55 = vpop.permute.xlu1 %2251 }
 0x4c0   :  { %v2250_v51 = vpop.permute.xlu0 %2249 }
 0x4c1   :  { %10905 = vmatmul.mubr.bf16.vlgmr.msra.gmra.mrb[32].mxu0 %v12339_v24 }
 0x4c2   :  { %10921 = vmatpush3.bf16.msra.mxu0 %v13353_v50  ;;  %10908 = vmatprep.mubr.bf16.mxu0 %v12340_v25  ;;  %v12349_v50 = vld [vmem:[#allocation2 + $0x1d8] sm:$0xff]  }
 0x4c3   :  { %10922 = vmatprep.subr.bf16.mxu0 %v13351_v45  ;;  %v2256_v61 = vpop.permute.xlu1 %2255 }
 0x4c4   :  { %v2254_v58 = vpop.permute.xlu0 %2253 }
 0x4c6   :  { %10923 = vmatpush3.bf16.msra.mxu0 %v13351_v45  ;;  %v12348_v45 = vld [vmem:[#allocation2 + $0x1d0] sm:$0xff]  }
 0x4c7   :  { %10924 = vmatprep.subr.bf16.mxu0 %v13359_v28  ;;  %v2260_v2 = vpop.permute.xlu1 %2259 }
 0x4c8   :  { %v2258_v0 = vpop.permute.xlu0 %2257 }
 0x4c9   :  { %10909 = vmatmul.mubr.bf16.gmra.mrb[36].mxu0 %v12341_v27 }
 0x4ca   :  { %10925 = vmatpush3.bf16.msra.mxu0 %v13359_v28  ;;  %10912 = vmatprep.mubr.bf16.mxu0 %v12342_v29  ;;  %v12352_v28 = vld [vmem:[#allocation2 + $0x1f0] sm:$0xff]  }
 0x4cb   :  { %10926 = vmatprep.subr.bf16.mxu0 %v13357_v57 }
 0x4ce   :  { %10927 = vmatpush3.bf16.msra.mxu0 %v13357_v57  ;;  %v12351_v57 = vld [vmem:[#allocation2 + $0x1e8] sm:$0xff]  }
 0x4cf   :  { %10928 = vmatprep.subr.bf16.mxu0 %v13365_v4 }
 0x4d1   :  { %10913 = vmatmul.mubr.bf16.gmra.mrb[40].mxu0 %v12343_v31 }
 0x4d2   :  { %10929 = vmatpush3.bf16.msra.mxu0 %v13365_v4  ;;  %10916 = vmatprep.mubr.bf16.mxu0 %v12344_v34  ;;  %v2482_v4 = vld [vmem:[#allocation5 + $0x20] sm:$0x3] }
 0x4d3   :  { %10930 = vmatprep.subr.bf16.mxu0 %v13363_v1  ;;  %v2523_v8 = vsel %vm2521_vm4, %v2482_v4, 0 }
 0x4d6   :  { %10931 = vmatpush3.bf16.msra.mxu0 %v13363_v1  ;;  %v12354_v1 = vld [vmem:[#allocation2 + $0x240] sm:$0xff]  }
 0x4d7   :  { %10932 = vmatprep.subr.bf16.mxu0 %v1825_v13 }
 0x4d9   :  { %10917 = vmatmul.mubr.bf16.gmra.mrb[44].mxu0 %v12345_v36 }
 0x4da   :  { %10933 = vmatpush3.bf16.msra.mxu0 %v1825_v13  ;;  %10936 = vmatprep.mubr.bf16.mxu0 %v12346_v37  ;;  %v12360_v13 = vld [vmem:[#allocation2 + $0x270] sm:$0xff]  }
 0x4db   :  { %10934 = vmatprep.subr.bf16.mxu0 %v13369_v10 }
 0x4de   :  { %10935 = vmatpush3.bf16.msra.mxu0 %v13369_v10  ;;  %v12358_v10 = vld [vmem:[#allocation2 + $0x260] sm:$0xff]  }
 0x4df   :  { %10952 = vmatprep.subr.bf16.mxu0 %v2246_v43 }
 0x4e1   :  { %10937 = vmatmul.mubr.bf16.vlgmr.msra.gmra.mrb[32].mxu0 %v12347_v39 }
 0x4e2   :  { %10953 = vmatpush3.bf16.msra.mxu0 %v2246_v43  ;;  %10940 = vmatprep.mubr.bf16.mxu0 %v12348_v45 }
 0x4e3   :  { %10954 = vmatprep.subr.bf16.mxu0 %v2248_v48 }
 0x4e6   :  { %10955 = vmatpush3.bf16.msra.mxu0 %v2248_v48 }
 0x4e7   :  { %10956 = vmatprep.subr.bf16.mxu0 %v2250_v51 }
 0x4e9   :  { %10941 = vmatmul.mubr.bf16.gmra.mrb[36].mxu0 %v12349_v50 }
 0x4ea   :  { %10957 = vmatpush3.bf16.msra.mxu0 %v2250_v51  ;;  %10944 = vmatprep.mubr.bf16.mxu0 %v12350_v53 }
 0x4eb   :  { %10958 = vmatprep.subr.bf16.mxu0 %v2252_v55 }
 0x4ee   :  { %10959 = vmatpush3.bf16.msra.mxu0 %v2252_v55 }
 0x4ef   :  { %10960 = vmatprep.subr.bf16.mxu0 %v2254_v58 }
 0x4f1   :  { %10945 = vmatmul.mubr.bf16.gmra.mrb[40].mxu0 %v12351_v57 }
 0x4f2   :  { %10961 = vmatpush3.bf16.msra.mxu0 %v2254_v58  ;;  %10948 = vmatprep.mubr.bf16.mxu0 %v12352_v28 }
 0x4f3   :  { %10962 = vmatprep.subr.bf16.mxu0 %v2256_v61 }
 0x4f6   :  { %10963 = vmatpush3.bf16.msra.mxu0 %v2256_v61 }
 0x4f7   :  { %10964 = vmatprep.subr.bf16.mxu0 %v2258_v0 }
 0x4f9   :  { %10949 = vmatmul.mubr.bf16.gmra.mrb[44].mxu0 %v12353_v63 }
 0x4fa   :  { %10965 = vmatpush3.bf16.msra.mxu0 %v2258_v0  ;;  %10968 = vmatprep.mubr.bf16.mxu0 %v12354_v1 }
 0x4fb   :  { %10966 = vmatprep.subr.bf16.mxu0 %v2260_v2 }
 0x4fe   :  { %10967 = vmatpush3.bf16.msra.mxu0 %v2260_v2 }
 0x4ff   :  { %12244 = vmatprep.subr.msk.bf16.mxu0 %vm2521_vm4, %v2482_v4 }
 0x501   :  { %10969 = vmatmul.mubr.bf16.vlgmr.msra.gmra.mrb[32].mxu0 %v12355_v5 }
 0x502   :  { %10972 = vmatprep.mubr.bf16.mxu0 %v12356_v6  ;;  %10985 = vmatpush3.bf16.msra.mxu0 %v2523_v8 }
 0x503   :  { %12245 = vmatprep.subr.msk.bf16.mxu0 %vm116_vm0, %v13403_v15 }
 0x509   :  { %10973 = vmatmul.mubr.bf16.gmra.mrb[36].mxu0 %v12357_v9 }
 0x50a   :  { %10976 = vmatprep.mubr.bf16.mxu0 %v12358_v10 }
 0x511   :  { %10977 = vmatmul.mubr.bf16.gmra.mrb[40].mxu0 %v12359_v11 }
 0x512   :  { %10980 = vmatprep.mubr.bf16.mxu0 %v12360_v13 }
 0x519   :  { %10981 = vmatmul.mubr.bf16.gmra.mrb[44].mxu0 %v12361_v14 }
 0x5d4   :  { %v10970_v17 = vpop.f32.mrb[32].mxu0 }
 0x5d5   :  { %v2388_v18 = vadd.f32 %v10970_v17, %v13410_v16  ;;  %v2303_v21 = vpop.f32.mrb[33].mxu0 }
 0x5d6   :  { %v2386_v22 = vadd.f32 %v13410_v16, %v2303_v21  ;;  %v10971_v23 = vpop.f32.mrb[34].mxu0 }
 0x5d7   :  { %v2422_v24 = vmul.f32 1.442695, %v2388_v18  ;;  %v2389_v25 = vadd.f32 %v10971_v23, %v13410_v16  ;;  %v2306_v27 = vpop.f32.mrb[35].mxu0  ;;  %vm2404_vm5 = vcmp.gt.f32.partialorder %v2388_v18, 0.0 }
 0x5d8   :  { %v2418_v29 = vmul.f32 1.442695, %v2386_v22  ;;  %v2387_v31 = vadd.f32 %v13410_v16, %v2306_v27  ;;  %vm2402_vm7 = vcmp.gt.f32.partialorder %v2386_v22, 0.0 }
 0x5d9   :  { %12463 = vpow2.f32 %v2422_v24  ;;  %v2424_v34 = vmul.f32 1.442695, %v2389_v25  ;;  %vm2405_vm8 = vcmp.gt.f32.partialorder %v2389_v25, 0.0 }
 0x5da   :  { %12465 = vpow2.f32 %v2418_v29  ;;  %v2420_v36 = vmul.f32 1.442695, %v2387_v31  ;;  %vm2403_vm9 = vcmp.gt.f32.partialorder %v2387_v31, 0.0 }
 0x5db   :  { %12467 = vpow2.f32 %v2424_v34 }
 0x5dc   :  { %12469 = vpow2.f32 %v2420_v36  ;;  %v10974_v37 = vpop.f32.mrb[36].mxu0 }
 0x5dd   :  { %v13417_v39 = vadd.f32 %v10974_v37, %v13410_v16  ;;  %v2319_v43 = vpop.f32.mrb[37].mxu0 }
 0x5de   :  { %v13420_v45 = vadd.f32 %v13410_v16, %v2319_v43  ;;  %v10975_v48 = vpop.f32.mrb[38].mxu0 }
 0x5df   :  { %v2430_v50 = vmul.f32 1.442695, %v13417_v39  ;;  %v13424_v51 = vadd.f32 %v10975_v48, %v13410_v16  ;;  %v2322_v53 = vpop.f32.mrb[39].mxu0  ;;  %vm2408_vm10 = vcmp.gt.f32.partialorder %v13417_v39, 0.0 }
 0x5e0   :  { %v2426_v55 = vmul.f32 1.442695, %v13420_v45  ;;  %v13428_v57 = vadd.f32 %v13410_v16, %v2322_v53  ;;  %vm2406_vm11 = vcmp.gt.f32.partialorder %v13420_v45, 0.0 }
 0x5e1   :  { %12471 = vpow2.f32 %v2430_v50  ;;  %v2432_v58 = vmul.f32 1.442695, %v13424_v51  ;;  %vm2409_vm12 = vcmp.gt.f32.partialorder %v13424_v51, 0.0 }
 0x5e2   :  { %12473 = vpow2.f32 %v2426_v55  ;;  %v2428_v28 = vmul.f32 1.442695, %v13428_v57  ;;  %vm2407_vm13 = vcmp.gt.f32.partialorder %v13428_v57, 0.0 }
 0x5e3   :  { %v12464_v61 = vpop.eup %12463  ;;  %12475 = vpow2.f32 %v2432_v58 }
 0x5e4   :  { %v12466_v63 = vpop.eup %12465  ;;  %v9711_v0 = vadd.f32 -1.0, %v12464_v61  ;;  %12477 = vpow2.f32 %v2428_v28  ;;  %v10978_v1 = vpop.f32.mrb[40].mxu0 }
 0x5e5   :  { %v12468_v2 = vpop.eup %12467  ;;  %v9709_v4 = vadd.f32 -1.0, %v12466_v63  ;;  %v13433_v5 = vadd.f32 %v10978_v1, %v13410_v16  ;;  %v2335_v6 = vpop.f32.mrb[41].mxu0 }
 0x5e6   :  { %v12470_v8 = vpop.eup %12469  ;;  %v9712_v9 = vadd.f32 -1.0, %v12468_v2  ;;  %v13436_v10 = vadd.f32 %v13410_v16, %v2335_v6  ;;  %v10979_v11 = vpop.f32.mrb[42].mxu0  ;;  %v2468_v13 = vsel %vm2404_vm5, %v2388_v18, %v9711_v0 }
 0x5e7   :  { %v9710_v14 = vadd.f32 -1.0, %v12470_v8  ;;  %v2438_v17 = vmul.f32 1.442695, %v13433_v5  ;;  %v2338_v21 = vpop.f32.mrb[43].mxu0  ;;  %v2466_v23 = vsel %vm2402_vm7, %v2386_v22, %v9709_v4  ;;  %v13441_v29 = vadd.f32 %v10979_v11, %v13410_v16 }
 0x5e8   :  { %v2469_v24 = vsel %vm2405_vm8, %v2389_v25, %v9712_v9  ;;  %v2434_v27 = vmul.f32 1.442695, %v13436_v10  ;;  %v13444_v37 = vadd.f32 %v13410_v16, %v2338_v21  ;;  %v2661_v22 = vsel %vm116_vm0, %v13403_v15, 0 }
 0x5e9   :  { %v2484_v34 = vpack.c.bf16 %v2469_v24, %v2468_v13  ;;  %v2467_v36 = vsel %vm2403_vm9, %v2387_v31, %v9710_v14  ;;  %12479 = vpow2.f32 %v2438_v17  ;;  %v2440_v18 = vmul.f32 1.442695, %v13441_v29  ;;  %v13451_v31 = vld [vmem:[#allocation5 + $0x40] sm:$0xf] }
 0x5ea   :  { %v2483_v43 = vpack.c.bf16 %v2467_v36, %v2466_v23  ;;  %12481 = vpow2.f32 %v2434_v27  ;;  %v2436_v50 = vmul.f32 1.442695, %v13444_v37  ;;  %vm2412_vm14 = vcmp.gt.f32.partialorder %v13433_v5, 0.0 }
 0x5eb   :  { %v12472_v48 = vpop.eup %12471  ;;  %12483 = vpow2.f32 %v2440_v18  ;;  %vm2413_vm15 = vcmp.gt.f32.partialorder %v13441_v29, 0.0  ;;  %vm2410_vm2 = vcmp.gt.f32.partialorder %v13436_v10, 0.0  ;;  %vm2411_vm3 = vcmp.gt.f32.partialorder %v13444_v37, 0.0 }
 0x5ec   :  { %v12474_v25 = vpop.eup %12473  ;;  %v9715_v53 = vadd.f32 -1.0, %v12472_v48  ;;  %v10982_v55 = vpop.f32.mrb[44].mxu0  ;;  %10986 = vmatprep.mubr.msk.bf16.mxu0 %vm2496_vm6, %v2483_v43  ;;  %12485 = vpow2.f32 %v2436_v50 }
 0x5ed   :  { %v12476_v58 = vpop.eup %12475  ;;  %v9713_v28 = vadd.f32 -1.0, %v12474_v25  ;;  %v13455_v61 = vadd.f32 %v10982_v55, %v13410_v16  ;;  %v2351_v63 = vpop.f32.mrb[45].mxu0  ;;  %10987 = vmatmul.mubr.msk.bf16.vlgmr.msra.gmra.mrb[48].mxu0 %vm2496_vm6, %v2484_v34 }
 0x5ee   :  { %v12478_v15 = vpop.eup %12477  ;;  %v9716_v0 = vadd.f32 -1.0, %v12476_v58  ;;  %v2398_v1 = vadd.f32 %v13410_v16, %v2351_v63  ;;  %v10983_v2 = vpop.f32.mrb[46].mxu0  ;;  %11003 = vmatpush3.bf16.msra.mxu0 %v2661_v22  ;;  %v2472_v4 = vsel %vm2408_vm10, %v13417_v39, %v9715_v53 }
 0x5ef   :  { %v9714_v6 = vadd.f32 -1.0, %v12478_v15  ;;  %v2446_v8 = vmul.f32 1.442695, %v13455_v61  ;;  %v2354_v9 = vpop.f32.mrb[47].mxu0  ;;  %12246 = vmatprep.subr.msk.bf16.mxu0 %vm116_vm0, %v13451_v31  ;;  %v2470_v11 = vsel %vm2406_vm11, %v13420_v45, %v9713_v28  ;;  %v2401_v17 = vadd.f32 %v10983_v2, %v13410_v16 }
 0x5f0   :  { %v2473_v13 = vsel %vm2409_vm12, %v13424_v51, %v9716_v0  ;;  %v2442_v14 = vmul.f32 1.442695, %v2398_v1  ;;  %v2399_v39 = vadd.f32 %v13410_v16, %v2354_v9  ;;  %vm2416_vm5 = vcmp.gt.f32.partialorder %v13455_v61, 0.0 }
 0x5f1   :  { %v2486_v21 = vpack.c.bf16 %v2473_v13, %v2472_v4  ;;  %v2471_v23 = vsel %vm2407_vm13, %v13428_v57, %v9714_v6  ;;  %12487 = vpow2.f32 %v2446_v8  ;;  %v2448_v27 = vmul.f32 1.442695, %v2401_v17 }
 0x5f2   :  { %v2485_v24 = vpack.c.bf16 %v2471_v23, %v2470_v11  ;;  %12489 = vpow2.f32 %v2442_v14  ;;  %v2444_v36 = vmul.f32 1.442695, %v2399_v39  ;;  %vm2417_vm7 = vcmp.gt.f32.partialorder %v2401_v17, 0.0 }
 0x5f3   :  { %v12480_v34 = vpop.eup %12479  ;;  %12491 = vpow2.f32 %v2448_v27  ;;  %vm2414_vm8 = vcmp.gt.f32.partialorder %v2398_v1, 0.0  ;;  %vm2415_vm9 = vcmp.gt.f32.partialorder %v2399_v39, 0.0  ;;  %v2890_v13 = vsel %vm116_vm0, %v13451_v31, 0 }
 0x5f4   :  { %v12482_v43 = vpop.eup %12481  ;;  %10990 = vmatprep.mubr.msk.bf16.mxu0 %vm2496_vm6, %v2485_v24  ;;  %v9719_v45 = vadd.f32 -1.0, %v12480_v34  ;;  %12493 = vpow2.f32 %v2444_v36 }
 0x5f5   :  { %10991 = vmatmul.mubr.msk.bf16.gmra.mrb[52].mxu0 %vm2496_vm6, %v2486_v21  ;;  %v12484_v51 = vpop.eup %12483  ;;  %v9717_v18 = vadd.f32 -1.0, %v12482_v43 }
 0x5f6   :  { %v12486_v48 = vpop.eup %12485  ;;  %v9720_v57 = vadd.f32 -1.0, %v12484_v51  ;;  %v2476_v50 = vsel %vm2412_vm14, %v13433_v5, %v9719_v45 }
 0x5f7   :  { %v9718_v16 = vadd.f32 -1.0, %v12486_v48  ;;  %v2474_v25 = vsel %vm2410_vm2, %v13436_v10, %v9717_v18 }
 0x5f8   :  { %v2477_v22 = vsel %vm2413_vm15, %v13441_v29, %v9720_v57 }
 0x5f9   :  { %v2488_v53 = vpack.c.bf16 %v2477_v22, %v2476_v50  ;;  %v2475_v55 = vsel %vm2411_vm3, %v13444_v37, %v9718_v16 }
 0x5fa   :  { %v2487_v28 = vpack.c.bf16 %v2475_v55, %v2474_v25 }
 0x5fb   :  { %v12488_v58 = vpop.eup %12487 }
 0x5fc   :  { %v12490_v63 = vpop.eup %12489  ;;  %v9723_v15 = vadd.f32 -1.0, %v12488_v58  ;;  %10994 = vmatprep.mubr.msk.bf16.mxu0 %vm2496_vm6, %v2487_v28 }
 0x5fd   :  { %v12492_v0 = vpop.eup %12491  ;;  %v9721_v2 = vadd.f32 -1.0, %v12490_v63  ;;  %10995 = vmatmul.mubr.msk.bf16.gmra.mrb[56].mxu0 %vm2496_vm6, %v2488_v53 }
 0x5fe   :  { %v12494_v5 = vpop.eup %12493  ;;  %v9724_v4 = vadd.f32 -1.0, %v12492_v0  ;;  %v2480_v10 = vsel %vm2416_vm5, %v13455_v61, %v9723_v15 }
 0x5ff   :  { %v9722_v29 = vadd.f32 -1.0, %v12494_v5  ;;  %v2478_v6 = vsel %vm2414_vm8, %v2398_v1, %v9721_v2 }
 0x600   :  { %v2481_v37 = vsel %vm2417_vm7, %v2401_v17, %v9724_v4 }
 0x601   :  { %v2490_v8 = vpack.c.bf16 %v2481_v37, %v2480_v10  ;;  %v2479_v9 = vsel %vm2415_vm9, %v2399_v39, %v9722_v29 }
 0x602   :  { %v2489_v11 = vpack.c.bf16 %v2479_v9, %v2478_v6 }
 0x604   :  { %10998 = vmatprep.mubr.msk.bf16.mxu0 %vm2496_vm6, %v2489_v11 }
 0x605   :  { %10999 = vmatmul.mubr.msk.bf16.gmra.mrb[60].mxu0 %vm2496_vm6, %v2490_v8 }
 0x606   :  { %11004 = vmatprep.mubr.msk.bf16.mxu0 %vm91_vm1, %v2623_v42 }
 0x60d   :  { %11005 = vmatmul.mubr.msk.bf16.vlgmr.msra.gmra.mrb[48].mxu0 %vm91_vm1, %v2624_v40 }
 0x60e   :  { %11008 = vmatprep.mubr.msk.bf16.mxu0 %vm91_vm1, %v2625_v56  ;;  %11021 = vmatpush3.bf16.msra.mxu0 %v2890_v13 }
 0x615   :  { %11009 = vmatmul.mubr.msk.bf16.gmra.mrb[52].mxu0 %vm91_vm1, %v2626_v54 }
 0x616   :  { %11012 = vmatprep.mubr.msk.bf16.mxu0 %vm91_vm1, %v2627_v19 }
 0x61d   :  { %11013 = vmatmul.mubr.msk.bf16.gmra.mrb[56].mxu0 %vm91_vm1, %v2628_v20 }
 0x61e   :  { %11016 = vmatprep.mubr.msk.bf16.mxu0 %vm91_vm1, %v2629_v59 }
 0x625   :  { %11017 = vmatmul.mubr.msk.bf16.gmra.mrb[60].mxu0 %vm91_vm1, %v2630_v60 }
 0x6e0   :  { %v11006_v38 = vpop.f32.mrb[48].mxu0 }
 0x6e1   :  { %v11966_v40 = vadd.f32 %v11006_v38, %v9725_v30  ;;  %v2697_v42 = vpop.f32.mrb[49].mxu0 }
 0x6e2   :  { %v11968_v44 = vadd.f32 %v9725_v30, %v2697_v42  ;;  %v11007_v46 = vpop.f32.mrb[50].mxu0 }
 0x6e3   :  { %v11967_v49 = vadd.f32 %v11966_v40, %v9734_v32  ;;  %v11971_v52 = vadd.f32 %v13527_v35, %v11007_v46  ;;  %v2700_v54 = vpop.f32.mrb[51].mxu0 }
 0x6e4   :  { %v11969_v56 = vadd.f32 %v11968_v44, %v9734_v32  ;;  %v11973_v62 = vadd.f32 %v13527_v35, %v2700_v54 }
 0x6e5   :  { %v2796_v3 = vmul.f32 1.442695, %v11967_v49  ;;  %v2798_v7 = vmul.f32 1.442695, %v11971_v52  ;;  %vm2778_vm6 = vcmp.gt.f32.partialorder %v11967_v49, 0.0  ;;  %vm2779_vm11 = vcmp.gt.f32.partialorder %v11971_v52, 0.0 }
 0x6e6   :  { %v2792_v12 = vmul.f32 1.442695, %v11969_v56  ;;  %v2794_v19 = vmul.f32 1.442695, %v11973_v62  ;;  %vm2776_vm10 = vcmp.gt.f32.partialorder %v11969_v56, 0.0  ;;  %vm2777_vm12 = vcmp.gt.f32.partialorder %v11973_v62, 0.0 }
 0x6e7   :  { %12495 = vpow2.f32 %v2796_v3 }
 0x6e8   :  { %12497 = vpow2.f32 %v2792_v12  ;;  %v11010_v20 = vpop.f32.mrb[52].mxu0 }
 0x6e9   :  { %12499 = vpow2.f32 %v2798_v7  ;;  %v13532_v26 = vadd.f32 %v13527_v35, %v11010_v20  ;;  %v2713_v33 = vpop.f32.mrb[53].mxu0 }
 0x6ea   :  { %12501 = vpow2.f32 %v2794_v19  ;;  %v13535_v41 = vadd.f32 %v13527_v35, %v2713_v33  ;;  %v11011_v47 = vpop.f32.mrb[54].mxu0 }
 0x6eb   :  { %v2804_v59 = vmul.f32 1.442695, %v13532_v26  ;;  %v13539_v60 = vadd.f32 %v13527_v35, %v11011_v47  ;;  %v2716_v31 = vpop.f32.mrb[55].mxu0  ;;  %vm2782_vm13 = vcmp.gt.f32.partialorder %v13532_v26, 0.0 }
 0x6ec   :  { %v2800_v61 = vmul.f32 1.442695, %v13535_v41  ;;  %v13543_v1 = vadd.f32 %v13527_v35, %v2716_v31  ;;  %vm2780_vm14 = vcmp.gt.f32.partialorder %v13535_v41, 0.0 }
 0x6ed   :  { %12503 = vpow2.f32 %v2804_v59  ;;  %v2806_v14 = vmul.f32 1.442695, %v13539_v60  ;;  %vm2783_vm15 = vcmp.gt.f32.partialorder %v13539_v60, 0.0 }
 0x6ee   :  { %12505 = vpow2.f32 %v2800_v61  ;;  %v2802_v17 = vmul.f32 1.442695, %v13543_v1  ;;  %vm2781_vm2 = vcmp.gt.f32.partialorder %v13543_v1, 0.0 }
 0x6ef   :  { %12507 = vpow2.f32 %v2806_v14 }
 0x6f0   :  { %12509 = vpow2.f32 %v2802_v17  ;;  %v11014_v21 = vpop.f32.mrb[56].mxu0 }
 0x6f1   :  { %v12496_v23 = vpop.eup %12495  ;;  %v13548_v39 = vadd.f32 %v13527_v35, %v11014_v21  ;;  %v2729_v24 = vpop.f32.mrb[57].mxu0 }
 0x6f2   :  { %v12498_v27 = vpop.eup %12497  ;;  %v9745_v34 = vadd.f32 -1.0, %v12496_v23  ;;  %v13551_v36 = vadd.f32 %v13527_v35, %v2729_v24  ;;  %v11015_v43 = vpop.f32.mrb[58].mxu0 }
 0x6f3   :  { %v12500_v45 = vpop.eup %12499  ;;  %v9743_v51 = vadd.f32 -1.0, %v12498_v27  ;;  %v2812_v18 = vmul.f32 1.442695, %v13548_v39  ;;  %v13555_v48 = vadd.f32 %v13527_v35, %v11015_v43  ;;  %v2732_v57 = vpop.f32.mrb[59].mxu0  ;;  %vm2786_vm3 = vcmp.gt.f32.partialorder %v13548_v39, 0.0 }
 0x6f4   :  { %v12502_v16 = vpop.eup %12501  ;;  %v9746_v50 = vadd.f32 -1.0, %v12500_v45  ;;  %v2842_v22 = vsel %vm2778_vm6, %v11967_v49, %v9745_v34  ;;  %v2808_v25 = vmul.f32 1.442695, %v13551_v36  ;;  %v13560_v63 = vadd.f32 %v13527_v35, %v2732_v57 }
 0x6f5   :  { %v9744_v53 = vadd.f32 -1.0, %v12502_v16  ;;  %v2840_v55 = vsel %vm2776_vm10, %v11969_v56, %v9743_v51  ;;  %12511 = vpow2.f32 %v2812_v18  ;;  %v2814_v28 = vmul.f32 1.442695, %v13555_v48 }
 0x6f6   :  { %v2843_v58 = vsel %vm2779_vm11, %v11971_v52, %v9746_v50  ;;  %12513 = vpow2.f32 %v2808_v25  ;;  %v2810_v8 = vmul.f32 1.442695, %v13560_v63  ;;  %vm2787_vm5 = vcmp.gt.f32.partialorder %v13555_v48, 0.0 }
 0x6f7   :  { %v12504_v15 = vpop.eup %12503  ;;  %v2858_v0 = vpack.c.bf16 %v2843_v58, %v2842_v22  ;;  %v2841_v2 = vsel %vm2777_vm12, %v11973_v62, %v9744_v53  ;;  %12515 = vpow2.f32 %v2814_v28  ;;  %vm2784_vm7 = vcmp.gt.f32.partialorder %v13551_v36, 0.0 }
 0x6f8   :  { %v12506_v5 = vpop.eup %12505  ;;  %v2857_v4 = vpack.c.bf16 %v2841_v2, %v2840_v55  ;;  %v9749_v29 = vadd.f32 -1.0, %v12504_v15  ;;  %v11018_v10 = vpop.f32.mrb[60].mxu0  ;;  %12517 = vpow2.f32 %v2810_v8  ;;  %vm2785_vm8 = vcmp.gt.f32.partialorder %v13560_v63, 0.0 }
 0x6f9   :  { %v12508_v37 = vpop.eup %12507  ;;  %v9747_v6 = vadd.f32 -1.0, %v12506_v5  ;;  %v13565_v9 = vadd.f32 %v13527_v35, %v11018_v10  ;;  %v2745_v11 = vpop.f32.mrb[61].mxu0 }
 0x6fa   :  { %v12510_v13 = vpop.eup %12509  ;;  %v9750_v30 = vadd.f32 -1.0, %v12508_v37  ;;  %11022 = vmatprep.mubr.msk.bf16.mxu0 %vm91_vm1, %v2857_v4  ;;  %v11993_v32 = vadd.f32 %v13527_v35, %v2745_v11  ;;  %v11019_v38 = vpop.f32.mrb[62].mxu0  ;;  %v2846_v40 = vsel %vm2782_vm13, %v13532_v26, %v9749_v29 }
 0x6fb   :  { %v9748_v42 = vadd.f32 -1.0, %v12510_v13  ;;  %11023 = vmatmul.mubr.msk.bf16.vlgmr.msra.gmra.mrb[64].mxu0 %vm91_vm1, %v2858_v0  ;;  %v2748_v44 = vpop.f32.mrb[63].mxu0  ;;  %v2844_v46 = vsel %vm2780_vm14, %v13535_v41, %v9747_v6  ;;  %v2820_v52 = vmul.f32 1.442695, %v13565_v9  ;;  %v11995_v3 = vadd.f32 %v13527_v35, %v11019_v38  ;;  %v12362_v13 = vld [vmem:[#allocation2 + $0x2a0] sm:$0xff]  }
 0x6fc   :  { %v2847_v49 = vsel %vm2783_vm15, %v13539_v60, %v9750_v30  ;;  %v2816_v54 = vmul.f32 1.442695, %v11993_v32  ;;  %v11997_v7 = vadd.f32 %v13527_v35, %v2748_v44  ;;  %vm2790_vm9 = vcmp.gt.f32.partialorder %v13565_v9, 0.0  ;;  %11054 = vmatprep.mubr.bf16.mxu1 %v12362_v13 }
 0x6fd   :  { %v2860_v56 = vpack.c.bf16 %v2847_v49, %v2846_v40  ;;  %v2845_v62 = vsel %vm2781_vm2, %v13543_v1, %v9748_v42  ;;  %12519 = vpow2.f32 %v2820_v52  ;;  %v2822_v20 = vmul.f32 1.442695, %v11995_v3 }
 0x6fe   :  { %v2859_v12 = vpack.c.bf16 %v2845_v62, %v2844_v46  ;;  %12521 = vpow2.f32 %v2816_v54  ;;  %v2818_v26 = vmul.f32 1.442695, %v11997_v7  ;;  %vm2791_vm6 = vcmp.gt.f32.partialorder %v11995_v3, 0.0 }
 0x6ff   :  { %v12512_v19 = vpop.eup %12511  ;;  %12523 = vpow2.f32 %v2822_v20  ;;  %vm2788_vm10 = vcmp.gt.f32.partialorder %v11993_v32, 0.0  ;;  %vm2789_vm11 = vcmp.gt.f32.partialorder %v11997_v7, 0.0  ;;  %v12364_v20 = vld [vmem:[#allocation2 + $0x2b0] sm:$0xff]   ;;  %vm3546_vm2 = vcmask 130048  }
 0x700   :  { %11026 = vmatprep.mubr.msk.bf16.mxu0 %vm91_vm1, %v2859_v12  ;;  %v12514_v33 = vpop.eup %12513  ;;  %v9753_v41 = vadd.f32 -1.0, %v12512_v19  ;;  %12525 = vpow2.f32 %v2818_v26  ;;  %v12363_v19 = vld [vmem:[#allocation2 + $0x2a8] sm:$0xff]   ;;  %v12365_v26 = vld [vmem:[#allocation2 + $0x2b8] sm:$0xff]  }
 0x701   :  { %v12516_v47 = vpop.eup %12515  ;;  %v9751_v60 = vadd.f32 -1.0, %v12514_v33  ;;  %v12366_v33 = vld [vmem:[#allocation2 + $0x280] sm:$0xff]  }
 0x702   :  { %v9754_v59 = vadd.f32 -1.0, %v12516_v47  ;;  %v12518_v35 = vpop.eup %12517  ;;  %v2850_v31 = vsel %vm2786_vm3, %v13548_v39, %v9753_v41  ;;  %v12367_v41 = vld [vmem:[#allocation2 + $0x288] sm:$0xff]  }
 0x703   :  { %11027 = vmatmul.mubr.msk.bf16.gmra.mrb[68].mxu0 %vm91_vm1, %v2860_v56  ;;  %v9752_v14 = vadd.f32 -1.0, %v12518_v35  ;;  %v2848_v21 = vsel %vm2784_vm7, %v13551_v36, %v9751_v60  ;;  %v12378_v56 = vld [vmem:[#allocation5 + $0x50] ss:$8 sps:$4 sm:$0xff]   ;;  %v12369_v35 = vld [vmem:[#allocation2 + $0x298] sm:$0xff]  }
 0x704   :  { %v2851_v61 = vsel %vm2787_vm5, %v13555_v48, %v9754_v59  ;;  %11134 = vmatprep.subr.bf16.mxu0 %v12378_v56  ;;  %v12368_v59 = vld [vmem:[#allocation2 + $0x290] sm:$0xff]  }
 0x705   :  { %v2862_v1 = vpack.c.bf16 %v2851_v61, %v2850_v31  ;;  %v2849_v23 = vsel %vm2785_vm8, %v13560_v63, %v9752_v14  ;;  %11135 = vmatpush3.bf16.msra.mxu0 %v12378_v56  ;;  %v12370_v61 = vld [vmem:[#allocation2 + $0x2c0] sm:$0xff]  }
 0x706   :  { %v2861_v27 = vpack.c.bf16 %v2849_v23, %v2848_v21 }
 0x707   :  { %v12520_v17 = vpop.eup %12519 }
 0x708   :  { %v12522_v24 = vpop.eup %12521  ;;  %v9757_v34 = vadd.f32 -1.0, %v12520_v17  ;;  %11030 = vmatprep.mubr.msk.bf16.mxu0 %vm91_vm1, %v2861_v27 }
 0x709   :  { %v12524_v43 = vpop.eup %12523  ;;  %v9755_v45 = vadd.f32 -1.0, %v12522_v24  ;;  %v12371_v24 = vld [vmem:[#allocation2 + $0x2c8] sm:$0xff]  }
 0x70a   :  { %v12526_v39 = vpop.eup %12525  ;;  %v9758_v51 = vadd.f32 -1.0, %v12524_v43  ;;  %v2854_v48 = vsel %vm2790_vm9, %v13565_v9, %v9757_v34  ;;  %v12372_v34 = vld [vmem:[#allocation2 + $0x2d0] sm:$0xff]   ;;  %vm3681_vm9 = vcmask 523264  }
 0x70b   :  { %11031 = vmatmul.mubr.msk.bf16.gmra.mrb[72].mxu0 %vm91_vm1, %v2862_v1  ;;  %v9756_v18 = vadd.f32 -1.0, %v12526_v39  ;;  %v2852_v57 = vsel %vm2788_vm10, %v11993_v32, %v9755_v45  ;;  %v12373_v45 = vld [vmem:[#allocation2 + $0x2d8] sm:$0xff]  }
 0x70c   :  { %v2855_v36 = vsel %vm2791_vm6, %v11995_v3, %v9758_v51  ;;  %v12374_v51 = vld [vmem:[#allocation2 + $0x2e0] sm:$0xff]  }
 0x70d   :  { %v2864_v16 = vpack.c.bf16 %v2855_v36, %v2854_v48  ;;  %v2853_v50 = vsel %vm2789_vm11, %v11997_v7, %v9756_v18 }
 0x70e   :  { %v2863_v22 = vpack.c.bf16 %v2853_v50, %v2852_v57  ;;  %v12375_v50 = vld [vmem:[#allocation2 + $0x2e8] sm:$0xff]  }
 0x710   :  { %11034 = vmatprep.mubr.msk.bf16.mxu0 %vm91_vm1, %v2863_v22  ;;  %v12376_v22 = vld [vmem:[#allocation2 + $0x2f0] sm:$0xff]  }
 0x713   :  { %11035 = vmatmul.mubr.msk.bf16.gmra.mrb[76].mxu0 %vm91_vm1, %v2864_v16 }
 0x7ce   :  { %v11024_v25 = vpop.f32.mrb[64].mxu0 }
 0x7cf   :  { %v2926_v53 = vpop.f32.mrb[65].mxu0 }
 0x7d0   :  { %v11025_v55 = vpop.f32.mrb[66].mxu0 }
 0x7d1   :  { %v13596_v58 = vpack.c.bf16 %v11025_v55, %v11024_v25  ;;  %v2929_v28 = vpop.f32.mrb[67].mxu0  ;;  %v12377_v25 = vld [vmem:[#allocation2 + $0x2f8] sm:$0xff]  }
 0x7d2   :  { %v13598_v63 = vpack.c.bf16 %v2929_v28, %v2926_v53  ;;  %v9783_v53 = vld [vmem:[%s14834_s4 + $0x4] ss:$0 sm:$0xff] }
 0x7d3   :  { %3048 = vrot.lane.b32.xlu1 %v13596_v58, %s12957_s0 }
 0x7d4   :  { %3046 = vrot.lane.b32.xlu0 %v13598_v63, %s12957_s0 }
 0x7d6   :  { %v11028_v15 = vpop.f32.mrb[68].mxu0 }
 0x7d7   :  { %v2942_v0 = vpop.f32.mrb[69].mxu0 }
 0x7d8   :  { %v11029_v2 = vpop.f32.mrb[70].mxu0 }
 0x7d9   :  { %v13604_v5 = vpack.c.bf16 %v11029_v2, %v11028_v15  ;;  %v2945_v4 = vpop.f32.mrb[71].mxu0 }
 0x7da   :  { %v13606_v29 = vpack.c.bf16 %v2945_v4, %v2942_v0 }
 0x7db   :  { %3052 = vrot.lane.b32.xlu1 %v13604_v5, %s12957_s0 }
 0x7dc   :  { %3050 = vrot.lane.b32.xlu0 %v13606_v29, %s12957_s0 }
 0x7de   :  { %v11032_v10 = vpop.f32.mrb[72].mxu0 }
 0x7df   :  { %v2958_v37 = vpop.f32.mrb[73].mxu0 }
 0x7e0   :  { %v11033_v6 = vpop.f32.mrb[74].mxu0 }
 0x7e1   :  { %v13612_v8 = vpack.c.bf16 %v11033_v6, %v11032_v10  ;;  %v2961_v9 = vpop.f32.mrb[75].mxu0 }
 0x7e2   :  { %v13614_v11 = vpack.c.bf16 %v2961_v9, %v2958_v37 }
 0x7e3   :  { %3056 = vrot.lane.b32.xlu1 %v13612_v8, %s12957_s0 }
 0x7e4   :  { %3054 = vrot.lane.b32.xlu0 %v13614_v11, %s12957_s0 }
 0x7e6   :  { %v11036_v30 = vpop.f32.mrb[76].mxu0 }
 0x7e7   :  { %v2974_v32 = vpop.f32.mrb[77].mxu0 }
 0x7e8   :  { %v11037_v38 = vpop.f32.mrb[78].mxu0 }
 0x7e9   :  { %v13620_v40 = vpack.c.bf16 %v11037_v38, %v11036_v30  ;;  %v2977_v42 = vpop.f32.mrb[79].mxu0 }
 0x7ea   :  { %v13622_v44 = vpack.c.bf16 %v2977_v42, %v2974_v32 }
 0x7eb   :  { %3060 = vrot.lane.b32.xlu1 %v13620_v40, %s12957_s0 }
 0x7ec   :  { %3058 = vrot.lane.b32.xlu0 %v13622_v44, %s12957_s0 }
 0x7ef   :  { %3258 = vrot.lane.b32.xlu1 %v13596_v58, %s12959_s18 }
 0x7f0   :  { %3256 = vrot.lane.b32.xlu0 %v13598_v63, %s12959_s18 }
 0x7f3   :  { %3262 = vrot.lane.b32.xlu1 %v13604_v5, %s12959_s18 }
 0x7f4   :  { %3260 = vrot.lane.b32.xlu0 %v13606_v29, %s12959_s18 }
 0x7f7   :  { %3266 = vrot.lane.b32.xlu1 %v13612_v8, %s12959_s18 }
 0x7f8   :  { %3264 = vrot.lane.b32.xlu0 %v13614_v11, %s12959_s18 }
 0x7fb   :  { %3270 = vrot.lane.b32.xlu1 %v13620_v40, %s12959_s18 }
 0x7fc   :  { %3268 = vrot.lane.b32.xlu0 %v13622_v44, %s12959_s18 }
 0x7ff   :  { %3387 = vrot.lane.b32.xlu1 %v13596_v58, %s12961_s20 }
 0x800   :  { %3385 = vrot.lane.b32.xlu0 %v13598_v63, %s12961_s20 }
 0x803   :  { %3391 = vrot.lane.b32.xlu1 %v13604_v5, %s12961_s20 }
 0x804   :  { %3389 = vrot.lane.b32.xlu0 %v13606_v29, %s12961_s20 }
 0x807   :  { %3395 = vrot.lane.b32.xlu1 %v13612_v8, %s12961_s20 }
 0x808   :  { %3393 = vrot.lane.b32.xlu0 %v13614_v11, %s12961_s20 }
 0x80b   :  { %3399 = vrot.lane.b32.xlu1 %v13620_v40, %s12961_s20 }
 0x80c   :  { %3397 = vrot.lane.b32.xlu0 %v13622_v44, %s12961_s20 }
 0x845   :  { %v3049_v49 = vpop.permute.xlu1 %3048 }
 0x846   :  { %v3047_v46 = vpop.permute.xlu0 %3046 }
 0x847   :  { %11038 = vmatprep.subr.bf16.mxu1 %v3047_v46 }
 0x848   :  { %11039 = vmatpush3.bf16.msra.mxu1 %v3047_v46 }
 0x849   :  { %11040 = vmatprep.subr.bf16.mxu1 %v3049_v49 }
 0x84c   :  { %11041 = vmatpush3.bf16.msra.mxu1 %v3049_v49 }
 0x84d   :  { %v3053_v54 = vpop.permute.xlu1 %3052 }
 0x84e   :  { %v3051_v52 = vpop.permute.xlu0 %3050 }
 0x84f   :  { %11042 = vmatprep.subr.bf16.mxu1 %v3051_v52 }
 0x850   :  { %11043 = vmatpush3.bf16.msra.mxu1 %v3051_v52 }
 0x851   :  { %11044 = vmatprep.subr.bf16.mxu1 %v3053_v54 }
 0x854   :  { %11045 = vmatpush3.bf16.msra.mxu1 %v3053_v54 }
 0x855   :  { %v3057_v3 = vpop.permute.xlu1 %3056 }
 0x856   :  { %v3055_v62 = vpop.permute.xlu0 %3054 }
 0x857   :  { %11046 = vmatprep.subr.bf16.mxu1 %v3055_v62 }
 0x858   :  { %11047 = vmatpush3.bf16.msra.mxu1 %v3055_v62 }
 0x859   :  { %11048 = vmatprep.subr.bf16.mxu1 %v3057_v3 }
 0x85c   :  { %11049 = vmatpush3.bf16.msra.mxu1 %v3057_v3 }
 0x85d   :  { %v3061_v12 = vpop.permute.xlu1 %3060 }
 0x85e   :  { %v3059_v7 = vpop.permute.xlu0 %3058 }
 0x85f   :  { %11050 = vmatprep.subr.bf16.mxu1 %v3059_v7 }
 0x860   :  { %11051 = vmatpush3.bf16.msra.mxu1 %v3059_v7 }
 0x861   :  { %11052 = vmatprep.subr.bf16.mxu1 %v3061_v12  ;;  %v3259_v60 = vpop.permute.xlu1 %3258 }
 0x862   :  { %v3257_v47 = vpop.permute.xlu0 %3256 }
 0x864   :  { %11053 = vmatpush3.bf16.msra.mxu1 %v3061_v12 }
 0x865   :  { %11062 = vmatprep.subr.bf16.mxu1 %v13598_v63  ;;  %v3263_v1 = vpop.permute.xlu1 %3262 }
 0x866   :  { %v3261_v31 = vpop.permute.xlu0 %3260 }
 0x867   :  { %11055 = vmatmul.mubr.bf16.vlgmr.msra.gmra.mrb[16].mxu1 %v12363_v19 }
 0x868   :  { %11063 = vmatpush3.bf16.msra.mxu1 %v13598_v63  ;;  %11058 = vmatprep.mubr.bf16.mxu1 %v12364_v20 }
 0x869   :  { %11064 = vmatprep.subr.bf16.mxu1 %v13596_v58  ;;  %v3267_v17 = vpop.permute.xlu1 %3266 }
 0x86a   :  { %v3265_v14 = vpop.permute.xlu0 %3264 }
 0x86c   :  { %11065 = vmatpush3.bf16.msra.mxu1 %v13596_v58 }
 0x86d   :  { %11066 = vmatprep.subr.bf16.mxu1 %v13606_v29  ;;  %v3271_v23 = vpop.permute.xlu1 %3270 }
 0x86e   :  { %v3269_v21 = vpop.permute.xlu0 %3268 }
 0x86f   :  { %11059 = vmatmul.mubr.bf16.gmra.mrb[20].mxu1 %v12365_v26 }
 0x870   :  { %11067 = vmatpush3.bf16.msra.mxu1 %v13606_v29  ;;  %11078 = vmatprep.mubr.bf16.mxu1 %v12366_v33 }
 0x871   :  { %11068 = vmatprep.subr.bf16.mxu1 %v13604_v5  ;;  %v3388_v43 = vpop.permute.xlu1 %3387 }
 0x872   :  { %v3386_v27 = vpop.permute.xlu0 %3385 }
 0x874   :  { %11069 = vmatpush3.bf16.msra.mxu1 %v13604_v5 }
 0x875   :  { %11070 = vmatprep.subr.bf16.mxu1 %v13614_v11  ;;  %v3392_v18 = vpop.permute.xlu1 %3391 }
 0x876   :  { %v3390_v39 = vpop.permute.xlu0 %3389 }
 0x878   :  { %11071 = vmatpush3.bf16.msra.mxu1 %v13614_v11 }
 0x879   :  { %11072 = vmatprep.subr.bf16.mxu1 %v13612_v8  ;;  %v3396_v36 = vpop.permute.xlu1 %3395 }
 0x87a   :  { %v3394_v48 = vpop.permute.xlu0 %3393 }
 0x87c   :  { %11073 = vmatpush3.bf16.msra.mxu1 %v13612_v8 }
 0x87d   :  { %11074 = vmatprep.subr.bf16.mxu1 %v13622_v44  ;;  %v3400_v16 = vpop.permute.xlu1 %3399 }
 0x87e   :  { %v3398_v57 = vpop.permute.xlu0 %3397 }
 0x880   :  { %11075 = vmatpush3.bf16.msra.mxu1 %v13622_v44 }
 0x881   :  { %11076 = vmatprep.subr.bf16.mxu1 %v13620_v40 }
 0x884   :  { %11077 = vmatpush3.bf16.msra.mxu1 %v13620_v40 }
 0x885   :  { %11086 = vmatprep.subr.bf16.mxu1 %v3257_v47 }
 0x887   :  { %11079 = vmatmul.mubr.bf16.vlgmr.msra.gmra.mrb[16].mxu1 %v12367_v41 }
 0x888   :  { %11087 = vmatpush3.bf16.msra.mxu1 %v3257_v47  ;;  %11082 = vmatprep.mubr.bf16.mxu1 %v12368_v59 }
 0x889   :  { %11088 = vmatprep.subr.bf16.mxu1 %v3259_v60 }
 0x88c   :  { %11089 = vmatpush3.bf16.msra.mxu1 %v3259_v60 }
 0x88d   :  { %11090 = vmatprep.subr.bf16.mxu1 %v3261_v31 }
 0x88f   :  { %11083 = vmatmul.mubr.bf16.gmra.mrb[20].mxu1 %v12369_v35 }
 0x890   :  { %11091 = vmatpush3.bf16.msra.mxu1 %v3261_v31  ;;  %11102 = vmatprep.mubr.bf16.mxu1 %v12370_v61 }
 0x891   :  { %11092 = vmatprep.subr.bf16.mxu1 %v3263_v1 }
 0x894   :  { %11093 = vmatpush3.bf16.msra.mxu1 %v3263_v1 }
 0x895   :  { %11094 = vmatprep.subr.bf16.mxu1 %v3265_v14 }
 0x898   :  { %11095 = vmatpush3.bf16.msra.mxu1 %v3265_v14 }
 0x899   :  { %11096 = vmatprep.subr.bf16.mxu1 %v3267_v17 }
 0x89c   :  { %11097 = vmatpush3.bf16.msra.mxu1 %v3267_v17 }
 0x89d   :  { %11098 = vmatprep.subr.bf16.mxu1 %v3269_v21 }
 0x8a0   :  { %11099 = vmatpush3.bf16.msra.mxu1 %v3269_v21 }
 0x8a1   :  { %11100 = vmatprep.subr.bf16.mxu1 %v3271_v23 }
 0x8a4   :  { %11101 = vmatpush3.bf16.msra.mxu1 %v3271_v23 }
 0x8a5   :  { %11110 = vmatprep.subr.bf16.mxu1 %v3386_v27 }
 0x8a7   :  { %11103 = vmatmul.mubr.bf16.vlgmr.msra.gmra.mrb[16].mxu1 %v12371_v24 }
 0x8a8   :  { %11111 = vmatpush3.bf16.msra.mxu1 %v3386_v27  ;;  %11106 = vmatprep.mubr.bf16.mxu1 %v12372_v34 }
 0x8a9   :  { %11112 = vmatprep.subr.bf16.mxu1 %v3388_v43 }
 0x8ac   :  { %11113 = vmatpush3.bf16.msra.mxu1 %v3388_v43 }
 0x8ad   :  { %11114 = vmatprep.subr.bf16.mxu1 %v3390_v39 }
 0x8af   :  { %11107 = vmatmul.mubr.bf16.gmra.mrb[20].mxu1 %v12373_v45 }
 0x8b0   :  { %11115 = vmatpush3.bf16.msra.mxu1 %v3390_v39  ;;  %11126 = vmatprep.mubr.bf16.mxu1 %v12374_v51 }
 0x8b1   :  { %11116 = vmatprep.subr.bf16.mxu1 %v3392_v18 }
 0x8b4   :  { %11117 = vmatpush3.bf16.msra.mxu1 %v3392_v18 }
 0x8b5   :  { %11118 = vmatprep.subr.bf16.mxu1 %v3394_v48 }
 0x8b8   :  { %11119 = vmatpush3.bf16.msra.mxu1 %v3394_v48 }
 0x8b9   :  { %11120 = vmatprep.subr.bf16.mxu1 %v3396_v36 }
 0x8bc   :  { %11121 = vmatpush3.bf16.msra.mxu1 %v3396_v36 }
 0x8bd   :  { %11122 = vmatprep.subr.bf16.mxu1 %v3398_v57 }
 0x8c0   :  { %11123 = vmatpush3.bf16.msra.mxu1 %v3398_v57 }
 0x8c1   :  { %11124 = vmatprep.subr.bf16.mxu1 %v3400_v16 }
 0x8c4   :  { %11125 = vmatpush3.bf16.msra.mxu1 %v3400_v16 }
 0x8c7   :  { %11127 = vmatmul.mubr.bf16.vlgmr.msra.gmra.mrb[16].mxu1 %v12375_v50 }
 0x8c8   :  { %11130 = vmatprep.mubr.bf16.mxu1 %v12376_v22 }
 0x8cf   :  { %11131 = vmatmul.mubr.bf16.gmra.mrb[20].mxu1 %v12377_v25  ;;  %v12379_v25 = vld [vmem:[#allocation2 + $0x320] sm:$0xff]  }
 0x99a   :  { %v11128_v55 = vpop.f32.mrb[16].mxu1 }
 0x99b   :  { %v13679_v58 = vadd.f32 %v11128_v55, %v9783_v53  ;;  %v3443_v28 = vpop.f32.mrb[17].mxu1 }
 0x99c   :  { %v13681_v63 = vadd.f32 %v9783_v53, %v3443_v28  ;;  %v11129_v15 = vpop.f32.mrb[18].mxu1 }
 0x99d   :  { %v3506_v0 = vmul.f32 1.442695, %v13679_v58  ;;  %v13684_v2 = vadd.f32 %v11129_v15, %v9783_v53  ;;  %v3446_v5 = vpop.f32.mrb[19].mxu1  ;;  %vm3496_vm12 = vcmp.gt.f32.partialorder %v13679_v58, 0.0 }
 0x99e   :  { %v3502_v4 = vmul.f32 1.442695, %v13681_v63  ;;  %v13687_v29 = vadd.f32 %v9783_v53, %v3446_v5  ;;  %vm3494_vm14 = vcmp.gt.f32.partialorder %v13681_v63, 0.0 }
 0x99f   :  { %12527 = vpow2.f32 %v3506_v0  ;;  %v3508_v10 = vmul.f32 1.442695, %v13684_v2  ;;  %v4126_v37 = vpack.c.bf16 %v13684_v2, %v13679_v58  ;;  %vm3497_vm13 = vcmp.gt.f32.partialorder %v13684_v2, 0.0 }
 0x9a0   :  { %12529 = vpow2.f32 %v3502_v4  ;;  %v3504_v6 = vmul.f32 1.442695, %v13687_v29  ;;  %v4125_v8 = vpack.c.bf16 %v13687_v29, %v13681_v63  ;;  %vm3495_vm15 = vcmp.gt.f32.partialorder %v13687_v29, 0.0 }
 0x9a1   :  { %12531 = vpow2.f32 %v3508_v10 }
 0x9a2   :  { %12533 = vpow2.f32 %v3504_v6  ;;  %v11132_v9 = vpop.f32.mrb[20].mxu1 }
 0x9a3   :  { %v13695_v11 = vadd.f32 %v11132_v9, %v9783_v53  ;;  %v3459_v13 = vpop.f32.mrb[21].mxu1 }
 0x9a4   :  { %v13697_v30 = vadd.f32 %v9783_v53, %v3459_v13  ;;  %v11133_v32 = vpop.f32.mrb[22].mxu1  ;;  %v12380_v13 = vld [vmem:[#allocation2 + $0x328] sm:$0xff]  }
 0x9a5   :  { %v3514_v38 = vmul.f32 1.442695, %v13695_v11  ;;  %v13700_v40 = vadd.f32 %v11133_v32, %v9783_v53  ;;  %v3462_v42 = vpop.f32.mrb[23].mxu1  ;;  %vm3500_vm3 = vcmp.gt.f32.partialorder %v13695_v11, 0.0  ;;  %v12381_v32 = vld [vmem:[#allocation2 + $0x330] sm:$0xff]  }
 0x9a6   :  { %v3510_v44 = vmul.f32 1.442695, %v13697_v30  ;;  %v13703_v46 = vadd.f32 %v9783_v53, %v3462_v42  ;;  %vm3498_vm7 = vcmp.gt.f32.partialorder %v13697_v30, 0.0  ;;  %v12383_v42 = vld [vmem:[#allocation2 + $0x300] sm:$0xff]  }
 0x9a7   :  { %12535 = vpow2.f32 %v3514_v38  ;;  %v3516_v49 = vmul.f32 1.442695, %v13700_v40  ;;  %v4128_v52 = vpack.c.bf16 %v13700_v40, %v13695_v11  ;;  %vm3501_vm5 = vcmp.gt.f32.partialorder %v13700_v40, 0.0  ;;  %v12382_v38 = vld [vmem:[#allocation2 + $0x338] sm:$0xff]  }
 0x9a8   :  { %12537 = vpow2.f32 %v3510_v44  ;;  %v3512_v54 = vmul.f32 1.442695, %v13703_v46  ;;  %v4127_v56 = vpack.c.bf16 %v13703_v46, %v13697_v30  ;;  %vm3499_vm8 = vcmp.gt.f32.partialorder %v13703_v46, 0.0  ;;  %v12384_v44 = vld [vmem:[#allocation2 + $0x308] sm:$0xff]  }
 0x9a9   :  { %v12528_v62 = vpop.eup %12527  ;;  %12539 = vpow2.f32 %v3516_v49 }
 0x9aa   :  { %v12530_v3 = vpop.eup %12529  ;;  %v9786_v7 = vadd.f32 -1.0, %v12528_v62  ;;  %12541 = vpow2.f32 %v3512_v54  ;;  %v12385_v54 = vld [vmem:[#allocation2 + $0x310] sm:$0xff]  }
 0x9ab   :  { %v12532_v12 = vpop.eup %12531  ;;  %v9784_v19 = vadd.f32 -1.0, %v12530_v3  ;;  %v12386_v3 = vld [vmem:[#allocation2 + $0x318] sm:$0xff]  }
 0x9ac   :  { %v12534_v20 = vpop.eup %12533  ;;  %v9787_v26 = vadd.f32 -1.0, %v12532_v12  ;;  %v3528_v41 = vsel %vm3496_vm12, %v13679_v58, %v9786_v7  ;;  %v12387_v12 = vld [vmem:[#allocation2 + $0x340] sm:$0xff]   ;;  %v9835_v58 = vld [vmem:[%s14834_s4 + $0x7] ss:$0 sm:$0xff] }
 0x9ad   :  { %v9785_v33 = vadd.f32 -1.0, %v12534_v20  ;;  %v3526_v60 = vsel %vm3494_vm14, %v13681_v63, %v9784_v19  ;;  %v12388_v20 = vld [vmem:[#allocation2 + $0x348] sm:$0xff]   ;;  %v9830_v63 = vld [vmem:[%s14834_s4 + $0x6] ss:$0 sm:$0xff] }
 0x9ae   :  { %v3529_v47 = vsel %vm3497_vm13, %v13684_v2, %v9787_v26  ;;  %v12389_v26 = vld [vmem:[#allocation2 + $0x350] sm:$0xff]   ;;  %v12004_v2 = vadd.f32 %v9835_v58, %v9830_v63 }
 0x9af   :  { %v3537_v59 = vpack.c.bf16 %v3529_v47, %v3528_v41  ;;  %v3527_v35 = vsel %vm3495_vm15, %v13687_v29, %v9785_v33  ;;  %v12390_v33 = vld [vmem:[#allocation2 + $0x358] sm:$0xff]   ;;  %v4033_v41 = vld [vmem:[#allocation5 + $0x60] sm:$0xf] }
 0x9b0   :  { %v3536_v31 = vpack.c.bf16 %v3527_v35, %v3526_v60  ;;  %v4056_v47 = vsel %vm116_vm0, %v4033_v41, 0  ;;  %v9821_v60 = vld [vmem:[%s14834_s4 + $0x5] ss:$0 sm:$0xff] }
 0x9b1   :  { %v12536_v61 = vpop.eup %12535 }
 0x9b2   :  { %v12538_v1 = vpop.eup %12537  ;;  %v9790_v14 = vadd.f32 -1.0, %v12536_v61  ;;  %11136 = vmatprep.mubr.msk.bf16.mxu0 %vm3546_vm2, %v3536_v31 }
 0x9b3   :  { %v12540_v17 = vpop.eup %12539  ;;  %v9788_v21 = vadd.f32 -1.0, %v12538_v1  ;;  %11137 = vmatmul.mubr.msk.bf16.vlgmr.msra.gmra.mrb[80].mxu0 %vm3546_vm2, %v3537_v59  ;;  %v12391_v59 = vld [vmem:[#allocation5 + $0x70] ss:$8 sps:$4 sm:$0xff]  }
 0x9b4   :  { %v12542_v23 = vpop.eup %12541  ;;  %v9791_v24 = vadd.f32 -1.0, %v12540_v17  ;;  %v3532_v34 = vsel %vm3500_vm3, %v13695_v11, %v9790_v14 }
 0x9b5   :  { %v9789_v27 = vadd.f32 -1.0, %v12542_v23  ;;  %v3530_v45 = vsel %vm3498_vm7, %v13697_v30, %v9788_v21 }
 0x9b6   :  { %v3533_v43 = vsel %vm3501_vm5, %v13700_v40, %v9791_v24 }
 0x9b7   :  { %v3531_v39 = vsel %vm3499_vm8, %v13703_v46, %v9789_v27  ;;  %v3539_v51 = vpack.c.bf16 %v3533_v43, %v3532_v34 }
 0x9b8   :  { %v3538_v18 = vpack.c.bf16 %v3531_v39, %v3530_v45 }
 0x9ba   :  { %11140 = vmatprep.mubr.msk.bf16.mxu0 %vm3546_vm2, %v3538_v18 }
 0x9bb   :  { %11141 = vmatmul.mubr.msk.bf16.gmra.mrb[84].mxu0 %vm3546_vm2, %v3539_v51 }
 0x9bc   :  { %11152 = vmatprep.mubr.msk.bf16.mxu0 %vm3681_vm9, %v12379_v25 }
 0xa86   :  { %v11138_v48 = vpop.f32.mrb[80].mxu0 }
 0xa87   :  { %v3593_v36 = vpop.f32.mrb[81].mxu0 }
 0xa88   :  { %v11139_v57 = vpop.f32.mrb[82].mxu0 }
 0xa89   :  { %v3626_v16 = vpack.c.bf16 %v11139_v57, %v11138_v48  ;;  %v3596_v50 = vpop.f32.mrb[83].mxu0 }
 0xa8a   :  { %v3625_v22 = vpack.c.bf16 %v3596_v50, %v3593_v36 }
 0xa8b   :  { %3671 = vrot.lane.b32.xlu1 %v3626_v16, %s12956_s8 }
 0xa8c   :  { %3669 = vrot.lane.b32.xlu0 %v3625_v22, %s12956_s8 }
 0xa8e   :  { %v11142_v53 = vpop.f32.mrb[84].mxu0 }
 0xa8f   :  { %v3609_v55 = vpop.f32.mrb[85].mxu0 }
 0xa90   :  { %v11143_v28 = vpop.f32.mrb[86].mxu0 }
 0xa91   :  { %v3628_v15 = vpack.c.bf16 %v11143_v28, %v11142_v53  ;;  %v3612_v0 = vpop.f32.mrb[87].mxu0 }
 0xa92   :  { %v3627_v5 = vpack.c.bf16 %v3612_v0, %v3609_v55 }
 0xa93   :  { %3675 = vrot.lane.b32.xlu1 %v3628_v15, %s12956_s8 }
 0xa94   :  { %3673 = vrot.lane.b32.xlu0 %v3627_v5, %s12956_s8 }
 0xa97   :  { %3886 = vrot.lane.b32.xlu1 %v3626_v16, %s12957_s0 }
 0xa98   :  { %3884 = vrot.lane.b32.xlu0 %v3625_v22, %s12957_s0 }
 0xa9b   :  { %3890 = vrot.lane.b32.xlu1 %v3628_v15, %s12957_s0 }
 0xa9c   :  { %3888 = vrot.lane.b32.xlu0 %v3627_v5, %s12957_s0 }
 0xafd   :  { %v3672_v10 = vpop.permute.xlu1 %3671 }
 0xafe   :  { %v3670_v4 = vpop.permute.xlu0 %3669 }
 0xaff   :  { %11144 = vmatprep.subr.bf16.mxu0 %v3670_v4 }
 0xb00   :  { %11145 = vmatpush3.bf16.msra.mxu0 %v3670_v4 }
 0xb01   :  { %11146 = vmatprep.subr.bf16.mxu0 %v3672_v10 }
 0xb04   :  { %11147 = vmatpush3.bf16.msra.mxu0 %v3672_v10 }
 0xb05   :  { %v3676_v9 = vpop.permute.xlu1 %3675 }
 0xb06   :  { %v3674_v6 = vpop.permute.xlu0 %3673 }
 0xb07   :  { %11148 = vmatprep.subr.bf16.mxu0 %v3674_v6 }
 0xb08   :  { %11149 = vmatpush3.bf16.msra.mxu0 %v3674_v6 }
 0xb09   :  { %11150 = vmatprep.subr.bf16.mxu0 %v3676_v9  ;;  %v3887_v62 = vpop.permute.xlu1 %3886 }
 0xb0a   :  { %v3885_v49 = vpop.permute.xlu0 %3884 }
 0xb0c   :  { %11151 = vmatpush3.bf16.msra.mxu0 %v3676_v9 }
 0xb0d   :  { %11160 = vmatprep.subr.bf16.mxu0 %v3625_v22  ;;  %v3891_v19 = vpop.permute.xlu1 %3890 }
 0xb0e   :  { %v3889_v7 = vpop.permute.xlu0 %3888 }
 0xb0f   :  { %11153 = vmatmul.mubr.msk.bf16.vlgmr.msra.gmra.mrb[88].mxu0 %vm3681_vm9, %v12380_v13 }
 0xb10   :  { %11161 = vmatpush3.bf16.msra.mxu0 %v3625_v22  ;;  %11156 = vmatprep.mubr.msk.bf16.mxu0 %vm3681_vm9, %v12381_v32 }
 0xb11   :  { %11162 = vmatprep.subr.bf16.mxu0 %v3626_v16 }
 0xb14   :  { %11163 = vmatpush3.bf16.msra.mxu0 %v3626_v16 }
 0xb15   :  { %11164 = vmatprep.subr.bf16.mxu0 %v3627_v5 }
 0xb17   :  { %11157 = vmatmul.mubr.msk.bf16.gmra.mrb[92].mxu0 %vm3681_vm9, %v12382_v38 }
 0xb18   :  { %11165 = vmatpush3.bf16.msra.mxu0 %v3627_v5  ;;  %11168 = vmatprep.mubr.msk.bf16.mxu0 %vm3681_vm9, %v12383_v42 }
 0xb19   :  { %11166 = vmatprep.subr.bf16.mxu0 %v3628_v15 }
 0xb1c   :  { %11167 = vmatpush3.bf16.msra.mxu0 %v3628_v15 }
 0xb1d   :  { %11176 = vmatprep.subr.bf16.mxu0 %v3885_v49 }
 0xb1f   :  { %11169 = vmatmul.mubr.msk.bf16.vlgmr.msra.gmra.mrb[88].mxu0 %vm3681_vm9, %v12384_v44 }
 0xb20   :  { %11177 = vmatpush3.bf16.msra.mxu0 %v3885_v49  ;;  %11172 = vmatprep.mubr.msk.bf16.mxu0 %vm3681_vm9, %v12385_v54 }
 0xb21   :  { %11178 = vmatprep.subr.bf16.mxu0 %v3887_v62 }
 0xb24   :  { %11179 = vmatpush3.bf16.msra.mxu0 %v3887_v62 }
 0xb25   :  { %11180 = vmatprep.subr.bf16.mxu0 %v3889_v7 }
 0xb27   :  { %11173 = vmatmul.mubr.msk.bf16.gmra.mrb[92].mxu0 %vm3681_vm9, %v12386_v3 }
 0xb28   :  { %11181 = vmatpush3.bf16.msra.mxu0 %v3889_v7  ;;  %11184 = vmatprep.mubr.msk.bf16.mxu0 %vm3681_vm9, %v12387_v12 }
 0xb29   :  { %11182 = vmatprep.subr.bf16.mxu0 %v3891_v19 }
 0xb2c   :  { %11183 = vmatpush3.bf16.msra.mxu0 %v3891_v19 }
 0xb2d   :  { %12247 = vmatprep.subr.msk.bf16.mxu0 %vm116_vm0, %v4033_v41 }
 0xb2f   :  { %11185 = vmatmul.mubr.msk.bf16.vlgmr.msra.gmra.mrb[88].mxu0 %vm3681_vm9, %v12388_v20 }
 0xb30   :  { %11188 = vmatprep.mubr.msk.bf16.mxu0 %vm3681_vm9, %v12389_v26  ;;  %11193 = vmatpush3.bf16.msra.mxu0 %v4056_v47 }
 0xb31   :  { %11202 = vmatprep.subr.bf16.mxu0 %v12391_v59 }
 0xb37   :  { %11189 = vmatmul.mubr.msk.bf16.gmra.mrb[92].mxu0 %vm3681_vm9, %v12390_v33 }
 0xc02   :  { %v11186_v35 = vpop.f32.mrb[88].mxu0 }
 0xc03   :  { %v3987_v31 = vadd.f32 %v11186_v35, %v9821_v60  ;;  %v3942_v61 = vpop.f32.mrb[89].mxu0 }
 0xc04   :  { %v3985_v1 = vadd.f32 %v9821_v60, %v3942_v61  ;;  %v11187_v14 = vpop.f32.mrb[90].mxu0 }
 0xc05   :  { %v4005_v17 = vmul.f32 1.442695, %v3987_v31  ;;  %v3988_v21 = vadd.f32 %v11187_v14, %v9821_v60  ;;  %v3945_v23 = vpop.f32.mrb[91].mxu0  ;;  %vm3995_vm6 = vcmp.gt.f32.partialorder %v3987_v31, 0.0 }
 0xc06   :  { %v4001_v24 = vmul.f32 1.442695, %v3985_v1  ;;  %v3986_v27 = vadd.f32 %v9821_v60, %v3945_v23  ;;  %vm3993_vm11 = vcmp.gt.f32.partialorder %v3985_v1, 0.0 }
 0xc07   :  { %12543 = vpow2.f32 %v4005_v17  ;;  %v4007_v34 = vmul.f32 1.442695, %v3988_v21  ;;  %vm3996_vm10 = vcmp.gt.f32.partialorder %v3988_v21, 0.0 }
 0xc08   :  { %12545 = vpow2.f32 %v4001_v24  ;;  %v4003_v43 = vmul.f32 1.442695, %v3986_v27  ;;  %vm3994_vm12 = vcmp.gt.f32.partialorder %v3986_v27, 0.0 }
 0xc09   :  { %12547 = vpow2.f32 %v4007_v34 }
 0xc0a   :  { %12549 = vpow2.f32 %v4003_v43  ;;  %v11190_v45 = vpop.f32.mrb[92].mxu0 }
 0xc0b   :  { %v3991_v39 = vadd.f32 %v11190_v45, %v9821_v60  ;;  %v3958_v51 = vpop.f32.mrb[93].mxu0 }
 0xc0c   :  { %v3989_v18 = vadd.f32 %v9821_v60, %v3958_v51  ;;  %v11191_v48 = vpop.f32.mrb[94].mxu0 }
 0xc0d   :  { %v4013_v36 = vmul.f32 1.442695, %v3991_v39  ;;  %v3992_v57 = vadd.f32 %v11191_v48, %v9821_v60  ;;  %v3961_v16 = vpop.f32.mrb[95].mxu0  ;;  %vm3999_vm13 = vcmp.gt.f32.partialorder %v3991_v39, 0.0 }
 0xc0e   :  { %v4009_v50 = vmul.f32 1.442695, %v3989_v18  ;;  %v3990_v22 = vadd.f32 %v9821_v60, %v3961_v16  ;;  %vm3997_vm15 = vcmp.gt.f32.partialorder %v3989_v18, 0.0 }
 0xc0f   :  { %12551 = vpow2.f32 %v4013_v36  ;;  %v4015_v25 = vmul.f32 1.442695, %v3992_v57  ;;  %vm4000_vm14 = vcmp.gt.f32.partialorder %v3992_v57, 0.0 }
 0xc10   :  { %12553 = vpow2.f32 %v4009_v50  ;;  %v4011_v53 = vmul.f32 1.442695, %v3990_v22  ;;  %vm3998_vm3 = vcmp.gt.f32.partialorder %v3990_v22, 0.0 }
 0xc11   :  { %v12544_v55 = vpop.eup %12543  ;;  %12555 = vpow2.f32 %v4015_v25 }
 0xc12   :  { %v12546_v28 = vpop.eup %12545  ;;  %v9824_v15 = vadd.f32 -1.0, %v12544_v55  ;;  %12557 = vpow2.f32 %v4011_v53 }
 0xc13   :  { %v12548_v0 = vpop.eup %12547  ;;  %v9822_v5 = vadd.f32 -1.0, %v12546_v28 }
 0xc14   :  { %v12550_v4 = vpop.eup %12549  ;;  %v9825_v10 = vadd.f32 -1.0, %v12548_v0  ;;  %v4027_v9 = vsel %vm3995_vm6, %v3987_v31, %v9824_v15 }
 0xc15   :  { %v9823_v6 = vadd.f32 -1.0, %v12550_v4  ;;  %v4025_v32 = vsel %vm3993_vm11, %v3985_v1, %v9822_v5 }
 0xc16   :  { %v4028_v13 = vsel %vm3996_vm10, %v3988_v21, %v9825_v10 }
 0xc17   :  { %v4035_v38 = vpack.c.bf16 %v4028_v13, %v4027_v9  ;;  %v4026_v42 = vsel %vm3994_vm12, %v3986_v27, %v9823_v6 }
 0xc18   :  { %v4034_v44 = vpack.c.bf16 %v4026_v42, %v4025_v32 }
 0xc19   :  { %v12552_v49 = vpop.eup %12551 }
 0xc1a   :  { %v12554_v54 = vpop.eup %12553  ;;  %v9828_v62 = vadd.f32 -1.0, %v12552_v49  ;;  %11194 = vmatprep.mubr.msk.bf16.mxu0 %vm91_vm1, %v4034_v44 }
 0xc1b   :  { %v12556_v3 = vpop.eup %12555  ;;  %v9826_v7 = vadd.f32 -1.0, %v12554_v54  ;;  %11195 = vmatmul.mubr.msk.bf16.vlgmr.msra.gmra.mrb[96].mxu0 %vm91_vm1, %v4035_v38 }
 0xc1c   :  { %v12558_v12 = vpop.eup %12557  ;;  %v9829_v19 = vadd.f32 -1.0, %v12556_v3  ;;  %11203 = vmatpush3.bf16.msra.mxu0 %v12391_v59  ;;  %v4031_v26 = vsel %vm3999_vm13, %v3991_v39, %v9828_v62  ;;  %v12392_v59 = vld [vmem:[#allocation5 + $0x80] ss:$8 sps:$4 sm:$0xff]   ;;  %vm7894_vm13 = vcmask 1045504  }
 0xc1d   :  { %v9827_v20 = vadd.f32 -1.0, %v12558_v12  ;;  %v4029_v41 = vsel %vm3997_vm15, %v3989_v18, %v9826_v7  ;;  %11212 = vmatprep.subr.bf16.mxu0 %v12392_v59 }
 0xc1e   :  { %v4032_v33 = vsel %vm4000_vm14, %v3992_v57, %v9829_v19 }
 0xc1f   :  { %v4037_v47 = vpack.c.bf16 %v4032_v33, %v4031_v26  ;;  %v4030_v60 = vsel %vm3998_vm3, %v3990_v22, %v9827_v20 }
 0xc20   :  { %v4036_v35 = vpack.c.bf16 %v4030_v60, %v4029_v41 }
 0xc22   :  { %11198 = vmatprep.mubr.msk.bf16.mxu0 %vm91_vm1, %v4036_v35 }
 0xc23   :  { %11199 = vmatmul.mubr.msk.bf16.gmra.mrb[100].mxu0 %vm91_vm1, %v4037_v47 }
 0xc24   :  { %11204 = vmatprep.mubr.msk.bf16.mxu0 %vm3546_vm2, %v4125_v8 }
 0xc2b   :  { %11205 = vmatmul.mubr.msk.bf16.vlgmr.msra.gmra.mrb[96].mxu0 %vm3546_vm2, %v4126_v37 }
 0xc2c   :  { %11208 = vmatprep.mubr.msk.bf16.mxu0 %vm3546_vm2, %v4127_v56  ;;  %11213 = vmatpush3.bf16.msra.mxu0 %v12392_v59  ;;  %v12393_v59 = vld [vmem:[#allocation2 + $0x370] sm:$0xff]  }
 0xc2d   :  { %11230 = vmatprep.mubr.msk.bf16.mxu1 %vm3681_vm9, %v12393_v59 }
 0xc33   :  { %11209 = vmatmul.mubr.msk.bf16.gmra.mrb[100].mxu0 %vm3546_vm2, %v4128_v52 }
 0xcfe   :  { %v11206_v29 = vpop.f32.mrb[96].mxu0 }
 0xcff   :  { %v11998_v37 = vadd.f32 %v11206_v29, %v9830_v63  ;;  %v4186_v8 = vpop.f32.mrb[97].mxu0 }
 0xd00   :  { %v12000_v30 = vadd.f32 %v9830_v63, %v4186_v8  ;;  %v11207_v46 = vpop.f32.mrb[98].mxu0 }
 0xd01   :  { %v11999_v11 = vadd.f32 %v11998_v37, %v9835_v58  ;;  %v12003_v40 = vadd.f32 %v12004_v2, %v11207_v46  ;;  %v4189_v52 = vpop.f32.mrb[99].mxu0 }
 0xd02   :  { %v12001_v56 = vadd.f32 %v12000_v30, %v9835_v58  ;;  %v12005_v31 = vadd.f32 %v12004_v2, %v4189_v52  ;;  %v12401_v30 = vld [vmem:[%s14833_s3] sm:$0xff]  }
 0xd03   :  { %v4237_v61 = vmul.f32 1.442695, %v11999_v11  ;;  %v4239_v1 = vmul.f32 1.442695, %v12003_v40  ;;  %vm4227_vm1 = vcmp.gt.f32.partialorder %v11999_v11, 0.0  ;;  %vm4228_vm7 = vcmp.gt.f32.partialorder %v12003_v40, 0.0  ;;  %11270 = vmatprep.subr.bf16.mxu0 %v12401_v30 }
 0xd04   :  { %v4233_v14 = vmul.f32 1.442695, %v12001_v56  ;;  %v4235_v17 = vmul.f32 1.442695, %v12005_v31  ;;  %vm4225_vm5 = vcmp.gt.f32.partialorder %v12001_v56, 0.0  ;;  %vm4226_vm8 = vcmp.gt.f32.partialorder %v12005_v31, 0.0 }
 0xd05   :  { %12559 = vpow2.f32 %v4237_v61  ;;  %v12396_v61 = vld [vmem:[#allocation2 + $0x368] sm:$0xff]  }
 0xd06   :  { %12561 = vpow2.f32 %v4233_v14  ;;  %v11210_v21 = vpop.f32.mrb[100].mxu0  ;;  %v12397_v14 = vld [vmem:[#allocation2 + $0x380] sm:$0xff]  }
 0xd07   :  { %12563 = vpow2.f32 %v4239_v1  ;;  %v12007_v23 = vadd.f32 %v12004_v2, %v11210_v21  ;;  %v4202_v24 = vpop.f32.mrb[101].mxu0 }
 0xd08   :  { %12565 = vpow2.f32 %v4235_v17  ;;  %v12009_v27 = vadd.f32 %v12004_v2, %v4202_v24  ;;  %v11211_v34 = vpop.f32.mrb[102].mxu0  ;;  %v12398_v24 = vld [vmem:[#allocation2 + $0x388] sm:$0xff]  }
 0xd09   :  { %v4245_v43 = vmul.f32 1.442695, %v12007_v23  ;;  %v12011_v45 = vadd.f32 %v12004_v2, %v11211_v34  ;;  %v4205_v39 = vpop.f32.mrb[103].mxu0  ;;  %vm4231_vm6 = vcmp.gt.f32.partialorder %v12007_v23, 0.0  ;;  %v12399_v34 = vld [vmem:[#allocation2 + $0x390] sm:$0xff]  }
 0xd0a   :  { %v4241_v51 = vmul.f32 1.442695, %v12009_v27  ;;  %v12013_v18 = vadd.f32 %v12004_v2, %v4205_v39  ;;  %vm4229_vm11 = vcmp.gt.f32.partialorder %v12009_v27, 0.0 }
 0xd0b   :  { %12567 = vpow2.f32 %v4245_v43  ;;  %v4247_v48 = vmul.f32 1.442695, %v12011_v45  ;;  %vm4232_vm10 = vcmp.gt.f32.partialorder %v12011_v45, 0.0 }
 0xd0c   :  { %12569 = vpow2.f32 %v4241_v51  ;;  %v4243_v36 = vmul.f32 1.442695, %v12013_v18  ;;  %vm4230_vm12 = vcmp.gt.f32.partialorder %v12013_v18, 0.0  ;;  %v12400_v51 = vld [vmem:[#allocation2 + $0x398] sm:$0xff]  }
 0xd0d   :  { %12571 = vpow2.f32 %v4247_v48  ;;  %v13815_v48 = vld [vmem:[%s14833_s3 + $0x10] sm:$0xff]  }
 0xd0e   :  { %12573 = vpow2.f32 %v4243_v36  ;;  %v12964_v36 = vmov 0.0  }
 0xd0f   :  { %v12560_v57 = vpop.eup %12559 }
 0xd10   :  { %v12562_v16 = vpop.eup %12561  ;;  %v9843_v50 = vadd.f32 -1.0, %v12560_v57  ;;  %v13824_v57 = vld [vmem:[%s14833_s3 + $0x18] sm:$0xff]  }
 0xd11   :  { %v12564_v22 = vpop.eup %12563  ;;  %v9841_v25 = vadd.f32 -1.0, %v12562_v16  ;;  %v12966_v16 = vmov 0  }
 0xd12   :  { %v12566_v53 = vpop.eup %12565  ;;  %v9844_v55 = vadd.f32 -1.0, %v12564_v22  ;;  %v4259_v28 = vsel %vm4227_vm1, %v11999_v11, %v9843_v50  ;;  %12276 = vset.pattern.permute.xlu1 %v12966_v16  ;;  %12270 = vset.pattern.permute.xlu0 %v12966_v16  ;;  %v9870_v22 = vld [vmem:[%s14834_s4 + $0x8] ss:$0 sm:$0xff] }
 0xd13   :  { %v9842_v15 = vadd.f32 -1.0, %v12566_v53  ;;  %v4257_v0 = vsel %vm4225_vm5, %v12001_v56, %v9841_v25  ;;  %v12394_v56 = vld [vmem:[#allocation2 + $0x378] sm:$0xff]  }
 0xd14   :  { %v4260_v5 = vsel %vm4228_vm7, %v12003_v40, %v9844_v55 }
 0xd15   :  { %v12568_v4 = vpop.eup %12567  ;;  %v4268_v10 = vpack.c.bf16 %v4260_v5, %v4259_v28  ;;  %v4258_v6 = vsel %vm4226_vm8, %v12005_v31, %v9842_v15  ;;  %v12395_v31 = vld [vmem:[#allocation2 + $0x360] sm:$0xff]  }
 0xd16   :  { %v12570_v9 = vpop.eup %12569  ;;  %v4267_v13 = vpack.c.bf16 %v4258_v6, %v4257_v0  ;;  %v9847_v32 = vadd.f32 -1.0, %v12568_v4  ;;  %v9871_v6 = vld [vmem:[%s14834_s4 + $0xa] ss:$0 sm:$0xff] }
 0xd17   :  { %v12572_v38 = vpop.eup %12571  ;;  %v9845_v42 = vadd.f32 -1.0, %v12570_v9 }
 0xd18   :  { %v12574_v44 = vpop.eup %12573  ;;  %v9848_v49 = vadd.f32 -1.0, %v12572_v38  ;;  %11214 = vmatprep.mubr.msk.bf16.mxu0 %vm3546_vm2, %v4267_v13  ;;  %v4263_v62 = vsel %vm4231_vm6, %v12007_v23, %v9847_v32 }
 0xd19   :  { %v9846_v54 = vadd.f32 -1.0, %v12574_v44  ;;  %11215 = vmatmul.mubr.msk.bf16.vlgmr.msra.gmra.mrb[104].mxu0 %vm3546_vm2, %v4268_v10  ;;  %v4261_v7 = vsel %vm4229_vm11, %v12009_v27, %v9845_v42 }
 0xd1a   :  { %v4264_v3 = vsel %vm4232_vm10, %v12011_v45, %v9848_v49  ;;  %11271 = vmatpush3.bf16.msra.mxu0 %v12401_v30  ;;  %v13900_v30 = vld [vmem:[%s14833_s3 + $0x28] sm:$0xff]  }
 0xd1b   :  { %v4270_v12 = vpack.c.bf16 %v4264_v3, %v4263_v62  ;;  %v4262_v19 = vsel %vm4230_vm12, %v12013_v18, %v9846_v54  ;;  %v12402_v18 = vld [vmem:[%s14833_s3 + $0x8] sm:$0xff]  }
 0xd1c   :  { %v4269_v20 = vpack.c.bf16 %v4262_v19, %v4261_v7  ;;  %11272 = vmatprep.subr.bf16.mxu0 %v12402_v18 }
 0xd1e   :  { %11218 = vmatprep.mubr.msk.bf16.mxu0 %vm3546_vm2, %v4269_v20  ;;  %11273 = vmatpush3.bf16.msra.mxu0 %v12402_v18 }
 0xd1f   :  { %11278 = vmatprep.subr.bf16.mxu0 %v12964_v36 }
 0xd21   :  { %11219 = vmatmul.mubr.msk.bf16.gmra.mrb[108].mxu0 %vm3546_vm2, %v4270_v12  ;;  %vm12965_vm2 = vmmov 0  }
 0xdec   :  { %v11216_v26 = vpop.f32.mrb[104].mxu0 }
 0xded   :  { %v4323_v33 = vpop.f32.mrb[105].mxu0 }
 0xdee   :  { %v11217_v41 = vpop.f32.mrb[106].mxu0 }
 0xdef   :  { %v4356_v47 = vpack.c.bf16 %v11217_v41, %v11216_v26  ;;  %v4326_v60 = vpop.f32.mrb[107].mxu0 }
 0xdf0   :  { %v4355_v35 = vpack.c.bf16 %v4326_v60, %v4323_v33 }
 0xdf1   :  { %4383 = vrot.lane.b32.xlu1 %v4356_v47, %s12959_s18 }
 0xdf2   :  { %4381 = vrot.lane.b32.xlu0 %v4355_v35, %s12959_s18 }
 0xdf4   :  { %v11220_v63 = vpop.f32.mrb[108].mxu0 }
 0xdf5   :  { %v4339_v58 = vpop.f32.mrb[109].mxu0 }
 0xdf6   :  { %v11221_v2 = vpop.f32.mrb[110].mxu0 }
 0xdf7   :  { %v4358_v29 = vpack.c.bf16 %v11221_v2, %v11220_v63  ;;  %v4342_v37 = vpop.f32.mrb[111].mxu0  ;;  %v13878_v2 = vld [vmem:[%s14833_s3 + $0x30] sm:$0xff]  }
 0xdf8   :  { %v4357_v8 = vpack.c.bf16 %v4342_v37, %v4339_v58  ;;  %v13891_v37 = vld [vmem:[%s14833_s3 + $0x20] sm:$0xff]  }
 0xdf9   :  { %4387 = vrot.lane.b32.xlu1 %v4358_v29, %s12959_s18 }
 0xdfa   :  { %4385 = vrot.lane.b32.xlu0 %v4357_v8, %s12959_s18 }
 0xdfd   :  { %4529 = vrot.lane.b32.xlu1 %v4356_v47, %s12953_s2 }
 0xdfe   :  { %4527 = vrot.lane.b32.xlu0 %v4355_v35, %s12953_s2 }
 0xe01   :  { %4533 = vrot.lane.b32.xlu1 %v4358_v29, %s12953_s2 }
 0xe02   :  { %4531 = vrot.lane.b32.xlu0 %v4357_v8, %s12953_s2 }
 0xe05   :  { %4614 = vrot.lane.b32.xlu1 %v4356_v47, %s12963_s15 }
 0xe06   :  { %4612 = vrot.lane.b32.xlu0 %v4355_v35, %s12963_s15 }
 0xe09   :  { %4618 = vrot.lane.b32.xlu1 %v4358_v29, %s12963_s15 }
 0xe0a   :  { %4616 = vrot.lane.b32.xlu0 %v4357_v8, %s12963_s15 }
 0xe63   :  { %v4384_v11 = vpop.permute.xlu1 %4383 }
 0xe64   :  { %v4382_v46 = vpop.permute.xlu0 %4381 }
 0xe65   :  { %11222 = vmatprep.subr.bf16.mxu1 %v4382_v46 }
 0xe66   :  { %11223 = vmatpush3.bf16.msra.mxu1 %v4382_v46 }
 0xe67   :  { %11224 = vmatprep.subr.bf16.mxu1 %v4384_v11 }
 0xe6a   :  { %11225 = vmatpush3.bf16.msra.mxu1 %v4384_v11 }
 0xe6b   :  { %v4388_v52 = vpop.permute.xlu1 %4387 }
 0xe6c   :  { %v4386_v40 = vpop.permute.xlu0 %4385 }
 0xe6d   :  { %11226 = vmatprep.subr.bf16.mxu1 %v4386_v40 }
 0xe6e   :  { %11227 = vmatpush3.bf16.msra.mxu1 %v4386_v40 }
 0xe6f   :  { %11228 = vmatprep.subr.bf16.mxu1 %v4388_v52  ;;  %v4530_v17 = vpop.permute.xlu1 %4529 }
 0xe70   :  { %v4528_v1 = vpop.permute.xlu0 %4527 }
 0xe72   :  { %11229 = vmatpush3.bf16.msra.mxu1 %v4388_v52 }
 0xe73   :  { %11234 = vmatprep.subr.bf16.mxu1 %v4355_v35  ;;  %v4534_v23 = vpop.permute.xlu1 %4533 }
 0xe74   :  { %v4532_v21 = vpop.permute.xlu0 %4531 }
 0xe75   :  { %11231 = vmatmul.mubr.msk.bf16.vlgmr.msra.gmra.mrb[24].mxu1 %vm3681_vm9, %v12394_v56 }
 0xe76   :  { %11235 = vmatpush3.bf16.msra.mxu1 %v4355_v35  ;;  %11242 = vmatprep.mubr.msk.bf16.mxu1 %vm3681_vm9, %v12395_v31 }
 0xe77   :  { %11236 = vmatprep.subr.bf16.mxu1 %v4356_v47  ;;  %v4615_v43 = vpop.permute.xlu1 %4614 }
 0xe78   :  { %v4613_v27 = vpop.permute.xlu0 %4612 }
 0xe7a   :  { %11237 = vmatpush3.bf16.msra.mxu1 %v4356_v47 }
 0xe7b   :  { %11238 = vmatprep.subr.bf16.mxu1 %v4357_v8  ;;  %v4619_v39 = vpop.permute.xlu1 %4618 }
 0xe7c   :  { %v4617_v45 = vpop.permute.xlu0 %4616 }
 0xe7e   :  { %11239 = vmatpush3.bf16.msra.mxu1 %v4357_v8 }
 0xe7f   :  { %11240 = vmatprep.subr.bf16.mxu1 %v4358_v29 }
 0xe82   :  { %11241 = vmatpush3.bf16.msra.mxu1 %v4358_v29  ;;  %v13884_v29 = vld [vmem:[%s14833_s3 + $0x38] sm:$0xff]  }
 0xe83   :  { %11246 = vmatprep.subr.bf16.mxu1 %v4528_v1 }
 0xe85   :  { %11243 = vmatmul.mubr.msk.bf16.vlgmr.msra.gmra.mrb[24].mxu1 %vm3681_vm9, %v12396_v61 }
 0xe86   :  { %11247 = vmatpush3.bf16.msra.mxu1 %v4528_v1  ;;  %11254 = vmatprep.mubr.msk.bf16.mxu1 %vm3681_vm9, %v12397_v14  ;;  %v13925_v14 = vld [vmem:[%s14834_s4 + $0xb] ss:$0 sm:$0xff] }
 0xe87   :  { %11248 = vmatprep.subr.bf16.mxu1 %v4530_v17 }
 0xe8a   :  { %11249 = vmatpush3.bf16.msra.mxu1 %v4530_v17 }
 0xe8b   :  { %11250 = vmatprep.subr.bf16.mxu1 %v4532_v21 }
 0xe8e   :  { %11251 = vmatpush3.bf16.msra.mxu1 %v4532_v21 }
 0xe8f   :  { %11252 = vmatprep.subr.bf16.mxu1 %v4534_v23 }
 0xe92   :  { %11253 = vmatpush3.bf16.msra.mxu1 %v4534_v23 }
 0xe93   :  { %11258 = vmatprep.subr.bf16.mxu1 %v4613_v27 }
 0xe95   :  { %11255 = vmatmul.mubr.msk.bf16.vlgmr.msra.gmra.mrb[24].mxu1 %vm3681_vm9, %v12398_v24 }
 0xe96   :  { %11259 = vmatpush3.bf16.msra.mxu1 %v4613_v27  ;;  %11266 = vmatprep.mubr.msk.bf16.mxu1 %vm3681_vm9, %v12399_v34 }
 0xe97   :  { %11260 = vmatprep.subr.bf16.mxu1 %v4615_v43 }
 0xe9a   :  { %11261 = vmatpush3.bf16.msra.mxu1 %v4615_v43 }
 0xe9b   :  { %11262 = vmatprep.subr.bf16.mxu1 %v4617_v45 }
 0xe9e   :  { %11263 = vmatpush3.bf16.msra.mxu1 %v4617_v45 }
 0xe9f   :  { %11264 = vmatprep.subr.bf16.mxu1 %v4619_v39 }
 0xea2   :  { %11265 = vmatpush3.bf16.msra.mxu1 %v4619_v39 }
 0xea3   :  { %11326 = vmatprep.subr.bf16.mxu1 %v12964_v36 }
 0xea5   :  { %11267 = vmatmul.mubr.msk.bf16.vlgmr.msra.gmra.mrb[24].mxu1 %vm3681_vm9, %v12400_v51  ;;  %vm4727_vm9 = vcmask 261120  }
 0xea6   :  { %11327 = vmatpush3.bf16.msra.mxu1 %v13815_v48  ;;  %11330 = vmatprep.mubr.msk.bf16.mxu1 %vm12965_vm2, %v12964_v36 }
 0xea7   :  { %11328 = vmatprep.subr.bf16.mxu1 %v12964_v36 }
 0xeaa   :  { %11329 = vmatpush3.bf16.msra.mxu1 %v13824_v57 }
 0xeab   :  { %11342 = vmatprep.subr.bf16.mxu1 %v12964_v36 }
 0xf78   :  { %v11268_v50 = vpop.f32.mrb[24].mxu1 }
 0xf79   :  { %v4664_v25 = vpop.f32.mrb[25].mxu1  ;;  %v13841_v5 = vadd.f32 %v11268_v50, %v9870_v22 }
 0xf7a   :  { %v11269_v53 = vpop.f32.mrb[26].mxu1  ;;  %v13837_v15 = vadd.f32 %v9870_v22, %v4664_v25 }
 0xf7b   :  { %v13835_v55 = vadd.f32 %v11269_v53, %v9870_v22  ;;  %v4667_v28 = vpop.f32.mrb[27].mxu1 }
 0xf7c   :  { %v13839_v0 = vadd.f32 %v9870_v22, %v4667_v28 }
 0xf7d   :  { %v4710_v10 = vpack.c.bf16 %v13835_v55, %v13841_v5 }
 0xf7e   :  { %v4709_v4 = vpack.c.bf16 %v13839_v0, %v13837_v15 }
 0xf80   :  { %11274 = vmatprep.mubr.msk.bf16.mxu0 %vm4727_vm9, %v4709_v4 }
 0xf81   :  { %11275 = vmatmul.mubr.msk.bf16.vlgmr.msra.gmra.mrb[112].mxu0 %vm4727_vm9, %v4710_v10 }
 0xf82   :  { %11279 = vmatpush3.bf16.msra.mxu0 %v13815_v48  ;;  %11282 = vmatprep.mubr.msk.bf16.mxu0 %vm12965_vm2, %v12964_v36 }
 0xf83   :  { %11280 = vmatprep.subr.bf16.mxu0 %v12964_v36 }
 0xf86   :  { %11281 = vmatpush3.bf16.msra.mxu0 %v13824_v57 }
 0xf87   :  { %11286 = vmatprep.subr.bf16.mxu0 %v12964_v36 }
 0xf89   :  { %11283 = vmatmul.mubr.bf16.vlgmr.msra.gmra.mrb[116].mxu0 %v12966_v16 }
 0xf8a   :  { %11290 = vmatprep.mubr.msk.bf16.mxu0 %vm12965_vm2, %v12964_v36  ;;  %11287 = vmatpush3.bf16.msra.mxu0 %v13878_v2 }
 0xf8b   :  { %11288 = vmatprep.subr.bf16.mxu0 %v12964_v36 }
 0xf8e   :  { %11289 = vmatpush3.bf16.msra.mxu0 %v13884_v29 }
 0xf8f   :  { %11294 = vmatprep.subr.bf16.mxu0 %v12964_v36 }
 0xf91   :  { %11291 = vmatmul.mubr.bf16.vlgmr.msra.gmra.mrb[120].mxu0 %v12966_v16 }
 0xf92   :  { %11295 = vmatpush3.bf16.msra.mxu0 %v13891_v37  ;;  %11298 = vmatprep.mubr.msk.bf16.mxu0 %vm12965_vm2, %v12964_v36 }
 0xf93   :  { %11296 = vmatprep.subr.bf16.mxu0 %v12964_v36 }
 0xf96   :  { %11297 = vmatpush3.bf16.msra.mxu0 %v13900_v30 }
 0xf97   :  { %11302 = vmatprep.subr.bf16.mxu0 %v12964_v36 }
0x1054   :  { %v11276_v9 = vpop.f32.mrb[112].mxu0 }
0x1055   :  { %v13861_v13 = vadd.f32 %v11276_v9, %v9871_v6  ;;  %v4768_v32 = vpop.f32.mrb[113].mxu0 }
0x1056   :  { %v11277_v38 = vpop.f32.mrb[114].mxu0  ;;  %v13867_v54 = vadd.f32 %v9871_v6, %v4768_v32 }
0x1057   :  { %v13863_v42 = vadd.f32 %v11277_v38, %v9871_v6  ;;  %v4771_v44 = vpop.f32.mrb[115].mxu0 }
0x1058   :  { %v13865_v49 = vadd.f32 %v9871_v6, %v4771_v44 }
0x105c   :  { %v4832_v62 = vpop.f32.mrb[116].mxu0 }
0x105d   :  { %v4838_v3 = vadd.f32 %v4832_v62, %v13867_v54  ;;  %v11284_v7 = vpop.f32.mrb[117].mxu0 }
0x105e   :  { %v4835_v12 = vpop.f32.mrb[118].mxu0 }
0x105f   :  { %12575 = vtanh.f32 %v4838_v3  ;;  %v11285_v19 = vpop.f32.mrb[119].mxu0  ;;  %v9878_v26 = vmul.f32 -1.442695, %v4838_v3 }
0x1061   :  { %12577 = vpow2.f32 %v9878_v26 }
0x1064   :  { %v4910_v52 = vpop.f32.mrb[120].mxu0 }
0x1065   :  { %v11292_v56 = vpop.f32.mrb[121].mxu0 }
0x1066   :  { %v4913_v31 = vpop.f32.mrb[122].mxu0 }
0x1067   :  { %v11293_v61 = vpop.f32.mrb[123].mxu0 }
0x1069   :  { %v12576_v20 = vpop.eup %12575 }
0x106a   :  { %4848 = vrot.lane.b32.xlu0 %v12576_v20, %s12953_s2 }
0x106b   :  { %v12578_v33 = vpop.eup %12577 }
0x106c   :  { %v4842_v41 = vadd.f32 1.0, %v12578_v33 }
0x106e   :  { %12579 = vrcp.f32 %v4842_v41 }
0x1078   :  { %v12580_v47 = vpop.eup %12579 }
0x1079   :  { %v4846_v59 = vmul.f32 0.0, %v12580_v47 }
0x10dc   :  { %v4849_v60 = vpop.permute.xlu0 %4848 }
0x10dd   :  { %v4851_v35 = vmul.f32 %v12580_v47, %v4849_v60 }
0x10df   :  { %4853 = vrot.lane.b32.xlu1 %v4851_v35, %s12963_s15 }
0x1151   :  { %v4854_v63 = vpop.permute.xlu1 %4853 }
0x1152   :  { %v13872_v58 = vadd.f32 %v4854_v63, %v4846_v59 }
0x1154   :  { %12581 = vtanh.f32 %v13872_v58  ;;  %v5055_v26 = vrot.slane %v13872_v58, 6 }
0x115e   :  { %v12582_v8 = vpop.eup %12581 }
0x115f   :  { %4859 = vrot.lane.b32.xlu0 %v12582_v8, %s12953_s2 }
0x11d1   :  { %v4860_v46 = vpop.permute.xlu0 %4859 }
0x11d2   :  { %v4862_v11 = vmul.f32 %v12580_v47, %v4860_v46 }
0x11d4   :  { %v4863_v40 = vpack.c.bf16 %v4862_v11, %v4862_v11 }
0x11d6   :  { %4917 = vrot.lane.b32.xlu1 %v4863_v40, %s12963_s15 }
0x1248   :  { %v4918_v1 = vpop.permute.xlu1 %4917 }
0x1249   :  { %11299 = vmatmul.mubr.msk.bf16.vlgmr.msra.gmra.mrb[124].mxu0 %vm4727_vm9, %v4918_v1 }
0x124a   :  { %11303 = vmatpush3.bf16.msra.mxu0 %v13815_v48  ;;  %11306 = vmatprep.mubr.msk.bf16.mxu0 %vm12965_vm2, %v12964_v36 }
0x124b   :  { %11304 = vmatprep.subr.bf16.mxu0 %v12964_v36 }
0x124e   :  { %11305 = vmatpush3.bf16.msra.mxu0 %v13824_v57 }
0x124f   :  { %11310 = vmatprep.subr.bf16.mxu0 %v12964_v36 }
0x1251   :  { %11307 = vmatmul.mubr.msk.bf16.vlgmr.msra.gmra.mrb[128].mxu0 %vm4727_vm9, %v4918_v1 }
0x1252   :  { %11311 = vmatpush3.bf16.msra.mxu0 %v13878_v2  ;;  %11314 = vmatprep.mubr.msk.bf16.mxu0 %vm12965_vm2, %v12964_v36 }
0x1253   :  { %11312 = vmatprep.subr.bf16.mxu0 %v12964_v36 }
0x1256   :  { %11313 = vmatpush3.bf16.msra.mxu0 %v13884_v29 }
0x1257   :  { %11318 = vmatprep.subr.bf16.mxu0 %v12964_v36 }
0x131c   :  { %v4968_v17 = vpop.f32.mrb[124].mxu0 }
0x131d   :  { %v4969_v21 = vadd.f32 %v4968_v17, %v4910_v52  ;;  %v11300_v23 = vpop.f32.mrb[125].mxu0 }
0x131e   :  { %v4971_v24 = vpop.f32.mrb[126].mxu0 }
0x131f   :  { %v4978_v27 = vadd.f32 %v13925_v14, %v4969_v21  ;;  %v11301_v34 = vpop.f32.mrb[127].mxu0 }
0x1321   :  { %12583 = vtanh.f32 %v4978_v27  ;;  %v9885_v53 = vmul.f32 -1.442695, %v4978_v27 }
0x1324   :  { %v5037_v43 = vpop.f32.mrb[128].mxu0 }
0x1325   :  { %v5044_v45 = vrot.slane %v5037_v43, 6  ;;  %v11308_v39 = vpop.f32.mrb[129].mxu0 }
0x1326   :  { %v5040_v51 = vpop.f32.mrb[130].mxu0 }
0x1327   :  { %v5046_v18 = vadd.f32 %v5044_v45, %v13867_v54  ;;  %v11309_v50 = vpop.f32.mrb[131].mxu0 }
0x1329   :  { %12585 = vtanh.f32 %v5046_v18  ;;  %v9887_v28 = vmul.f32 -1.442695, %v5046_v18 }
0x132a   :  { %12587 = vpow2.f32 %v9885_v53 }
0x132b   :  { %v12584_v22 = vpop.eup %12583  ;;  %12589 = vpow2.f32 %v9887_v28 }
0x132c   :  { %4988 = vrot.lane.b32.xlu0 %v12584_v22, %s12953_s2 }
0x1333   :  { %v12586_v25 = vpop.eup %12585 }
0x1334   :  { %5059 = vrot.lane.b32.xlu1 %v12586_v25, %s12953_s2  ;;  %v12588_v4 = vpop.eup %12587 }
0x1335   :  { %v4982_v10 = vadd.f32 1.0, %v12588_v4  ;;  %v12590_v6 = vpop.eup %12589 }
0x1336   :  { %v5050_v9 = vadd.f32 1.0, %v12590_v6 }
0x1337   :  { %12591 = vrcp.f32 %v4982_v10 }
0x1338   :  { %12593 = vrcp.f32 %v5050_v9 }
0x1341   :  { %v12592_v32 = vpop.eup %12591 }
0x1342   :  { %v12594_v62 = vpop.eup %12593  ;;  %v4986_v12 = vmul.f32 0.0, %v12592_v32 }
0x1343   :  { %v5057_v33 = vmul.f32 %v12594_v62, %v5055_v26 }
0x139e   :  { %v4989_v38 = vpop.permute.xlu0 %4988 }
0x139f   :  { %v4991_v44 = vmul.f32 %v12592_v32, %v4989_v38 }
0x13a1   :  { %4993 = vrot.lane.b32.xlu0 %v4991_v44, %s12963_s15 }
0x13a6   :  { %v5060_v3 = vpop.permute.xlu1 %5059 }
0x13a7   :  { %v5062_v7 = vmul.f32 %v12594_v62, %v5060_v3 }
0x13a9   :  { %5064 = vrot.lane.b32.xlu1 %v5062_v7, %s12963_s15 }
0x1413   :  { %v4994_v19 = vpop.permute.xlu0 %4993 }
0x1414   :  { %v13933_v20 = vadd.f32 %v4994_v19, %v4986_v12 }
0x1416   :  { %12595 = vtanh.f32 %v13933_v20 }
0x141b   :  { %v5065_v41 = vpop.permute.xlu1 %5064 }
0x141c   :  { %v13937_v47 = vadd.f32 %v5065_v41, %v5057_v33 }
0x141e   :  { %12597 = vtanh.f32 %v13937_v47  ;;  %v5246_v19 = vrot.slane %v13937_v47, 6 }
0x1420   :  { %v12596_v60 = vpop.eup %12595 }
0x1421   :  { %4999 = vrot.lane.b32.xlu0 %v12596_v60, %s12953_s2 }
0x1428   :  { %v12598_v35 = vpop.eup %12597 }
0x1429   :  { %5070 = vrot.lane.b32.xlu1 %v12598_v35, %s12953_s2 }
0x1493   :  { %v5000_v59 = vpop.permute.xlu0 %4999 }
0x1494   :  { %v13942_v63 = vmul.f32 %v12592_v32, %v5000_v59 }
0x1496   :  { %v5075_v8 = vpack.c.bf16 %v13942_v63, %v13942_v63 }
0x1498   :  { %5077 = vrot.lane.b32.xlu0 %v5075_v8, %s12963_s15 }
0x149b   :  { %v5071_v58 = vpop.permute.xlu1 %5070 }
0x149c   :  { %v5073_v46 = vmul.f32 %v12594_v62, %v5071_v58 }
0x149e   :  { %v5074_v11 = vpack.c.bf16 %v5073_v46, %v5073_v46 }
0x14a0   :  { %v5123_v40 = vrot.slane %v5074_v11, 1 }
0x14a2   :  { %5124 = vrot.lane.b32.xlu1 %v5123_v40, %s12963_s15 }
0x150a   :  { %v5078_v52 = vpop.permute.xlu0 %5077 }
0x150b   :  { %11315 = vmatmul.mubr.msk.bf16.vlgmr.msra.gmra.mrb[132].mxu0 %vm4727_vm9, %v5078_v52 }
0x150c   :  { %11319 = vmatpush3.bf16.msra.mxu0 %v13891_v37  ;;  %11322 = vmatprep.mubr.msk.bf16.mxu0 %vm12965_vm2, %v12964_v36 }
0x150d   :  { %11320 = vmatprep.subr.bf16.mxu0 %v12964_v36 }
0x1510   :  { %11321 = vmatpush3.bf16.msra.mxu0 %v13900_v30 }
0x1511   :  { %11334 = vmatprep.subr.bf16.mxu0 %v12964_v36 }
0x1514   :  { %v5125_v56 = vpop.permute.xlu1 %5124 }
0x1515   :  { %11323 = vmatmul.mubr.msk.bf16.vlgmr.msra.gmra.mrb[136].mxu0 %vm4727_vm9, %v5125_v56  ;;  %11331 = vmatmul.mubr.msk.bf16.vlgmr.msra.gmra.mrb[28].mxu1 %vm4727_vm9, %v5125_v56 }
0x1516   :  { %11335 = vmatpush3.bf16.msra.mxu0 %v13878_v2  ;;  %11343 = vmatpush3.bf16.msra.mxu1 %v13891_v37 }
0x1517   :  { %11336 = vmatprep.subr.bf16.mxu0 %v12964_v36  ;;  %11344 = vmatprep.subr.bf16.mxu1 %v12964_v36 }
0x1518   :  { %11338 = vmatprep.mubr.msk.bf16.mxu0 %vm12965_vm2, %v12964_v36  ;;  %11346 = vmatprep.mubr.msk.bf16.mxu1 %vm12965_vm2, %v12964_v36 }
0x151a   :  { %11337 = vmatpush3.bf16.msra.mxu0 %v13884_v29  ;;  %11345 = vmatpush3.bf16.msra.mxu1 %v13900_v30 }
0x151b   :  { %11350 = vmatprep.subr.bf16.mxu0 %v12964_v36  ;;  %11358 = vmatprep.subr.bf16.mxu1 %v12964_v36 }
0x15de   :  { %v5116_v31 = vpop.f32.mrb[132].mxu0 }
0x15df   :  { %v11316_v61 = vpop.f32.mrb[133].mxu0 }
0x15e0   :  { %v5119_v1 = vpop.f32.mrb[134].mxu0 }
0x15e1   :  { %v11317_v17 = vpop.f32.mrb[135].mxu0 }
0x15e8   :  { %v5163_v21 = vpop.f32.mrb[136].mxu0  ;;  %v5228_v23 = vpop.f32.mrb[28].mxu1 }
0x15e9   :  { %v5164_v24 = vadd.f32 %v5163_v21, %v5116_v31  ;;  %v5235_v27 = vrot.slane %v5228_v23, 4  ;;  %v11324_v34 = vpop.f32.mrb[137].mxu0  ;;  %v11332_v43 = vpop.f32.mrb[29].mxu1 }
0x15ea   :  { %v5166_v45 = vpop.f32.mrb[138].mxu0  ;;  %v5231_v39 = vpop.f32.mrb[30].mxu1 }
0x15eb   :  { %v5169_v51 = vadd.f32 %v13925_v14, %v5164_v24  ;;  %v5237_v18 = vadd.f32 %v5235_v27, %v13867_v54  ;;  %v11325_v50 = vpop.f32.mrb[139].mxu0  ;;  %v11333_v22 = vpop.f32.mrb[31].mxu1 }
0x15ed   :  { %12599 = vtanh.f32 %v5169_v51  ;;  %v9890_v28 = vmul.f32 -1.442695, %v5169_v51  ;;  %v9892_v4 = vmul.f32 -1.442695, %v5237_v18 }
0x15ee   :  { %12601 = vtanh.f32 %v5237_v18 }
0x15ef   :  { %12603 = vpow2.f32 %v9890_v28 }
0x15f0   :  { %12605 = vpow2.f32 %v9892_v4 }
0x15f7   :  { %v12600_v25 = vpop.eup %12599 }
0x15f8   :  { %v12602_v53 = vpop.eup %12601  ;;  %5179 = vrot.lane.b32.xlu0 %v12600_v25, %s12953_s2 }
0x15f9   :  { %5250 = vrot.lane.b32.xlu1 %v12602_v53, %s12953_s2  ;;  %v12604_v10 = vpop.eup %12603 }
0x15fa   :  { %v12606_v6 = vpop.eup %12605  ;;  %v5173_v9 = vadd.f32 1.0, %v12604_v10 }
0x15fb   :  { %v5241_v32 = vadd.f32 1.0, %v12606_v6 }
0x15fc   :  { %12607 = vrcp.f32 %v5173_v9 }
0x15fd   :  { %12609 = vrcp.f32 %v5241_v32 }
0x1606   :  { %v12608_v38 = vpop.eup %12607 }
0x1607   :  { %v12610_v62 = vpop.eup %12609  ;;  %v5177_v26 = vmul.f32 %v12608_v38, %v13933_v20 }
0x1608   :  { %v5248_v33 = vmul.f32 %v12610_v62, %v5246_v19 }
0x166a   :  { %v5180_v44 = vpop.permute.xlu0 %5179 }
0x166b   :  { %v5251_v3 = vpop.permute.xlu1 %5250  ;;  %v5182_v7 = vmul.f32 %v12608_v38, %v5180_v44 }
0x166c   :  { %v5253_v12 = vmul.f32 %v12610_v62, %v5251_v3 }
0x166d   :  { %5184 = vrot.lane.b32.xlu0 %v5182_v7, %s12963_s15 }
0x166e   :  { %5255 = vrot.lane.b32.xlu1 %v5253_v12, %s12963_s15 }
0x16df   :  { %v5185_v41 = vpop.permute.xlu0 %5184 }
0x16e0   :  { %v5256_v60 = vpop.permute.xlu1 %5255  ;;  %v13977_v35 = vadd.f32 %v5185_v41, %v5177_v26 }
0x16e1   :  { %v13979_v59 = vadd.f32 %v5256_v60, %v5248_v33 }
0x16e2   :  { %12611 = vtanh.f32 %v13977_v35 }
0x16e3   :  { %12613 = vtanh.f32 %v13979_v59  ;;  %v5437_v60 = vrot.slane %v13979_v59, 6 }
0x16ec   :  { %v12612_v8 = vpop.eup %12611 }
0x16ed   :  { %v12614_v58 = vpop.eup %12613  ;;  %5190 = vrot.lane.b32.xlu0 %v12612_v8, %s12953_s2 }
0x16ee   :  { %5261 = vrot.lane.b32.xlu1 %v12614_v58, %s12953_s2 }
0x175f   :  { %v5191_v47 = vpop.permute.xlu0 %5190 }
0x1760   :  { %v5262_v46 = vpop.permute.xlu1 %5261  ;;  %v13985_v20 = vmul.f32 %v12608_v38, %v5191_v47 }
0x1761   :  { %v5264_v11 = vmul.f32 %v12610_v62, %v5262_v46 }
0x1762   :  { %v5266_v40 = vpack.c.bf16 %v13985_v20, %v13985_v20 }
0x1763   :  { %v5265_v52 = vpack.c.bf16 %v5264_v11, %v5264_v11 }
0x1764   :  { %5268 = vrot.lane.b32.xlu0 %v5266_v40, %s12963_s15 }
0x1765   :  { %v5314_v56 = vrot.slane %v5265_v52, 2 }
0x1767   :  { %5315 = vrot.lane.b32.xlu1 %v5314_v56, %s12963_s15 }
0x17d6   :  { %v5269_v31 = vpop.permute.xlu0 %5268 }
0x17d7   :  { %11339 = vmatmul.mubr.msk.bf16.vlgmr.msra.gmra.mrb[140].mxu0 %vm4727_vm9, %v5269_v31 }
0x17d8   :  { %11351 = vmatpush3.bf16.msra.mxu0 %v13815_v48  ;;  %11354 = vmatprep.mubr.msk.bf16.mxu0 %vm12965_vm2, %v12964_v36 }
0x17d9   :  { %v5316_v61 = vpop.permute.xlu1 %5315  ;;  %11352 = vmatprep.subr.bf16.mxu0 %v12964_v36 }
0x17da   :  { %11347 = vmatmul.mubr.msk.bf16.vlgmr.msra.gmra.mrb[32].mxu1 %vm4727_vm9, %v5316_v61 }
0x17db   :  { %11359 = vmatpush3.bf16.msra.mxu1 %v13878_v2  ;;  %11362 = vmatprep.mubr.msk.bf16.mxu1 %vm12965_vm2, %v12964_v36 }
0x17dc   :  { %11353 = vmatpush3.bf16.msra.mxu0 %v13824_v57  ;;  %11360 = vmatprep.subr.bf16.mxu1 %v12964_v36 }
0x17dd   :  { %11366 = vmatprep.subr.bf16.mxu0 %v12964_v36 }
0x17df   :  { %11355 = vmatmul.mubr.msk.bf16.vlgmr.msra.gmra.mrb[144].mxu0 %vm4727_vm9, %v5316_v61  ;;  %11361 = vmatpush3.bf16.msra.mxu1 %v13884_v29 }
0x17e0   :  { %11374 = vmatprep.subr.bf16.mxu1 %v12964_v36  ;;  %11367 = vmatpush3.bf16.msra.mxu0 %v13891_v37 }
0x17e1   :  { %11368 = vmatprep.subr.bf16.mxu0 %v12964_v36  ;;  %11370 = vmatprep.mubr.msk.bf16.mxu0 %vm12965_vm2, %v12964_v36 }
0x17e4   :  { %11369 = vmatpush3.bf16.msra.mxu0 %v13900_v30 }
0x17e5   :  { %11382 = vmatprep.subr.bf16.mxu0 %v12964_v36 }
0x18aa   :  { %v5307_v1 = vpop.f32.mrb[140].mxu0 }
0x18ab   :  { %v11340_v17 = vpop.f32.mrb[141].mxu0 }
0x18ac   :  { %v5310_v21 = vpop.f32.mrb[142].mxu0 }
0x18ad   :  { %v5354_v23 = vpop.f32.mrb[32].mxu1  ;;  %v11341_v24 = vpop.f32.mrb[143].mxu0 }
0x18ae   :  { %v5355_v27 = vadd.f32 %v5354_v23, %v5307_v1  ;;  %v11348_v34 = vpop.f32.mrb[33].mxu1 }
0x18af   :  { %v5357_v43 = vpop.f32.mrb[34].mxu1 }
0x18b0   :  { %v5360_v45 = vadd.f32 %v13925_v14, %v5355_v27  ;;  %v11349_v39 = vpop.f32.mrb[35].mxu1 }
0x18b2   :  { %12615 = vtanh.f32 %v5360_v45  ;;  %v5419_v51 = vpop.f32.mrb[144].mxu0  ;;  %v9895_v10 = vmul.f32 -1.442695, %v5360_v45 }
0x18b3   :  { %v5426_v18 = vrot.slane %v5419_v51, 2  ;;  %v11356_v50 = vpop.f32.mrb[145].mxu0 }
0x18b4   :  { %v5422_v22 = vpop.f32.mrb[146].mxu0 }
0x18b5   :  { %v5428_v25 = vadd.f32 %v5426_v18, %v13867_v54  ;;  %v11357_v53 = vpop.f32.mrb[147].mxu0 }
0x18b7   :  { %12617 = vtanh.f32 %v5428_v25  ;;  %v9897_v6 = vmul.f32 -1.442695, %v5428_v25 }
0x18b8   :  { %12619 = vpow2.f32 %v9895_v10 }
0x18b9   :  { %12621 = vpow2.f32 %v9897_v6 }
0x18bc   :  { %v12616_v28 = vpop.eup %12615 }
0x18bd   :  { %5370 = vrot.lane.b32.xlu1 %v12616_v28, %s12953_s2 }
0x18c1   :  { %v12618_v4 = vpop.eup %12617 }
0x18c2   :  { %5441 = vrot.lane.b32.xlu0 %v12618_v4, %s12953_s2  ;;  %v12620_v9 = vpop.eup %12619 }
0x18c3   :  { %v5364_v32 = vadd.f32 1.0, %v12620_v9  ;;  %v12622_v38 = vpop.eup %12621 }
0x18c4   :  { %v5432_v44 = vadd.f32 1.0, %v12622_v38 }
0x18c5   :  { %12623 = vrcp.f32 %v5364_v32 }
0x18c6   :  { %12625 = vrcp.f32 %v5432_v44 }
0x18cf   :  { %v12624_v62 = vpop.eup %12623 }
0x18d0   :  { %v12626_v7 = vpop.eup %12625  ;;  %v5368_v26 = vmul.f32 %v12624_v62, %v13977_v35  ;;  %v7857_v35 = vrot.slane %v13985_v20, 6 }
0x18d1   :  { %v5439_v8 = vmul.f32 %v12626_v7, %v5437_v60 }
0x18d2   :  { %v7892_v31 = vsel %vm2521_vm4, %v13942_v63, %v7857_v35 }
0x192f   :  { %v5371_v54 = vpop.permute.xlu1 %5370 }
0x1930   :  { %v5373_v3 = vmul.f32 %v12624_v62, %v5371_v54 }
0x1932   :  { %5375 = vrot.lane.b32.xlu1 %v5373_v3, %s12963_s15 }
0x1934   :  { %v5442_v12 = vpop.permute.xlu0 %5441 }
0x1935   :  { %v5444_v19 = vmul.f32 %v12626_v7, %v5442_v12 }
0x1937   :  { %5446 = vrot.lane.b32.xlu0 %v5444_v19, %s12963_s15 }
0x19a4   :  { %v5376_v33 = vpop.permute.xlu1 %5375 }
0x19a5   :  { %v14019_v41 = vadd.f32 %v5376_v33, %v5368_v26 }
0x19a7   :  { %12627 = vtanh.f32 %v14019_v41 }
0x19a9   :  { %v5447_v58 = vpop.permute.xlu0 %5446 }
0x19aa   :  { %v14023_v47 = vadd.f32 %v5447_v58, %v5439_v8 }
0x19ac   :  { %12629 = vtanh.f32 %v14023_v47  ;;  %v5625_v8 = vrot.slane %v14023_v47, 6 }
0x19b1   :  { %v12628_v46 = vpop.eup %12627 }
0x19b2   :  { %5381 = vrot.lane.b32.xlu1 %v12628_v46, %s12953_s2 }
0x19b6   :  { %v12630_v11 = vpop.eup %12629 }
0x19b7   :  { %5452 = vrot.lane.b32.xlu0 %v12630_v11, %s12953_s2 }
0x1a24   :  { %v5382_v40 = vpop.permute.xlu1 %5381 }
0x1a25   :  { %v5384_v52 = vmul.f32 %v12624_v62, %v5382_v40 }
0x1a27   :  { %v5457_v56 = vpack.c.bf16 %v5384_v52, %v5384_v52  ;;  %v7860_v59 = vrot.slane %v5384_v52, 4 }
0x1a29   :  { %5459 = vrot.lane.b32.xlu0 %v5457_v56, %s12963_s15  ;;  %v5453_v61 = vpop.permute.xlu0 %5452  ;;  %v14033_v1 = vsel %vm116_vm0, %v7892_v31, %v7860_v59 }
0x1a2a   :  { %v5455_v17 = vmul.f32 %v12626_v7, %v5453_v61 }
0x1a2c   :  { %v5456_v21 = vpack.c.bf16 %v5455_v17, %v5455_v17 }
0x1a2e   :  { %v5505_v23 = vrot.slane %v5456_v21, 3 }
0x1a30   :  { %5506 = vrot.lane.b32.xlu1 %v5505_v23, %s12963_s15 }
0x1a9b   :  { %v5460_v24 = vpop.permute.xlu0 %5459 }
0x1a9c   :  { %11363 = vmatmul.mubr.msk.bf16.vlgmr.msra.gmra.mrb[36].mxu1 %vm4727_vm9, %v5460_v24 }
0x1a9d   :  { %11375 = vmatpush3.bf16.msra.mxu1 %v13815_v48  ;;  %11378 = vmatprep.mubr.msk.bf16.mxu1 %vm12965_vm2, %v12964_v36 }
0x1a9e   :  { %11376 = vmatprep.subr.bf16.mxu1 %v12964_v36 }
0x1aa1   :  { %11377 = vmatpush3.bf16.msra.mxu1 %v13824_v57 }
0x1aa2   :  { %v5507_v63 = vpop.permute.xlu1 %5506  ;;  %11390 = vmatprep.subr.bf16.mxu1 %v12964_v36 }
0x1aa3   :  { %11371 = vmatmul.mubr.msk.bf16.vlgmr.msra.gmra.mrb[148].mxu0 %vm4727_vm9, %v5507_v63 }
0x1aa4   :  { %11379 = vmatmul.mubr.msk.bf16.vlgmr.msra.gmra.mrb[40].mxu1 %vm4727_vm9, %v5507_v63  ;;  %11383 = vmatpush3.bf16.msra.mxu0 %v13878_v2 }
0x1aa5   :  { %11391 = vmatpush3.bf16.msra.mxu1 %v13891_v37  ;;  %11384 = vmatprep.subr.bf16.mxu0 %v12964_v36 }
0x1aa6   :  { %11392 = vmatprep.subr.bf16.mxu1 %v12964_v36  ;;  %11394 = vmatprep.mubr.msk.bf16.mxu1 %vm12965_vm2, %v12964_v36 }
0x1aa7   :  { %11386 = vmatprep.mubr.msk.bf16.mxu0 %vm12965_vm2, %v12964_v36 }
0x1aa8   :  { %11385 = vmatpush3.bf16.msra.mxu0 %v13884_v29 }
0x1aa9   :  { %11393 = vmatpush3.bf16.msra.mxu1 %v13900_v30  ;;  %11398 = vmatprep.subr.bf16.mxu0 %v12964_v36 }
0x1aaa   :  { %11406 = vmatprep.subr.bf16.mxu1 %v12964_v36 }
0x1b6f   :  { %v5498_v20 = vpop.f32.mrb[36].mxu1 }
0x1b70   :  { %v11364_v27 = vpop.f32.mrb[37].mxu1 }
0x1b71   :  { %v5501_v34 = vpop.f32.mrb[38].mxu1 }
0x1b72   :  { %v11365_v43 = vpop.f32.mrb[39].mxu1 }
0x1b76   :  { %v5545_v45 = vpop.f32.mrb[148].mxu0 }
0x1b77   :  { %v5546_v39 = vadd.f32 %v5545_v45, %v5498_v20  ;;  %v5610_v51 = vpop.f32.mrb[40].mxu1  ;;  %v11372_v18 = vpop.f32.mrb[149].mxu0 }
0x1b78   :  { %v5616_v50 = vadd.f32 %v5610_v51, %v13865_v49  ;;  %v11380_v22 = vpop.f32.mrb[41].mxu1  ;;  %v5548_v25 = vpop.f32.mrb[150].mxu0 }
0x1b79   :  { %v5551_v53 = vadd.f32 %v13925_v14, %v5546_v39  ;;  %v5613_v28 = vpop.f32.mrb[42].mxu1  ;;  %v11373_v4 = vpop.f32.mrb[151].mxu0 }
0x1b7a   :  { %12631 = vtanh.f32 %v5616_v50  ;;  %v11381_v10 = vpop.f32.mrb[43].mxu1  ;;  %v9902_v32 = vmul.f32 -1.442695, %v5616_v50 }
0x1b7b   :  { %12633 = vtanh.f32 %v5551_v53  ;;  %v9900_v38 = vmul.f32 -1.442695, %v5551_v53 }
0x1b7c   :  { %12635 = vpow2.f32 %v9902_v32 }
0x1b7d   :  { %12637 = vpow2.f32 %v9900_v38 }
0x1b84   :  { %v12632_v6 = vpop.eup %12631 }
0x1b85   :  { %v12634_v9 = vpop.eup %12633  ;;  %5629 = vrot.lane.b32.xlu1 %v12632_v6, %s12953_s2 }
0x1b86   :  { %5561 = vrot.lane.b32.xlu0 %v12634_v9, %s12953_s2  ;;  %v12636_v44 = vpop.eup %12635 }
0x1b87   :  { %v12638_v62 = vpop.eup %12637  ;;  %v5620_v54 = vadd.f32 1.0, %v12636_v44 }
0x1b88   :  { %v5555_v3 = vadd.f32 1.0, %v12638_v62 }
0x1b89   :  { %12639 = vrcp.f32 %v5620_v54 }
0x1b8a   :  { %12641 = vrcp.f32 %v5555_v3 }
0x1b93   :  { %v12640_v7 = vpop.eup %12639 }
0x1b94   :  { %v12642_v19 = vpop.eup %12641  ;;  %v5627_v58 = vmul.f32 %v12640_v7, %v5625_v8 }
0x1b95   :  { %v5559_v11 = vmul.f32 %v12642_v19, %v14019_v41 }
0x1bf7   :  { %v5630_v12 = vpop.permute.xlu1 %5629 }
0x1bf8   :  { %v5632_v26 = vmul.f32 %v12640_v7, %v5630_v12  ;;  %v5562_v33 = vpop.permute.xlu0 %5561 }
0x1bf9   :  { %v5564_v60 = vmul.f32 %v12642_v19, %v5562_v33 }
0x1bfa   :  { %5634 = vrot.lane.b32.xlu1 %v5632_v26, %s12963_s15 }
0x1bfb   :  { %5566 = vrot.lane.b32.xlu0 %v5564_v60, %s12963_s15 }
0x1c6c   :  { %v5635_v46 = vpop.permute.xlu1 %5634 }
0x1c6d   :  { %v14065_v35 = vadd.f32 %v5635_v46, %v5627_v58  ;;  %v5567_v40 = vpop.permute.xlu0 %5566 }
0x1c6e   :  { %v14067_v52 = vadd.f32 %v5567_v40, %v5559_v11 }
0x1c6f   :  { %12643 = vtanh.f32 %v14065_v35  ;;  %v5815_v40 = vrot.slane %v14065_v35, 6 }
0x1c70   :  { %12645 = vtanh.f32 %v14067_v52 }
0x1c79   :  { %v12644_v56 = vpop.eup %12643 }
0x1c7a   :  { %v12646_v59 = vpop.eup %12645  ;;  %5640 = vrot.lane.b32.xlu1 %v12644_v56, %s12953_s2 }
0x1c7b   :  { %5572 = vrot.lane.b32.xlu0 %v12646_v59, %s12953_s2 }
0x1cec   :  { %v5641_v47 = vpop.permute.xlu1 %5640 }
0x1ced   :  { %v5643_v31 = vmul.f32 %v12640_v7, %v5641_v47  ;;  %v5573_v61 = vpop.permute.xlu0 %5572 }
0x1cee   :  { %v5575_v17 = vmul.f32 %v12642_v19, %v5573_v61 }
0x1cef   :  { %v5644_v41 = vpack.c.bf16 %v5643_v31, %v5643_v31 }
0x1cf0   :  { %v5645_v21 = vpack.c.bf16 %v5575_v17, %v5575_v17  ;;  %v7863_v23 = vrot.slane %v5575_v17, 2 }
0x1cf1   :  { %5693 = vrot.lane.b32.xlu1 %v5644_v41, %s12963_s15 }
0x1cf2   :  { %5647 = vrot.lane.b32.xlu0 %v5645_v21, %s12963_s15  ;;  %v14077_v24 = vsel %vm7894_vm13, %v14033_v1, %v7863_v23 }
0x1d63   :  { %v5694_v63 = vpop.permute.xlu1 %5693 }
0x1d64   :  { %11395 = vmatmul.mubr.msk.bf16.vlgmr.msra.gmra.mrb[44].mxu1 %vm4727_vm9, %v5694_v63  ;;  %v5648_v20 = vpop.permute.xlu0 %5647 }
0x1d65   :  { %11387 = vmatmul.mubr.msk.bf16.vlgmr.msra.gmra.mrb[152].mxu0 %vm4727_vm9, %v5648_v20  ;;  %11407 = vmatpush3.bf16.msra.mxu1 %v13878_v2 }
0x1d66   :  { %11399 = vmatpush3.bf16.msra.mxu0 %v13815_v48  ;;  %11402 = vmatprep.mubr.msk.bf16.mxu0 %vm12965_vm2, %v12964_v36 }
0x1d67   :  { %11400 = vmatprep.subr.bf16.mxu0 %v12964_v36  ;;  %11408 = vmatprep.subr.bf16.mxu1 %v12964_v36 }
0x1d68   :  { %11410 = vmatprep.mubr.msk.bf16.mxu1 %vm12965_vm2, %v12964_v36 }
0x1d69   :  { %11409 = vmatpush3.bf16.msra.mxu1 %v13884_v29 }
0x1d6a   :  { %11401 = vmatpush3.bf16.msra.mxu0 %v13824_v57  ;;  %11422 = vmatprep.subr.bf16.mxu1 %v12964_v36 }
0x1d6b   :  { %11414 = vmatprep.subr.bf16.mxu0 %v12964_v36 }
0x1d6d   :  { %11403 = vmatmul.mubr.msk.bf16.vlgmr.msra.gmra.mrb[156].mxu0 %vm4727_vm9, %v5694_v63 }
0x1d6e   :  { %11415 = vmatpush3.bf16.msra.mxu0 %v13891_v37  ;;  %11418 = vmatprep.mubr.msk.bf16.mxu0 %vm12965_vm2, %v12964_v36 }
0x1d6f   :  { %11416 = vmatprep.subr.bf16.mxu0 %v12964_v36 }
0x1d72   :  { %11417 = vmatpush3.bf16.msra.mxu0 %v13900_v30 }
0x1d73   :  { %11430 = vmatprep.subr.bf16.mxu0 %v12964_v36 }
0x1e37   :  { %v5732_v1 = vpop.f32.mrb[44].mxu1 }
0x1e38   :  { %v11396_v27 = vpop.f32.mrb[45].mxu1  ;;  %v5686_v34 = vpop.f32.mrb[152].mxu0 }
0x1e39   :  { %v5733_v43 = vadd.f32 %v5732_v1, %v5686_v34  ;;  %v5735_v45 = vpop.f32.mrb[46].mxu1  ;;  %v11388_v39 = vpop.f32.mrb[153].mxu0 }
0x1e3a   :  { %v11397_v51 = vpop.f32.mrb[47].mxu1  ;;  %v5689_v18 = vpop.f32.mrb[154].mxu0 }
0x1e3b   :  { %v5738_v50 = vadd.f32 %v13925_v14, %v5733_v43  ;;  %v11389_v22 = vpop.f32.mrb[155].mxu0 }
0x1e3d   :  { %12647 = vtanh.f32 %v5738_v50  ;;  %v9905_v38 = vmul.f32 -1.442695, %v5738_v50 }
0x1e40   :  { %v5797_v25 = vpop.f32.mrb[156].mxu0 }
0x1e41   :  { %v5804_v53 = vrot.slane %v5797_v25, 6  ;;  %v11404_v28 = vpop.f32.mrb[157].mxu0 }
0x1e42   :  { %v5800_v4 = vpop.f32.mrb[158].mxu0 }
0x1e43   :  { %v5806_v10 = vadd.f32 %v5804_v53, %v13865_v49  ;;  %v11405_v6 = vpop.f32.mrb[159].mxu0 }
0x1e45   :  { %12649 = vtanh.f32 %v5806_v10  ;;  %v9907_v44 = vmul.f32 -1.442695, %v5806_v10 }
0x1e46   :  { %12651 = vpow2.f32 %v9905_v38 }
0x1e47   :  { %v12648_v9 = vpop.eup %12647  ;;  %12653 = vpow2.f32 %v9907_v44 }
0x1e48   :  { %5748 = vrot.lane.b32.xlu0 %v12648_v9, %s12953_s2 }
0x1e4f   :  { %v12650_v32 = vpop.eup %12649 }
0x1e50   :  { %5819 = vrot.lane.b32.xlu1 %v12650_v32, %s12953_s2  ;;  %v12652_v62 = vpop.eup %12651 }
0x1e51   :  { %v5742_v54 = vadd.f32 1.0, %v12652_v62  ;;  %v12654_v3 = vpop.eup %12653 }
0x1e52   :  { %v5810_v7 = vadd.f32 1.0, %v12654_v3 }
0x1e53   :  { %12655 = vrcp.f32 %v5742_v54 }
0x1e54   :  { %12657 = vrcp.f32 %v5810_v7 }
0x1e5d   :  { %v12656_v12 = vpop.eup %12655 }
0x1e5e   :  { %v12658_v33 = vpop.eup %12657  ;;  %v5746_v58 = vmul.f32 %v12656_v12, %v14067_v52 }
0x1e5f   :  { %v5817_v56 = vmul.f32 %v12658_v33, %v5815_v40 }
0x1eba   :  { %v5749_v19 = vpop.permute.xlu0 %5748 }
0x1ebb   :  { %v5751_v26 = vmul.f32 %v12656_v12, %v5749_v19 }
0x1ebd   :  { %5753 = vrot.lane.b32.xlu0 %v5751_v26, %s12963_s15 }
0x1ec2   :  { %v5820_v60 = vpop.permute.xlu1 %5819 }
0x1ec3   :  { %v5822_v8 = vmul.f32 %v12658_v33, %v5820_v60 }
0x1ec5   :  { %5824 = vrot.lane.b32.xlu1 %v5822_v8, %s12963_s15 }
0x1f2f   :  { %v5754_v46 = vpop.permute.xlu0 %5753 }
0x1f30   :  { %v14107_v11 = vadd.f32 %v5754_v46, %v5746_v58 }
0x1f32   :  { %12659 = vtanh.f32 %v14107_v11 }
0x1f37   :  { %v5825_v59 = vpop.permute.xlu1 %5824 }
0x1f38   :  { %v14111_v47 = vadd.f32 %v5825_v59, %v5817_v56 }
0x1f3a   :  { %12661 = vtanh.f32 %v14111_v47  ;;  %v6006_v19 = vrot.slane %v14111_v47, 6 }
0x1f3c   :  { %v12660_v31 = vpop.eup %12659 }
0x1f3d   :  { %5759 = vrot.lane.b32.xlu0 %v12660_v31, %s12953_s2 }
0x1f44   :  { %v12662_v61 = vpop.eup %12661 }
0x1f45   :  { %5830 = vrot.lane.b32.xlu1 %v12662_v61, %s12953_s2 }
0x1faf   :  { %v5760_v52 = vpop.permute.xlu0 %5759 }
0x1fb0   :  { %v14116_v17 = vmul.f32 %v12656_v12, %v5760_v52 }
0x1fb2   :  { %v5835_v41 = vpack.c.bf16 %v14116_v17, %v14116_v17 }
0x1fb4   :  { %5837 = vrot.lane.b32.xlu0 %v5835_v41, %s12963_s15 }
0x1fb7   :  { %v5831_v35 = vpop.permute.xlu1 %5830 }
0x1fb8   :  { %v5833_v21 = vmul.f32 %v12658_v33, %v5831_v35 }
0x1fba   :  { %v5834_v23 = vpack.c.bf16 %v5833_v21, %v5833_v21  ;;  %v14169_v21 = vld [vmem:[%s14833_s3 + $0x10] sm:$0xff]  }
0x1fbc   :  { %v5883_v63 = vrot.slane %v5834_v23, 1 }
0x1fbe   :  { %5884 = vrot.lane.b32.xlu1 %v5883_v63, %s12963_s15  ;;  %v14179_v63 = vld [vmem:[%s14833_s3 + $0x30] sm:$0xff]  }
0x2026   :  { %v5838_v20 = vpop.permute.xlu0 %5837 }
0x2027   :  { %11411 = vmatmul.mubr.msk.bf16.vlgmr.msra.gmra.mrb[48].mxu1 %vm4727_vm9, %v5838_v20  ;;  %v14187_v20 = vld [vmem:[%s14833_s3 + $0x18] sm:$0xff]  }
0x2028   :  { %11423 = vmatpush3.bf16.msra.mxu1 %v13815_v48  ;;  %11426 = vmatprep.mubr.msk.bf16.mxu1 %vm12965_vm2, %v12964_v36 }
0x2029   :  { %11424 = vmatprep.subr.bf16.mxu1 %v12964_v36 }
0x202c   :  { %11425 = vmatpush3.bf16.msra.mxu1 %v13824_v57 }
0x202d   :  { %11438 = vmatprep.subr.bf16.mxu1 %v12964_v36 }
0x2030   :  { %v5885_v1 = vpop.permute.xlu1 %5884 }
0x2031   :  { %11419 = vmatmul.mubr.msk.bf16.vlgmr.msra.gmra.mrb[160].mxu0 %vm4727_vm9, %v5885_v1  ;;  %11427 = vmatmul.mubr.msk.bf16.vlgmr.msra.gmra.mrb[52].mxu1 %vm4727_vm9, %v5885_v1  ;;  %v14196_v1 = vld [vmem:[%s14833_s3 + $0x38] sm:$0xff]  }
0x2032   :  { %11431 = vmatpush3.bf16.msra.mxu0 %v13878_v2  ;;  %11439 = vmatpush3.bf16.msra.mxu1 %v13891_v37 }
0x2033   :  { %11432 = vmatprep.subr.bf16.mxu0 %v12964_v36  ;;  %11440 = vmatprep.subr.bf16.mxu1 %v12964_v36 }
0x2034   :  { %11434 = vmatprep.mubr.msk.bf16.mxu0 %vm12965_vm2, %v12964_v36  ;;  %11442 = vmatprep.mubr.msk.bf16.mxu1 %vm12965_vm2, %v12964_v36 }
0x2036   :  { %11433 = vmatpush3.bf16.msra.mxu0 %v13884_v29  ;;  %11441 = vmatpush3.bf16.msra.mxu1 %v13900_v30 }
0x2037   :  { %11446 = vmatprep.subr.bf16.mxu0 %v12964_v36  ;;  %11454 = vmatprep.subr.bf16.mxu1 %v12964_v36 }
0x20fa   :  { %v5876_v48 = vpop.f32.mrb[48].mxu1 }
0x20fb   :  { %v11412_v57 = vpop.f32.mrb[49].mxu1 }
0x20fc   :  { %v5879_v2 = vpop.f32.mrb[50].mxu1  ;;  %v14212_v57 = vld [vmem:[%s14833_s3 + $0x28] sm:$0xff]  }
0x20fd   :  { %v11413_v37 = vpop.f32.mrb[51].mxu1 }
0x2104   :  { %v5923_v27 = vpop.f32.mrb[160].mxu0  ;;  %v5988_v34 = vpop.f32.mrb[52].mxu1 }
0x2105   :  { %v5924_v43 = vadd.f32 %v5923_v27, %v5876_v48  ;;  %v5995_v45 = vrot.slane %v5988_v34, 4  ;;  %v11420_v39 = vpop.f32.mrb[161].mxu0  ;;  %v11428_v51 = vpop.f32.mrb[53].mxu1  ;;  %v14203_v48 = vld [vmem:[%s14833_s3 + $0x20] sm:$0xff]  }
0x2106   :  { %v5926_v18 = vpop.f32.mrb[162].mxu0  ;;  %v5991_v50 = vpop.f32.mrb[54].mxu1 }
0x2107   :  { %v5929_v29 = vadd.f32 %v13925_v14, %v5924_v43  ;;  %v5997_v30 = vadd.f32 %v5995_v45, %v13865_v49  ;;  %v11421_v22 = vpop.f32.mrb[163].mxu0  ;;  %v11429_v25 = vpop.f32.mrb[55].mxu1 }
0x2109   :  { %12663 = vtanh.f32 %v5929_v29  ;;  %v9910_v4 = vmul.f32 -1.442695, %v5929_v29  ;;  %v9912_v10 = vmul.f32 -1.442695, %v5997_v30 }
0x210a   :  { %12665 = vtanh.f32 %v5997_v30 }
0x210b   :  { %12667 = vpow2.f32 %v9910_v4 }
0x210c   :  { %12669 = vpow2.f32 %v9912_v10 }
0x2113   :  { %v12664_v53 = vpop.eup %12663 }
0x2114   :  { %v12666_v28 = vpop.eup %12665  ;;  %5939 = vrot.lane.b32.xlu0 %v12664_v53, %s12953_s2 }
0x2115   :  { %6010 = vrot.lane.b32.xlu1 %v12666_v28, %s12953_s2  ;;  %v12668_v6 = vpop.eup %12667 }
0x2116   :  { %v12670_v9 = vpop.eup %12669  ;;  %v5933_v32 = vadd.f32 1.0, %v12668_v6 }
0x2117   :  { %v6001_v38 = vadd.f32 1.0, %v12670_v9 }
0x2118   :  { %12671 = vrcp.f32 %v5933_v32 }
0x2119   :  { %12673 = vrcp.f32 %v6001_v38 }
0x2122   :  { %v12672_v44 = vpop.eup %12671 }
0x2123   :  { %v12674_v54 = vpop.eup %12673  ;;  %v5937_v26 = vmul.f32 %v12672_v44, %v14107_v11 }
0x2124   :  { %v6008_v33 = vmul.f32 %v12674_v54, %v6006_v19 }
0x2186   :  { %v5940_v62 = vpop.permute.xlu0 %5939 }
0x2187   :  { %v6011_v3 = vpop.permute.xlu1 %6010  ;;  %v5942_v7 = vmul.f32 %v12672_v44, %v5940_v62 }
0x2188   :  { %v6013_v12 = vmul.f32 %v12674_v54, %v6011_v3 }
0x2189   :  { %5944 = vrot.lane.b32.xlu0 %v5942_v7, %s12963_s15 }
0x218a   :  { %6015 = vrot.lane.b32.xlu1 %v6013_v12, %s12963_s15 }
0x21fb   :  { %v5945_v60 = vpop.permute.xlu0 %5944 }
0x21fc   :  { %v6016_v8 = vpop.permute.xlu1 %6015  ;;  %v14151_v58 = vadd.f32 %v5945_v60, %v5937_v26 }
0x21fd   :  { %v14153_v46 = vadd.f32 %v6016_v8, %v6008_v33 }
0x21fe   :  { %12675 = vtanh.f32 %v14151_v58 }
0x21ff   :  { %12677 = vtanh.f32 %v14153_v46  ;;  %v6197_v60 = vrot.slane %v14153_v46, 6 }
0x2208   :  { %v12676_v40 = vpop.eup %12675 }
0x2209   :  { %v12678_v56 = vpop.eup %12677  ;;  %5950 = vrot.lane.b32.xlu0 %v12676_v40, %s12953_s2 }
0x220a   :  { %6021 = vrot.lane.b32.xlu1 %v12678_v56, %s12953_s2 }
0x227b   :  { %v5951_v59 = vpop.permute.xlu0 %5950 }
0x227c   :  { %v6022_v47 = vpop.permute.xlu1 %6021  ;;  %v14159_v11 = vmul.f32 %v12672_v44, %v5951_v59 }
0x227d   :  { %v6024_v31 = vmul.f32 %v12674_v54, %v6022_v47 }
0x227e   :  { %v6026_v61 = vpack.c.bf16 %v14159_v11, %v14159_v11 }
0x227f   :  { %v6025_v52 = vpack.c.bf16 %v6024_v31, %v6024_v31 }
0x2280   :  { %6028 = vrot.lane.b32.xlu0 %v6026_v61, %s12963_s15 }
0x2281   :  { %v6074_v41 = vrot.slane %v6025_v52, 2 }
0x2283   :  { %6075 = vrot.lane.b32.xlu1 %v6074_v41, %s12963_s15 }
0x22f2   :  { %v6029_v35 = vpop.permute.xlu0 %6028 }
0x22f3   :  { %11435 = vmatmul.mubr.msk.bf16.vlgmr.msra.gmra.mrb[164].mxu0 %vm4727_vm9, %v6029_v35 }
0x22f4   :  { %11447 = vmatpush3.bf16.msra.mxu0 %v14169_v21  ;;  %11450 = vmatprep.mubr.msk.bf16.mxu0 %vm12965_vm2, %v12964_v36 }
0x22f5   :  { %v6076_v23 = vpop.permute.xlu1 %6075  ;;  %11448 = vmatprep.subr.bf16.mxu0 %v12964_v36 }
0x22f6   :  { %11443 = vmatmul.mubr.msk.bf16.vlgmr.msra.gmra.mrb[56].mxu1 %vm4727_vm9, %v6076_v23 }
0x22f7   :  { %11455 = vmatpush3.bf16.msra.mxu1 %v14179_v63  ;;  %11458 = vmatprep.mubr.msk.bf16.mxu1 %vm12965_vm2, %v12964_v36 }
0x22f8   :  { %11449 = vmatpush3.bf16.msra.mxu0 %v14187_v20  ;;  %11456 = vmatprep.subr.bf16.mxu1 %v12964_v36 }
0x22f9   :  { %11462 = vmatprep.subr.bf16.mxu0 %v12964_v36 }
0x22fb   :  { %11451 = vmatmul.mubr.msk.bf16.vlgmr.msra.gmra.mrb[168].mxu0 %vm4727_vm9, %v6076_v23  ;;  %11457 = vmatpush3.bf16.msra.mxu1 %v14196_v1 }
0x22fc   :  { %11470 = vmatprep.subr.bf16.mxu1 %v12964_v36  ;;  %11463 = vmatpush3.bf16.msra.mxu0 %v14203_v48 }
0x22fd   :  { %11464 = vmatprep.subr.bf16.mxu0 %v12964_v36  ;;  %11466 = vmatprep.mubr.msk.bf16.mxu0 %vm12965_vm2, %v12964_v36 }
0x2300   :  { %11465 = vmatpush3.bf16.msra.mxu0 %v14212_v57 }
0x2301   :  { %11478 = vmatprep.subr.bf16.mxu0 %v12964_v36 }
0x23c6   :  { %v6067_v2 = vpop.f32.mrb[164].mxu0 }
0x23c7   :  { %v11436_v37 = vpop.f32.mrb[165].mxu0 }
0x23c8   :  { %v6070_v27 = vpop.f32.mrb[166].mxu0 }
0x23c9   :  { %v6114_v34 = vpop.f32.mrb[56].mxu1  ;;  %v11437_v43 = vpop.f32.mrb[167].mxu0 }
0x23ca   :  { %v6115_v45 = vadd.f32 %v6114_v34, %v6067_v2  ;;  %v11444_v39 = vpop.f32.mrb[57].mxu1 }
0x23cb   :  { %v6117_v51 = vpop.f32.mrb[58].mxu1 }
0x23cc   :  { %v6120_v18 = vadd.f32 %v13925_v14, %v6115_v45  ;;  %v11445_v50 = vpop.f32.mrb[59].mxu1 }
0x23ce   :  { %12679 = vtanh.f32 %v6120_v18  ;;  %v6179_v29 = vpop.f32.mrb[168].mxu0  ;;  %v9915_v6 = vmul.f32 -1.442695, %v6120_v18 }
0x23cf   :  { %v6186_v30 = vrot.slane %v6179_v29, 2  ;;  %v11452_v22 = vpop.f32.mrb[169].mxu0 }
0x23d0   :  { %v6182_v25 = vpop.f32.mrb[170].mxu0 }
0x23d1   :  { %v6188_v53 = vadd.f32 %v6186_v30, %v13865_v49  ;;  %v11453_v28 = vpop.f32.mrb[171].mxu0 }
0x23d3   :  { %12681 = vtanh.f32 %v6188_v53  ;;  %v9917_v9 = vmul.f32 -1.442695, %v6188_v53  ;;  %v14265_v53 = vld [vmem:[%s14834_s4 + $0xb] ss:$0 sm:$0xff] }
0x23d4   :  { %12683 = vpow2.f32 %v9915_v6 }
0x23d5   :  { %12685 = vpow2.f32 %v9917_v9 }
0x23d8   :  { %v12680_v4 = vpop.eup %12679 }
0x23d9   :  { %6130 = vrot.lane.b32.xlu1 %v12680_v4, %s12953_s2 }
0x23dd   :  { %v12682_v10 = vpop.eup %12681 }
0x23de   :  { %6201 = vrot.lane.b32.xlu0 %v12682_v10, %s12953_s2  ;;  %v12684_v14 = vpop.eup %12683 }
0x23df   :  { %v6124_v32 = vadd.f32 1.0, %v12684_v14  ;;  %v12686_v38 = vpop.eup %12685 }
0x23e0   :  { %v6192_v44 = vadd.f32 1.0, %v12686_v38 }
0x23e1   :  { %12687 = vrcp.f32 %v6124_v32 }
0x23e2   :  { %12689 = vrcp.f32 %v6192_v44 }
0x23eb   :  { %v12688_v62 = vpop.eup %12687 }
0x23ec   :  { %v12690_v3 = vpop.eup %12689  ;;  %v6128_v19 = vmul.f32 %v12688_v62, %v14151_v58  ;;  %v7866_v58 = vrot.slane %v14159_v11, 6 }
0x23ed   :  { %v6199_v8 = vmul.f32 %v12690_v3, %v6197_v60 }
0x23ee   :  { %v7896_v41 = vsel %vm2521_vm4, %v14116_v17, %v7866_v58 }
0x244b   :  { %v6131_v49 = vpop.permute.xlu1 %6130 }
0x244c   :  { %v6133_v54 = vmul.f32 %v12688_v62, %v6131_v49 }
0x244e   :  { %6135 = vrot.lane.b32.xlu1 %v6133_v54, %s12963_s15 }
0x2450   :  { %v6202_v7 = vpop.permute.xlu0 %6201 }
0x2451   :  { %v6204_v12 = vmul.f32 %v12690_v3, %v6202_v7 }
0x2453   :  { %6206 = vrot.lane.b32.xlu0 %v6204_v12, %s12963_s15 }
0x24c0   :  { %v6136_v26 = vpop.permute.xlu1 %6135 }
0x24c1   :  { %v14223_v33 = vadd.f32 %v6136_v26, %v6128_v19 }
0x24c3   :  { %12691 = vtanh.f32 %v14223_v33 }
0x24c5   :  { %v6207_v40 = vpop.permute.xlu0 %6206 }
0x24c6   :  { %v14227_v56 = vadd.f32 %v6207_v40, %v6199_v8 }
0x24c8   :  { %12693 = vtanh.f32 %v14227_v56  ;;  %v6385_v8 = vrot.slane %v14227_v56, 6 }
0x24cd   :  { %v12692_v59 = vpop.eup %12691 }
0x24ce   :  { %6141 = vrot.lane.b32.xlu1 %v12692_v59, %s12953_s2 }
0x24d2   :  { %v12694_v47 = vpop.eup %12693 }
0x24d3   :  { %6212 = vrot.lane.b32.xlu0 %v12694_v47, %s12953_s2 }
0x2540   :  { %v6142_v31 = vpop.permute.xlu1 %6141 }
0x2541   :  { %v6144_v61 = vmul.f32 %v12688_v62, %v6142_v31 }
0x2543   :  { %v6217_v52 = vpack.c.bf16 %v6144_v61, %v6144_v61  ;;  %v7869_v46 = vrot.slane %v6144_v61, 4 }
0x2545   :  { %6219 = vrot.lane.b32.xlu0 %v6217_v52, %s12963_s15  ;;  %v6213_v35 = vpop.permute.xlu0 %6212  ;;  %v14237_v23 = vsel %vm116_vm0, %v7896_v41, %v7869_v46 }
0x2546   :  { %v6215_v2 = vmul.f32 %v12690_v3, %v6213_v35 }
0x2548   :  { %v6216_v37 = vpack.c.bf16 %v6215_v2, %v6215_v2 }
0x254a   :  { %v6265_v27 = vrot.slane %v6216_v37, 3 }
0x254c   :  { %6266 = vrot.lane.b32.xlu1 %v6265_v27, %s12963_s15 }
0x25b7   :  { %v6220_v34 = vpop.permute.xlu0 %6219 }
0x25b8   :  { %11459 = vmatmul.mubr.msk.bf16.vlgmr.msra.gmra.mrb[60].mxu1 %vm4727_vm9, %v6220_v34 }
0x25b9   :  { %11471 = vmatpush3.bf16.msra.mxu1 %v14169_v21  ;;  %11474 = vmatprep.mubr.msk.bf16.mxu1 %vm12965_vm2, %v12964_v36 }
0x25ba   :  { %11472 = vmatprep.subr.bf16.mxu1 %v12964_v36 }
0x25bd   :  { %11473 = vmatpush3.bf16.msra.mxu1 %v14187_v20 }
0x25be   :  { %v6267_v17 = vpop.permute.xlu1 %6266  ;;  %11486 = vmatprep.subr.bf16.mxu1 %v12964_v36 }
0x25bf   :  { %11467 = vmatmul.mubr.msk.bf16.vlgmr.msra.gmra.mrb[172].mxu0 %vm4727_vm9, %v6267_v17 }
0x25c0   :  { %11475 = vmatmul.mubr.msk.bf16.vlgmr.msra.gmra.mrb[64].mxu1 %vm4727_vm9, %v6267_v17  ;;  %11479 = vmatpush3.bf16.msra.mxu0 %v14179_v63 }
0x25c1   :  { %11487 = vmatpush3.bf16.msra.mxu1 %v14203_v48  ;;  %11480 = vmatprep.subr.bf16.mxu0 %v12964_v36 }
0x25c2   :  { %11488 = vmatprep.subr.bf16.mxu1 %v12964_v36  ;;  %11490 = vmatprep.mubr.msk.bf16.mxu1 %vm12965_vm2, %v12964_v36 }
0x25c3   :  { %11482 = vmatprep.mubr.msk.bf16.mxu0 %vm12965_vm2, %v12964_v36 }
0x25c4   :  { %11481 = vmatpush3.bf16.msra.mxu0 %v14196_v1 }
0x25c5   :  { %11489 = vmatpush3.bf16.msra.mxu1 %v14212_v57  ;;  %11494 = vmatprep.subr.bf16.mxu0 %v12964_v36 }
0x25c6   :  { %11502 = vmatprep.subr.bf16.mxu1 %v12964_v36 }
0x268b   :  { %v6258_v11 = vpop.f32.mrb[60].mxu1 }
0x268c   :  { %v11460_v43 = vpop.f32.mrb[61].mxu1 }
0x268d   :  { %v6261_v45 = vpop.f32.mrb[62].mxu1 }
0x268e   :  { %v11461_v39 = vpop.f32.mrb[63].mxu1 }
0x2692   :  { %v6305_v51 = vpop.f32.mrb[172].mxu0 }
0x2693   :  { %v6306_v18 = vadd.f32 %v6305_v51, %v6258_v11  ;;  %v6370_v50 = vpop.f32.mrb[64].mxu1  ;;  %v11468_v29 = vpop.f32.mrb[173].mxu0 }
0x2694   :  { %v6376_v30 = vadd.f32 %v6370_v50, %v13861_v13  ;;  %v11476_v22 = vpop.f32.mrb[65].mxu1  ;;  %v6308_v25 = vpop.f32.mrb[174].mxu0 }
0x2695   :  { %v6311_v28 = vadd.f32 %v14265_v53, %v6306_v18  ;;  %v6373_v4 = vpop.f32.mrb[66].mxu1  ;;  %v11469_v10 = vpop.f32.mrb[175].mxu0 }
0x2696   :  { %12695 = vtanh.f32 %v6376_v30  ;;  %v11477_v6 = vpop.f32.mrb[67].mxu1  ;;  %v9922_v32 = vmul.f32 -1.442695, %v6376_v30 }
0x2697   :  { %12697 = vtanh.f32 %v6311_v28  ;;  %v9920_v38 = vmul.f32 -1.442695, %v6311_v28 }
0x2698   :  { %12699 = vpow2.f32 %v9922_v32 }
0x2699   :  { %12701 = vpow2.f32 %v9920_v38 }
0x26a0   :  { %v12696_v9 = vpop.eup %12695 }
0x26a1   :  { %v12698_v14 = vpop.eup %12697  ;;  %6389 = vrot.lane.b32.xlu1 %v12696_v9, %s12953_s2 }
0x26a2   :  { %6321 = vrot.lane.b32.xlu0 %v12698_v14, %s12953_s2  ;;  %v12700_v44 = vpop.eup %12699 }
0x26a3   :  { %v12702_v62 = vpop.eup %12701  ;;  %v6380_v49 = vadd.f32 1.0, %v12700_v44 }
0x26a4   :  { %v6315_v54 = vadd.f32 1.0, %v12702_v62 }
0x26a5   :  { %12703 = vrcp.f32 %v6380_v49 }
0x26a6   :  { %12705 = vrcp.f32 %v6315_v54 }
0x26af   :  { %v12704_v3 = vpop.eup %12703 }
0x26b0   :  { %v12706_v12 = vpop.eup %12705  ;;  %v6387_v40 = vmul.f32 %v12704_v3, %v6385_v8 }
0x26b1   :  { %v6319_v47 = vmul.f32 %v12706_v12, %v14223_v33 }
0x2713   :  { %v6390_v7 = vpop.permute.xlu1 %6389 }
0x2714   :  { %v6392_v19 = vmul.f32 %v12704_v3, %v6390_v7  ;;  %v6322_v26 = vpop.permute.xlu0 %6321 }
0x2715   :  { %v6324_v60 = vmul.f32 %v12706_v12, %v6322_v26 }
0x2716   :  { %6394 = vrot.lane.b32.xlu1 %v6392_v19, %s12963_s15 }
0x2717   :  { %6326 = vrot.lane.b32.xlu0 %v6324_v60, %s12963_s15 }
0x2788   :  { %v6395_v59 = vpop.permute.xlu1 %6394 }
0x2789   :  { %v14274_v58 = vadd.f32 %v6395_v59, %v6387_v40  ;;  %v6327_v31 = vpop.permute.xlu0 %6326 }
0x278a   :  { %v14276_v61 = vadd.f32 %v6327_v31, %v6319_v47 }
0x278b   :  { %12707 = vtanh.f32 %v14274_v58  ;;  %v6575_v31 = vrot.slane %v14274_v58, 6 }
0x278c   :  { %12709 = vtanh.f32 %v14276_v61 }
0x2795   :  { %v12708_v52 = vpop.eup %12707 }
0x2796   :  { %v12710_v46 = vpop.eup %12709  ;;  %6400 = vrot.lane.b32.xlu1 %v12708_v52, %s12953_s2 }
0x2797   :  { %6332 = vrot.lane.b32.xlu0 %v12710_v46, %s12953_s2 }
0x2808   :  { %v6401_v56 = vpop.permute.xlu1 %6400 }
0x2809   :  { %v6403_v41 = vmul.f32 %v12704_v3, %v6401_v56  ;;  %v6333_v35 = vpop.permute.xlu0 %6332 }
0x280a   :  { %v6335_v2 = vmul.f32 %v12706_v12, %v6333_v35 }
0x280b   :  { %v6404_v33 = vpack.c.bf16 %v6403_v41, %v6403_v41 }
0x280c   :  { %v6405_v37 = vpack.c.bf16 %v6335_v2, %v6335_v2  ;;  %v7872_v27 = vrot.slane %v6335_v2, 2 }
0x280d   :  { %6453 = vrot.lane.b32.xlu1 %v6404_v33, %s12963_s15 }
0x280e   :  { %6407 = vrot.lane.b32.xlu0 %v6405_v37, %s12963_s15  ;;  %v14286_v34 = vsel %vm7894_vm13, %v14237_v23, %v7872_v27 }
0x287f   :  { %v6454_v17 = vpop.permute.xlu1 %6453 }
0x2880   :  { %11491 = vmatmul.mubr.msk.bf16.vlgmr.msra.gmra.mrb[68].mxu1 %vm4727_vm9, %v6454_v17  ;;  %v6408_v11 = vpop.permute.xlu0 %6407 }
0x2881   :  { %11483 = vmatmul.mubr.msk.bf16.vlgmr.msra.gmra.mrb[176].mxu0 %vm4727_vm9, %v6408_v11  ;;  %11503 = vmatpush3.bf16.msra.mxu1 %v14179_v63 }
0x2882   :  { %11495 = vmatpush3.bf16.msra.mxu0 %v14169_v21  ;;  %11498 = vmatprep.mubr.msk.bf16.mxu0 %vm12965_vm2, %v12964_v36 }
0x2883   :  { %11496 = vmatprep.subr.bf16.mxu0 %v12964_v36  ;;  %11504 = vmatprep.subr.bf16.mxu1 %v12964_v36 }
0x2884   :  { %11506 = vmatprep.mubr.msk.bf16.mxu1 %vm12965_vm2, %v12964_v36 }
0x2885   :  { %11505 = vmatpush3.bf16.msra.mxu1 %v14196_v1 }
0x2886   :  { %11497 = vmatpush3.bf16.msra.mxu0 %v14187_v20  ;;  %11518 = vmatprep.subr.bf16.mxu1 %v12964_v36 }
0x2887   :  { %11510 = vmatprep.subr.bf16.mxu0 %v12964_v36 }
0x2889   :  { %11499 = vmatmul.mubr.msk.bf16.vlgmr.msra.gmra.mrb[180].mxu0 %vm4727_vm9, %v6454_v17 }
0x288a   :  { %11511 = vmatpush3.bf16.msra.mxu0 %v14203_v48  ;;  %11514 = vmatprep.mubr.msk.bf16.mxu0 %vm12965_vm2, %v12964_v36 }
0x288b   :  { %11512 = vmatprep.subr.bf16.mxu0 %v12964_v36 }
0x288e   :  { %11513 = vmatpush3.bf16.msra.mxu0 %v14212_v57 }
0x288f   :  { %11526 = vmatprep.subr.bf16.mxu0 %v12964_v36 }
0x2953   :  { %v6492_v23 = vpop.f32.mrb[68].mxu1 }
0x2954   :  { %v11492_v43 = vpop.f32.mrb[69].mxu1  ;;  %v6446_v45 = vpop.f32.mrb[176].mxu0 }
0x2955   :  { %v6493_v39 = vadd.f32 %v6492_v23, %v6446_v45  ;;  %v6495_v51 = vpop.f32.mrb[70].mxu1  ;;  %v11484_v18 = vpop.f32.mrb[177].mxu0 }
0x2956   :  { %v11493_v50 = vpop.f32.mrb[71].mxu1  ;;  %v6449_v29 = vpop.f32.mrb[178].mxu0 }
0x2957   :  { %v6498_v30 = vadd.f32 %v14265_v53, %v6493_v39  ;;  %v11485_v22 = vpop.f32.mrb[179].mxu0 }
0x2959   :  { %12711 = vtanh.f32 %v6498_v30  ;;  %v9925_v38 = vmul.f32 -1.442695, %v6498_v30 }
0x295c   :  { %v6557_v25 = vpop.f32.mrb[180].mxu0 }
0x295d   :  { %v6564_v28 = vrot.slane %v6557_v25, 6  ;;  %v11500_v4 = vpop.f32.mrb[181].mxu0 }
0x295e   :  { %v6560_v10 = vpop.f32.mrb[182].mxu0 }
0x295f   :  { %v6566_v6 = vadd.f32 %v6564_v28, %v13861_v13  ;;  %v11501_v9 = vpop.f32.mrb[183].mxu0 }
0x2961   :  { %12713 = vtanh.f32 %v6566_v6  ;;  %v9927_v44 = vmul.f32 -1.442695, %v6566_v6 }
0x2962   :  { %12715 = vpow2.f32 %v9925_v38 }
0x2963   :  { %v12712_v14 = vpop.eup %12711  ;;  %12717 = vpow2.f32 %v9927_v44 }
0x2964   :  { %6508 = vrot.lane.b32.xlu0 %v12712_v14, %s12953_s2 }
0x296b   :  { %v12714_v32 = vpop.eup %12713 }
0x296c   :  { %6579 = vrot.lane.b32.xlu1 %v12714_v32, %s12953_s2  ;;  %v12716_v62 = vpop.eup %12715 }
0x296d   :  { %v6502_v49 = vadd.f32 1.0, %v12716_v62  ;;  %v12718_v54 = vpop.eup %12717 }
0x296e   :  { %v6570_v3 = vadd.f32 1.0, %v12718_v54 }
0x296f   :  { %12719 = vrcp.f32 %v6502_v49 }
0x2970   :  { %12721 = vrcp.f32 %v6570_v3 }
0x2979   :  { %v12720_v7 = vpop.eup %12719 }
0x297a   :  { %v12722_v26 = vpop.eup %12721  ;;  %v6506_v40 = vmul.f32 %v12720_v7, %v14276_v61 }
0x297b   :  { %v6577_v52 = vmul.f32 %v12722_v26, %v6575_v31 }
0x29d6   :  { %v6509_v12 = vpop.permute.xlu0 %6508 }
0x29d7   :  { %v6511_v19 = vmul.f32 %v12720_v7, %v6509_v12 }
0x29d9   :  { %6513 = vrot.lane.b32.xlu0 %v6511_v19, %s12963_s15 }
0x29de   :  { %v6580_v60 = vpop.permute.xlu1 %6579 }
0x29df   :  { %v6582_v8 = vmul.f32 %v12722_v26, %v6580_v60 }
0x29e1   :  { %6584 = vrot.lane.b32.xlu1 %v6582_v8, %s12963_s15 }
0x2a4b   :  { %v6514_v59 = vpop.permute.xlu0 %6513 }
0x2a4c   :  { %v14316_v47 = vadd.f32 %v6514_v59, %v6506_v40 }
0x2a4e   :  { %12723 = vtanh.f32 %v14316_v47 }
0x2a53   :  { %v6585_v46 = vpop.permute.xlu1 %6584 }
0x2a54   :  { %v14320_v56 = vadd.f32 %v6585_v46, %v6577_v52 }
0x2a56   :  { %12725 = vtanh.f32 %v14320_v56  ;;  %v6766_v59 = vrot.slane %v14320_v56, 6 }
0x2a58   :  { %v12724_v41 = vpop.eup %12723 }
0x2a59   :  { %6519 = vrot.lane.b32.xlu0 %v12724_v41, %s12953_s2 }
0x2a60   :  { %v12726_v35 = vpop.eup %12725 }
0x2a61   :  { %6590 = vrot.lane.b32.xlu1 %v12726_v35, %s12953_s2 }
0x2acb   :  { %v6520_v61 = vpop.permute.xlu0 %6519 }
0x2acc   :  { %v14325_v2 = vmul.f32 %v12720_v7, %v6520_v61 }
0x2ace   :  { %v6595_v33 = vpack.c.bf16 %v14325_v2, %v14325_v2 }
0x2ad0   :  { %6597 = vrot.lane.b32.xlu0 %v6595_v33, %s12963_s15 }
0x2ad3   :  { %v6591_v58 = vpop.permute.xlu1 %6590 }
0x2ad4   :  { %v6593_v37 = vmul.f32 %v12722_v26, %v6591_v58 }
0x2ad6   :  { %v6594_v27 = vpack.c.bf16 %v6593_v37, %v6593_v37 }
0x2ad8   :  { %v6643_v17 = vrot.slane %v6594_v27, 1 }
0x2ada   :  { %6644 = vrot.lane.b32.xlu1 %v6643_v17, %s12963_s15 }
0x2b42   :  { %v6598_v11 = vpop.permute.xlu0 %6597 }
0x2b43   :  { %11507 = vmatmul.mubr.msk.bf16.vlgmr.msra.gmra.mrb[72].mxu1 %vm4727_vm9, %v6598_v11 }
0x2b44   :  { %11519 = vmatpush3.bf16.msra.mxu1 %v14169_v21  ;;  %11522 = vmatprep.mubr.msk.bf16.mxu1 %vm12965_vm2, %v12964_v36 }
0x2b45   :  { %11520 = vmatprep.subr.bf16.mxu1 %v12964_v36 }
0x2b48   :  { %11521 = vmatpush3.bf16.msra.mxu1 %v14187_v20 }
0x2b49   :  { %11534 = vmatprep.subr.bf16.mxu1 %v12964_v36 }
0x2b4c   :  { %v6645_v23 = vpop.permute.xlu1 %6644 }
0x2b4d   :  { %11515 = vmatmul.mubr.msk.bf16.vlgmr.msra.gmra.mrb[184].mxu0 %vm4727_vm9, %v6645_v23  ;;  %11523 = vmatmul.mubr.msk.bf16.vlgmr.msra.gmra.mrb[76].mxu1 %vm4727_vm9, %v6645_v23 }
0x2b4e   :  { %11527 = vmatpush3.bf16.msra.mxu0 %v14179_v63  ;;  %11535 = vmatpush3.bf16.msra.mxu1 %v14203_v48 }
0x2b4f   :  { %11528 = vmatprep.subr.bf16.mxu0 %v12964_v36  ;;  %11536 = vmatprep.subr.bf16.mxu1 %v12964_v36 }
0x2b50   :  { %11530 = vmatprep.mubr.msk.bf16.mxu0 %vm12965_vm2, %v12964_v36  ;;  %11538 = vmatprep.mubr.msk.bf16.mxu1 %vm12965_vm2, %v12964_v36 }
0x2b52   :  { %11529 = vmatpush3.bf16.msra.mxu0 %v14196_v1  ;;  %11537 = vmatpush3.bf16.msra.mxu1 %v14212_v57 }
0x2b53   :  { %11542 = vmatprep.subr.bf16.mxu0 %v12964_v36  ;;  %11550 = vmatprep.subr.bf16.mxu1 %v12964_v36 }
0x2c16   :  { %v6636_v43 = vpop.f32.mrb[72].mxu1 }
0x2c17   :  { %v11508_v45 = vpop.f32.mrb[73].mxu1 }
0x2c18   :  { %v6639_v39 = vpop.f32.mrb[74].mxu1 }
0x2c19   :  { %v11509_v51 = vpop.f32.mrb[75].mxu1 }
0x2c20   :  { %v6683_v18 = vpop.f32.mrb[184].mxu0  ;;  %v6748_v50 = vpop.f32.mrb[76].mxu1 }
0x2c21   :  { %v6684_v29 = vadd.f32 %v6683_v18, %v6636_v43  ;;  %v6755_v30 = vrot.slane %v6748_v50, 4  ;;  %v11516_v22 = vpop.f32.mrb[185].mxu0  ;;  %v11524_v25 = vpop.f32.mrb[77].mxu1 }
0x2c22   :  { %v6686_v28 = vpop.f32.mrb[186].mxu0  ;;  %v6751_v4 = vpop.f32.mrb[78].mxu1 }
0x2c23   :  { %v6689_v10 = vadd.f32 %v14265_v53, %v6684_v29  ;;  %v6757_v6 = vadd.f32 %v6755_v30, %v13861_v13  ;;  %v11517_v9 = vpop.f32.mrb[187].mxu0  ;;  %v11525_v14 = vpop.f32.mrb[79].mxu1 }
0x2c25   :  { %12727 = vtanh.f32 %v6689_v10  ;;  %v9930_v44 = vmul.f32 -1.442695, %v6689_v10  ;;  %v9932_v62 = vmul.f32 -1.442695, %v6757_v6 }
0x2c26   :  { %12729 = vtanh.f32 %v6757_v6 }
0x2c27   :  { %12731 = vpow2.f32 %v9930_v44 }
0x2c28   :  { %12733 = vpow2.f32 %v9932_v62 }
0x2c2f   :  { %v12728_v32 = vpop.eup %12727 }
0x2c30   :  { %v12730_v38 = vpop.eup %12729  ;;  %6699 = vrot.lane.b32.xlu0 %v12728_v32, %s12953_s2 }
0x2c31   :  { %6770 = vrot.lane.b32.xlu1 %v12730_v38, %s12953_s2  ;;  %v12732_v49 = vpop.eup %12731 }
0x2c32   :  { %v12734_v54 = vpop.eup %12733  ;;  %v6693_v3 = vadd.f32 1.0, %v12732_v49 }
0x2c33   :  { %v6761_v7 = vadd.f32 1.0, %v12734_v54 }
0x2c34   :  { %12735 = vrcp.f32 %v6693_v3 }
0x2c35   :  { %12737 = vrcp.f32 %v6761_v7 }
0x2c3e   :  { %v12736_v12 = vpop.eup %12735 }
0x2c3f   :  { %v12738_v26 = vpop.eup %12737  ;;  %v6697_v31 = vmul.f32 %v12736_v12, %v14316_v47 }
0x2c40   :  { %v6768_v52 = vmul.f32 %v12738_v26, %v6766_v59 }
0x2ca2   :  { %v6700_v19 = vpop.permute.xlu0 %6699 }
0x2ca3   :  { %v6771_v60 = vpop.permute.xlu1 %6770  ;;  %v6702_v8 = vmul.f32 %v12736_v12, %v6700_v19 }
0x2ca4   :  { %v6773_v40 = vmul.f32 %v12738_v26, %v6771_v60 }
0x2ca5   :  { %6704 = vrot.lane.b32.xlu0 %v6702_v8, %s12963_s15 }
0x2ca6   :  { %6775 = vrot.lane.b32.xlu1 %v6773_v40, %s12963_s15 }
0x2d17   :  { %v6705_v46 = vpop.permute.xlu0 %6704 }
0x2d18   :  { %v6776_v41 = vpop.permute.xlu1 %6775  ;;  %v14360_v35 = vadd.f32 %v6705_v46, %v6697_v31 }
0x2d19   :  { %v14362_v61 = vadd.f32 %v6776_v41, %v6768_v52 }
0x2d1a   :  { %12739 = vtanh.f32 %v14360_v35 }
0x2d1b   :  { %12741 = vtanh.f32 %v14362_v61  ;;  %v6957_v41 = vrot.slane %v14362_v61, 6 }
0x2d24   :  { %v12740_v33 = vpop.eup %12739 }
0x2d25   :  { %v12742_v58 = vpop.eup %12741  ;;  %6710 = vrot.lane.b32.xlu0 %v12740_v33, %s12953_s2 }
0x2d26   :  { %6781 = vrot.lane.b32.xlu1 %v12742_v58, %s12953_s2 }
0x2d97   :  { %v6711_v56 = vpop.permute.xlu0 %6710 }
0x2d98   :  { %v6782_v37 = vpop.permute.xlu1 %6781  ;;  %v14368_v47 = vmul.f32 %v12736_v12, %v6711_v56 }
0x2d99   :  { %v6784_v27 = vmul.f32 %v12738_v26, %v6782_v37 }
0x2d9a   :  { %v6786_v17 = vpack.c.bf16 %v14368_v47, %v14368_v47 }
0x2d9b   :  { %v6785_v11 = vpack.c.bf16 %v6784_v27, %v6784_v27 }
0x2d9c   :  { %6788 = vrot.lane.b32.xlu0 %v6786_v17, %s12963_s15 }
0x2d9d   :  { %v6834_v23 = vrot.slane %v6785_v11, 2 }
0x2d9f   :  { %6835 = vrot.lane.b32.xlu1 %v6834_v23, %s12963_s15 }
0x2e0e   :  { %v6789_v43 = vpop.permute.xlu0 %6788 }
0x2e0f   :  { %11531 = vmatmul.mubr.msk.bf16.vlgmr.msra.gmra.mrb[188].mxu0 %vm4727_vm9, %v6789_v43 }
0x2e10   :  { %11543 = vmatpush3.bf16.msra.mxu0 %v14169_v21  ;;  %11546 = vmatprep.mubr.msk.bf16.mxu0 %vm12965_vm2, %v12964_v36 }
0x2e11   :  { %v6836_v45 = vpop.permute.xlu1 %6835  ;;  %11544 = vmatprep.subr.bf16.mxu0 %v12964_v36 }
0x2e12   :  { %11539 = vmatmul.mubr.msk.bf16.vlgmr.msra.gmra.mrb[80].mxu1 %vm4727_vm9, %v6836_v45 }
0x2e13   :  { %11551 = vmatpush3.bf16.msra.mxu1 %v14179_v63  ;;  %11554 = vmatprep.mubr.msk.bf16.mxu1 %vm12965_vm2, %v12964_v36 }
0x2e14   :  { %11545 = vmatpush3.bf16.msra.mxu0 %v14187_v20  ;;  %11552 = vmatprep.subr.bf16.mxu1 %v12964_v36 }
0x2e15   :  { %11558 = vmatprep.subr.bf16.mxu0 %v12964_v36 }
0x2e17   :  { %11547 = vmatmul.mubr.msk.bf16.vlgmr.msra.gmra.mrb[192].mxu0 %vm4727_vm9, %v6836_v45  ;;  %11553 = vmatpush3.bf16.msra.mxu1 %v14196_v1 }
0x2e18   :  { %11566 = vmatprep.subr.bf16.mxu1 %v12964_v36  ;;  %11559 = vmatpush3.bf16.msra.mxu0 %v14203_v48 }
0x2e19   :  { %11560 = vmatprep.subr.bf16.mxu0 %v12964_v36  ;;  %11562 = vmatprep.mubr.msk.bf16.mxu0 %vm12965_vm2, %v12964_v36 }
0x2e1c   :  { %11561 = vmatpush3.bf16.msra.mxu0 %v14212_v57 }
0x2e1d   :  { %11574 = vmatprep.subr.bf16.mxu0 %v12964_v36 }
0x2ee2   :  { %v6827_v39 = vpop.f32.mrb[188].mxu0 }
0x2ee3   :  { %v11532_v51 = vpop.f32.mrb[189].mxu0 }
0x2ee4   :  { %v6830_v18 = vpop.f32.mrb[190].mxu0 }
0x2ee5   :  { %v6874_v50 = vpop.f32.mrb[80].mxu1  ;;  %v11533_v29 = vpop.f32.mrb[191].mxu0 }
0x2ee6   :  { %v6875_v30 = vadd.f32 %v6874_v50, %v6827_v39  ;;  %v11540_v22 = vpop.f32.mrb[81].mxu1 }
0x2ee7   :  { %v6877_v25 = vpop.f32.mrb[82].mxu1 }
0x2ee8   :  { %v6880_v28 = vadd.f32 %v14265_v53, %v6875_v30  ;;  %v11541_v4 = vpop.f32.mrb[83].mxu1 }
0x2eea   :  { %12743 = vtanh.f32 %v6880_v28  ;;  %v6939_v10 = vpop.f32.mrb[192].mxu0  ;;  %v9935_v49 = vmul.f32 -1.442695, %v6880_v28 }
0x2eeb   :  { %v6946_v6 = vrot.slane %v6939_v10, 2  ;;  %v11548_v9 = vpop.f32.mrb[193].mxu0 }
0x2eec   :  { %v6942_v14 = vpop.f32.mrb[194].mxu0 }
0x2eed   :  { %v6948_v32 = vadd.f32 %v6946_v6, %v13861_v13  ;;  %v11549_v38 = vpop.f32.mrb[195].mxu0 }
0x2eef   :  { %12745 = vtanh.f32 %v6948_v32  ;;  %v9937_v54 = vmul.f32 -1.442695, %v6948_v32 }
0x2ef0   :  { %12747 = vpow2.f32 %v9935_v49 }
0x2ef1   :  { %12749 = vpow2.f32 %v9937_v54 }
0x2ef4   :  { %v12744_v44 = vpop.eup %12743 }
0x2ef5   :  { %6890 = vrot.lane.b32.xlu1 %v12744_v44, %s12953_s2 }
0x2ef9   :  { %v12746_v62 = vpop.eup %12745 }
0x2efa   :  { %6961 = vrot.lane.b32.xlu0 %v12746_v62, %s12953_s2  ;;  %v12748_v3 = vpop.eup %12747 }
0x2efb   :  { %v6884_v7 = vadd.f32 1.0, %v12748_v3  ;;  %v12750_v12 = vpop.eup %12749 }
0x2efc   :  { %v6952_v19 = vadd.f32 1.0, %v12750_v12 }
0x2efd   :  { %12751 = vrcp.f32 %v6884_v7 }
0x2efe   :  { %12753 = vrcp.f32 %v6952_v19 }
0x2f07   :  { %v12752_v26 = vpop.eup %12751 }
0x2f08   :  { %v12754_v8 = vpop.eup %12753  ;;  %v6888_v31 = vmul.f32 %v12752_v26, %v14360_v35  ;;  %v7875_v35 = vrot.slane %v14368_v47, 6 }
0x2f09   :  { %v6959_v33 = vmul.f32 %v12754_v8, %v6957_v41 }
0x2f0a   :  { %v7899_v43 = vsel %vm2521_vm4, %v14325_v2, %v7875_v35 }
0x2f67   :  { %v6891_v13 = vpop.permute.xlu1 %6890 }
0x2f68   :  { %v6893_v60 = vmul.f32 %v12752_v26, %v6891_v13 }
0x2f6a   :  { %6895 = vrot.lane.b32.xlu1 %v6893_v60, %s12963_s15 }
0x2f6c   :  { %v6962_v40 = vpop.permute.xlu0 %6961 }
0x2f6d   :  { %v6964_v59 = vmul.f32 %v12754_v8, %v6962_v40 }
0x2f6f   :  { %6966 = vrot.lane.b32.xlu0 %v6964_v59, %s12963_s15 }
0x2fdc   :  { %v6896_v52 = vpop.permute.xlu1 %6895 }
0x2fdd   :  { %v14402_v46 = vadd.f32 %v6896_v52, %v6888_v31 }
0x2fdf   :  { %12755 = vtanh.f32 %v14402_v46 }
0x2fe1   :  { %v6967_v58 = vpop.permute.xlu0 %6966 }
0x2fe2   :  { %v14406_v56 = vadd.f32 %v6967_v58, %v6959_v33 }
0x2fe4   :  { %12757 = vtanh.f32 %v14406_v56  ;;  %v7145_v33 = vrot.slane %v14406_v56, 6 }
0x2fe9   :  { %v12756_v37 = vpop.eup %12755 }
0x2fea   :  { %6901 = vrot.lane.b32.xlu1 %v12756_v37, %s12953_s2 }
0x2fee   :  { %v12758_v27 = vpop.eup %12757 }
0x2fef   :  { %6972 = vrot.lane.b32.xlu0 %v12758_v27, %s12953_s2 }
0x305c   :  { %v6902_v17 = vpop.permute.xlu1 %6901 }
0x305d   :  { %v6904_v11 = vmul.f32 %v12752_v26, %v6902_v17 }
0x305f   :  { %v6977_v23 = vpack.c.bf16 %v6904_v11, %v6904_v11  ;;  %v7878_v61 = vrot.slane %v6904_v11, 4 }
0x3061   :  { %6979 = vrot.lane.b32.xlu0 %v6977_v23, %s12963_s15  ;;  %v6973_v45 = vpop.permute.xlu0 %6972  ;;  %v14416_v39 = vsel %vm116_vm0, %v7899_v43, %v7878_v61 }
0x3062   :  { %v6975_v51 = vmul.f32 %v12754_v8, %v6973_v45 }
0x3064   :  { %v6976_v18 = vpack.c.bf16 %v6975_v51, %v6975_v51 }
0x3066   :  { %v7025_v50 = vrot.slane %v6976_v18, 3 }
0x3068   :  { %7026 = vrot.lane.b32.xlu1 %v7025_v50, %s12963_s15 }
0x30d3   :  { %v6980_v29 = vpop.permute.xlu0 %6979 }
0x30d4   :  { %11555 = vmatmul.mubr.msk.bf16.vlgmr.msra.gmra.mrb[84].mxu1 %vm4727_vm9, %v6980_v29 }
0x30d5   :  { %11567 = vmatpush3.bf16.msra.mxu1 %v14169_v21  ;;  %11570 = vmatprep.mubr.msk.bf16.mxu1 %vm12965_vm2, %v12964_v36 }
0x30d6   :  { %11568 = vmatprep.subr.bf16.mxu1 %v12964_v36 }
0x30d9   :  { %11569 = vmatpush3.bf16.msra.mxu1 %v14187_v20 }
0x30da   :  { %v7027_v2 = vpop.permute.xlu1 %7026  ;;  %11582 = vmatprep.subr.bf16.mxu1 %v12964_v36 }
0x30db   :  { %11563 = vmatmul.mubr.msk.bf16.vlgmr.msra.gmra.mrb[196].mxu0 %vm4727_vm9, %v7027_v2 }
0x30dc   :  { %11571 = vmatmul.mubr.msk.bf16.vlgmr.msra.gmra.mrb[88].mxu1 %vm4727_vm9, %v7027_v2  ;;  %11575 = vmatpush3.bf16.msra.mxu0 %v14179_v63 }
0x30dd   :  { %11583 = vmatpush3.bf16.msra.mxu1 %v14203_v48  ;;  %11576 = vmatprep.subr.bf16.mxu0 %v12964_v36 }
0x30de   :  { %11584 = vmatprep.subr.bf16.mxu1 %v12964_v36  ;;  %11586 = vmatprep.mubr.msk.bf16.mxu1 %vm12965_vm2, %v12964_v36 }
0x30df   :  { %11578 = vmatprep.mubr.msk.bf16.mxu0 %vm12965_vm2, %v12964_v36 }
0x30e0   :  { %11577 = vmatpush3.bf16.msra.mxu0 %v14196_v1 }
0x30e1   :  { %11585 = vmatpush3.bf16.msra.mxu1 %v14212_v57  ;;  %11590 = vmatprep.subr.bf16.mxu0 %v12964_v36 }
0x30e2   :  { %11598 = vmatprep.subr.bf16.mxu1 %v12964_v36 }
0x31a7   :  { %v7018_v47 = vpop.f32.mrb[84].mxu1 }
0x31a8   :  { %v11556_v30 = vpop.f32.mrb[85].mxu1 }
0x31a9   :  { %v7021_v22 = vpop.f32.mrb[86].mxu1 }
0x31aa   :  { %v11557_v25 = vpop.f32.mrb[87].mxu1 }
0x31ae   :  { %v7065_v28 = vpop.f32.mrb[196].mxu0 }
0x31af   :  { %v7066_v4 = vadd.f32 %v7065_v28, %v7018_v47  ;;  %v7130_v10 = vpop.f32.mrb[88].mxu1  ;;  %v11564_v6 = vpop.f32.mrb[197].mxu0 }
0x31b0   :  { %v7136_v9 = vadd.f32 %v7130_v10, %v13863_v42  ;;  %v11572_v14 = vpop.f32.mrb[89].mxu1  ;;  %v7068_v32 = vpop.f32.mrb[198].mxu0 }
0x31b1   :  { %v7071_v38 = vadd.f32 %v14265_v53, %v7066_v4  ;;  %v7133_v44 = vpop.f32.mrb[90].mxu1  ;;  %v11565_v62 = vpop.f32.mrb[199].mxu0 }
0x31b2   :  { %12759 = vtanh.f32 %v7136_v9  ;;  %v11573_v49 = vpop.f32.mrb[91].mxu1  ;;  %v9942_v7 = vmul.f32 -1.442695, %v7136_v9 }
0x31b3   :  { %12761 = vtanh.f32 %v7071_v38  ;;  %v9940_v12 = vmul.f32 -1.442695, %v7071_v38 }
0x31b4   :  { %12763 = vpow2.f32 %v9942_v7 }
0x31b5   :  { %12765 = vpow2.f32 %v9940_v12 }
0x31bc   :  { %v12760_v54 = vpop.eup %12759 }
0x31bd   :  { %v12762_v3 = vpop.eup %12761  ;;  %7149 = vrot.lane.b32.xlu1 %v12760_v54, %s12953_s2 }
0x31be   :  { %7081 = vrot.lane.b32.xlu0 %v12762_v3, %s12953_s2  ;;  %v12764_v19 = vpop.eup %12763 }
0x31bf   :  { %v12766_v26 = vpop.eup %12765  ;;  %v7140_v13 = vadd.f32 1.0, %v12764_v19 }
0x31c0   :  { %v7075_v60 = vadd.f32 1.0, %v12766_v26 }
0x31c1   :  { %12767 = vrcp.f32 %v7140_v13 }
0x31c2   :  { %12769 = vrcp.f32 %v7075_v60 }
0x31cb   :  { %v12768_v8 = vpop.eup %12767 }
0x31cc   :  { %v12770_v59 = vpop.eup %12769  ;;  %v7147_v58 = vmul.f32 %v12768_v8, %v7145_v33 }
0x31cd   :  { %v7079_v27 = vmul.f32 %v12770_v59, %v14402_v46 }
0x322f   :  { %v7150_v40 = vpop.permute.xlu1 %7149 }
0x3230   :  { %v7152_v31 = vmul.f32 %v12768_v8, %v7150_v40  ;;  %v7082_v52 = vpop.permute.xlu0 %7081 }
0x3231   :  { %v7084_v41 = vmul.f32 %v12770_v59, %v7082_v52 }
0x3232   :  { %7154 = vrot.lane.b32.xlu1 %v7152_v31, %s12963_s15 }
0x3233   :  { %7086 = vrot.lane.b32.xlu0 %v7084_v41, %s12963_s15 }
0x32a4   :  { %v7155_v37 = vpop.permute.xlu1 %7154 }
0x32a5   :  { %v14448_v35 = vadd.f32 %v7155_v37, %v7147_v58  ;;  %v7087_v17 = vpop.permute.xlu0 %7086 }
0x32a6   :  { %v14450_v11 = vadd.f32 %v7087_v17, %v7079_v27 }
0x32a7   :  { %12771 = vtanh.f32 %v14448_v35  ;;  %v7335_v52 = vrot.slane %v14448_v35, 6 }
0x32a8   :  { %12773 = vtanh.f32 %v14450_v11 }
0x32b1   :  { %v12772_v23 = vpop.eup %12771 }
0x32b2   :  { %v12774_v61 = vpop.eup %12773  ;;  %7160 = vrot.lane.b32.xlu1 %v12772_v23, %s12953_s2 }
0x32b3   :  { %7092 = vrot.lane.b32.xlu0 %v12774_v61, %s12953_s2 }
0x3324   :  { %v7161_v56 = vpop.permute.xlu1 %7160 }
0x3325   :  { %v7163_v43 = vmul.f32 %v12768_v8, %v7161_v56  ;;  %v7093_v45 = vpop.permute.xlu0 %7092 }
0x3326   :  { %v7095_v51 = vmul.f32 %v12770_v59, %v7093_v45 }
0x3327   :  { %v7164_v46 = vpack.c.bf16 %v7163_v43, %v7163_v43 }
0x3328   :  { %v7165_v18 = vpack.c.bf16 %v7095_v51, %v7095_v51  ;;  %v7881_v50 = vrot.slane %v7095_v51, 2  ;;  %v14509_v51 = vld [vmem:[%s14833_s3 + $0x10] sm:$0xff]  }
0x3329   :  { %7213 = vrot.lane.b32.xlu1 %v7164_v46, %s12963_s15  ;;  %v14518_v46 = vld [vmem:[%s14833_s3 + $0x18] sm:$0xff]  }
0x332a   :  { %7167 = vrot.lane.b32.xlu0 %v7165_v18, %s12963_s15  ;;  %v14460_v29 = vsel %vm7894_vm13, %v14416_v39, %v7881_v50  ;;  %v14527_v50 = vld [vmem:[%s14833_s3 + $0x30] sm:$0xff]  }
0x339b   :  { %v7214_v2 = vpop.permute.xlu1 %7213 }
0x339c   :  { %11587 = vmatmul.mubr.msk.bf16.vlgmr.msra.gmra.mrb[92].mxu1 %vm4727_vm9, %v7214_v2  ;;  %v7168_v47 = vpop.permute.xlu0 %7167 }
0x339d   :  { %11579 = vmatmul.mubr.msk.bf16.vlgmr.msra.gmra.mrb[200].mxu0 %vm4727_vm9, %v7168_v47  ;;  %11599 = vmatpush3.bf16.msra.mxu1 %v14179_v63  ;;  %v14545_v47 = vld [vmem:[%s14833_s3 + $0x38] sm:$0xff]  }
0x339e   :  { %11591 = vmatpush3.bf16.msra.mxu0 %v14169_v21  ;;  %11594 = vmatprep.mubr.msk.bf16.mxu0 %vm12965_vm2, %v12964_v36 }
0x339f   :  { %11592 = vmatprep.subr.bf16.mxu0 %v12964_v36  ;;  %11600 = vmatprep.subr.bf16.mxu1 %v12964_v36 }
0x33a0   :  { %11602 = vmatprep.mubr.msk.bf16.mxu1 %vm12965_vm2, %v12964_v36 }
0x33a1   :  { %11601 = vmatpush3.bf16.msra.mxu1 %v14196_v1 }
0x33a2   :  { %11593 = vmatpush3.bf16.msra.mxu0 %v14187_v20  ;;  %11614 = vmatprep.subr.bf16.mxu1 %v12964_v36 }
0x33a3   :  { %11606 = vmatprep.subr.bf16.mxu0 %v12964_v36 }
0x33a5   :  { %11595 = vmatmul.mubr.msk.bf16.vlgmr.msra.gmra.mrb[204].mxu0 %vm4727_vm9, %v7214_v2  ;;  %v14533_v2 = vld [vmem:[%s14833_s3 + $0x20] sm:$0xff]  }
0x33a6   :  { %11607 = vmatpush3.bf16.msra.mxu0 %v14203_v48  ;;  %11610 = vmatprep.mubr.msk.bf16.mxu0 %vm12965_vm2, %v12964_v36 }
0x33a7   :  { %11608 = vmatprep.subr.bf16.mxu0 %v12964_v36 }
0x33aa   :  { %11609 = vmatpush3.bf16.msra.mxu0 %v14212_v57 }
0x33ab   :  { %11622 = vmatprep.subr.bf16.mxu0 %v12964_v36 }
0x346f   :  { %v7252_v21 = vpop.f32.mrb[92].mxu1 }
0x3470   :  { %v11588_v63 = vpop.f32.mrb[93].mxu1  ;;  %v7206_v20 = vpop.f32.mrb[200].mxu0 }
0x3471   :  { %v7253_v1 = vadd.f32 %v7252_v21, %v7206_v20  ;;  %v7255_v39 = vpop.f32.mrb[94].mxu1  ;;  %v11580_v30 = vpop.f32.mrb[201].mxu0  ;;  %v14551_v21 = vld [vmem:[%s14833_s3 + $0x28] sm:$0xff]  }
0x3472   :  { %v11589_v22 = vpop.f32.mrb[95].mxu1  ;;  %v7209_v25 = vpop.f32.mrb[202].mxu0 }
0x3473   :  { %v7258_v28 = vadd.f32 %v14265_v53, %v7253_v1  ;;  %v11581_v48 = vpop.f32.mrb[203].mxu0 }
0x3475   :  { %12775 = vtanh.f32 %v7258_v28  ;;  %v9945_v44 = vmul.f32 -1.442695, %v7258_v28 }
0x3478   :  { %v7317_v4 = vpop.f32.mrb[204].mxu0 }
0x3479   :  { %v7324_v10 = vrot.slane %v7317_v4, 6  ;;  %v11596_v6 = vpop.f32.mrb[205].mxu0 }
0x347a   :  { %v7320_v9 = vpop.f32.mrb[206].mxu0 }
0x347b   :  { %v7326_v57 = vadd.f32 %v7324_v10, %v13863_v42  ;;  %v11597_v14 = vpop.f32.mrb[207].mxu0 }
0x347d   :  { %12777 = vtanh.f32 %v7326_v57  ;;  %v9947_v62 = vmul.f32 -1.442695, %v7326_v57 }
0x347e   :  { %12779 = vpow2.f32 %v9945_v44 }
0x347f   :  { %v12776_v32 = vpop.eup %12775  ;;  %12781 = vpow2.f32 %v9947_v62 }
0x3480   :  { %7268 = vrot.lane.b32.xlu0 %v12776_v32, %s12953_s2 }
0x3487   :  { %v12778_v38 = vpop.eup %12777 }
0x3488   :  { %7339 = vrot.lane.b32.xlu1 %v12778_v38, %s12953_s2  ;;  %v12780_v49 = vpop.eup %12779 }
0x3489   :  { %v7262_v54 = vadd.f32 1.0, %v12780_v49  ;;  %v12782_v3 = vpop.eup %12781 }
0x348a   :  { %v7330_v7 = vadd.f32 1.0, %v12782_v3 }
0x348b   :  { %12783 = vrcp.f32 %v7262_v54 }
0x348c   :  { %12785 = vrcp.f32 %v7330_v7 }
0x3495   :  { %v12784_v12 = vpop.eup %12783 }
0x3496   :  { %v12786_v13 = vpop.eup %12785  ;;  %v7266_v40 = vmul.f32 %v12784_v12, %v14450_v11 }
0x3497   :  { %v7337_v41 = vmul.f32 %v12786_v13, %v7335_v52 }
0x34f2   :  { %v7269_v19 = vpop.permute.xlu0 %7268 }
0x34f3   :  { %v7271_v26 = vmul.f32 %v12784_v12, %v7269_v19 }
0x34f5   :  { %7273 = vrot.lane.b32.xlu0 %v7271_v26, %s12963_s15 }
0x34fa   :  { %v7340_v60 = vpop.permute.xlu1 %7339 }
0x34fb   :  { %v7342_v8 = vmul.f32 %v12786_v13, %v7340_v60 }
0x34fd   :  { %7344 = vrot.lane.b32.xlu1 %v7342_v8, %s12963_s15 }
0x3567   :  { %v7274_v59 = vpop.permute.xlu0 %7273 }
0x3568   :  { %v14490_v31 = vadd.f32 %v7274_v59, %v7266_v40 }
0x356a   :  { %12787 = vtanh.f32 %v14490_v31 }
0x356f   :  { %v7345_v33 = vpop.permute.xlu1 %7344 }
0x3570   :  { %v14494_v58 = vadd.f32 %v7345_v33, %v7337_v41 }
0x3572   :  { %12789 = vtanh.f32 %v14494_v58  ;;  %v7526_v40 = vrot.slane %v14494_v58, 6 }
0x3574   :  { %v12788_v37 = vpop.eup %12787 }
0x3575   :  { %7279 = vrot.lane.b32.xlu0 %v12788_v37, %s12953_s2 }
0x357c   :  { %v12790_v27 = vpop.eup %12789 }
0x357d   :  { %7350 = vrot.lane.b32.xlu1 %v12790_v27, %s12953_s2 }
0x35e7   :  { %v7280_v17 = vpop.permute.xlu0 %7279 }
0x35e8   :  { %v14499_v11 = vmul.f32 %v12784_v12, %v7280_v17 }
0x35ea   :  { %v7355_v23 = vpack.c.bf16 %v14499_v11, %v14499_v11 }
0x35ec   :  { %7357 = vrot.lane.b32.xlu0 %v7355_v23, %s12963_s15 }
0x35ef   :  { %v7351_v35 = vpop.permute.xlu1 %7350 }
0x35f0   :  { %v7353_v61 = vmul.f32 %v12786_v13, %v7351_v35 }
0x35f2   :  { %v7354_v56 = vpack.c.bf16 %v7353_v61, %v7353_v61 }
0x35f4   :  { %v7403_v43 = vrot.slane %v7354_v56, 1 }
0x35f6   :  { %7404 = vrot.lane.b32.xlu1 %v7403_v43, %s12963_s15 }
0x365e   :  { %v7358_v45 = vpop.permute.xlu0 %7357 }
0x365f   :  { %11603 = vmatmul.mubr.msk.bf16.vlgmr.msra.gmra.mrb[96].mxu1 %vm4727_vm9, %v7358_v45 }
0x3660   :  { %11615 = vmatpush3.bf16.msra.mxu1 %v14509_v51  ;;  %11618 = vmatprep.mubr.msk.bf16.mxu1 %vm12965_vm2, %v12964_v36 }
0x3661   :  { %11616 = vmatprep.subr.bf16.mxu1 %v12964_v36 }
0x3664   :  { %11617 = vmatpush3.bf16.msra.mxu1 %v14518_v46 }
0x3665   :  { %11630 = vmatprep.subr.bf16.mxu1 %v12964_v36 }
0x3668   :  { %v7405_v18 = vpop.permute.xlu1 %7404 }
0x3669   :  { %11611 = vmatmul.mubr.msk.bf16.vlgmr.msra.gmra.mrb[208].mxu0 %vm4727_vm9, %v7405_v18  ;;  %11619 = vmatmul.mubr.msk.bf16.vlgmr.msra.gmra.mrb[100].mxu1 %vm4727_vm9, %v7405_v18 }
0x366a   :  { %11623 = vmatpush3.bf16.msra.mxu0 %v14527_v50  ;;  %11631 = vmatpush3.bf16.msra.mxu1 %v14533_v2 }
0x366b   :  { %11624 = vmatprep.subr.bf16.mxu0 %v12964_v36  ;;  %11632 = vmatprep.subr.bf16.mxu1 %v12964_v36 }
0x366c   :  { %11626 = vmatprep.mubr.msk.bf16.mxu0 %vm12965_vm2, %v12964_v36  ;;  %11634 = vmatprep.mubr.msk.bf16.mxu1 %vm12965_vm2, %v12964_v36 }
0x366e   :  { %11625 = vmatpush3.bf16.msra.mxu0 %v14545_v47  ;;  %11633 = vmatpush3.bf16.msra.mxu1 %v14551_v21 }
0x366f   :  { %11638 = vmatprep.subr.bf16.mxu0 %v12964_v36  ;;  %11646 = vmatprep.subr.bf16.mxu1 %v12964_v36 }
0x3732   :  { %v7396_v63 = vpop.f32.mrb[96].mxu1 }
0x3733   :  { %v11604_v20 = vpop.f32.mrb[97].mxu1 }
0x3734   :  { %v7399_v1 = vpop.f32.mrb[98].mxu1 }
0x3735   :  { %v11605_v39 = vpop.f32.mrb[99].mxu1 }
0x373c   :  { %v7443_v30 = vpop.f32.mrb[208].mxu0  ;;  %v7508_v22 = vpop.f32.mrb[100].mxu1 }
0x373d   :  { %v7444_v25 = vadd.f32 %v7443_v30, %v7396_v63  ;;  %v7515_v28 = vrot.slane %v7508_v22, 4  ;;  %v11612_v48 = vpop.f32.mrb[209].mxu0  ;;  %v11620_v4 = vpop.f32.mrb[101].mxu1 }
0x373e   :  { %v7446_v10 = vpop.f32.mrb[210].mxu0  ;;  %v7511_v6 = vpop.f32.mrb[102].mxu1 }
0x373f   :  { %v7449_v9 = vadd.f32 %v14265_v53, %v7444_v25  ;;  %v7517_v57 = vadd.f32 %v7515_v28, %v13863_v42  ;;  %v11613_v14 = vpop.f32.mrb[211].mxu0  ;;  %v11621_v32 = vpop.f32.mrb[103].mxu1 }
0x3741   :  { %12791 = vtanh.f32 %v7449_v9  ;;  %v9950_v62 = vmul.f32 -1.442695, %v7449_v9  ;;  %v9952_v49 = vmul.f32 -1.442695, %v7517_v57 }
0x3742   :  { %12793 = vtanh.f32 %v7517_v57 }
0x3743   :  { %12795 = vpow2.f32 %v9950_v62 }
0x3744   :  { %12797 = vpow2.f32 %v9952_v49 }
0x374b   :  { %v12792_v38 = vpop.eup %12791 }
0x374c   :  { %v12794_v44 = vpop.eup %12793  ;;  %7459 = vrot.lane.b32.xlu0 %v12792_v38, %s12953_s2 }
0x374d   :  { %7530 = vrot.lane.b32.xlu1 %v12794_v44, %s12953_s2  ;;  %v12796_v54 = vpop.eup %12795 }
0x374e   :  { %v12798_v3 = vpop.eup %12797  ;;  %v7453_v7 = vadd.f32 1.0, %v12796_v54 }
0x374f   :  { %v7521_v53 = vadd.f32 1.0, %v12798_v3 }
0x3750   :  { %12799 = vrcp.f32 %v7453_v7 }
0x3751   :  { %12801 = vrcp.f32 %v7521_v53 }
0x375a   :  { %v12800_v12 = vpop.eup %12799 }
0x375b   :  { %v12802_v26 = vpop.eup %12801  ;;  %v7457_v59 = vmul.f32 %v12800_v12, %v14490_v31 }
0x375c   :  { %v7528_v52 = vmul.f32 %v12802_v26, %v7526_v40 }
0x37be   :  { %v7460_v19 = vpop.permute.xlu0 %7459 }
0x37bf   :  { %v7531_v13 = vpop.permute.xlu1 %7530  ;;  %v7462_v60 = vmul.f32 %v12800_v12, %v7460_v19 }
0x37c0   :  { %v7533_v8 = vmul.f32 %v12802_v26, %v7531_v13 }
0x37c1   :  { %7464 = vrot.lane.b32.xlu0 %v7462_v60, %s12963_s15 }
0x37c2   :  { %7535 = vrot.lane.b32.xlu1 %v7533_v8, %s12963_s15 }
0x3833   :  { %v7465_v41 = vpop.permute.xlu0 %7464 }
0x3834   :  { %v7536_v33 = vpop.permute.xlu1 %7535  ;;  %v14564_v37 = vadd.f32 %v7465_v41, %v7457_v59 }
0x3835   :  { %v14566_v27 = vadd.f32 %v7536_v33, %v7528_v52 }
0x3836   :  { %12803 = vtanh.f32 %v14564_v37 }
0x3837   :  { %12805 = vtanh.f32 %v14566_v27  ;;  %v7717_v60 = vrot.slane %v14566_v27, 6 }
0x3840   :  { %v12804_v17 = vpop.eup %12803 }
0x3841   :  { %v12806_v23 = vpop.eup %12805  ;;  %7470 = vrot.lane.b32.xlu0 %v12804_v17, %s12953_s2 }
0x3842   :  { %7541 = vrot.lane.b32.xlu1 %v12806_v23, %s12953_s2 }
0x38b3   :  { %v7471_v58 = vpop.permute.xlu0 %7470 }
0x38b4   :  { %v7542_v35 = vpop.permute.xlu1 %7541  ;;  %v14572_v31 = vmul.f32 %v12800_v12, %v7471_v58 }
0x38b5   :  { %v7544_v61 = vmul.f32 %v12802_v26, %v7542_v35 }
0x38b6   :  { %v7546_v56 = vpack.c.bf16 %v14572_v31, %v14572_v31  ;;  %v7884_v33 = vrot.slane %v14572_v31, 6 }
0x38b7   :  { %v7545_v43 = vpack.c.bf16 %v7544_v61, %v7544_v61 }
0x38b8   :  { %7548 = vrot.lane.b32.xlu0 %v7546_v56, %s12963_s15  ;;  %v7902_v27 = vsel %vm2521_vm4, %v14499_v11, %v7884_v33 }
0x38b9   :  { %v7594_v45 = vrot.slane %v7545_v43, 2 }
0x38bb   :  { %7595 = vrot.lane.b32.xlu1 %v7594_v45, %s12963_s15 }
0x392a   :  { %v7549_v18 = vpop.permute.xlu0 %7548 }
0x392b   :  { %11627 = vmatmul.mubr.msk.bf16.vlgmr.msra.gmra.mrb[212].mxu0 %vm4727_vm9, %v7549_v18 }
0x392c   :  { %11639 = vmatpush3.bf16.msra.mxu0 %v14509_v51  ;;  %11642 = vmatprep.mubr.msk.bf16.mxu0 %vm12965_vm2, %v12964_v36 }
0x392d   :  { %v7596_v63 = vpop.permute.xlu1 %7595  ;;  %11640 = vmatprep.subr.bf16.mxu0 %v12964_v36 }
0x392e   :  { %11635 = vmatmul.mubr.msk.bf16.vlgmr.msra.gmra.mrb[104].mxu1 %vm4727_vm9, %v7596_v63 }
0x392f   :  { %11647 = vmatpush3.bf16.msra.mxu1 %v14527_v50  ;;  %11650 = vmatprep.mubr.msk.bf16.mxu1 %vm12965_vm2, %v12964_v36 }
0x3930   :  { %11641 = vmatpush3.bf16.msra.mxu0 %v14518_v46  ;;  %11648 = vmatprep.subr.bf16.mxu1 %v12964_v36 }
0x3931   :  { %11654 = vmatprep.subr.bf16.mxu0 %v12964_v36 }
0x3933   :  { %11643 = vmatmul.mubr.msk.bf16.vlgmr.msra.gmra.mrb[216].mxu0 %vm4727_vm9, %v7596_v63  ;;  %11649 = vmatpush3.bf16.msra.mxu1 %v14545_v47  ;;  %v14600_v47 = vld [vmem:[%s14834_s4 + $0xb] ss:$0 sm:$0xff] }
0x3934   :  { %11655 = vmatpush3.bf16.msra.mxu0 %v14533_v2  ;;  %11658 = vmatprep.mubr.msk.bf16.mxu0 %vm12965_vm2, %v12964_v36 }
0x3935   :  { %11656 = vmatprep.subr.bf16.mxu0 %v12964_v36 }
0x3938   :  { %11657 = vmatpush3.bf16.msra.mxu0 %v14551_v21 }
0x39fe   :  { %v7587_v51 = vpop.f32.mrb[212].mxu0 }
0x39ff   :  { %v11628_v50 = vpop.f32.mrb[213].mxu0 }
0x3a00   :  { %v7590_v46 = vpop.f32.mrb[214].mxu0 }
0x3a01   :  { %v7634_v20 = vpop.f32.mrb[104].mxu1  ;;  %v11629_v1 = vpop.f32.mrb[215].mxu0 }
0x3a02   :  { %v7635_v39 = vadd.f32 %v7634_v20, %v7587_v51  ;;  %v11636_v30 = vpop.f32.mrb[105].mxu1 }
0x3a03   :  { %v7637_v22 = vpop.f32.mrb[106].mxu1 }
0x3a04   :  { %v7640_v2 = vadd.f32 %v14600_v47, %v7635_v39  ;;  %v11637_v25 = vpop.f32.mrb[107].mxu1 }
0x3a06   :  { %12807 = vtanh.f32 %v7640_v2  ;;  %v7699_v28 = vpop.f32.mrb[216].mxu0  ;;  %v9955_v14 = vmul.f32 -1.442695, %v7640_v2 }
0x3a07   :  { %v7706_v48 = vrot.slane %v7699_v28, 2  ;;  %v11644_v21 = vpop.f32.mrb[217].mxu0 }
0x3a08   :  { %v7702_v4 = vpop.f32.mrb[218].mxu0 }
0x3a09   :  { %v7708_v10 = vadd.f32 %v7706_v48, %v13863_v42  ;;  %v11645_v6 = vpop.f32.mrb[219].mxu0 }
0x3a0b   :  { %12809 = vtanh.f32 %v7708_v10  ;;  %v9957_v32 = vmul.f32 -1.442695, %v7708_v10 }
0x3a0c   :  { %12811 = vpow2.f32 %v9955_v14 }
0x3a0d   :  { %12813 = vpow2.f32 %v9957_v32  ;;  %v12409_v32 = vld [vmem:[#allocation5 + $0x90] ss:$8 sps:$4 sm:$0xff]  }
0x3a10   :  { %v12808_v9 = vpop.eup %12807 }
0x3a11   :  { %7650 = vrot.lane.b32.xlu1 %v12808_v9, %s12953_s2 }
0x3a15   :  { %v12810_v57 = vpop.eup %12809 }
0x3a16   :  { %7721 = vrot.lane.b32.xlu0 %v12810_v57, %s12953_s2  ;;  %v12812_v38 = vpop.eup %12811 }
0x3a17   :  { %v7644_v44 = vadd.f32 1.0, %v12812_v38  ;;  %v12814_v62 = vpop.eup %12813  ;;  %v12411_v38 = vld [vmem:[#allocation5 + $0x94] ss:$8 sps:$4 sm:$0xff]  }
0x3a18   :  { %v7712_v49 = vadd.f32 1.0, %v12814_v62  ;;  %7983 = vmatprep.subr.bf16.mxu1 %v12411_v38 }
0x3a19   :  { %12815 = vrcp.f32 %v7644_v44 }
0x3a1a   :  { %12817 = vrcp.f32 %v7712_v49  ;;  %v12414_v49 = vld [vmem:[#allocation5 + $0xa4] ss:$8 sps:$4 sm:$0xff]  }
0x3a23   :  { %v12816_v54 = vpop.eup %12815 }
0x3a24   :  { %v12818_v7 = vpop.eup %12817  ;;  %v7648_v19 = vmul.f32 %v12816_v54, %v14564_v37 }
0x3a25   :  { %v7719_v8 = vmul.f32 %v12818_v7, %v7717_v60 }
0x3a83   :  { %v7651_v42 = vpop.permute.xlu1 %7650 }
0x3a84   :  { %v7653_v3 = vmul.f32 %v12816_v54, %v7651_v42 }
0x3a86   :  { %7655 = vrot.lane.b32.xlu1 %v7653_v3, %s12963_s15 }
0x3a88   :  { %v7722_v53 = vpop.permute.xlu0 %7721 }
0x3a89   :  { %v7724_v12 = vmul.f32 %v12818_v7, %v7722_v53 }
0x3a8b   :  { %7726 = vrot.lane.b32.xlu0 %v7724_v12, %s12963_s15 }
0x3af8   :  { %v7656_v26 = vpop.permute.xlu1 %7655 }
0x3af9   :  { %v7658_v13 = vadd.f32 %v7656_v26, %v7648_v19 }
0x3afb   :  { %12819 = vtanh.f32 %v7658_v13 }
0x3afd   :  { %v7727_v40 = vpop.permute.xlu0 %7726 }
0x3afe   :  { %v7729_v59 = vadd.f32 %v7727_v40, %v7719_v8 }
0x3b00   :  { %12821 = vtanh.f32 %v7729_v59 }
0x3b05   :  { %v12820_v52 = vpop.eup %12819 }
0x3b06   :  { %7661 = vrot.lane.b32.xlu1 %v12820_v52, %s12953_s2 }
0x3b0a   :  { %v12822_v41 = vpop.eup %12821 }
0x3b0b   :  { %7732 = vrot.lane.b32.xlu0 %v12822_v41, %s12953_s2 }
0x3b78   :  { %v7662_v17 = vpop.permute.xlu1 %7661 }
0x3b79   :  { %v7664_v23 = vmul.f32 %v12816_v54, %v7662_v17  ;;  %v12412_v54 = vld [vmem:[#allocation5 + $0xa0] ss:$8 sps:$4 sm:$0xff]  }
0x3b7b   :  { %v7737_v37 = vpack.c.bf16 %v7664_v23, %v7664_v23  ;;  %v7887_v58 = vrot.slane %v7664_v23, 4 }
0x3b7d   :  { %7739 = vrot.lane.b32.xlu0 %v7737_v37, %s12963_s15  ;;  %v7733_v35 = vpop.permute.xlu0 %7732  ;;  %v14617_v61 = vsel %vm116_vm0, %v7902_v27, %v7887_v58 }
0x3b7e   :  { %v7735_v56 = vmul.f32 %v12818_v7, %v7733_v35 }
0x3b80   :  { %v7736_v43 = vpack.c.bf16 %v7735_v56, %v7735_v56 }
0x3b82   :  { %v7785_v45 = vrot.slane %v7736_v43, 3 }
0x3b84   :  { %7786 = vrot.lane.b32.xlu1 %v7785_v45, %s12963_s15 }
0x3bef   :  { %v7740_v18 = vpop.permute.xlu0 %7739 }
0x3bf0   :  { %11651 = vmatmul.mubr.msk.bf16.vlgmr.msra.gmra.mrb[108].mxu1 %vm4727_vm9, %v7740_v18 }
0x3bf1   :  { %8015 = vmatprep.mubr.bf16.mxu1 %v12966_v16  ;;  %7984 = vmatpush1.bf16.msra.mxu1 %v12409_v32  ;;  %v12421_v32 = vld [vmem:[#allocation2 + $0x3d0] sm:$0xff]  }
0x3bf2   :  { %7985 = vmatprep.subr.bf16.mxu1 %v12414_v49  ;;  %v12424_v49 = vld [vmem:[#allocation2 + $0x3e8] sm:$0xff]  }
0x3bf5   :  { %7986 = vmatpush1.bf16.msra.mxu1 %v12412_v54  ;;  %v12425_v54 = vld [vmem:[#allocation2 + $0x3f0] sm:$0xff]  }
0x3bf6   :  { %v7787_v31 = vpop.permute.xlu1 %7786 }
0x3bf7   :  { %11659 = vmatmul.mubr.msk.bf16.vlgmr.msra.gmra.mrb[220].mxu0 %vm4727_vm9, %v7787_v31 }
0x3cc3   :  { %v7778_v11 = vpop.f32.mrb[108].mxu1 }
0x3cc4   :  { %v11652_v63 = vpop.f32.mrb[109].mxu1 }
0x3cc5   :  { %v7781_v51 = vpop.f32.mrb[110].mxu1  ;;  %v12415_v63 = vld [vmem:[#allocation2 + $0x3b0] sm:$0xff]  }
0x3cc6   :  { %v11653_v50 = vpop.f32.mrb[111].mxu1  ;;  %11666 = vmatprep.mubr.msk.bf16.mxu0 %vm4727_vm9, %v12415_v63 }
0x3cca   :  { %v7825_v46 = vpop.f32.mrb[220].mxu0 }
0x3ccb   :  { %v7826_v20 = vadd.f32 %v7825_v46, %v7778_v11  ;;  %v11660_v1 = vpop.f32.mrb[221].mxu0 }
0x3ccc   :  { %v7828_v39 = vpop.f32.mrb[222].mxu0 }
0x3ccd   :  { %v7831_v30 = vadd.f32 %v14600_v47, %v7826_v20  ;;  %v11661_v22 = vpop.f32.mrb[223].mxu0 }
0x3cce   :  { %v8603_v22 = vld [vmem:[#allocation7 + $0x88] sm:$0xff] }
0x3ccf   :  { %12823 = vtanh.f32 %v7831_v30  ;;  %v9960_v25 = vmul.f32 -1.442695, %v7831_v30  ;;  %v8602_v30 = vld [vmem:[#allocation7 + $0x80] sm:$0xff] }
0x3cd1   :  { %12825 = vpow2.f32 %v9960_v25  ;;  %v11866_v25 = vpack.c.bf16 %v8603_v22, %v8602_v30 }
0x3cd3   :  { %11867 = vmatprep.subr.bf16.mxu1 %v11866_v25 }
0x3cd9   :  { %v12824_v2 = vpop.eup %12823 }
0x3cda   :  { %7841 = vrot.lane.b32.xlu0 %v12824_v2, %s12953_s2  ;;  %v8604_v2 = vld [vmem:[#allocation7 + $0x90] sm:$0xff] }
0x3cdb   :  { %v12826_v28 = vpop.eup %12825 }
0x3cdc   :  { %v7835_v48 = vadd.f32 1.0, %v12826_v28  ;;  %v8605_v28 = vld [vmem:[#allocation7 + $0x98] sm:$0xff] }
0x3cde   :  { %7909 = vrot.lane.b32.xlu0 %v13837_v15, %s12959_s18  ;;  %12827 = vrcp.f32 %v7835_v48  ;;  %v11870_v48 = vpack.c.bf16 %v8605_v28, %v8604_v2 }
0x3ce8   :  { %v12828_v21 = vpop.eup %12827 }
0x3ce9   :  { %v7839_v15 = vmul.f32 %v12828_v21, %v7658_v13 }
0x3d4c   :  { %v7842_v4 = vpop.permute.xlu0 %7841 }
0x3d4d   :  { %v7844_v10 = vmul.f32 %v12828_v21, %v7842_v4  ;;  %v12416_v4 = vld [vmem:[#allocation2 + $0x3b8] sm:$0xff]  }
0x3d4f   :  { %7846 = vrot.lane.b32.xlu1 %v7844_v10, %s12963_s15  ;;  %v12417_v10 = vld [vmem:[#allocation2 + $0x3a0] sm:$0xff]  }
0x3d50   :  { %v7910_v47 = vpop.permute.xlu0 %7909 }
0x3d51   :  { %v7921_v6 = vadd.f32 %v7910_v47, %v14077_v24 }
0x3d53   :  { %7911 = vrot.lane.b32.xlu1 %v13839_v0, %s12959_s18  ;;  %v7929_v57 = vmul.f32 1.442695, %v7921_v6  ;;  %vm7925_vm0 = vcmp.gt.f32.partialorder %v7921_v6, 0.0 }
0x3d57   :  { %7913 = vrot.lane.b32.xlu1 %v13841_v5, %s12959_s18 }
0x3dc1   :  { %v7847_v9 = vpop.permute.xlu1 %7846 }
0x3dc2   :  { %v7849_v14 = vadd.f32 %v7847_v9, %v7839_v15  ;;  %v12419_v15 = vld [vmem:[#allocation2 + $0x3c0] sm:$0xff]  }
0x3dc4   :  { %12829 = vtanh.f32 %v7849_v14  ;;  %v12420_v14 = vld [vmem:[#allocation2 + $0x3c8] sm:$0xff]  }
0x3dc5   :  { %v7912_v44 = vpop.permute.xlu1 %7911  ;;  %12831 = vpow2.f32 %v7929_v57 }
0x3dc6   :  { %v7922_v62 = vadd.f32 %v7912_v44, %v14286_v34  ;;  %v12422_v44 = vld [vmem:[#allocation2 + $0x3d8] sm:$0xff]  }
0x3dc8   :  { %v7931_v0 = vmul.f32 1.442695, %v7922_v62  ;;  %vm7926_vm4 = vcmp.gt.f32.partialorder %v7922_v62, 0.0 }
0x3dc9   :  { %v7914_v19 = vpop.permute.xlu1 %7913 }
0x3dca   :  { %12833 = vpow2.f32 %v7931_v0  ;;  %v7923_v26 = vadd.f32 %v7914_v19, %v14460_v29 }
0x3dcc   :  { %v7933_v8 = vmul.f32 1.442695, %v7923_v26  ;;  %vm7927_vm14 = vcmp.gt.f32.partialorder %v7923_v26, 0.0 }
0x3dce   :  { %v12830_v5 = vpop.eup %12829  ;;  %12835 = vpow2.f32 %v7933_v8 }
0x3dcf   :  { %7852 = vrot.lane.b32.xlu0 %v12830_v5, %s12953_s2  ;;  %v12832_v24 = vpop.eup %12831 }
0x3dd0   :  { %v9961_v42 = vadd.f32 -1.0, %v12832_v24 }
0x3dd2   :  { %v7941_v34 = vsel %vm7925_vm0, %v7921_v6, %v9961_v42  ;;  %v12418_v6 = vld [vmem:[#allocation2 + $0x3a8] sm:$0xff]   ;;  %v12426_v42 = vld [vmem:[#allocation2 + $0x3f8] sm:$0xff]  }
0x3dd3   :  { %7915 = vrot.lane.b32.xlu0 %v13835_v55, %s12959_s18 }
0x3dd4   :  { %v12834_v3 = vpop.eup %12833 }
0x3dd5   :  { %v9962_v7 = vadd.f32 -1.0, %v12834_v3  ;;  %v12427_v3 = vld [vmem:[#allocation2 + $0x400] sm:$0xff]  }
0x3dd7   :  { %v7942_v53 = vsel %vm7926_vm4, %v7922_v62, %v9962_v7  ;;  %v12423_v62 = vld [vmem:[#allocation2 + $0x3e0] sm:$0xff]  }
0x3dd8   :  { %v7949_v12 = vpack.c.bf16 %v7942_v53, %v7941_v34  ;;  %v12836_v17 = vpop.eup %12835  ;;  %v12428_v34 = vld [vmem:[#allocation2 + $0x408] sm:$0xff]   ;;  %v9999_v53 = vld [vmem:[%s14834_s4 + $0x9] ss:$0 sm:$0xff] }
0x3dd9   :  { %v9963_v23 = vadd.f32 -1.0, %v12836_v17 }
0x3dda   :  { %7953 = vrot.lane.b32.xlu1 %v7949_v12, %s12963_s15 }
0x3ddb   :  { %v7943_v58 = vsel %vm7927_vm14, %v7923_v26, %v9963_v23 }
0x3e41   :  { %v7853_v13 = vpop.permute.xlu0 %7852 }
0x3e42   :  { %v7855_v60 = vmul.f32 %v12828_v21, %v7853_v13 }
0x3e44   :  { %v7890_v40 = vrot.slane %v7855_v60, 2 }
0x3e45   :  { %v7916_v59 = vpop.permute.xlu0 %7915 }
0x3e46   :  { %v7904_v55 = vsel %vm7894_vm13, %v14617_v61, %v7890_v40 }
0x3e47   :  { %v7924_v52 = vadd.f32 %v7916_v59, %v7904_v55  ;;  %v10004_v55 = vld [vmem:[#allocation7 + $0xa0] ss:$0 sm:$0xff] }
0x3e49   :  { %v7935_v41 = vmul.f32 1.442695, %v7924_v52  ;;  %vm7928_vm15 = vcmp.gt.f32.partialorder %v7924_v52, 0.0 }
0x3e4b   :  { %12837 = vpow2.f32 %v7935_v41 }
0x3e4c   :  { %v7954_v33 = vpop.permute.xlu1 %7953 }
0x3e4d   :  { %9969 = vmatmul.mubr.msk.bf16.vlgmr.msra.gmra.mrb[112].mxu1 %vm4727_vm9, %v7954_v33 }
0x3e4e   :  { %8025 = vmatprep.mubr.bf16.mxu1 %v12966_v16  ;;  %11869 = vmatpush3.bf16.msra.mxu1 %v11866_v25 }
0x3e4f   :  { %11871 = vmatprep.subr.bf16.mxu1 %v11870_v48 }
0x3e52   :  { %11873 = vmatpush3.bf16.msra.mxu1 %v11870_v48  ;;  %v8586_v48 = vld [vmem:[#allocation7] sm:$0xff] }
0x3e55   :  { %v12838_v29 = vpop.eup %12837 }
0x3e56   :  { %v9964_v37 = vadd.f32 -1.0, %v12838_v29 }
0x3e58   :  { %v7944_v27 = vsel %vm7928_vm15, %v7924_v52, %v9964_v37 }
0x3e59   :  { %v7950_v35 = vpack.c.bf16 %v7944_v27, %v7943_v58 }
0x3e5b   :  { %7955 = vrot.lane.b32.xlu0 %v7950_v35, %s12963_s15 }
0x3ecd   :  { %v7956_v61 = vpop.permute.xlu0 %7955 }
0x3ece   :  { %9970 = vmatmul.mubr.msk.bf16.gmra.mrb[116].mxu1 %vm4727_vm9, %v7956_v61 }
0x3f20   :  { %v8017_v56 = vpop.f32.mrb[112].mxu1 }
0x3f21   :  { %v8019_v43 = vpop.f32.mrb[113].mxu1 }
0x3f22   :  { %v8021_v45 = vpop.f32.mrb[114].mxu1 }
0x3f23   :  { %v8037_v18 = vpack.c.bf16 %v8021_v45, %v8017_v56  ;;  %v8023_v31 = vpop.f32.mrb[115].mxu1 }
0x3f24   :  { %v14645_v16 = vpack.c.bf16 %v8023_v31, %v8019_v43  ;;  %v8724_v43 = vlaneseq }
0x3f25   :  { %8061 = vrot.lane.b32.xlu1 %v8037_v18, %s12959_s18 }
0x3f26   :  { %v14694_v45 = vand.u32 127, %v8724_v43  ;;  %v8924_v43 = vld [vmem:[#allocation7 + $0x130] sm:$0xff] }
0x3f29   :  { %8201 = vrot.lane.b32.xlu1 %v8037_v18, %s12953_s2 }
0x3f2d   :  { %8280 = vrot.lane.b32.xlu1 %v8037_v18, %s12963_s15 }
0x3f31   :  { %8434 = vrot.lane.b32.xlu1 %v14645_v16, %s12959_s18 }
0x3f35   :  { %8513 = vrot.lane.b32.xlu1 %v14645_v16, %s12953_s2 }
0x3f97   :  { %v8062_v11 = vpop.permute.xlu1 %8061 }
0x3f98   :  { %11662 = vmatprep.subr.bf16.mxu0 %v8062_v11 }
0x3f99   :  { %11663 = vmatpush3.bf16.msra.mxu0 %v8062_v11 }
0x3f9b   :  { %v8202_v47 = vpop.permute.xlu1 %8201 }
0x3f9f   :  { %v8281_v57 = vpop.permute.xlu1 %8280 }
0x3fa1   :  { %v8027_v51 = vpop.f32.mrb[116].mxu1 }
0x3fa2   :  { %v8029_v50 = vpop.f32.mrb[117].mxu1 }
0x3fa3   :  { %v8031_v46 = vpop.f32.mrb[118].mxu1  ;;  %v8435_v0 = vpop.permute.xlu1 %8434 }
0x3fa4   :  { %v8039_v20 = vpack.c.bf16 %v8031_v46, %v8027_v51  ;;  %v8033_v1 = vpop.f32.mrb[119].mxu1 }
0x3fa5   :  { %v8040_v39 = vpack.c.bf16 %v8033_v1, %v8029_v50 }
0x3fa6   :  { %8063 = vrot.lane.b32.xlu0 %v8039_v20, %s12959_s18 }
0x3fa7   :  { %v8514_v24 = vpop.permute.xlu1 %8513 }
0x3faa   :  { %8203 = vrot.lane.b32.xlu0 %v8039_v20, %s12953_s2 }
0x3fae   :  { %8282 = vrot.lane.b32.xlu0 %v8039_v20, %s12963_s15 }
0x3fb2   :  { %8436 = vrot.lane.b32.xlu0 %v8040_v39, %s12959_s18 }
0x3fb6   :  { %8515 = vrot.lane.b32.xlu0 %v8040_v39, %s12953_s2 }
0x4018   :  { %v8064_v21 = vpop.permute.xlu0 %8063 }
0x4019   :  { %11664 = vmatprep.subr.bf16.mxu0 %v8064_v21 }
0x401a   :  { %11665 = vmatpush3.bf16.msra.mxu0 %v8064_v21  ;;  %v8587_v21 = vld [vmem:[#allocation7 + $0x8] sm:$0xff] }
0x401b   :  { %11670 = vmatprep.subr.bf16.mxu0 %v8037_v18 }
0x401c   :  { %v8204_v9 = vpop.permute.xlu0 %8203 }
0x401d   :  { %11667 = vmatmul.mubr.msk.bf16.vlgmr.msra.gmra.mrb[224].mxu0 %vm4727_vm9, %v12416_v4  ;;  %v8588_v4 = vld [vmem:[#allocation7 + $0x10] sm:$0xff] }
0x401e   :  { %11671 = vmatpush3.bf16.msra.mxu0 %v8037_v18  ;;  %11674 = vmatprep.mubr.msk.bf16.mxu0 %vm4727_vm9, %v12417_v10  ;;  %v11874_v10 = vpack.c.bf16 %v8587_v21, %v8586_v48 }
0x401f   :  { %11672 = vmatprep.subr.bf16.mxu0 %v8039_v20 }
0x4020   :  { %v8283_v38 = vpop.permute.xlu0 %8282  ;;  %11875 = vmatprep.subr.bf16.mxu1 %v11874_v10 }
0x4022   :  { %11673 = vmatpush3.bf16.msra.mxu0 %v8039_v20 }
0x4023   :  { %11678 = vmatprep.subr.bf16.mxu0 %v8202_v47 }
0x4024   :  { %v8437_v5 = vpop.permute.xlu0 %8436 }
0x4028   :  { %v8516_v7 = vpop.permute.xlu0 %8515 }
0x4029   :  { %11675 = vmatmul.mubr.msk.bf16.vlgmr.msra.gmra.mrb[224].mxu0 %vm4727_vm9, %v12418_v6 }
0x402a   :  { %11679 = vmatpush3.bf16.msra.mxu0 %v8202_v47  ;;  %11682 = vmatprep.mubr.msk.bf16.mxu0 %vm4727_vm9, %v12419_v15  ;;  %v8589_v47 = vld [vmem:[#allocation7 + $0x18] sm:$0xff]  ;;  %v8590_v15 = vld [vmem:[#allocation7 + $0x20] sm:$0xff] }
0x402b   :  { %11680 = vmatprep.subr.bf16.mxu0 %v8204_v9  ;;  %v11878_v6 = vpack.c.bf16 %v8589_v47, %v8588_v4 }
0x402e   :  { %11681 = vmatpush3.bf16.msra.mxu0 %v8204_v9  ;;  %v8591_v9 = vld [vmem:[#allocation7 + $0x28] sm:$0xff] }
0x402f   :  { %11686 = vmatprep.subr.bf16.mxu0 %v8281_v57 }
0x4035   :  { %11683 = vmatmul.mubr.msk.bf16.vlgmr.msra.gmra.mrb[224].mxu0 %vm4727_vm9, %v12420_v14  ;;  %v8592_v14 = vld [vmem:[#allocation7 + $0x30] sm:$0xff] }
0x4036   :  { %11687 = vmatpush3.bf16.msra.mxu0 %v8281_v57  ;;  %11690 = vmatprep.mubr.msk.bf16.mxu0 %vm4727_vm9, %v12421_v32  ;;  %v11882_v57 = vpack.c.bf16 %v8591_v9, %v8590_v15  ;;  %v8593_v32 = vld [vmem:[#allocation7 + $0x38] sm:$0xff]  ;;  %v12967_v15 = vmov 1.0   ;;  %v8920_v9 = vld [vmem:[#allocation7 + $0x110] sm:$0xff] }
0x4037   :  { %11688 = vmatprep.subr.bf16.mxu0 %v8283_v38 }
0x403a   :  { %11689 = vmatpush3.bf16.msra.mxu0 %v8283_v38  ;;  %v11886_v38 = vpack.c.bf16 %v8593_v32, %v8592_v14 }
0x403b   :  { %11694 = vmatprep.subr.bf16.mxu0 %v14645_v16 }
0x4041   :  { %11691 = vmatmul.mubr.msk.bf16.vlgmr.msra.gmra.mrb[224].mxu0 %vm4727_vm9, %v12422_v44  ;;  %v8594_v44 = vld [vmem:[#allocation7 + $0x40] sm:$0xff] }
0x4042   :  { %11695 = vmatpush3.bf16.msra.mxu0 %v14645_v16  ;;  %11698 = vmatprep.mubr.msk.bf16.mxu0 %vm4727_vm9, %v12423_v62  ;;  %v8595_v62 = vld [vmem:[#allocation7 + $0x48] sm:$0xff] }
0x4043   :  { %11696 = vmatprep.subr.bf16.mxu0 %v8040_v39 }
0x4046   :  { %11697 = vmatpush3.bf16.msra.mxu0 %v8040_v39 }
0x4047   :  { %11702 = vmatprep.subr.bf16.mxu0 %v8435_v0 }
0x404d   :  { %11699 = vmatmul.mubr.msk.bf16.vlgmr.msra.gmra.mrb[224].mxu0 %vm4727_vm9, %v12424_v49  ;;  %v8596_v49 = vld [vmem:[#allocation7 + $0x50] sm:$0xff] }
0x404e   :  { %11703 = vmatpush3.bf16.msra.mxu0 %v8435_v0  ;;  %11706 = vmatprep.mubr.msk.bf16.mxu0 %vm4727_vm9, %v12425_v54  ;;  %v11890_v0 = vpack.c.bf16 %v8595_v62, %v8594_v44  ;;  %v8597_v54 = vld [vmem:[#allocation7 + $0x58] sm:$0xff] }
0x404f   :  { %11704 = vmatprep.subr.bf16.mxu0 %v8437_v5 }
0x4052   :  { %11705 = vmatpush3.bf16.msra.mxu0 %v8437_v5  ;;  %v11894_v5 = vpack.c.bf16 %v8597_v54, %v8596_v49 }
0x4053   :  { %11710 = vmatprep.subr.bf16.mxu0 %v8514_v24 }
0x4059   :  { %11707 = vmatmul.mubr.msk.bf16.vlgmr.msra.gmra.mrb[224].mxu0 %vm4727_vm9, %v12426_v42  ;;  %v8599_v42 = vld [vmem:[#allocation7 + $0x68] sm:$0xff] }
0x405a   :  { %11711 = vmatpush3.bf16.msra.mxu0 %v8514_v24  ;;  %11714 = vmatprep.mubr.msk.bf16.mxu0 %vm4727_vm9, %v12427_v3  ;;  %v8598_v24 = vld [vmem:[#allocation7 + $0x60] sm:$0xff] }
0x405b   :  { %11712 = vmatprep.subr.bf16.mxu0 %v8516_v7  ;;  %v11898_v3 = vpack.c.bf16 %v8599_v42, %v8598_v24 }
0x405e   :  { %11713 = vmatpush3.bf16.msra.mxu0 %v8516_v7 }
0x4065   :  { %11715 = vmatmul.mubr.msk.bf16.vlgmr.msra.gmra.mrb[224].mxu0 %vm4727_vm9, %v12428_v34 }
0x4138   :  { %v11716_v12 = vpop.f32.mrb[224].mxu0 }
0x4139   :  { %v8559_v19 = vpop.f32.mrb[225].mxu0  ;;  %v14684_v40 = vadd.f32 %v11716_v12, %v9999_v53 }
0x413a   :  { %v14678_v26 = vadd.f32 %v9999_v53, %v8559_v19  ;;  %v11717_v13 = vpop.f32.mrb[226].mxu0 }
0x413b   :  { %v8562_v60 = vpop.f32.mrb[227].mxu0  ;;  %v14690_v59 = vadd.f32 %v11717_v13, %v9999_v53 }
0x413c   :  { %v14680_v8 = vadd.f32 %v9999_v53, %v8562_v60  ;;  %11726 = vmatprep.mubr.msk.f32.mxu1 %vm4727_vm9, %v14678_v26 }
0x413e   :  { %11727 = vmatmul.mubr.msk.f32.vlgmr.msra.gmra.mrb[120].mxu1 %vm4727_vm9, %v14680_v8 }
0x413f   :  { %11729 = vmatprep.mubr.msk.f32.mxu1 %vm4727_vm9, %v14684_v40  ;;  %11877 = vmatpush3.bf16.msra.mxu1 %v11874_v10 }
0x4140   :  { %11879 = vmatprep.subr.bf16.mxu1 %v11878_v6 }
0x4142   :  { %11730 = vmatmul.mubr.msk.f32.gmra.mrb[122].mxu1 %vm4727_vm9, %v14690_v59 }
0x4143   :  { %11881 = vmatpush3.bf16.msra.mxu1 %v11878_v6 }
0x4144   :  { %11883 = vmatprep.subr.bf16.mxu1 %v11882_v57 }
0x4147   :  { %11885 = vmatpush3.bf16.msra.mxu1 %v11882_v57 }
0x4148   :  { %11887 = vmatprep.subr.bf16.mxu1 %v11886_v38 }
0x414b   :  { %11889 = vmatpush3.bf16.msra.mxu1 %v11886_v38  ;;  %v12968_v38 = vmov 1.0|1.0  }
0x414c   :  { %11891 = vmatprep.subr.bf16.mxu1 %v11890_v0 }
0x414f   :  { %11893 = vmatpush3.bf16.msra.mxu1 %v11890_v0 }
0x4150   :  { %11895 = vmatprep.subr.bf16.mxu1 %v11894_v5 }
0x4153   :  { %11897 = vmatpush3.bf16.msra.mxu1 %v11894_v5 }
0x4154   :  { %11899 = vmatprep.subr.bf16.mxu1 %v11898_v3 }
0x4157   :  { %11901 = vmatpush3.bf16.msra.mxu1 %v11898_v3 }
0x4211   :  { %v11728_v52 = vpop.f32.mrb[120].mxu1 }
0x4212   :  { %v8705_v41 = vmul.f32 2.0, %v11728_v52  ;;  %v8685_v33 = vpop.f32.mrb[121].mxu1 }
0x4213   :  { %v8704_v17 = vmul.f32 2.0, %v8685_v33 }
0x4214   :  { %v8713_v23 = vsub.f32 %v10004_v55, %v8705_v41 }
0x4215   :  { %v8712_v29 = vsub.f32 %v10004_v55, %v8704_v17  ;;  %v11731_v37 = vpop.f32.mrb[122].mxu1 }
0x4216   :  { %v8707_v58 = vmul.f32 2.0, %v11731_v37  ;;  %8718 = vmin.xlane.f32.xlu0 %v8713_v23  ;;  %v8695_v27 = vpop.f32.mrb[123].mxu1 }
0x4217   :  { %v8706_v35 = vmul.f32 2.0, %v8695_v27  ;;  %8716 = vmin.xlane.f32.xlu1 %v8712_v29  ;;  %v8600_v27 = vld [vmem:[#allocation7 + $0x70] sm:$0xff] }
0x4218   :  { %v8715_v61 = vsub.f32 %v10004_v55, %v8707_v58 }
0x4219   :  { %v8714_v56 = vsub.f32 %v10004_v55, %v8706_v35  ;;  %v8601_v35 = vld [vmem:[#allocation7 + $0x78] sm:$0xff] }
0x421b   :  { %8722 = vmin.xlane.f32.xlu1 %v8715_v61  ;;  %8720 = vmin.xlane.f32.xlu0 %v8714_v56 }
0x42a3   :  { %v8719_v18 = vpop.xlane.xlu0 %8718 }
0x42a4   :  { %vm8727_vm3 = vcmp.le.f32.partialorder %v8713_v23, %v8719_v18  ;;  %v8717_v31 = vpop.xlane.xlu1 %8716 }
0x42a5   :  { %v8731_v16 = vsel %vm8727_vm3, %v14694_v45, 128  ;;  %vm8726_vm1 = vcmp.le.f32.partialorder %v8712_v29, %v8717_v31 }
0x42a6   :  { %v8749_v11 = vshra.s32 %v8731_v16, 16  ;;  %v8730_v63 = vsel %vm8726_vm1, %v14694_v45, 128  ;;  %v8748_v7 = vand.u32 65535, %v8731_v16 }
0x42a7   :  { %v8735_v51 = vshra.s32 %v8730_v63, 16  ;;  %v8734_v34 = vand.u32 65535, %v8730_v63 }
0x42a8   :  { %v8751_v50 = vcvt.s32.f32 %v8749_v11  ;;  %v8723_v46 = vpop.xlane.xlu1 %8722  ;;  %v8721_v20 = vpop.xlane.xlu0 %8720  ;;  %v8750_v53 = vcvt.s32.f32 %v8748_v7 }
0x42a9   :  { %v8737_v1 = vcvt.s32.f32 %v8735_v51  ;;  %vm8729_vm5 = vcmp.le.f32.partialorder %v8715_v61, %v8723_v46  ;;  %vm8728_vm7 = vcmp.le.f32.partialorder %v8714_v56, %v8721_v20  ;;  %v8736_v19 = vcvt.s32.f32 %v8734_v34  ;;  %v8923_v56 = vld [vmem:[#allocation7 + $0x128] sm:$0xff] }
0x42aa   :  { %v8733_v39 = vsel %vm8729_vm5, %v14694_v45, 128  ;;  %v8732_v30 = vsel %vm8728_vm7, %v14694_v45, 128  ;;  %8752 = vmin.xlane.f32.xlu1 %v8751_v50  ;;  %v11902_v61 = vpack.c.bf16 %v8601_v35, %v8600_v27  ;;  %v11906_v18 = vpack.c.bf16 %v8924_v43, %v8923_v56 }
0x42ab   :  { %v8777_v22 = vshra.s32 %v8733_v39, 16  ;;  %v8763_v2 = vshra.s32 %v8732_v30, 16  ;;  %8738 = vmin.xlane.f32.xlu0 %v8737_v1  ;;  %v8776_v13 = vand.u32 65535, %v8733_v39  ;;  %v8762_v60 = vand.u32 65535, %v8732_v30  ;;  %v8925_v30 = vld [vmem:[#allocation7 + $0x138] sm:$0xff] }
0x42ac   :  { %11903 = vmatprep.subr.bf16.mxu1 %v11902_v61 }
0x42ad   :  { %v8779_v25 = vcvt.s32.f32 %v8777_v22  ;;  %v8765_v28 = vcvt.s32.f32 %v8763_v2  ;;  %v8778_v33 = vcvt.s32.f32 %v8776_v13  ;;  %v8764_v17 = vcvt.s32.f32 %v8762_v60  ;;  %11905 = vmatpush3.bf16.msra.mxu1 %v11902_v61  ;;  %v8926_v22 = vld [vmem:[#allocation7 + $0x140] sm:$0xff] }
0x42ae   :  { %11907 = vmatprep.subr.bf16.mxu1 %v11906_v18  ;;  %v11910_v10 = vpack.c.bf16 %v8926_v22, %v8925_v30  ;;  %v8913_v22 = vld [vmem:[#allocation7 + $0xd8] sm:$0xff] }
0x42af   :  { %8780 = vmin.xlane.f32.xlu1 %v8779_v25  ;;  %8766 = vmin.xlane.f32.xlu0 %v8765_v28 }
0x4337   :  { %v8753_v12 = vpop.xlane.xlu1 %8752 }
0x4338   :  { %vm8754_vm8 = vcmp.eq.f32.partialorder %v8751_v50, %v8753_v12  ;;  %v8739_v55 = vpop.xlane.xlu0 %8738  ;;  %v8759_v31 = vcvt.f32.s32 %v8753_v12 }
0x4339   :  { %vm8740_vm6 = vcmp.eq.f32.partialorder %v8737_v1, %v8739_v55  ;;  %v8755_v52 = vsel %vm8754_vm8, %v8750_v53, inf  ;;  %v8745_v16 = vcvt.f32.s32 %v8739_v55 }
0x433a   :  { %8756 = vmin.xlane.f32.xlu1 %v8755_v52  ;;  %v8741_v41 = vsel %vm8740_vm6, %v8736_v19, inf  ;;  %v8760_v63 = vshll.u32 %v8759_v31, 16 }
0x433b   :  { %8742 = vmin.xlane.f32.xlu0 %v8741_v41  ;;  %v8746_v1 = vshll.u32 %v8745_v16, 16 }
0x433c   :  { %v8781_v23 = vpop.xlane.xlu1 %8780  ;;  %v8767_v29 = vpop.xlane.xlu0 %8766 }
0x433d   :  { %vm8782_vm10 = vcmp.eq.f32.partialorder %v8779_v25, %v8781_v23  ;;  %vm8768_vm11 = vcmp.eq.f32.partialorder %v8765_v28, %v8767_v29  ;;  %v8787_v51 = vcvt.f32.s32 %v8781_v23  ;;  %v8773_v50 = vcvt.f32.s32 %v8767_v29 }
0x433e   :  { %v8783_v37 = vsel %vm8782_vm10, %v8778_v33, inf  ;;  %v8769_v58 = vsel %vm8768_vm11, %v8764_v17, inf }
0x433f   :  { %8784 = vmin.xlane.f32.xlu1 %v8783_v37  ;;  %8770 = vmin.xlane.f32.xlu0 %v8769_v58  ;;  %v8788_v28 = vshll.u32 %v8787_v51, 16  ;;  %v8774_v48 = vshll.u32 %v8773_v50, 16  ;;  %v8909_v51 = vld [vmem:[#allocation7 + $0xb8] sm:$0xff] }
0x43c7   :  { %v8757_v11 = vpop.xlane.xlu1 %8756 }
0x43c8   :  { %v8758_v46 = vcvt.f32.s32 %v8757_v11  ;;  %v8743_v20 = vpop.xlane.xlu0 %8742  ;;  %v8907_v11 = vld [vmem:[#allocation7 + $0xa8] sm:$0xff] }
0x43c9   :  { %v8744_v39 = vcvt.f32.s32 %v8743_v20 }
0x43ca   :  { %v8761_v2 = vadd.s32 %v8760_v63, %v8758_v46  ;;  %v8908_v63 = vld [vmem:[#allocation7 + $0xb0] sm:$0xff]  ;;  %v8910_v46 = vld [vmem:[#allocation7 + $0xc0] sm:$0xff] }
0x43cb   :  { %v8747_v25 = vadd.s32 %v8746_v1, %v8744_v39  ;;  %v11914_v50 = vpack.c.bf16 %v8908_v63, %v8907_v11  ;;  %v11918_v20 = vpack.c.bf16 %v8910_v46, %v8909_v51  ;;  %v8911_v1 = vld [vmem:[#allocation7 + $0xc8] sm:$0xff]  ;;  %v8912_v39 = vld [vmem:[#allocation7 + $0xd0] sm:$0xff] }
0x43cc   :  { %v8785_v21 = vpop.xlane.xlu1 %8784  ;;  %v8771_v4 = vpop.xlane.xlu0 %8770  ;;  %vm8896_vm12 = vcmp.ne.s32.totalorder %v8761_v2, 62  ;;  %vm8791_vm4 = vcmp.eq.s32.totalorder %v14694_v45, %v8761_v2  ;;  %v11922_v30 = vpack.c.bf16 %v8912_v39, %v8911_v1  ;;  %v8914_v2 = vld [vmem:[#allocation7 + $0xe0] sm:$0xff] }
0x43cd   :  { %v8786_v47 = vcvt.f32.s32 %v8785_v21  ;;  %v8772_v6 = vcvt.f32.s32 %v8771_v4  ;;  %vm8790_vm13 = vcmp.eq.s32.totalorder %v14694_v45, %v8747_v25  ;;  %vm8895_vm0 = vcmp.ne.s32.totalorder %v8747_v25, 62  ;;  %11915 = vmatprep.subr.bf16.mxu0 %v11914_v50  ;;  %v8917_v4 = vld [vmem:[#allocation7 + $0xf8] sm:$0xff] }
0x43ce   :  { %11764 = vmatprep.mubr.msk.f32.mxu1 %vm8790_vm13, %v12967_v15  ;;  %vm14703_vm14 = vmpackc.low %vm8896_vm12, %vm8895_vm0  ;;  %11917 = vmatpush3.bf16.msra.mxu0 %v11914_v50  ;;  %v11926_v25 = vpack.c.bf16 %v8914_v2, %v8913_v22  ;;  %v12430_v22 = vld [vmem:[%s14833_s3 + $0x48] sm:$0xff]  }
0x43cf   :  { %v8789_v57 = vadd.s32 %v8788_v28, %v8786_v47  ;;  %v8775_v14 = vadd.s32 %v8774_v48, %v8772_v6  ;;  %11765 = vmatmul.mubr.msk.f32.vlgmr.msra.gmra.mrb[124].mxu1 %vm8791_vm4, %v12967_v15  ;;  %11919 = vmatprep.subr.bf16.mxu0 %v11918_v20  ;;  %v8915_v28 = vld [vmem:[#allocation7 + $0xe8] sm:$0xff]  ;;  %v8916_v48 = vld [vmem:[#allocation7 + $0xf0] sm:$0xff] }
0x43d0   :  { %11909 = vmatpush3.bf16.msra.mxu1 %v11906_v18  ;;  %v11930_v21 = vpack.c.bf16 %v8916_v48, %v8915_v28  ;;  %v8919_v6 = vld [vmem:[#allocation7 + $0x108] sm:$0xff] }
0x43d1   :  { %vm8792_vm15 = vcmp.eq.s32.totalorder %v14694_v45, %v8775_v14  ;;  %11911 = vmatprep.subr.bf16.mxu1 %v11910_v10  ;;  %vm8793_vm3 = vcmp.eq.s32.totalorder %v14694_v45, %v8789_v57  ;;  %vm8897_vm1 = vcmp.ne.s32.totalorder %v8775_v14, 62  ;;  %vm8898_vm5 = vcmp.ne.s32.totalorder %v8789_v57, 62 }
0x43d2   :  { %11767 = vmatprep.mubr.msk.f32.mxu1 %vm8792_vm15, %v12967_v15  ;;  %vm14711_vm7 = vmpackc.low %vm8898_vm5, %vm8897_vm1  ;;  %11921 = vmatpush3.bf16.msra.mxu0 %v11918_v20  ;;  %v11938_v57 = vpack.c.bf16 %v8920_v9, %v8919_v6 }
0x43d3   :  { %11768 = vmatmul.mubr.msk.f32.gmra.mrb[126].mxu1 %vm8793_vm3, %v12967_v15  ;;  %11923 = vmatprep.subr.bf16.mxu0 %v11922_v30 }
0x43d4   :  { %11913 = vmatpush3.bf16.msra.mxu1 %v11910_v10  ;;  %v8918_v10 = vld [vmem:[#allocation7 + $0x100] sm:$0xff] }
0x43d5   :  { %11947 = vmatprep.subr.msk.bf16.mxu1 %vm14703_vm14, %v12968_v38  ;;  %v11934_v47 = vpack.c.bf16 %v8918_v10, %v8917_v4 }
0x43d6   :  { %11925 = vmatpush3.bf16.msra.mxu0 %v11922_v30  ;;  %v12429_v30 = vld [vmem:[%s14833_s3 + $0x40] sm:$0xff]  }
0x43d7   :  { %11927 = vmatprep.subr.bf16.mxu0 %v11926_v25 }
0x43da   :  { %11929 = vmatpush3.bf16.msra.mxu0 %v11926_v25 }
0x43db   :  { %11931 = vmatprep.subr.bf16.mxu0 %v11930_v21 }
0x43de   :  { %11933 = vmatpush3.bf16.msra.mxu0 %v11930_v21 }
0x43df   :  { %11935 = vmatprep.subr.bf16.mxu0 %v11934_v47 }
0x43e2   :  { %11937 = vmatpush3.bf16.msra.mxu0 %v11934_v47 }
0x43e3   :  { %11939 = vmatprep.subr.bf16.mxu0 %v11938_v57 }
0x43e6   :  { %11941 = vmatpush3.bf16.msra.mxu0 %v11938_v57 }
0x44a2   :  { %v14719_v44 = vpop.f32.mrb[124].mxu1 }
0x44a3   :  { %v14721_v62 = vpop.f32.mrb[125].mxu1  ;;  %v8888_v49 = vsub.f32 %v14680_v8, %v14719_v44  ;;  %v10021_v8 = vld [vmem:[#allocation7 + $0x148] ss:$0 sm:$0xff] }
0x44a4   :  { %v8887_v0 = vsub.f32 %v14678_v26, %v14721_v62 }
0x44a6   :  { %v14727_v54 = vpop.f32.mrb[126].mxu1  ;;  %11778 = vmatprep.mubr.msk.f32.mxu1 %vm4727_vm9, %v8887_v0 }
0x44a7   :  { %v14730_v5 = vpop.f32.mrb[127].mxu1  ;;  %11779 = vmatmul.mubr.msk.f32.vlgmr.msra.gmra.mrb[128].mxu1 %vm4727_vm9, %v8888_v49  ;;  %v8890_v26 = vsub.f32 %v14690_v59, %v14727_v54 }
0x44a8   :  { %v8889_v24 = vsub.f32 %v14684_v40, %v14730_v5  ;;  %11949 = vmatpush3.bf16.msk.msra.mxu1 %vm14703_vm14, %v12968_v38 }
0x44a9   :  { %11951 = vmatprep.subr.msk.bf16.mxu1 %vm14711_vm7, %v12968_v38 }
0x44aa   :  { %11781 = vmatprep.mubr.msk.f32.mxu1 %vm4727_vm9, %v8889_v24 }
0x44ab   :  { %11782 = vmatmul.mubr.msk.f32.gmra.mrb[130].mxu1 %vm4727_vm9, %v8890_v26 }
0x44ac   :  { %11953 = vmatpush3.bf16.msk.msra.mxu1 %vm14711_vm7, %v12968_v38 }
0x44ad   :  { %11836 = vmatprep.subr.bf16.mxu1 %v12429_v30 }
0x457a   :  { %v11780_v40 = vpop.f32.mrb[128].mxu1 }
0x457b   :  { %v9026_v42 = vmul.f32 2.0, %v11780_v40  ;;  %v9006_v3 = vpop.f32.mrb[129].mxu1 }
0x457c   :  { %v9025_v7 = vmul.f32 2.0, %v9006_v3 }
0x457d   :  { %v9034_v34 = vsub.f32 %v10021_v8, %v9026_v42 }
0x457e   :  { %v9033_v53 = vsub.f32 %v10021_v8, %v9025_v7  ;;  %v11783_v59 = vpop.f32.mrb[130].mxu1 }
0x457f   :  { %v9028_v12 = vmul.f32 2.0, %v11783_v59  ;;  %9039 = vmin.xlane.f32.xlu1 %v9034_v34  ;;  %v9016_v19 = vpop.f32.mrb[131].mxu1 }
0x4580   :  { %v9027_v13 = vmul.f32 2.0, %v9016_v19  ;;  %9037 = vmin.xlane.f32.xlu0 %v9033_v53 }
0x4581   :  { %v9036_v60 = vsub.f32 %v10021_v8, %v9028_v12 }
0x4582   :  { %v9035_v55 = vsub.f32 %v10021_v8, %v9027_v13  ;;  %v8921_v13 = vld [vmem:[#allocation7 + $0x118] sm:$0xff] }
0x4583   :  { %9043 = vmin.xlane.f32.xlu1 %v9036_v60 }
0x4584   :  { %9041 = vmin.xlane.f32.xlu0 %v9035_v55 }
0x460c   :  { %v9040_v52 = vpop.xlane.xlu1 %9039 }
0x460d   :  { %vm9046_vm8 = vcmp.le.f32.partialorder %v9034_v34, %v9040_v52  ;;  %v9038_v41 = vpop.xlane.xlu0 %9037  ;;  %v9210_v52 = vld [vmem:[%s14834_s4 + $0x10] sm:$0xff] }
0x460e   :  { %v9050_v33 = vsel %vm9046_vm8, %v14694_v45, 128  ;;  %vm9045_vm6 = vcmp.le.f32.partialorder %v9033_v53, %v9038_v41  ;;  %v9211_v41 = vld [vmem:[%s14834_s4 + $0x18] sm:$0xff]  ;;  %11830 = vmatprep.mubr.msk.f32.mxu1 %vm4727_vm9, %v9210_v52 }
0x460f   :  { %v9068_v17 = vshra.s32 %v9050_v33, 16  ;;  %v9049_v23 = vsel %vm9045_vm6, %v14694_v45, 128  ;;  %v9067_v14 = vand.u32 65535, %v9050_v33  ;;  %v9212_v33 = vld [vmem:[%s14834_s4 + $0x20] sm:$0xff]  ;;  %11831 = vmatmul.mubr.msk.f32.vlgmr.msra.gmra.mrb[132].mxu1 %vm4727_vm9, %v9211_v41 }
0x4610   :  { %v9054_v29 = vshra.s32 %v9049_v23, 16  ;;  %v9044_v37 = vpop.xlane.xlu1 %9043  ;;  %v9053_v32 = vand.u32 65535, %v9049_v23  ;;  %11833 = vmatprep.mubr.msk.f32.mxu1 %vm4727_vm9, %v9212_v33  ;;  %11837 = vmatpush3.bf16.msra.mxu1 %v12429_v30 }
0x4611   :  { %v9070_v58 = vcvt.s32.f32 %v9068_v17  ;;  %vm9048_vm10 = vcmp.le.f32.partialorder %v9036_v60, %v9044_v37  ;;  %v9042_v27 = vpop.xlane.xlu0 %9041  ;;  %v9069_v0 = vcvt.s32.f32 %v9067_v14  ;;  %v8922_v60 = vld [vmem:[#allocation7 + $0x120] sm:$0xff]  ;;  %v9213_v17 = vld [vmem:[%s14834_s4 + $0x28] sm:$0xff]  ;;  %11838 = vmatprep.subr.bf16.mxu1 %v12430_v22 }
0x4612   :  { %v9056_v35 = vcvt.s32.f32 %v9054_v29  ;;  %v9052_v61 = vsel %vm9048_vm10, %v14694_v45, 128  ;;  %vm9047_vm11 = vcmp.le.f32.partialorder %v9035_v55, %v9042_v27  ;;  %v9055_v26 = vcvt.s32.f32 %v9053_v32 }
0x4613   :  { %v9096_v56 = vshra.s32 %v9052_v61, 16  ;;  %v9051_v43 = vsel %vm9047_vm11, %v14694_v45, 128  ;;  %9071 = vmin.xlane.f32.xlu1 %v9070_v58  ;;  %v9095_v49 = vand.u32 65535, %v9052_v61  ;;  %v11942_v55 = vpack.c.bf16 %v8922_v60, %v8921_v13  ;;  %11834 = vmatmul.mubr.msk.f32.gmra.mrb[134].mxu1 %vm4727_vm9, %v9213_v17 }
0x4614   :  { %v9082_v18 = vshra.s32 %v9051_v43, 16  ;;  %9057 = vmin.xlane.f32.xlu0 %v9056_v35  ;;  %v9081_v8 = vand.u32 65535, %v9051_v43  ;;  %11839 = vmatpush3.bf16.msra.mxu1 %v12430_v22 }
0x4615   :  { %v9098_v31 = vcvt.s32.f32 %v9096_v56  ;;  %v9097_v7 = vcvt.s32.f32 %v9095_v49  ;;  %11943 = vmatprep.subr.bf16.mxu0 %v11942_v55 }
0x4616   :  { %v9084_v16 = vcvt.s32.f32 %v9082_v18  ;;  %v9083_v53 = vcvt.s32.f32 %v9081_v8  ;;  %11945 = vmatpush3.bf16.msra.mxu0 %v11942_v55 }
0x4617   :  { %9099 = vmin.xlane.f32.xlu1 %v9098_v31 }
0x4618   :  { %9085 = vmin.xlane.f32.xlu0 %v9084_v16 }
0x46a0   :  { %v9072_v24 = vpop.xlane.xlu1 %9071 }
0x46a1   :  { %vm9073_vm12 = vcmp.eq.f32.partialorder %v9070_v58, %v9072_v24  ;;  %v9058_v40 = vpop.xlane.xlu0 %9057  ;;  %v9078_v23 = vcvt.f32.s32 %v9072_v24 }
0x46a2   :  { %vm9059_vm13 = vcmp.eq.f32.partialorder %v9056_v35, %v9058_v40  ;;  %v9074_v42 = vsel %vm9073_vm12, %v9069_v0, inf  ;;  %v9064_v29 = vcvt.f32.s32 %v9058_v40  ;;  %vm9577_vm12 = vcmask 386048  }
0x46a3   :  { %9075 = vmin.xlane.f32.xlu1 %v9074_v42  ;;  %v9060_v3 = vsel %vm9059_vm13, %v9055_v26, inf  ;;  %v9079_v58 = vshll.u32 %v9078_v23, 16 }
0x46a4   :  { %v9100_v34 = vpop.xlane.xlu1 %9099  ;;  %9061 = vmin.xlane.f32.xlu0 %v9060_v3  ;;  %v9065_v56 = vshll.u32 %v9064_v29, 16  ;;  %v12969_v3 = vmov 0.0|0.0  }
0x46a5   :  { %vm9101_vm0 = vcmp.eq.f32.partialorder %v9098_v31, %v9100_v34  ;;  %v9086_v59 = vpop.xlane.xlu0 %9085  ;;  %v9106_v27 = vcvt.f32.s32 %v9100_v34  ;;  %11954 = vmatprep.subr.bf16.mxu1 %v12969_v3 }
0x46a6   :  { %vm9087_vm4 = vcmp.eq.f32.partialorder %v9084_v16, %v9086_v59  ;;  %v9102_v12 = vsel %vm9101_vm0, %v9097_v7, inf  ;;  %v9092_v43 = vcvt.f32.s32 %v9086_v59 }
0x46a7   :  { %9103 = vmin.xlane.f32.xlu1 %v9102_v12  ;;  %v9088_v19 = vsel %vm9087_vm4, %v9083_v53, inf  ;;  %v9107_v63 = vshll.u32 %v9106_v27, 16  ;;  %v9425_v27 = vld [vmem:[%s14834_s4 + $0x30] sm:$0x3] }
0x46a8   :  { %9089 = vmin.xlane.f32.xlu0 %v9088_v19  ;;  %v9093_v46 = vshll.u32 %v9092_v43, 16 }
0x46e2   :  { %v11832_v2 = vpop.f32.mrb[132].mxu1 }
0x46e3   :  { %vm9312_vm5 = vcmp.gt.f32.partialorder %v11832_v2, 0.0  ;;  %v9292_v25 = vpop.f32.mrb[133].mxu1 }
0x46e4   :  { %v10039_v28 = vsel %vm9312_vm5, 1.0, %v12964_v36  ;;  %vm9311_vm7 = vcmp.gt.f32.partialorder %v9292_v25, 0.0 }
0x46e5   :  { %vm14784_vm8 = vmpackc.low %vm9312_vm5, %vm9311_vm7 }
0x4730   :  { %v9076_v37 = vpop.xlane.xlu1 %9075 }
0x4731   :  { %v9077_v35 = vcvt.f32.s32 %v9076_v37  ;;  %v9062_v61 = vpop.xlane.xlu0 %9061 }
0x4732   :  { %v9063_v18 = vcvt.f32.s32 %v9062_v61 }
0x4733   :  { %v9080_v31 = vadd.s32 %v9079_v58, %v9077_v35 }
0x4734   :  { %v9066_v16 = vadd.s32 %v9065_v56, %v9063_v18  ;;  %v9104_v11 = vpop.xlane.xlu1 %9103 }
0x4735   :  { %v9105_v51 = vcvt.f32.s32 %v9104_v11  ;;  %v9090_v50 = vpop.xlane.xlu0 %9089  ;;  %vm9110_vm15 = vcmp.eq.s32.totalorder %v14694_v45, %v9080_v31 }
0x4736   :  { %v9091_v20 = vcvt.f32.s32 %v9090_v50  ;;  %vm9109_vm14 = vcmp.eq.s32.totalorder %v14694_v45, %v9066_v16 }
0x4737   :  { %v9108_v1 = vadd.s32 %v9107_v63, %v9105_v51  ;;  %11816 = vmatprep.mubr.msk.f32.mxu0 %vm9109_vm14, %v12967_v15 }
0x4738   :  { %v9094_v39 = vadd.s32 %v9093_v46, %v9091_v20  ;;  %11817 = vmatmul.mubr.msk.f32.vlgmr.msra.gmra.mrb[228].mxu0 %vm9110_vm15, %v12967_v15 }
0x4739   :  { %vm9112_vm1 = vcmp.eq.s32.totalorder %v14694_v45, %v9108_v1 }
0x473a   :  { %vm9111_vm3 = vcmp.eq.s32.totalorder %v14694_v45, %v9094_v39  ;;  %v11835_v45 = vpop.f32.mrb[134].mxu1 }
0x473b   :  { %11819 = vmatprep.mubr.msk.f32.mxu0 %vm9111_vm3, %v12967_v15  ;;  %vm9314_vm6 = vcmp.gt.f32.partialorder %v11835_v45, 0.0  ;;  %v9302_v21 = vpop.f32.mrb[135].mxu1 }
0x473c   :  { %11820 = vmatmul.mubr.msk.f32.gmra.mrb[230].mxu0 %vm9112_vm1, %v12967_v15  ;;  %v10038_v15 = vsel %vm9311_vm7, 1.0, %v12964_v36  ;;  %v10041_v10 = vsel %vm9314_vm6, 1.0, %v12964_v36  ;;  %vm9313_vm10 = vcmp.gt.f32.partialorder %v9302_v21, 0.0 }
0x473d   :  { %v12271_v4 = vpack.i.bf16 %v10039_v28, %v10038_v15  ;;  %v10040_v47 = vsel %vm9313_vm10, 1.0, %v12964_v36  ;;  %vm14790_vm11 = vmpackc.low %vm9314_vm6, %vm9313_vm10 }
0x473e   :  { %v12277_v9 = vpack.i.bf16 %v10041_v10, %v10040_v47 }
0x473f   :  { %12272 = vperm.xlu0 %12270, %v12271_v4  }
0x4740   :  { %12278 = vperm.xlu1 %12276, %v12277_v9  }
0x47be   :  { %v12273_v7 = vpop.permute.xlu0 %12272 }
0x47bf   :  { %v12275_v19 = vunpack.i.h.bf16 %v12273_v7  ;;  %v12274_v13 = vunpack.i.l.bf16 %v12273_v7 }
0x480b   :  { %v11818_v57 = vpop.f32.mrb[228].mxu0 }
0x480c   :  { %v9207_v14 = vadd.f32 %v11818_v57, %v14719_v44  ;;  %v9187_v32 = vpop.f32.mrb[229].mxu0  ;;  %v12279_v44 = vpop.permute.xlu1 %12278 }
0x480d   :  { %v9206_v0 = vadd.f32 %v9187_v32, %v14721_v62  ;;  %v10042_v62 = vld [vmem:[%s14834_s4 + $0xc] ss:$0 sm:$0xff]  ;;  %v12281_v34 = vunpack.i.h.bf16 %v12279_v44  ;;  %v12280_v53 = vunpack.i.l.bf16 %v12279_v44  ;;  %s12970_s4 = smov [#allocation8]  }
0x480e   :  { %s9585_s27 = sshll.u32 %s12970_s4, 4  ;;  %s9586_s27 = int_to_ptr.vmem [resolvable:$true] %s9585_s27 }
0x480f   :  { %v9328_v49 = vpack.c.bf16 %v9207_v14, %v9206_v0  ;;  %v11821_v24 = vpop.f32.mrb[230].mxu0  ;;  %s12921_s28 = scalar_lea.vmem %s9586_s27, 32  ;;  %p12926_p11 = scmp.lt.s32.totalorder %s9586_s27, %s9586_s27 }
0x4810   :  { %v9209_v26 = vadd.f32 %v11821_v24, %v14727_v54  ;;  %v9197_v8 = vpop.f32.mrb[231].mxu0  ;;  %p12922_p10 = scmp.ne.s32.totalorder %s9586_s27, %s12921_s28  ;;  %p12927_p12 = scmp.lt.s32.totalorder %s12921_s28, %s12921_s28 }
0x4811   :  { %v9208_v40 = vadd.f32 %v9197_v8, %v14730_v5  ;;  %11840 = vmatprep.mubr.msk.bf16.mxu1 %vm4727_vm9, %v9328_v49 }
0x4812   :  { %p12928_p13 = por %p12927_p12, %p12926_p11 }
0x4813   :  { %v9329_v42 = vpack.c.bf16 %v9209_v26, %v9208_v40 }
0x4814   :  { %p12929_p0 = pnand %p12928_p13, %p12922_p10 }
0x4815   :  { %11841 = vmatmul.mubr.msk.bf16.vlgmr.msra.gmra.mrb[136].mxu1 %vm4727_vm9, %v9329_v42 }
0x4816   :  { %11852 = vmatprep.mubr.msk.f32.mxu1 %vm12965_vm2, %v12964_v36 }
0x48e8   :  { %v11842_v54 = vpop.f32.mrb[136].mxu1 }
0x48e9   :  { %v9395_v5 = vadd.f32 %v11842_v54, %v10042_v62  ;;  %v9386_v59 = vpop.f32.mrb[137].mxu1 }
0x48ea   :  { %v9387_v12 = vadd.f32 %v10042_v62, %v9386_v59  ;;  %v11843_v60 = vpop.f32.mrb[138].mxu1 }
0x48eb   :  { %v9398_v55 = vadd.f32 %v11843_v60, %v10042_v62  ;;  %v9389_v52 = vpop.f32.mrb[139].mxu1  ;;  %v9423_v33 = vmul.f32 %v12280_v53, %v9395_v5 }
0x48ec   :  { %v9390_v41 = vadd.f32 %v10042_v62, %v9389_v52  ;;  %v9421_v23 = vmul.f32 %v12274_v13, %v9387_v12 }
0x48ed   :  { %v9424_v17 = vmul.f32 %v12281_v34, %v9398_v55 }
0x48ee   :  { %v9422_v29 = vmul.f32 %v12275_v19, %v9390_v41 }
0x48ef   :  { %v11958_v37 = vpack.c.bf16 %v9424_v17, %v9423_v33 }
0x48f0   :  { %v11955_v58 = vpack.c.bf16 %v9422_v29, %v9421_v23 }
0x48f2   :  { %11956 = vmatpush3.bf16.msra.mxu1 %v11955_v58 }
0x48f3   :  { %11957 = vmatprep.subr.bf16.mxu1 %v12969_v3 }
0x48f6   :  { %11959 = vmatpush3.bf16.msra.mxu1 %v11958_v37 }
0x48f7   :  { %11960 = vmatprep.subr.bf16.mxu1 %v12969_v3 }
0x48f9   :  { %11853 = vmatmul.mubr.msk.f32.vlgmr.msra.gmra.mrb[140].mxu1 %vm4727_vm9, %v9425_v27 }
0x48fa   :  { %11962 = vmatpush3.bf16.msk.msra.mxu1 %vm14784_vm8, %v12968_v38  ;;  %11863 = vmatprep.mubr.msk.f32.mxu1 %vm12965_vm2, %v12964_v36 }
0x48fb   :  { %11963 = vmatprep.subr.bf16.mxu1 %v12969_v3 }
0x48fe   :  { %11965 = vmatpush3.bf16.msk.msra.mxu1 %vm14790_vm11, %v12968_v38 }
0x4901   :  { %11864 = vmatmul.mubr.msk.f32.vlgmr.msra.gmra.mrb[142].mxu1 %vm4727_vm9, %v9425_v27 }
0x49cc   :  { %v9495_v35 = vpop.f32.mrb[140].mxu1 }
0x49cd   :  { %v11854_v61 = vpop.f32.mrb[141].mxu1 }
0x49d4   :  { %v9565_v56 = vpop.f32.mrb[142].mxu1 }
0x49d5   :  { %v9569_v43 = vmax.f32 %v9565_v56, 1.0  ;;  %v11865_v18 = vpop.f32.mrb[143].mxu1 }
0x49d7   :  { %9572 = vperm.xlu1 %12276, %v9569_v43  }
0x4a56   :  { %v9573_v31 = vpop.permute.xlu1 %9572 }
0x4a57   :  { %12839 = vrcp.f32 %v9573_v31 }
0x4a61   :  { %v12840_v16 = vpop.eup %12839 }
0x4a62   :  { %v9576_v36 = vmul.f32 %v12840_v16, %v9495_v35 }
0x4a64   :  { %9578 = vst.msk [vmem:[#allocation8] sm:$0x3] %vm9577_vm12, %v9576_v36 }
0x4a65   :  { %12932 = shalt.err (!%p12929_p0)
}
0x4a66   :  { %s12933_s9 = scalar_lea.hbm %s14836_s6, 32 }
0x4a67   :  { %p12934_p1 = scmp.ne.s32.totalorder %s14836_s6, %s12933_s9  ;;  %p12937_p2 = scmp.lt.u32.totalorder %s12933_s9, %s14836_s6 }
0x4a69   :  { %p12939_p3 = pnand %p12937_p2, %p12934_p1 }
0x4a6b   :  { %12942 = shalt.err (!%p12939_p3)
}
0x4a6c   :  { %9588 = dma.vmem_to_hbm [thread:$0]  %s9586_s27, 32, %s14836_s6, [#allocation4]  }
0x4a6d   :  { %12947 = dma.done.wait [#allocation4], 32  }
0x4a6e   :  { %12948 = vsyncadd [#allocation4], 4294967264 }
0x4a6f   :  { %9592 = vsyncpa [#allocation3], 1 }
0x4a70   :  { %9593 = vsyncpa [#allocation6], 1 }
0x4a71   :  { %9594 = vsyncpa [#allocation4], 1 }

</bundles_post_ra>
